<compile_context>
chip_gen: v5e
topology: v5e:2x2
jax: 0.10.0
libtpu: 0.0.40
codegen_flags: <defaults>
</compile_context>

<pallas_src>
import functools
import math

import jax
import jax.numpy as jnp
from jax import lax
from jax.experimental import pallas as pl
from jax.experimental.pallas import tpu as pltpu


def _round_up(n, m):
    return ((n + m - 1) // m) * m


# ---------------------------------------------------------------------------
# Kernels
# ---------------------------------------------------------------------------
def _pe_fused_kernel(x_ref, div_ref, o_ref, *, xscale):
    """out = x*sqrt(D) + PE, PE computed in-kernel (no table read from HBM)."""
    _, t_blk, d = x_ref.shape
    t0 = pl.program_id(0) * t_blk
    pos = (t0 + lax.broadcasted_iota(jnp.int32, (t_blk, d), 0)).astype(jnp.float32)
    angle = pos * div_ref[...]                                   # (t,D) * (1,D)
    lane = lax.broadcasted_iota(jnp.int32, (t_blk, d), 1)
    pe = jnp.where(lane % 2 == 0, jnp.sin(angle), jnp.cos(angle))
    y = x_ref[...].astype(jnp.float32) * xscale + pe[None, :, :]
    o_ref[...] = y.astype(o_ref.dtype)


def _pe_fused_mask_kernel(x_ref, div_ref, m_ref, o_ref, *, xscale):
    _, t_blk, d = x_ref.shape
    t0 = pl.program_id(0) * t_blk
    pos = (t0 + lax.broadcasted_iota(jnp.int32, (t_blk, d), 0)).astype(jnp.float32)
    angle = pos * div_ref[...]
    lane = lax.broadcasted_iota(jnp.int32, (t_blk, d), 1)
    pe = jnp.where(lane % 2 == 0, jnp.sin(angle), jnp.cos(angle))
    y = x_ref[...].astype(jnp.float32) * xscale + pe[None, :, :]
    keep = m_ref[...] != 0.0                                     # (B, t, 1) -> lane splat
    o_ref[...] = jnp.where(keep, y, 0.0).astype(o_ref.dtype)


def _pe_table_kernel(x_ref, pe_ref, o_ref, *, xscale):
    y = x_ref[...].astype(jnp.float32) * xscale + pe_ref[...].astype(jnp.float32)[None, :, :]
    o_ref[...] = y.astype(o_ref.dtype)


def _pe_table_mask_kernel(x_ref, pe_ref, m_ref, o_ref, *, xscale):
    y = x_ref[...].astype(jnp.float32) * xscale + pe_ref[...].astype(jnp.float32)[None, :, :]
    keep = m_ref[...] != 0.0
    o_ref[...] = jnp.where(keep, y, 0.0).astype(o_ref.dtype)


# ---------------------------------------------------------------------------
# PE table helpers (shared by the reference / fallback path)
# ---------------------------------------------------------------------------
@functools.lru_cache(maxsize=8)
def _div_term_half(d_model):
    # exp(arange(0, D, 2) * -(log(10000)/D)), identical to the PyTorch buffer.
    return jnp.exp(jnp.arange(0, d_model, 2, dtype=jnp.float32)
                   * (-(math.log(10000.0) / d_model)))


def make_sin_table(num_rows, d_model, dtype=jnp.float32):
    """Sinusoidal table identical to PyTorch _get_sin_table, shape (num_rows, D)."""
    position = jnp.arange(0, num_rows, dtype=jnp.float32)[:, None]
    div_term = _div_term_half(d_model)
    pe = jnp.zeros((num_rows, d_model), dtype=jnp.float32)
    pe = pe.at[:, 0::2].set(jnp.sin(position * div_term))
    pe = pe.at[:, 1::2].set(jnp.cos(position * div_term))
    return pe.astype(dtype)


# ---------------------------------------------------------------------------
# Wrapper
# ---------------------------------------------------------------------------
def positional_encoding(x, mask=None, *, out_dtype=None, tile_t=512,
                        _force_table=False):
    """x: (B, T, D); mask: optional (B, T, 1) or (B, T) bool/float (True = keep)."""
    B, T, D = x.shape
    assert D % 2 == 0, "d_model must be even (sin/cos interleave)"
    xscale = math.sqrt(D)
    out_dtype = x.dtype if out_dtype is None else jnp.dtype(out_dtype)

    # ---- choose the T tile (multiple of 8 sublanes, <= T, VMEM-budgeted) ----
    if T <= 8:
        t_block = T
    else:
        t_block = min(_round_up(max(tile_t, 8), 8), (T // 8) * 8)
        # steady-state x-block + out-block budget; double-buffered footprint is
        # ~2x this, comfortably below vmem_limit_bytes on v5e/v6e/v7x.
        row_bytes = B * D * (jnp.dtype(x.dtype).itemsize + jnp.dtype(out_dtype).itemsize)
        budget = 8 * 1024 * 1024
        while t_block > 8 and row_bytes * t_block > budget:
            t_block = max(8, _round_up(t_block // 2, 8))
        # Give both v7x TensorCores work: force >= 2 grid steps on short T.
        if pl.cdiv(T, t_block) < 2 and T >= 16:
            t_block = min(t_block, _round_up(pl.cdiv(T, 2), 8))

    grid = (pl.cdiv(T, t_block),)

    x_spec = pl.BlockSpec((B, t_block, D), lambda i: (0, i, 0))
    out_spec = pl.BlockSpec((B, t_block, D), lambda i: (0, i, 0))
    out_shape = jax.ShapeDtypeStruct((B, T, D), out_dtype)
    cparams = pltpu.CompilerParams(
        dimension_semantics=("parallel",),
        vmem_limit_bytes=32 * 1024 * 1024,
    )

    masked = mask is not None
    if masked:
        # Lane-thin (B, T, 1) layout: T stays in sublanes, D-broadcast is a
        # lane splat (no per-step XLU relayout). The extra DMA is a few KiB.
        mask_f = mask.reshape(B, T, 1).astype(jnp.float32)
        mask_spec = pl.BlockSpec((B, t_block, 1), lambda i: (0, i, 0))

    def _call(fused_pe):
        if fused_pe:
            div_full = jnp.repeat(_div_term_half(D), 2).reshape(1, D)
            in_arrays = [x, div_full]
            in_specs = [x_spec, pl.BlockSpec((1, D), lambda i: (0, 0))]
            kern = functools.partial(
                _pe_fused_mask_kernel if masked else _pe_fused_kernel,
                xscale=xscale)
        else:
            pe = make_sin_table(T, D, dtype=jnp.float32)
            in_arrays = [x, pe]
            in_specs = [x_spec, pl.BlockSpec((t_block, D), lambda i: (i, 0))]
            kern = functools.partial(
                _pe_table_mask_kernel if masked else _pe_table_kernel,
                xscale=xscale)
        if masked:
            in_arrays.append(mask_f)
            in_specs.append(mask_spec)
        return pl.pallas_call(
            kern,
            out_shape=out_shape,
            grid=grid,
            in_specs=in_specs,
            out_specs=out_spec,
            compiler_params=cparams,
        )(*in_arrays)

    if _force_table:
        return _call(False)
    try:
        return _call(True)
    except Exception:
        # Fallback if in-kernel sin/cos lowering is unavailable: stream the
        # precomputed table from HBM (still pad/slice-free, still big tiles).
        return _call(False)


# ---------------------------------------------------------------------------
# Self-test
# ---------------------------------------------------------------------------
if __name__ == "__main__":
    key = jax.random.PRNGKey(0)
    # d_model = 256 matches AdaTTS's hidden size; small B/T for the demo.
    B, T, D = 2, 200, 256

    kx, km = jax.random.split(key)
    x = jax.random.normal(kx, (B, T, D), dtype=jnp.float32)
    mask = jax.random.uniform(km, (B, T, 1)) > 0.2        # (B, T, 1) bool, True = keep

    # Pure-JAX reference (matches the PyTorch module)
    sin_table = make_sin_table(T, D)
    ref = x * math.sqrt(D) + sin_table[None, :, :]
    ref_masked = jnp.where(mask, ref, 0.0)

    # 1) masked, default tile (grid forced to 2 parallel steps, ragged tail)
    out_m = jax.block_until_ready(positional_encoding(x, mask))
    # 2) unmasked path (no mask DMA at all)
    out_n = jax.block_until_ready(positional_encoding(x, None))
    # 3) masked, small tiles -> multi-block grid with a partial last block
    out_s = jax.block_until_ready(positional_encoding(x, mask, tile_t=64))
    # 4) masked, forced HBM-table fallback path
    out_t = jax.block_until_ready(positional_encoding(x, mask, _force_table=True))

    assert out_m.shape == (B, T, D)
    # fused path: allow tiny sin/cos implementation differences (Mosaic vs XLA)
    assert jnp.allclose(out_m, ref_masked, atol=5e-4, rtol=1e-4)
    assert jnp.allclose(out_n, ref, atol=5e-4, rtol=1e-4)
    assert jnp.allclose(out_s, ref_masked, atol=5e-4, rtol=1e-4)
    # table path: same table values as the reference
    assert jnp.allclose(out_t, ref_masked, atol=1e-5, rtol=1e-5)

    print("KERNEL_OK")
</pallas_src>

<mosaic_0001>
module attributes {stable_mosaic.version = 11 : i64} {
  func.func @_pe_fused_mask_kernel(%arg0: i32, %arg1: memref<2x104x256xf32, #tpu.memory_space<vmem>>, %arg2: memref<1x256xf32, #tpu.memory_space<vmem>>, %arg3: memref<2x104x1xf32, #tpu.memory_space<vmem>>, %arg4: memref<2x104x256xf32, #tpu.memory_space<vmem>>) attributes {dimension_semantics = [#tpu.dimension_semantics<parallel>], iteration_bounds = array<i64: 2>, scalar_prefetch = 0 : i64, scratch_operands = 0 : i64, tpu.core_type = #tpu.core_type<tc>, window_params = [{transform_indices = @transform_0, window_bounds = array<i64: 2, 104, 256>}, {pipeline_mode = #tpu.pipeline_mode<synchronous>, transform_indices = @transform_1, window_bounds = array<i64: 1, 256>}, {transform_indices = @transform_2, window_bounds = array<i64: 2, 104, 1>}, {transform_indices = @transform_3, window_bounds = array<i64: 2, 104, 256>}]} {
    %c104_i32 = arith.constant 104 : i32
    %0 = arith.muli %arg0, %c104_i32 : i32
    %1 = tpu.iota {dimensions = array<i32: 0>} : vector<104x256xi32>
    %2 = vector.broadcast %0 : i32 to vector<104x256xi32>
    %3 = arith.addi %2, %1 : vector<104x256xi32>
    %4 = arith.sitofp %3 : vector<104x256xi32> to vector<104x256xf32>
    %c0 = arith.constant 0 : index
    %c0_0 = arith.constant 0 : index
    %5 = vector.load %arg2[%c0, %c0_0] : memref<1x256xf32, #tpu.memory_space<vmem>>, vector<1x256xf32>
    %6 = vector.broadcast %5 : vector<1x256xf32> to vector<104x256xf32>
    %7 = arith.mulf %4, %6 : vector<104x256xf32>
    %8 = tpu.iota {dimensions = array<i32: 1>} : vector<104x256xi32>
    %c2_i32 = arith.constant 2 : i32
    %c0_i32 = arith.constant 0 : i32
    %9 = arith.cmpi eq, %c2_i32, %c0_i32 : i32
    %c1_i32 = arith.constant 1 : i32
    %10 = arith.select %9, %c1_i32, %c2_i32 : i32
    %11 = vector.broadcast %10 : i32 to vector<104x256xi32>
    %12 = arith.remsi %8, %11 : vector<104x256xi32>
    %c0_i32_1 = arith.constant 0 : i32
    %13 = vector.broadcast %c0_i32_1 : i32 to vector<104x256xi32>
    %14 = arith.cmpi ne, %12, %13 : vector<104x256xi32>
    %c0_i32_2 = arith.constant 0 : i32
    %15 = vector.broadcast %c0_i32_2 : i32 to vector<104x256xi32>
    %16 = arith.cmpi slt, %12, %15 : vector<104x256xi32>
    %c0_i32_3 = arith.constant 0 : i32
    %17 = arith.cmpi slt, %10, %c0_i32_3 : i32
    %18 = vector.broadcast %17 : i1 to vector<104x256xi1>
    %19 = vector.broadcast %18 : vector<104x256xi1> to vector<104x256xi1>
    %20 = arith.xori %16, %19 : vector<104x256xi1>
    %21 = arith.andi %20, %14 : vector<104x256xi1>
    %22 = vector.broadcast %10 : i32 to vector<104x256xi32>
    %23 = arith.addi %12, %22 : vector<104x256xi32>
    %24 = arith.select %21, %23, %12 : vector<104x256xi1>, vector<104x256xi32>
    %c0_i32_4 = arith.constant 0 : i32
    %25 = vector.broadcast %c0_i32_4 : i32 to vector<104x256xi32>
    %26 = arith.cmpi eq, %24, %25 : vector<104x256xi32>
    %27 = math.sin %7 : vector<104x256xf32>
    %28 = math.cos %7 : vector<104x256xf32>
    %29 = arith.select %26, %27, %28 : vector<104x256xi1>, vector<104x256xf32>
    %c0_5 = arith.constant 0 : index
    %c0_6 = arith.constant 0 : index
    %c0_7 = arith.constant 0 : index
    %30 = vector.load %arg1[%c0_5, %c0_6, %c0_7] : memref<2x104x256xf32, #tpu.memory_space<vmem>>, vector<2x104x256xf32>
    %cst = arith.constant 1.600000e+01 : f32
    %31 = vector.broadcast %cst : f32 to vector<2x104x256xf32>
    %32 = arith.mulf %30, %31 : vector<2x104x256xf32>
    %33 = vector.shape_cast %29 : vector<104x256xf32> to vector<1x104x256xf32>
    %34 = vector.broadcast %33 : vector<1x104x256xf32> to vector<2x104x256xf32>
    %35 = arith.addf %32, %34 : vector<2x104x256xf32>
    %c0_8 = arith.constant 0 : index
    %c0_9 = arith.constant 0 : index
    %c0_10 = arith.constant 0 : index
    %36 = vector.load %arg3[%c0_8, %c0_9, %c0_10] : memref<2x104x1xf32, #tpu.memory_space<vmem>>, vector<2x104x1xf32>
    %cst_11 = arith.constant 0.000000e+00 : f32
    %37 = vector.broadcast %cst_11 : f32 to vector<2x104x1xf32>
    %38 = arith.cmpf one, %36, %37 : vector<2x104x1xf32>
    %cst_12 = arith.constant 0.000000e+00 : f32
    %39 = vector.shape_cast %38 : vector<2x104x1xi1> to vector<2x104x1xi1>
    %40 = vector.broadcast %39 : vector<2x104x1xi1> to vector<2x104x256xi1>
    %41 = vector.broadcast %cst_12 : f32 to vector<2x104x256xf32>
    %42 = arith.select %40, %35, %41 : vector<2x104x256xi1>, vector<2x104x256xf32>
    %c0_13 = arith.constant 0 : index
    %c0_14 = arith.constant 0 : index
    %c0_15 = arith.constant 0 : index
    %43 = vector.load %arg4[%c0_13, %c0_14, %c0_15] : memref<2x104x256xf32, #tpu.memory_space<vmem>>, vector<2x104x256xf32>
    tpu.vector_store %arg4[%c0_13, %c0_14, %c0_15], %42 {strides = array<i32>} : memref<2x104x256xf32, #tpu.memory_space<vmem>>, vector<2x104x256xf32>,
    return
  }
  func.func @transform_0(%arg0: i32) -> (i32, i32, i32) {
    %c0_i32 = arith.constant 0 : i32
    %c0_i32_0 = arith.constant 0 : i32
    %c0_i32_1 = arith.constant 0 : i32
    return %c0_i32, %arg0, %c0_i32_0 : i32, i32, i32
  }
  func.func @transform_1(%arg0: i32) -> (i32, i32) {
    %c0_i32 = arith.constant 0 : i32
    %c0_i32_0 = arith.constant 0 : i32
    %c0_i32_1 = arith.constant 0 : i32
    return %c0_i32, %c0_i32_0 : i32, i32
  }
  func.func @transform_2(%arg0: i32) -> (i32, i32, i32) {
    %c0_i32 = arith.constant 0 : i32
    %c0_i32_0 = arith.constant 0 : i32
    %c0_i32_1 = arith.constant 0 : i32
    return %c0_i32, %arg0, %c0_i32_0 : i32, i32, i32
  }
  func.func @transform_3(%arg0: i32) -> (i32, i32, i32) {
    %c0_i32 = arith.constant 0 : i32
    %c0_i32_0 = arith.constant 0 : i32
    %c0_i32_1 = arith.constant 0 : i32
    return %c0_i32, %arg0, %c0_i32_0 : i32, i32, i32
  }
}

module attributes {stable_mosaic.version = 11 : i64} {
  func.func @_pe_table_mask_kernel(%arg0: i32, %arg1: memref<2x104x256xf32, #tpu.memory_space<vmem>>, %arg2: memref<104x256xf32, #tpu.memory_space<vmem>>, %arg3: memref<2x104x1xf32, #tpu.memory_space<vmem>>, %arg4: memref<2x104x256xf32, #tpu.memory_space<vmem>>) attributes {dimension_semantics = [#tpu.dimension_semantics<parallel>], iteration_bounds = array<i64: 2>, scalar_prefetch = 0 : i64, scratch_operands = 0 : i64, tpu.core_type = #tpu.core_type<tc>, window_params = [{transform_indices = @transform_0, window_bounds = array<i64: 2, 104, 256>}, {transform_indices = @transform_1, window_bounds = array<i64: 104, 256>}, {transform_indices = @transform_2, window_bounds = array<i64: 2, 104, 1>}, {transform_indices = @transform_3, window_bounds = array<i64: 2, 104, 256>}]} {
    %c0 = arith.constant 0 : index
    %c0_0 = arith.constant 0 : index
    %c0_1 = arith.constant 0 : index
    %0 = vector.load %arg1[%c0, %c0_0, %c0_1] : memref<2x104x256xf32, #tpu.memory_space<vmem>>, vector<2x104x256xf32>
    %cst = arith.constant 1.600000e+01 : f32
    %1 = vector.broadcast %cst : f32 to vector<2x104x256xf32>
    %2 = arith.mulf %0, %1 : vector<2x104x256xf32>
    %c0_2 = arith.constant 0 : index
    %c0_3 = arith.constant 0 : index
    %3 = vector.load %arg2[%c0_2, %c0_3] : memref<104x256xf32, #tpu.memory_space<vmem>>, vector<104x256xf32>
    %4 = vector.shape_cast %3 : vector<104x256xf32> to vector<1x104x256xf32>
    %5 = vector.broadcast %4 : vector<1x104x256xf32> to vector<2x104x256xf32>
    %6 = arith.addf %2, %5 : vector<2x104x256xf32>
    %c0_4 = arith.constant 0 : index
    %c0_5 = arith.constant 0 : index
    %c0_6 = arith.constant 0 : index
    %7 = vector.load %arg3[%c0_4, %c0_5, %c0_6] : memref<2x104x1xf32, #tpu.memory_space<vmem>>, vector<2x104x1xf32>
    %cst_7 = arith.constant 0.000000e+00 : f32
    %8 = vector.broadcast %cst_7 : f32 to vector<2x104x1xf32>
    %9 = arith.cmpf one, %7, %8 : vector<2x104x1xf32>
    %cst_8 = arith.constant 0.000000e+00 : f32
    %10 = vector.shape_cast %9 : vector<2x104x1xi1> to vector<2x104x1xi1>
    %11 = vector.broadcast %10 : vector<2x104x1xi1> to vector<2x104x256xi1>
    %12 = vector.broadcast %cst_8 : f32 to vector<2x104x256xf32>
    %13 = arith.select %11, %6, %12 : vector<2x104x256xi1>, vector<2x104x256xf32>
    %c0_9 = arith.constant 0 : index
    %c0_10 = arith.constant 0 : index
    %c0_11 = arith.constant 0 : index
    %14 = vector.load %arg4[%c0_9, %c0_10, %c0_11] : memref<2x104x256xf32, #tpu.memory_space<vmem>>, vector<2x104x256xf32>
    tpu.vector_store %arg4[%c0_9, %c0_10, %c0_11], %13 {strides = array<i32>} : memref<2x104x256xf32, #tpu.memory_space<vmem>>, vector<2x104x256xf32>,
    return
  }
  func.func @transform_0(%arg0: i32) -> (i32, i32, i32) {
    %c0_i32 = arith.constant 0 : i32
    %c0_i32_0 = arith.constant 0 : i32
    %c0_i32_1 = arith.constant 0 : i32
    return %c0_i32, %arg0, %c0_i32_0 : i32, i32, i32
  }
  func.func @transform_1(%arg0: i32) -> (i32, i32) {
    %c0_i32 = arith.constant 0 : i32
    %c0_i32_0 = arith.constant 0 : i32
    return %arg0, %c0_i32 : i32, i32
  }
  func.func @transform_2(%arg0: i32) -> (i32, i32, i32) {
    %c0_i32 = arith.constant 0 : i32
    %c0_i32_0 = arith.constant 0 : i32
    %c0_i32_1 = arith.constant 0 : i32
    return %c0_i32, %arg0, %c0_i32_0 : i32, i32, i32
  }
  func.func @transform_3(%arg0: i32) -> (i32, i32, i32) {
    %c0_i32 = arith.constant 0 : i32
    %c0_i32_0 = arith.constant 0 : i32
    %c0_i32_1 = arith.constant 0 : i32
    return %c0_i32, %arg0, %c0_i32_0 : i32, i32, i32
  }
}

</mosaic_0001>

<bundles_post_ra>
// kernel: tpu_custom_call.1
= control target key start
LH: loop header
LB: loop body
LE: loop exit
PB: predicated region body
PF: predicated region fallthrough
CT: control target
= control target key end

     0   :  { %8 = vsyncpa [#allocation3], 0  ;;  %s16202_s0 = inlined_call_operand.hbm [shape: f32[2,200,256], index: 0, kind: input, shape index: {}]   ;;  %s16203_s1 = inlined_call_operand.vmem [shape: f32[1,256], index: 1, kind: input, shape index: {}]   ;;  %s16204_s2 = inlined_call_operand.vmem [shape: f32[2,200,1], index: 2, kind: input, shape index: {}]   ;;  %s16205_s3 = inlined_call_operand.hbm [shape: f32[2,200,256], index: 3, kind: output, shape index: {}]  }
   0x1   :  { %10 = vsyncpa [#allocation3 + $0x1], 0 }
   0x2   :  { %11 = vsyncpa [#allocation4], 0 }
   0x3   :  { %13 = vsyncpa [#allocation4 + $0x1], 0  ;;  %s9752_s12 = smov 0   ;;  %s9754_s13 = smov 0  }
   0x4   :  { %s9756_s14 = smov 0   ;;  %s9758_s15 = smov 0  }
   0x5 LB: > { %s9773_s16 = sadd.s32 4294967295, %s9680_s15   ;;  %s9272_s17 = sadd.s32 4294967294, %s9680_s15   ;;  %s9680_s15 = sphi %s9758_s15, %s17126_s15   ;;  %s9676_s14 = sphi %s9756_s14, %s17125_s14   ;;  %s9672_s13 = sphi %s9754_s13, %s17124_s13   ;;  %s9668_s12 = sphi %s9752_s12, %s17123_s12  }
   0x6   : > { %s9777_s18 = sadd.s32 1, %s9680_s15   ;;  %s26_s19 = sadd.s32 1, %s9676_s14 }
   0x7   : > { %s23_s20 = ssub.s32 %s9680_s15, %s9777_s18  ;;  %p33_p0 = scmp.ne.s32.totalorder %s9676_s14, %s9672_s13 }
   0x8   : > { %p24_p1 = scmp.eq.s32.totalorder %s23_s20, 0  ;;  %p34_p2 = scmp.eq.s32.totalorder %s9680_s15, 0 }
   0x9   : > { %p39_p3 = scmp.ne.s32.totalorder %s9672_s13, %s9668_s12  ;;  %p40_p4 = scmp.eq.s32.totalorder %s9773_s16, 0 }
   0xa   : > { %s9789_s21 = scalar_select %p24_p1, %s9676_s14, %s26_s19  }
   0xb   : > { %p9791_p5 = por %p34_p2, %p33_p0  ;;  %p9795_p6 = por %p40_p4, %p39_p3 }
   0xc   : > { %16520 = sst [smem:[#allocation13_spill]] %s9789_s21  ;;  %p110_p7 = scmp.eq.s32.totalorder %s9773_s16, 1 }
   0xd   : > { %p116_p8 = scmp.eq.s32.totalorder %s9272_s17, 1  ;;  %p9274_p11 = scmp.ge.s32.totalorder %s9680_s15, 2 }
   0xe   : > { %p9800_p9 = por %p110_p7, %p33_p0 }
   0xf   : > { %p9804_p10 = por %p116_p8, %p39_p3  ;;  %135 = sbr.rel (%p9274_p11) target bundleno = 124 (0x7c), region = 20 }
  0x14   : > { %138 = sbr.rel (!%p9791_p5) target bundleno = 45 (0x2d), region = 24 }
  0x19   : > { %s139_s26 = sand.u32 1, %s9676_s14   ;;  %s144_s27 = smul.u32 13, %s9680_s15 }
  0x1a   : > { %s9475_s28 = smul.u32 416, %s139_s26  ;;  %s9818_s6 = scalar_lea.sflag [#allocation3], %s139_s26 }
  0x1b   : > { %s145_s29 = ssub.s32 25, %s144_s27 }
  0x1c   : > { %p146_p12 = scmp.lt.s32.totalorder %s145_s29, 13  ;;  %s143_s7 = scalar_lea.vmem [#allocation2], %s9475_s28 }
  0x1e   : > { %s17128_s29 = smov (!%p146_p12, %s145_s29), 13 }
  0x1f   : > { %s9462_s30 = sshll.u32 %s17128_s29, 5 }
  0x20   : > { %s150_s4 = ssub.s32 416, %s9462_s30 }
  0x21   : > { %s151_s5 = sshll.u32 %s150_s4, 4 }
  0x22   : > { %152 = vsyncadd %s9818_s6, %s151_s5  ;;  %p9821_p13 = scmp.ne.s32.totalorder %s9462_s30, 0  ;;  %s9473_s9 = smul.u32 208, %s9680_s15 }
  0x23   : > { %s163_s10 = sld [smem:[#allocation0]]   ;;  %s173_s11 = sshll.u32 %s143_s7, 4  ;;  %s174_s11 = int_to_ptr.vmem [resolvable:$true] %s173_s11 }
  0x24   : > { %s156_s20 = scalar_lea.hbm %s16202_s0, %s9473_s9  ;;  %s9466_s27 = sshll.u32 %s17128_s29, 9 }
  0x25   : > { %s171_s26 = sshll.u32 %s156_s20, 4  ;;  %s9714_s28 = smov 6400   ;;  %s172_s26 = int_to_ptr.hbm [resolvable:$true] %s171_s26 }
  0x26   : > { %180 = sst [smem:[#allocation8]] %s9714_s28  ;;  %s9715_s4 = smov 3328  }
  0x27   : > { %182 = sst [smem:[#allocation8 + $0x1]] %s9715_s4  ;;  %s9716_s21 = smov 256  }
  0x28   : > { %184 = sst [smem:[#allocation8 + $0x2]] %s17128_s29  ;;  %s9717_s7 = smov 16  }
  0x29   : > { %s9282_s30 = sshll.u32 %s163_s10, 26  ;;  %186 = sst [smem:[#allocation8 + $0x3]] %s9716_s21 }
  0x2a   : > { %s9283_s5 = sadd.s32 134217728, %s9282_s30  ;;  %188 = sst [smem:[#allocation8 + $0x4]] %s9716_s21 }
  0x2b   : > { %190 = sst [smem:[#allocation8 + $0x5]] %s9717_s7  ;;  %s9718_s17 = smov [#allocation7]  }
  0x2c   : > { %192 = dma.general (%p9821_p13), %s172_s26, %s9466_s27, %s174_s11, %s9818_s6, %s9718_s17, [#allocation8], %s9283_s5, 0  }
  0x2d PF: > { %195 = sbr.rel (!%p9791_p5) target bundleno = 124 (0x7c), region = 28  ;;  %s197_s9 = sand.u32 (%p9791_p5), 1, %s9676_s14  }
  0x2e   : > { %s200_s19 = smul.u32 (%p9791_p5), 13, %s9680_s15 }
  0x2f   : > { %s9476_s10 = smul.u32 (%p9791_p5), 208, %s197_s9 }
  0x30   : > { %s201_s29 = ssub.s32 (%p9791_p5), 25, %s200_s19  ;;  %s9467_s20 = smul.u32 (%p9791_p5), 104, %s9680_s15 }
  0x31   : > { %p202_p0 = scmp.lt.s32.totalorder (%p9791_p5), %s201_s29, 13  ;;  %s9847_s22 = scalar_lea.vmem (%p9791_p5), [#allocation5], %s9476_s10  }
  0x32   : > { %s9842_s4 = scalar_lea.vmem %s16204_s2, %s9467_s20  }
  0x33   : > { %s17130_s29 = smov (!%p202_p0, %s201_s29), 13 }
  0x34   : > { %s9285_s6 = sshll.u32 %s17130_s29, 4 }
  0x35   : > { %p9288_p1 = scmp.eq.s32.totalorder %s9285_s6, 0 }
  0x36   : > { %9601 = sdivrem.u32 (!%p9288_p1), %s17130_s29, 13 }
  0x37   : > { %210 = sbr.rel (%p9288_p1) target bundleno = 124 (0x7c), region = 32 }
  0x3f   : > { %s9850_s8 = spop.drf %9601 }
  0x40   : > { %s9603_s11 = spop.drf %9601  ;;  %p9289_p2 = scmp.le.s32.totalorder %s9850_s8, 0 }
  0x41   : > { %s16526_s26 = smov (!%p9289_p2), %s9847_s22  ;;  %s16527_s27 = smov (!%p9289_p2), %s9842_s4 }
  0x42   : > { %9219 = sbr.rel (%p9289_p2) target bundleno = 98 (0x62), region = 149  ;;  %s9859_s30 = smov (!%p9289_p2), 0  }
  0x43   : > { %s9861_s5 = smov (!%p9289_p2), 0  }
  0x47 LB: >> { %v327_v0 = vld [vmem:[%s9688_s27] sm:$0xff]  ;;  %v329_v1 = vld [vmem:[%s9688_s27 + $0x8] sm:$0xff]  ;;  %v331_v2 = vld [vmem:[%s9688_s27 + $0x10] sm:$0xff]  ;;  %s379_s7 = sadd.s32 1, %s9692_s30  ;;  %s321_s5 = sadd.s32 1, %s9696_s5   ;;  %s9696_s5 = sphi %s9861_s5, %s321_s5   ;;  %s9692_s30 = sphi %s9859_s30, %s16530_s30   ;;  %s9688_s27 = sphi %s16527_s27, %s16529_s27   ;;  %s9684_s26 = sphi %s16526_s26, %s16528_s26  }
  0x48   : >> { %328 = vst [vmem:[%s9684_s26] sm:$0xff] %v327_v0  ;;  %v333_v3 = vld [vmem:[%s9688_s27 + $0x18] sm:$0xff]  ;;  %p380_p3 = scmp.ge.s32.totalorder %s379_s7, %s9850_s8  ;;  %v335_v4 = vld [vmem:[%s9688_s27 + $0x20] sm:$0xff]  ;;  %v337_v5 = vld [vmem:[%s9688_s27 + $0x28] sm:$0xff]  ;;  %p320_p4 = scmp.ge.s32.totalorder %s321_s5, %s9850_s8 }
  0x49   : >> { %330 = vst [vmem:[%s9684_s26 + $0x8] sm:$0xff] %v329_v1  ;;  %v339_v6 = vld [vmem:[%s9688_s27 + $0x30] sm:$0xff]  ;;  %v341_v7 = vld [vmem:[%s9688_s27 + $0x38] sm:$0xff]  ;;  %v343_v8 = vld [vmem:[%s9688_s27 + $0x40] sm:$0xff] }
  0x4a   : >> { %332 = vst [vmem:[%s9684_s26 + $0x10] sm:$0xff] %v331_v2  ;;  %s17132_s7 = smov (%p380_p3, %s379_s7), 0  ;;  %v345_v9 = vld [vmem:[%s9688_s27 + $0x48] sm:$0xff]  ;;  %v347_v10 = vld [vmem:[%s9688_s27 + $0x50] sm:$0xff]  ;;  %v349_v11 = vld [vmem:[%s9688_s27 + $0x58] sm:$0xff] }
  0x4b   : >> { %334 = vst [vmem:[%s9684_s26 + $0x18] sm:$0xff] %v333_v3  ;;  %s382_s17 = smul.u32 104, %s17132_s7  ;;  %v351_v12 = vld [vmem:[%s9688_s27 + $0x60] sm:$0xff]  ;;  %v353_v13 = vld [vmem:[%s9688_s27 + $0xc8] sm:$0xff]  ;;  %v355_v14 = vld [vmem:[%s9688_s27 + $0xd0] sm:$0xff]  ;;  %s16530_s30 = smov %s17132_s7 }
  0x4c   : >> { %336 = vst [vmem:[%s9684_s26 + $0x20] sm:$0xff] %v335_v4  ;;  %v357_v15 = vld [vmem:[%s9688_s27 + $0xd8] sm:$0xff]  ;;  %v359_v16 = vld [vmem:[%s9688_s27 + $0xe0] sm:$0xff]  ;;  %v361_v17 = vld [vmem:[%s9688_s27 + $0xe8] sm:$0xff] }
  0x4d   : >> { %338 = vst [vmem:[%s9684_s26 + $0x28] sm:$0xff] %v337_v5  ;;  %s9895_s9 = scalar_lea.vmem %s9842_s4, %s382_s17   ;;  %s9898_s19 = scalar_lea.vmem %s9847_s22, %s382_s17 [#allocation5]   ;;  %v363_v18 = vld [vmem:[%s9688_s27 + $0xf0] sm:$0xff]  ;;  %v365_v19 = vld [vmem:[%s9688_s27 + $0xf8] sm:$0xff]  ;;  %v367_v20 = vld [vmem:[%s9688_s27 + $0x100] sm:$0xff] }
  0x4e   : >> { %340 = vst [vmem:[%s9684_s26 + $0x30] sm:$0xff] %v339_v6  ;;  %v369_v21 = vld [vmem:[%s9688_s27 + $0x108] sm:$0xff]  ;;  %v371_v22 = vld [vmem:[%s9688_s27 + $0x110] sm:$0xff]  ;;  %v373_v23 = vld [vmem:[%s9688_s27 + $0x118] sm:$0xff] }
  0x4f   : >> { %342 = vst [vmem:[%s9684_s26 + $0x38] sm:$0xff] %v341_v7  ;;  %v375_v24 = vld [vmem:[%s9688_s27 + $0x120] sm:$0xff]  ;;  %v377_v25 = vld [vmem:[%s9688_s27 + $0x128] sm:$0xff]  ;;  %s16529_s27 = smov %s9895_s9 }
  0x50   : >> { %344 = vst [vmem:[%s9684_s26 + $0x40] sm:$0xff] %v343_v8 }
  0x51   : >> { %346 = vst [vmem:[%s9684_s26 + $0x48] sm:$0xff] %v345_v9 }
  0x52   : >> { %348 = vst [vmem:[%s9684_s26 + $0x50] sm:$0xff] %v347_v10 }
  0x53   : >> { %350 = vst [vmem:[%s9684_s26 + $0x58] sm:$0xff] %v349_v11 }
  0x54   : >> { %352 = vst [vmem:[%s9684_s26 + $0x60] sm:$0xff] %v351_v12 }
  0x55   : >> { %354 = vst [vmem:[%s9684_s26 + $0x68] sm:$0xff] %v353_v13 }
  0x56   : >> { %356 = vst [vmem:[%s9684_s26 + $0x70] sm:$0xff] %v355_v14 }
  0x57   : >> { %358 = vst [vmem:[%s9684_s26 + $0x78] sm:$0xff] %v357_v15 }
  0x58   : >> { %360 = vst [vmem:[%s9684_s26 + $0x80] sm:$0xff] %v359_v16 }
  0x59   : >> { %362 = vst [vmem:[%s9684_s26 + $0x88] sm:$0xff] %v361_v17 }
  0x5a   : >> { %364 = vst [vmem:[%s9684_s26 + $0x90] sm:$0xff] %v363_v18 }
  0x5b   : >> { %366 = vst [vmem:[%s9684_s26 + $0x98] sm:$0xff] %v365_v19 }
  0x5c   : >> { %368 = vst [vmem:[%s9684_s26 + $0xa0] sm:$0xff] %v367_v20 }
  0x5d   : >> { %370 = vst [vmem:[%s9684_s26 + $0xa8] sm:$0xff] %v369_v21  ;;  %323 = sbr.rel (!%p320_p4) target bundleno = 71 (0x47), region = 155 }
  0x5e   : >> { %372 = vst [vmem:[%s9684_s26 + $0xb0] sm:$0xff] %v371_v22 }
  0x5f   : >> { %374 = vst [vmem:[%s9684_s26 + $0xb8] sm:$0xff] %v373_v23 }
  0x60   : >> { %376 = vst [vmem:[%s9684_s26 + $0xc0] sm:$0xff] %v375_v24 }
  0x61   : >> { %378 = vst [vmem:[%s9684_s26 + $0xc8] sm:$0xff] %v377_v25  ;;  %s16528_s26 = smov %s9898_s19 }
  0x62 PF: > { %9604 = sdivrem.u32 %s17130_s29, 13 }
  0x63   : > { %s9290_s10 = smul.u32 104, %s9850_s8 }
  0x65   : > { %s9951_s20 = scalar_lea.vmem %s9842_s4, %s9290_s10   ;;  %s9954_s28 = scalar_lea.vmem %s9847_s22, %s9290_s10 [#allocation5]  }
  0x6b   : > { %s9605_s21 = spop.drf %9604 }
  0x6c   : > { %s9606_s6 = spop.drf %9604 }
  0x6d   : > { %p9292_p5 = scmp.le.s32.totalorder %s9606_s6, 0 }
  0x6e   : > { %s9698_s11 = smov (!%p9292_p5), %s9954_s28   ;;  %s9702_s5 = smov (!%p9292_p5), %s9951_s20  }
  0x6f   : > { %9233 = sbr.rel (%p9292_p5) target bundleno = 124 (0x7c), region = 160  ;;  %s9706_s7 = smov (!%p9292_p5), 0  }
  0x70   : > { %s9710_s26 = smov (!%p9292_p5), 0  }
  0x74 LB: >> { %v402_v26 = vld [vmem:[%s9704_s5] sm:$0xff]  ;;  %v404_v27 = vld [vmem:[%s9704_s5 + $0xc8] sm:$0xff]  ;;  %s406_s29 = sadd.s32 1, %s9708_s7  ;;  %s396_s26 = sadd.s32 1, %s9712_s26   ;;  %s9712_s26 = sphi %s9710_s26, %s396_s26   ;;  %s9708_s7 = sphi %s9706_s7, %s9707_s7   ;;  %s9704_s5 = sphi %s9702_s5, %s411_s5   ;;  %s9700_s11 = sphi %s9698_s11, %s412_s11  }
  0x75   : >> { %403 = vst [vmem:[%s9700_s11] sm:$0xff] %v402_v26  ;;  %p407_p7 = scmp.ge.s32.totalorder %s406_s29, %s9606_s6  ;;  %p395_p8 = scmp.ge.s32.totalorder %s396_s26, %s9606_s6 }
  0x76   : >> { %405 = vst [vmem:[%s9700_s11 + $0x68] sm:$0xff] %v404_v27 }
  0x77   : >> { %s17134_s29 = smov (%p407_p7, %s406_s29), 0  ;;  %398 = sbr.rel (!%p395_p8) target bundleno = 116 (0x74), region = 166 }
  0x78   : >> { %s9293_s4 = sshll.u32 %s17134_s29, 3  ;;  %s9707_s7 = smov %s17134_s29  }
  0x79   : >> { %s411_s5 = scalar_lea.vmem %s9951_s20, %s9293_s4   ;;  %s412_s11 = scalar_lea.vmem %s9954_s28, %s9293_s4 [#allocation5]  }
  0x7c PF: > { %p9295_p12 = scmp.ge.s32.totalorder %s9680_s15, 1  ;;  %p417_p13 = scmp.lt.s32.totalorder %s9680_s15, 3 }
  0x7e   : > { %p418_p0 = pnand %p9295_p12, %p417_p13 }
  0x80   : > { %421 = sbr.rel (%p418_p0) target bundleno = 1331 (0x533), region = 80 }
  0x85   : > { %s9963_s22 = sand.u32 1, %s9672_s13  }
  0x86   : > { %s9477_s8 = smul.u32 416, %s9963_s22  ;;  %s424_s27 = scalar_lea.sflag [#allocation3], %s9963_s22 }
  0x88   : > { %s9969_s30 = scalar_lea.vmem [#allocation2], %s9477_s8 }
  0x89   : > { %9659 = dma.done.wait (%p9795_p6), %s424_s27, 6656  }
  0x8a   : > { %9661 = vsyncadd (%p9795_p6), %s424_s27, 4294960640  ;;  %s9478_s17 = smul.u32 208, %s9963_s22  ;;  %v16224_v28 = vmov 0   ;;  %v16208_v47 = vlaneseq  ;;  %v521_v56 = vld [vmem:[%s16203_s1] sm:$0x3]  ;;  %s15857_s20 = scalar_lea.vmem [#allocation6], %s9477_s8 }
  0x8b   : > { %9609 = vset.pattern.permute.xlu2 %v16224_v28  ;;  %9608 = vset.pattern.permute.xlu1 %v16224_v28  ;;  %s479_s23 = smul.u32 104, %s9773_s16  ;;  %v10022_v62 = vperm.slane %v521_v56, 0  ;;  %v10046_v23 = vperm.slane %v521_v56, 1  ;;  %s9085_s28 = scalar_lea.sflag [#allocation4], %s9963_s22 }
  0x8c   : > { %9607 = vset.pattern.permute.xlu0 %v16224_v28  ;;  %s9979_s9 = scalar_lea.vmem [#allocation5], %s9478_s17  ;;  %v10006_v52 = vshrl.u32 %v16208_v47, 7 }
  0x8d   : > { %v8802_v29 = vld [vmem:[%s9979_s9 + $0x20] sm:$0xff]  ;;  %v8800_v30 = vld [vmem:[%s9979_s9 + $0x10] sm:$0xff]  ;;  %v8803_v35 = vld [vmem:[%s9979_s9 + $0x28] sm:$0xff]  ;;  %v10003_v51 = vstv %s479_s23 }
  0x8e   : > { %v8798_v31 = vld [vmem:[%s9979_s9] sm:$0xff]  ;;  %vm8828_vm0 = vcmp.ne.f32.partialorder %v8802_v29, 0.0  ;;  %vm8826_vm1 = vcmp.ne.f32.partialorder %v8800_v30, 0.0  ;;  %v8801_v36 = vld [vmem:[%s9979_s9 + $0x18] sm:$0xff]  ;;  %v8799_v37 = vld [vmem:[%s9979_s9 + $0x8] sm:$0xff]  ;;  %vm8829_vm3 = vcmp.ne.f32.partialorder %v8803_v35, 0.0  ;;  %v10010_v53 = vadd.s32 %v10003_v51, %v10006_v52 }
  0x8f   : > { %vm8824_vm2 = vcmp.ne.f32.partialorder %v8798_v31, 0.0  ;;  %v8854_v32 = vsel %vm8828_vm0, 1, %v16224_v28  ;;  %v8852_v33 = vsel %vm8826_vm1, 1, %v16224_v28  ;;  %vm8827_vm4 = vcmp.ne.f32.partialorder %v8801_v36, 0.0  ;;  %v8806_v41 = vld [vmem:[%s9979_s9 + $0x40] sm:$0xff]  ;;  %v8805_v42 = vld [vmem:[%s9979_s9 + $0x38] sm:$0xff] }
  0x90   : > { %v8850_v34 = vsel %vm8824_vm2, 1, %v16224_v28  ;;  %8889 = vperm.xlu2 %9609, %v8854_v32   ;;  %8883 = vperm.xlu1 %9608, %v8852_v33   ;;  %vm8825_vm5 = vcmp.ne.f32.partialorder %v8799_v37, 0.0  ;;  %v8855_v38 = vsel %vm8829_vm3, 1, %v16224_v28  ;;  %v8853_v39 = vsel %vm8827_vm4, 1, %v16224_v28  ;;  %v8804_v43 = vld [vmem:[%s9979_s9 + $0x30] sm:$0xff]  ;;  %v8809_v48 = vld [vmem:[%s9979_s9 + $0x58] sm:$0xff] }
  0x91   : > { %8877 = vperm.xlu0 %9607, %v8850_v34   ;;  %v8851_v40 = vsel %vm8825_vm5, 1, %v16224_v28  ;;  %vm8832_vm6 = vcmp.ne.f32.partialorder %v8806_v41, 0.0  ;;  %vm8831_vm7 = vcmp.ne.f32.partialorder %v8805_v42, 0.0  ;;  %vm8830_vm8 = vcmp.ne.f32.partialorder %v8804_v43, 0.0  ;;  %v8808_v49 = vld [vmem:[%s9979_s9 + $0x50] sm:$0xff]  ;;  %v8807_v50 = vld [vmem:[%s9979_s9 + $0x48] sm:$0xff] }
  0x92   : > { %v8858_v44 = vsel %vm8832_vm6, 1, %v16224_v28  ;;  %v8857_v45 = vsel %vm8831_vm7, 1, %v16224_v28  ;;  %v8856_v46 = vsel %vm8830_vm8, 1, %v16224_v28  ;;  %vm8835_vm9 = vcmp.ne.f32.partialorder %v8809_v48, 0.0  ;;  %v8812_v58 = vld [vmem:[%s9979_s9 + $0x70] sm:$0xff]  ;;  %v8811_v59 = vld [vmem:[%s9979_s9 + $0x68] sm:$0xff] }
  0x93   : > { %vm8834_vm10 = vcmp.ne.f32.partialorder %v8808_v49, 0.0  ;;  %vm8833_vm11 = vcmp.ne.f32.partialorder %v8807_v50, 0.0  ;;  %v8861_v54 = vsel %vm8835_vm9, 1, %v16224_v28  ;;  %v8810_v60 = vld [vmem:[%s9979_s9 + $0x60] sm:$0xff]  ;;  %v508_v61 = vcvt.s32.f32 %v10010_v53  ;;  %v8815_v3 = vld [vmem:[%s9979_s9 + $0x88] sm:$0xff]  ;;  %v8813_v5 = vld [vmem:[%s9979_s9 + $0x78] sm:$0xff] }
  0x94   : > { %v8860_v55 = vsel %vm8834_vm10, 1, %v16224_v28  ;;  %v8859_v57 = vsel %vm8833_vm11, 1, %v16224_v28  ;;  %vm8838_vm12 = vcmp.ne.f32.partialorder %v8812_v58, 0.0  ;;  %vm8837_vm13 = vcmp.ne.f32.partialorder %v8811_v59, 0.0  ;;  %v8814_v4 = vld [vmem:[%s9979_s9 + $0x80] sm:$0xff]  ;;  %v8817_v12 = vld [vmem:[%s9979_s9 + $0x98] sm:$0xff] }
  0x95   : > { %vm8836_vm14 = vcmp.ne.f32.partialorder %v8810_v60, 0.0  ;;  %v10025_v63 = vmul.f32 %v10022_v62, %v508_v61  ;;  %v8864_v0 = vsel %vm8838_vm12, 1, %v16224_v28  ;;  %v8863_v1 = vsel %vm8837_vm13, 1, %v16224_v28  ;;  %v8818_v11 = vld [vmem:[%s9979_s9 + $0xa0] sm:$0xff]  ;;  %v8816_v13 = vld [vmem:[%s9979_s9 + $0x90] sm:$0xff]  ;;  %v8821_v19 = vld [vmem:[%s9979_s9 + $0xb8] sm:$0xff] }
  0x96   : > { %v8862_v2 = vsel %vm8836_vm14, 1, %v16224_v28  ;;  %vm8841_vm15 = vcmp.ne.f32.partialorder %v8815_v3, 0.0  ;;  %vm8840_vm0 = vcmp.ne.f32.partialorder %v8814_v4, 0.0  ;;  %vm8839_vm1 = vcmp.ne.f32.partialorder %v8813_v5, 0.0  ;;  %v8820_v20 = vld [vmem:[%s9979_s9 + $0xb0] sm:$0xff]  ;;  %v8819_v21 = vld [vmem:[%s9979_s9 + $0xa8] sm:$0xff] }
  0x97   : > { %16531 = vst [vmem:[#allocation14_spill] sm:$0xff] %v10025_v63  ;;  %v585_v6 = vand.u32 2139095040, %v10025_v63  ;;  %v8867_v8 = vsel %vm8841_vm15, 1, %v16224_v28  ;;  %v8866_v9 = vsel %vm8840_vm0, 1, %v16224_v28  ;;  %v8865_v10 = vsel %vm8839_vm1, 1, %v16224_v28  ;;  %v8823_v29 = vld [vmem:[%s9979_s9 + $0xc8] sm:$0xff] }
  0x98   : > { %8892 = vperm.xlu2 %9609, %v8855_v38   ;;  %8886 = vperm.xlu1 %9608, %v8853_v39   ;;  %vm8844_vm2 = vcmp.ne.f32.partialorder %v8818_v11, 0.0  ;;  %vm8843_vm3 = vcmp.ne.f32.partialorder %v8817_v12, 0.0  ;;  %vm8842_vm4 = vcmp.ne.f32.partialorder %v8816_v13, 0.0  ;;  %vm8847_vm6 = vcmp.ne.f32.partialorder %v8821_v19, 0.0  ;;  %v8822_v30 = vld [vmem:[%s9979_s9 + $0xc0] sm:$0xff] }
  0x99   : > { %8880 = vperm.xlu0 %9607, %v8851_v40   ;;  %v586_v7 = vshrl.u32 %v585_v6, 23  ;;  %v8870_v16 = vsel %vm8844_vm2, 1, %v16224_v28  ;;  %v8869_v17 = vsel %vm8843_vm3, 1, %v16224_v28  ;;  %v8868_v18 = vsel %vm8842_vm4, 1, %v16224_v28 }
  0x9a   : > { %vm8846_vm7 = vcmp.ne.f32.partialorder %v8820_v20, 0.0  ;;  %vm8845_vm8 = vcmp.ne.f32.partialorder %v8819_v21, 0.0  ;;  %v8873_v24 = vsel %vm8847_vm6, 1, %v16224_v28  ;;  %v10054_v31 = vmul.f32 %v10046_v23, %v508_v61 }
  0x9b   : > { %v9296_v14 = vadd.s32 4294967169, %v586_v7  ;;  %v8872_v25 = vsel %vm8846_vm7, 1, %v16224_v28  ;;  %v8871_v26 = vsel %vm8845_vm8, 1, %v16224_v28  ;;  %vm8849_vm9 = vcmp.ne.f32.partialorder %v8823_v29, 0.0 }
  0x9c   : > { %16532 = vst [vmem:[#allocation15_spill] sm:$0xff] %v10054_v31  ;;  %vm8848_vm10 = vcmp.ne.f32.partialorder %v8822_v30, 0.0  ;;  %v740_v33 = vand.u32 2139095040, %v10054_v31  ;;  %v8875_v34 = vsel %vm8849_vm9, 1, %v16224_v28  ;;  %v16218_v36 = vmov 920167782  }
  0x9d   : > { %v592_v15 = vadd.s32 1, %v9296_v14  ;;  %v8874_v35 = vsel %vm8848_vm10, 1, %v16224_v28  ;;  %v16222_v38 = vmov 1326507024   ;;  %v16209_v40 = vand.u32 2147483647, %v10025_v63 }
  0x9e   : > { %v16220_v42 = vmov 2102212464   ;;  %v16211_v49 = vmov 2131351028  }
  0x9f   : > { %vm593_vm5 = vcmp.gt.s32.totalorder %v592_v15, 0  ;;  %v589_v59 = vand.u32 8388607, %v16209_v40 }
  0xa0   : > { %8901 = vperm.xlu2 %9609, %v8858_v44   ;;  %8898 = vperm.xlu1 %9608, %v8857_v45   ;;  %v594_v22 = vsel %vm593_vm5, %v592_v15, 0  ;;  %v741_v45 = vshrl.u32 %v740_v33, 23 }
  0xa1   : > { %8895 = vperm.xlu0 %9607, %v8856_v46   ;;  %v596_v27 = vand.u32 31, %v594_v22  ;;  %v10065_v41 = vshrl.u32 %v594_v22, 5  ;;  %v16213_v46 = vmov 2475754826   ;;  %v590_v5 = vor.u32 8388608, %v589_v59 }
  0xa2   : > { %v9299_v61 = vadd.s32 4294967169, %v741_v45  ;;  %v16207_v45 = vand.u32 2147483647, %v10054_v31 }
  0xa3   : > { %v10056_v32 = vsub.s32 32, %v596_v27  ;;  %v611_v37 = vshll.u32 %v16218_v36, %v596_v27  ;;  %v608_v43 = vshll.u32 %v16220_v42, %v596_v27  ;;  %v602_v48 = vshll.u32 %v16213_v46, %v596_v27 }
  0xa4   : > { %v605_v53 = vshll.u32 %v16211_v49, %v596_v27  ;;  %vm617_vm11 = vcmp.lt.s32.totalorder %v10065_v41, 4  ;;  %vm614_vm12 = vcmp.lt.s32.totalorder %v10065_v41, 1  ;;  %vm616_vm13 = vcmp.lt.s32.totalorder %v10065_v41, 3 }
  0xa5   : > { %v612_v39 = vshrl.u32 %v16222_v38, %v10056_v32  ;;  %v609_v44 = vshrl.u32 %v16218_v36, %v10056_v32  ;;  %v603_v50 = vshrl.u32 %v16211_v49, %v10056_v32  ;;  %v747_v7 = vadd.s32 1, %v9299_v61 }
  0xa6   : > { %vm615_vm14 = vcmp.lt.s32.totalorder %v10065_v41, 2  ;;  %v10112_v13 = vshll.u32 %v590_v5, 8 }
  0xa7   : > { %v613_v58 = vor.u32 %v612_v39, %v611_v37  ;;  %v610_v60 = vor.u32 %v609_v44, %v608_v43  ;;  %vm748_vm15 = vcmp.gt.s32.totalorder %v747_v7, 0 }
  0xa8   : > { %8910 = vperm.xlu2 %9609, %v8861_v54   ;;  %8907 = vperm.xlu1 %9608, %v8860_v55   ;;  %v606_v54 = vshrl.u32 %v16220_v42, %v10056_v32  ;;  %v16216_v55 = vmov 683565275   ;;  %v749_v19 = vsel %vm748_vm15, %v747_v7, 0 }
  0xa9   : > { %8904 = vperm.xlu0 %9607, %v8859_v57   ;;  %v599_v56 = vshll.u32 %v16216_v55, %v596_v27  ;;  %v600_v57 = vshrl.u32 %v16213_v46, %v10056_v32  ;;  %v627_v4 = vsel %vm617_vm11, %v613_v58, 1326507024  ;;  %v623_v6 = vsel %vm617_vm11, %v610_v60, 920167782 }
  0xaa   : > { %v751_v22 = vand.u32 31, %v749_v19 }
  0xab   : > { %v10087_v3 = vor.u32 %v600_v57, %v599_v56 }
  0xac   : > { %v10131_v33 = vsub.s32 32, %v751_v22  ;;  %v763_v61 = vshll.u32 %v16220_v42, %v751_v22 }
  0xae   : > { %v767_v56 = vshrl.u32 %v16222_v38, %v10131_v33  ;;  %v758_v5 = vshrl.u32 %v16211_v49, %v10131_v33  ;;  %v761_v7 = vshrl.u32 %v16220_v42, %v10131_v33 }
  0xb0   : > { %8919 = vperm.xlu2 %9609, %v8864_v0   ;;  %8916 = vperm.xlu1 %9608, %v8863_v1   ;;  %v482_v0 = vadd.s32 8, %v10006_v52  ;;  %v10083_v1 = vor.u32 %v603_v50, %v602_v48  ;;  %v10140_v50 = vshrl.u32 %v749_v19, 5 }
  0xb1   : > { %8913 = vperm.xlu0 %9607, %v8862_v2   ;;  %v10085_v2 = vor.u32 %v606_v54, %v605_v53  ;;  %v757_v53 = vshll.u32 %v16213_v46, %v751_v22  ;;  %v766_v54 = vshll.u32 %v16218_v36, %v751_v22 }
  0xb2   : > { %v622_v11 = vsel %vm614_vm12, %v10087_v3, %v10083_v1  ;;  %vm772_vm2 = vcmp.lt.s32.totalorder %v10140_v50, 4  ;;  %vm769_vm5 = vcmp.lt.s32.totalorder %v10140_v50, 1  ;;  %vm771_vm6 = vcmp.lt.s32.totalorder %v10140_v50, 3 }
  0xb3   : > { %v624_v12 = vsel %vm616_vm13, %v10085_v2, %v623_v6  ;;  %v760_v6 = vshll.u32 %v16211_v49, %v751_v22  ;;  %vm770_vm7 = vcmp.lt.s32.totalorder %v10140_v50, 2  ;;  %v491_v50 = vadd.s32 80, %v10006_v52 }
  0xb8   : > { %8928 = vperm.xlu2 %9609, %v8867_v8   ;;  %8925 = vperm.xlu1 %9608, %v8866_v9   ;;  %v10096_v8 = vadd.s32 %v10003_v51, %v482_v0  ;;  %v626_v9 = vsel %vm614_vm12, %v10083_v1, %v10085_v2  ;;  %v764_v0 = vshrl.u32 %v16218_v36, %v10131_v33 }
  0xb9   : > { %8922 = vperm.xlu0 %9607, %v8865_v10   ;;  %v628_v10 = vsel %vm616_vm13, %v610_v60, %v627_v4 }
  0xba   : > { %v629_v14 = vsel %vm615_vm14, %v626_v9, %v628_v10  ;;  %v509_v15 = vcvt.s32.f32 %v10096_v8 }
  0xbc   : > { %v10123_v21 = vmul.f32 %v10022_v62, %v509_v15 }
  0xbe   : > { %16533 = vst [vmem:[#allocation16_spill] sm:$0xff] %v10123_v21  ;;  %v895_v30 = vand.u32 2139095040, %v10123_v21 }
  0xc0   : > { %8937 = vperm.xlu2 %9609, %v8870_v16   ;;  %8934 = vperm.xlu1 %9608, %v8869_v17   ;;  %v625_v16 = vsel %vm615_vm14, %v622_v11, %v624_v12  ;;  %v631_v17 = vand.u32 65535, %v10112_v13  ;;  %v896_v48 = vshrl.u32 %v895_v30, 23  ;;  %v744_v11 = vand.u32 8388607, %v16207_v45 }
  0xc1   : > { %8931 = vperm.xlu0 %9607, %v8868_v18   ;;  %v634_v18 = vshrl.u32 %v629_v14, 16  ;;  %v656_v20 = vshrl.u32 %v625_v16, 16  ;;  %v655_v27 = vand.u32 65535, %v625_v16  ;;  %v768_v12 = vor.u32 %v767_v56, %v766_v54 }
  0xc2   : > { %v754_v16 = vshll.u32 %v16216_v55, %v751_v22 }
  0xc3   : > { %v10128_v29 = vmul.u32 %v656_v20, %v631_v17  ;;  %v657_v43 = vmul.u32 %v655_v27, %v631_v17  ;;  %v782_v22 = vsel %vm772_vm2, %v768_v12, 1326507024 }
  0xc5   : > { %v661_v44 = vshll.u32 %v10128_v29, 16 }
  0xc7   : > { %vm665_vm1 = vc.u32 %v657_v43, %v661_v44  ;;  %v667_v60 = vadd.s32 %v661_v44, %v657_v43 }
  0xc8   : > { %8946 = vperm.xlu2 %9609, %v8873_v24   ;;  %8943 = vperm.xlu1 %9608, %v8872_v25   ;;  %v632_v24 = vshrl.u32 %v10112_v13, 16  ;;  %v633_v25 = vand.u32 65535, %v629_v14  ;;  %v666_v14 = vsel %vm665_vm1, 1, %v16224_v28 }
  0xc9   : > { %8940 = vperm.xlu0 %9607, %v8871_v26   ;;  %v10126_v26 = vmul.u32 %v634_v18, %v631_v17 }
  0xca   : > { %v10136_v39 = vmul.u32 %v655_v27, %v632_v24  ;;  %v638_v4 = vmul.u32 %v634_v18, %v632_v24  ;;  %v660_v10 = vmul.u32 %v656_v20, %v632_v24  ;;  %v765_v18 = vor.u32 %v764_v0, %v763_v61 }
  0xcb   : > { %v639_v37 = vshll.u32 %v10126_v26, 16  ;;  %v10166_v20 = vor.u32 %v761_v7, %v760_v6  ;;  %v640_v56 = vshrl.u32 %v10126_v26, 16  ;;  %v598_v26 = vshrl.u32 %v16216_v55, %v10056_v32 }
  0xcc   : > { %v663_v59 = vshll.u32 %v10136_v39, 16  ;;  %v668_v27 = vadd.s32 %v666_v14, %v660_v10  ;;  %v778_v44 = vsel %vm772_vm2, %v765_v18, 920167782 }
  0xcd   : > { %v618_v32 = vsel %vm614_vm12, %v598_v26, %v10087_v3 }
  0xce   : > { %vm669_vm4 = vc.u32 %v667_v60, %v663_v59 }
  0xd0   : > { %8952 = vperm.xlu1 %9608, %v8875_v34   ;;  %v635_v34 = vmul.u32 %v633_v25, %v631_v17  ;;  %v755_v17 = vshrl.u32 %v16213_v46, %v10131_v33 }
  0xd1   : > { %8949 = vperm.xlu0 %9607, %v8874_v35   ;;  %v10133_v35 = vmul.u32 %v633_v25, %v632_v24  ;;  %v10164_v25 = vor.u32 %v758_v5, %v757_v53  ;;  %v9302_v24 = vadd.s32 4294967169, %v896_v48  ;;  %v783_v53 = vsel %vm771_vm6, %v765_v18, %v782_v22 }
  0xd2   : > { %vm643_vm0 = vc.u32 %v635_v34, %v639_v37  ;;  %v645_v58 = vadd.s32 %v639_v37, %v635_v34  ;;  %v670_v34 = vsel %vm669_vm4, 1, %v16224_v28  ;;  %v745_v37 = vor.u32 8388608, %v744_v11 }
  0xd3   : > { %v641_v57 = vshll.u32 %v10133_v35, 16  ;;  %v644_v9 = vsel %vm643_vm0, 1, %v16224_v28  ;;  %v10174_v43 = vor.u32 %v755_v17, %v754_v16  ;;  %v781_v48 = vsel %vm769_vm5, %v10164_v25, %v10166_v20 }
  0xd4   : > { %v646_v19 = vadd.s32 %v644_v9, %v638_v4  ;;  %v902_v54 = vadd.s32 1, %v9302_v24  ;;  %v672_v61 = vadd.s32 %v670_v34, %v668_v27  ;;  %v779_v4 = vsel %vm771_vm6, %v10166_v20, %v778_v44 }
  0xd5   : > { %vm647_vm3 = vc.u32 %v645_v58, %v641_v57  ;;  %v662_v58 = vshrl.u32 %v10128_v29, 16  ;;  %v777_v0 = vsel %vm769_vm5, %v10174_v43, %v10164_v25  ;;  %v10194_v5 = vshll.u32 %v745_v37, 8 }
  0xd6   : > { %v648_v30 = vsel %vm647_vm3, 1, %v16224_v28  ;;  %v784_v6 = vsel %vm770_vm7, %v781_v48, %v783_v53  ;;  %v642_v29 = vshrl.u32 %v10133_v35, 16  ;;  %vm903_vm8 = vcmp.gt.s32.totalorder %v902_v54, 0 }
  0xd7   : > { %v650_v57 = vadd.s32 %v648_v30, %v646_v19  ;;  %v664_v9 = vshrl.u32 %v10136_v39, 16  ;;  %v673_v10 = vadd.s32 %v672_v61, %v662_v58  ;;  %v780_v11 = vsel %vm770_vm7, %v777_v0, %v779_v4 }
  0xd8   : > { %v786_v12 = vand.u32 65535, %v10194_v5  ;;  %v789_v14 = vshrl.u32 %v784_v6, 16  ;;  %v619_v16 = vsel %vm617_vm11, %v10085_v2, 2102212464  ;;  %v904_v17 = vsel %vm903_vm8, %v902_v54, 0 }
  0xd9   : > { %v651_v7 = vadd.s32 %v650_v57, %v640_v56  ;;  %v10211_v35 = vadd.s32 %v667_v60, %v663_v59  ;;  %v811_v18 = vshrl.u32 %v780_v11, 16  ;;  %v674_v19 = vadd.s32 %v673_v10, %v664_v9 }
  0xda   : > { %v787_v24 = vshrl.u32 %v10194_v5, 16  ;;  %v788_v27 = vand.u32 65535, %v784_v6  ;;  %v620_v22 = vsel %vm616_vm13, %v10083_v1, %v619_v16  ;;  %v10219_v30 = vmul.u32 %v789_v14, %v786_v12 }
  0xdb   : > { %v10213_v39 = vadd.s32 %v651_v7, %v642_v29  ;;  %v810_v2 = vand.u32 65535, %v780_v11  ;;  %v906_v34 = vand.u32 31, %v904_v17  ;;  %v10221_v37 = vmul.u32 %v811_v18, %v786_v12 }
  0xdc   : > { %v621_v3 = vsel %vm615_vm14, %v618_v32, %v620_v22  ;;  %v678_v59 = vadd.s32 1, %v674_v19  ;;  %v10227_v60 = vmul.u32 %v788_v27, %v787_v24  ;;  %v790_v44 = vmul.u32 %v788_v27, %v786_v12 }
  0xdd   : > { %vm677_vm9 = vc.u32 %v10213_v39, %v10211_v35  ;;  %v794_v48 = vshll.u32 %v10219_v30, 16  ;;  %v10230_v53 = vmul.u32 %v810_v2, %v787_v24  ;;  %v10232_v1 = vsub.s32 32, %v906_v34 }
  0xde   : > { %v10237_v54 = vmul.f32 %v10046_v23, %v509_v15  ;;  %v812_v41 = vmul.u32 %v810_v2, %v786_v12  ;;  %v816_v56 = vshll.u32 %v10221_v37, 16  ;;  %v675_v57 = vmul.u32 %v10112_v13, %v621_v3 }
  0xdf   : > { %v679_v58 = vsel %vm677_vm9, %v678_v59, %v674_v19  ;;  %v796_v61 = vshll.u32 %v10227_v60, 16  ;;  %v16206_v0 = vand.u32 2147483647, %v10123_v21  ;;  %vm10243_vm10 = vc.u32 %v790_v44, %v794_v48 }
  0xe0   : > { %16534 = vst [vmem:[#allocation17_spill] sm:$0xff] %v10237_v54  ;;  %v818_v6 = vshll.u32 %v10230_v53, 16  ;;  %v918_v8 = vshll.u32 %v16220_v42, %v906_v34  ;;  %v919_v15 = vshrl.u32 %v16218_v36, %v10232_v1  ;;  %v800_v26 = vadd.s32 %v794_v48, %v790_v44 }
  0xe1   : > { %v10251_v29 = vshrl.u32 %v904_v17, 5  ;;  %v921_v13 = vshll.u32 %v16218_v36, %v906_v34  ;;  %v922_v7 = vshrl.u32 %v16222_v38, %v10232_v1  ;;  %vm820_vm11 = vc.u32 %v812_v41, %v816_v56 }
  0xe2   : > { %v10256_v9 = vadd.s32 %v816_v56, %v812_v41  ;;  %v909_v10 = vshll.u32 %v16216_v55, %v906_v34  ;;  %v912_v11 = vshll.u32 %v16213_v46, %v906_v34  ;;  %v910_v12 = vshrl.u32 %v16213_v46, %v10232_v1 }
  0xe3   : > { %v913_v16 = vshrl.u32 %v16211_v49, %v10232_v1  ;;  %v915_v17 = vshll.u32 %v16211_v49, %v906_v34  ;;  %v916_v32 = vshrl.u32 %v16220_v42, %v10232_v1  ;;  %v815_v19 = vmul.u32 %v811_v18, %v787_v24 }
  0xe4   : > { %v899_v27 = vand.u32 8388607, %v16206_v0  ;;  %v920_v22 = vor.u32 %v919_v15, %v918_v8  ;;  %v793_v2 = vmul.u32 %v789_v14, %v787_v24  ;;  %v821_v3 = vsel %vm820_vm11, 1, %v16224_v28 }
  0xe5   : > { %v923_v59 = vor.u32 %v922_v7, %v921_v13  ;;  %vm927_vm12 = vcmp.lt.s32.totalorder %v10251_v29, 4  ;;  %v10271_v44 = vadd.s32 %v679_v58, %v675_v57  ;;  %v799_v34 = vsel %vm10243_vm10, 1, %v16224_v28 }
  0xe6   : > { %vm802_vm13 = vc.u32 %v800_v26, %v796_v61  ;;  %vm824_vm14 = vc.u32 %v10256_v9, %v818_v6  ;;  %v10279_v18 = vor.u32 %v910_v12, %v909_v10  ;;  %v10281_v48 = vor.u32 %v913_v16, %v912_v11 }
  0xe7   : > { %v10283_v14 = vor.u32 %v916_v32, %v915_v17  ;;  %v1050_v24 = vand.u32 2139095040, %v10237_v54  ;;  %v823_v41 = vadd.s32 %v821_v3, %v815_v19  ;;  %vm924_vm15 = vcmp.lt.s32.totalorder %v10251_v29, 1 }
  0xe8   : > { %vm926_vm0 = vcmp.lt.s32.totalorder %v10251_v29, 3  ;;  %v933_v56 = vsel %vm927_vm12, %v920_v22, 920167782  ;;  %v801_v57 = vadd.s32 %v799_v34, %v793_v2  ;;  %v825_v58 = vsel %vm824_vm14, 1, %v16224_v28 }
  0xe9   : > { %v900_v61 = vor.u32 8388608, %v899_v27  ;;  %v937_v4 = vsel %vm927_vm12, %v923_v59, 1326507024  ;;  %v681_v8 = vadd.s32 536870912, %v10271_v44  ;;  %v803_v15 = vsel %vm802_vm13, 1, %v16224_v28 }
  0xea   : > { %vm925_vm1 = vcmp.lt.s32.totalorder %v10251_v29, 2  ;;  %v932_v26 = vsel %vm924_vm15, %v10279_v18, %v10281_v48  ;;  %v934_v13 = vsel %vm926_vm0, %v10283_v14, %v933_v56  ;;  %v1051_v7 = vshrl.u32 %v1050_v24, 23 }
  0xeb   : > { %v817_v10 = vshrl.u32 %v10221_v37, 16  ;;  %v827_v11 = vadd.s32 %v825_v58, %v823_v41  ;;  %v936_v12 = vsel %vm924_vm15, %v10281_v48, %v10283_v14  ;;  %v938_v16 = vsel %vm926_vm0, %v920_v22, %v937_v4 }
  0xec   : > { %v795_v17 = vshrl.u32 %v10219_v30, 16  ;;  %v805_v32 = vadd.s32 %v803_v15, %v801_v57  ;;  %v10311_v19 = vshll.u32 %v900_v61, 8  ;;  %v483_v27 = vadd.s32 16, %v10006_v52 }
  0xed   : > { %v484_v2 = vadd.s32 24, %v10006_v52  ;;  %v485_v37 = vadd.s32 32, %v10006_v52  ;;  %v10318_v3 = vsel %vm925_vm1, %v932_v26, %v934_v13  ;;  %v486_v59 = vadd.s32 40, %v10006_v52 }
  0xee   : > { %v753_v22 = vshrl.u32 %v16216_v55, %v10131_v33  ;;  %v10325_v30 = vsel %vm925_vm1, %v936_v12, %v938_v16  ;;  %v9305_v34 = vadd.s32 4294967169, %v1051_v7  ;;  %v10327_v24 = vshrl.u32 %v681_v8, 30 }
  0xef   : > { %v774_v41 = vsel %vm772_vm2, %v10166_v20, 2102212464  ;;  %v819_v56 = vshrl.u32 %v10230_v53, 16  ;;  %v828_v57 = vadd.s32 %v827_v11, %v817_v10  ;;  %v797_v58 = vshrl.u32 %v10227_v60, 16 }
  0xf0   : > { %16537 = vst [vmem:[#allocation18_spill] sm:$0xff] %v10327_v24  ;;  %v806_v61 = vadd.s32 %v805_v32, %v795_v17  ;;  %v941_v4 = vand.u32 65535, %v10311_v19  ;;  %v966_v33 = vshrl.u32 %v10318_v3, 16  ;;  %v487_v15 = vadd.s32 48, %v10006_v52 }
  0xf1   : > { %v488_v26 = vadd.s32 56, %v10006_v52  ;;  %v10339_v8 = vadd.s32 %v10003_v51, %v483_v27  ;;  %v944_v13 = vshrl.u32 %v10325_v30, 16  ;;  %v489_v20 = vadd.s32 64, %v10006_v52 }
  0xf2   : > { %v492_v7 = vadd.s32 88, %v10006_v52  ;;  %v773_v60 = vsel %vm769_vm5, %v753_v22, %v10174_v43  ;;  %v1057_v10 = vadd.s32 1, %v9305_v34  ;;  %v683_v11 = vshll.u32 %v10327_v24, 30 }
  0xf3   : > { %v775_v12 = vsel %vm771_vm6, %v10164_v25, %v774_v41  ;;  %v10354_v16 = vadd.s32 %v10256_v9, %v818_v6  ;;  %v829_v17 = vadd.s32 %v828_v57, %v819_v56  ;;  %v10356_v32 = vadd.s32 %v806_v61, %v797_v58 }
  0xf4   : > { %v942_v27 = vshrl.u32 %v10311_v19, 16  ;;  %v965_v0 = vand.u32 65535, %v10318_v3  ;;  %v10360_v43 = vmul.u32 %v966_v33, %v941_v4  ;;  %v10363_v22 = vadd.s32 %v10003_v51, %v484_v2 }
  0xf5   : > { %16538 = vst [vmem:[#allocation19_spill] sm:$0xff] %v10354_v16  ;;  %v16210_v34 = vcvt.s32.f32 %v10339_v8  ;;  %v943_v25 = vand.u32 65535, %v10325_v30  ;;  %v10367_v53 = vmul.u32 %v944_v13, %v941_v4  ;;  %v10370_v6 = vadd.s32 %v10003_v51, %v485_v37 }
  0xf6   : > { %16539 = vst [vmem:[#allocation20_spill] sm:$0xff] %v10356_v32  ;;  %v10373_v9 = vadd.s32 %v10003_v51, %v486_v59  ;;  %v10376_v41 = vadd.s32 %v10003_v51, %v487_v15  ;;  %vm1058_vm2 = vcmp.gt.s32.totalorder %v1057_v10, 0  ;;  %v490_v3 = vadd.s32 72, %v10006_v52 }
  0xf7   : > { %v10380_v2 = vsub.s32 %v10271_v44, %v683_v11  ;;  %v776_v30 = vsel %vm770_vm7, %v773_v60, %v775_v12  ;;  %v833_v56 = vadd.s32 1, %v829_v17  ;;  %vm832_vm3 = vc.u32 %v10356_v32, %v10354_v16 }
  0xf8   : > { %v967_v37 = vmul.u32 %v965_v0, %v941_v4  ;;  %v10386_v57 = vmul.u32 %v965_v0, %v942_v27  ;;  %v971_v59 = vshll.u32 %v10360_v43, 16  ;;  %v10392_v58 = vmul.f32 %v10022_v62, %v16210_v34 }
  0xf9   : > { %v945_v61 = vmul.u32 %v943_v25, %v941_v4  ;;  %v949_v44 = vshll.u32 %v10367_v53, 16  ;;  %v1059_v15 = vsel %vm1058_vm2, %v1057_v10, 0  ;;  %v10397_v60 = vadd.s32 %v10003_v51, %v488_v26 }
  0xfa   : > { %16540 = vst [vmem:[#allocation21_spill] sm:$0xff] %v10392_v58  ;;  %v10400_v11 = vadd.s32 %v10003_v51, %v489_v20  ;;  %v10402_v0 = vmul.u32 %v943_v25, %v942_v27  ;;  %v10405_v12 = vadd.s32 %v10003_v51, %v492_v7  ;;  %v686_v45 = vsub.s32 0, %v10380_v2 }
  0xfb   : > { %16541 = vst [vmem:[#allocation22_spill] sm:$0xff] %v10397_v60  ;;  %v830_v4 = vmul.u32 %v10194_v5, %v776_v30  ;;  %v834_v47 = vsel %vm832_vm3, %v833_v56, %v829_v17  ;;  %v16215_v10 = vshll.u32 %v10386_v57, 16  ;;  %vm975_vm4 = vc.u32 %v967_v37, %v971_v59 }
  0xfc   : > { %16542 = vst [vmem:[#allocation23_spill] sm:$0xff] %v10400_v11  ;;  %v10410_v40 = vadd.s32 %v971_v59, %v967_v37  ;;  %v1061_v26 = vand.u32 31, %v1059_v15  ;;  %v10413_v34 = vadd.s32 %v10003_v51, %v490_v3  ;;  %vm685_vm5 = vcmp.lt.s32.totalorder %v10380_v2, 0 }
  0xfd   : > { %vm953_vm6 = vc.u32 %v945_v61, %v949_v44  ;;  %v1205_v20 = vand.u32 2139095040, %v10392_v58  ;;  %v10418_v7 = vadd.s32 %v10003_v51, %v491_v50  ;;  %v951_v5 = vshll.u32 %v10402_v0, 16 }
  0xfe   : > { %v955_v17 = vadd.s32 %v949_v44, %v945_v61  ;;  %v970_v25 = vmul.u32 %v966_v33, %v942_v27  ;;  %v10422_v56 = vadd.s32 %v834_v47, %v830_v4  ;;  %v948_v37 = vmul.u32 %v944_v13, %v942_v27 }
  0xff   : > { %v976_v3 = vsel %vm975_vm4, 1, %v16224_v28  ;;  %v687_v59 = vsel %vm685_vm5, %v686_v45, %v10380_v2  ;;  %v954_v49 = vsel %vm953_vm6, 1, %v16224_v28  ;;  %vm979_vm7 = vc.u32 %v10410_v40, %v16215_v10 }
 0x100   : > { %v10430_v50 = vsub.s32 32, %v1061_v26  ;;  %v493_v61 = vadd.s32 96, %v10006_v52  ;;  %v1206_v44 = vshrl.u32 %v1205_v20, 23  ;;  %vm957_vm8 = vc.u32 %v955_v17, %v951_v5 }
 0x101   : > { %v978_v45 = vadd.s32 %v976_v3, %v970_v25  ;;  %v688_v4 = vclz %v687_v59  ;;  %v836_v30 = vadd.s32 536870912, %v10422_v56  ;;  %v956_v46 = vadd.s32 %v954_v49, %v948_v37 }
 0x102   : > { %v980_v10 = vsel %vm979_vm7, 1, %v16224_v28  ;;  %v1073_v55 = vshll.u32 %v16220_v42, %v1061_v26  ;;  %v1074_v52 = vshrl.u32 %v16218_v36, %v10430_v50  ;;  %v1076_v47 = vshll.u32 %v16218_v36, %v1061_v26 }
 0x103   : > { %v1077_v20 = vshrl.u32 %v16222_v38, %v10430_v50  ;;  %v958_v27 = vsel %vm957_vm8, 1, %v16224_v28  ;;  %v10447_v17 = vshrl.u32 %v1059_v15, 5  ;;  %v9308_v25 = vadd.s32 4294967169, %v1206_v44 }
 0x104   : > { %v972_v49 = vshrl.u32 %v10360_v43, 16  ;;  %v982_v37 = vadd.s32 %v980_v10, %v978_v45  ;;  %v16543_v3 = vmov 683565275   ;;  %v16544_v13 = vmov 2475754826  }
 0x105   : > { %v1064_v59 = vshll.u32 %v16543_v3, %v1061_v26  ;;  %v1067_v33 = vshll.u32 %v16544_v13, %v1061_v26  ;;  %v1065_v36 = vshrl.u32 %v16544_v13, %v10430_v50  ;;  %v16545_v42 = vmov 2131351028  }
 0x106   : > { %v1068_v38 = vshrl.u32 %v16545_v42, %v10430_v50  ;;  %v1070_v28 = vshll.u32 %v16545_v42, %v1061_v26  ;;  %v16546_v5 = vmov 2102212464   ;;  %v950_v43 = vshrl.u32 %v10367_v53, 16 }
 0x107   : > { %v1071_v15 = vshrl.u32 %v16546_v5, %v10430_v50  ;;  %v1075_v10 = vor.u32 %v1074_v52, %v1073_v55  ;;  %v1078_v45 = vor.u32 %v1077_v20, %v1076_v47  ;;  %v960_v21 = vadd.s32 %v958_v27, %v956_v46 }
 0x108   : > { %v16547_v24 = vand.u32 2147483647, %v10237_v54  ;;  %vm1082_vm9 = vcmp.lt.s32.totalorder %v10447_v17, 4  ;;  %v1212_v63 = vadd.s32 1, %v9308_v25  ;;  %v9297_v16 = vadd.s32 4294967294, %v688_v4 }
 0x109   : > { %v10464_v32 = vshrl.u32 %v836_v30, 30  ;;  %v908_v26 = vshrl.u32 %v16543_v3, %v10232_v1  ;;  %v974_v60 = vshrl.u32 %v10386_v57, 16  ;;  %v983_v44 = vadd.s32 %v982_v37, %v972_v49 }
 0x10a   : > { %v1054_v31 = vand.u32 8388607, %v16547_v24  ;;  %v10469_v11 = vor.u32 %v1065_v36, %v1064_v59  ;;  %v10471_v55 = vor.u32 %v1068_v38, %v1067_v33  ;;  %v10473_v46 = vor.u32 %v1071_v15, %v1070_v28 }
 0x10b   : > { %16548 = vst [vmem:[#allocation24_spill] sm:$0xff] %v10464_v32  ;;  %vm1079_vm10 = vcmp.lt.s32.totalorder %v10447_v17, 1  ;;  %vm1081_vm11 = vcmp.lt.s32.totalorder %v10447_v17, 3  ;;  %v1088_v24 = vsel %vm1082_vm9, %v1075_v10, 920167782  ;;  %v952_v1 = vshrl.u32 %v10402_v0, 16 }
 0x10c   : > { %v1092_v53 = vsel %vm1082_vm9, %v1078_v45, 1326507024  ;;  %v961_v30 = vadd.s32 %v960_v21, %v950_v43  ;;  %v1055_v47 = vor.u32 8388608, %v1054_v31  ;;  %vm1213_vm13 = vcmp.gt.s32.totalorder %v1212_v63, 0 }
 0x10d   : > { %v10483_v36 = vadd.s32 %v10003_v51, %v493_v61  ;;  %v838_v28 = vshll.u32 %v10464_v32, 30  ;;  %v929_v38 = vsel %vm927_vm12, %v10283_v14, 2102212464  ;;  %vm1080_vm14 = vcmp.lt.s32.totalorder %v10447_v17, 2 }
 0x10e   : > { %v1087_v33 = vsel %vm1079_vm10, %v10469_v11, %v10471_v55  ;;  %v1089_v31 = vsel %vm1081_vm11, %v10473_v46, %v1088_v24  ;;  %v1091_v51 = vsel %vm1079_vm10, %v10471_v55, %v10473_v46  ;;  %v1093_v21 = vsel %vm1081_vm11, %v1075_v10, %v1092_v53 }
 0x10f   : > { %vm9298_vm12 = vcmp.lt.s32.totalorder %v9297_v16, 0  ;;  %v928_v14 = vsel %vm924_vm15, %v908_v26, %v10279_v18  ;;  %v984_v0 = vadd.s32 %v983_v44, %v974_v60  ;;  %v1214_v61 = vsel %vm1213_vm13, %v1212_v63, 0 }
 0x110   : > { %v930_v27 = vsel %vm926_vm0, %v10281_v48, %v929_v38  ;;  %v10509_v4 = vadd.s32 %v961_v30, %v952_v1  ;;  %v16549_v52 = vshll.u32 %v10386_v57, 16  ;;  %v10516_v25 = vshll.u32 %v1055_v47, 8 }
 0x111   : > { %v10520_v37 = vsub.s32 %v10422_v56, %v838_v28  ;;  %v1090_v63 = vsel %vm1080_vm14, %v1087_v33, %v1089_v31  ;;  %v10526_v18 = vsel %vm1080_vm14, %v1091_v51, %v1093_v21  ;;  %v1216_v60 = vand.u32 31, %v1214_v61 }
 0x112   : > { %v10514_v20 = vadd.s32 %v10410_v40, %v16549_v52  ;;  %v10530_v40 = vsel %vm9298_vm12, 0, %v9297_v16  ;;  %v16551_v15 = vcvt.s32.f32 %v10339_v8  ;;  %v931_v44 = vsel %vm925_vm1, %v928_v14, %v930_v27 }
 0x113   : > { %v988_v43 = vadd.s32 1, %v984_v0  ;;  %v1096_v10 = vand.u32 65535, %v10516_v25  ;;  %v1099_v16 = vshrl.u32 %v10526_v18, 16  ;;  %v1121_v45 = vshrl.u32 %v1090_v63, 16 }
 0x114   : > { %16550 = vst [vmem:[#allocation25_spill] sm:$0xff] %v10514_v20  ;;  %v10536_v56 = vmul.f32 %v10046_v23, %v16551_v15  ;;  %vm987_vm15 = vc.u32 %v10509_v4, %v10514_v20  ;;  %v16553_v26 = vcvt.s32.f32 %v10363_v22  ;;  %v696_v29 = vsub.s32 4294967266, %v10530_v40 }
 0x115   : > { %v841_v1 = vsub.s32 0, %v10520_v37  ;;  %v16557_v30 = vcvt.s32.f32 %v10370_v6  ;;  %vm840_vm0 = vcmp.lt.s32.totalorder %v10520_v37, 0  ;;  %v985_v28 = vmul.u32 %v10311_v19, %v931_v44 }
 0x116   : > { %16552 = vst [vmem:[#allocation26_spill] sm:$0xff] %v10536_v56  ;;  %v10547_v24 = vmul.f32 %v10022_v62, %v16553_v26  ;;  %v16555_v8 = vmov %v16553_v26  ;;  %v10563_v38 = vsub.s32 32, %v1216_v60  ;;  %v989_v31 = vsel %vm987_vm15, %v988_v43, %v984_v0 }
 0x117   : > { %v10552_v53 = vmul.f32 %v10046_v23, %v16555_v8  ;;  %v10559_v47 = vmul.f32 %v10022_v62, %v16557_v30  ;;  %v16559_v22 = vmov %v16557_v30  ;;  %v1097_v51 = vshrl.u32 %v10516_v25, 16 }
 0x118   : > { %16554 = vst [vmem:[#allocation27_spill] sm:$0xff] %v10547_v24  ;;  %v10568_v33 = vmul.f32 %v10046_v23, %v16559_v22  ;;  %v1120_v21 = vand.u32 65535, %v1090_v63  ;;  %v10573_v14 = vadd.s32 %v10211_v35, %v10213_v39  ;;  %v1098_v27 = vand.u32 65535, %v10526_v18 }
 0x119   : > { %16556 = vst [vmem:[#allocation28_spill] sm:$0xff] %v10552_v53  ;;  %v10576_v52 = vmul.u32 %v1099_v16, %v1096_v10  ;;  %v10578_v19 = vmul.u32 %v1121_v45, %v1096_v10  ;;  %v692_v15 = vsub.s32 32, %v10530_v40  ;;  %v10581_v6 = vadd.s32 127, %v696_v29 }
 0x11a   : > { %16558 = vst [vmem:[#allocation29_spill] sm:$0xff] %v10559_v47  ;;  %v10584_v44 = vsel %vm840_vm0, %v841_v1, %v10520_v37  ;;  %v16249_v0 = vand.u32 2147483647, %v10392_v58  ;;  %v10587_v63 = vadd.s32 %v989_v31, %v985_v28  ;;  %v10589_v43 = vshrl.u32 %v1214_v61, 5 }
 0x11b   : > { %16560 = vst [vmem:[#allocation30_spill] sm:$0xff] %v10568_v33  ;;  %v16561_v35 = vmov 920167782   ;;  %v16562_v18 = vmov 1326507024   ;;  %v1122_v8 = vmul.u32 %v1120_v21, %v1096_v10  ;;  %v10594_v30 = vmul.u32 %v1120_v21, %v1097_v51 }
 0x11c   : > { %v1231_v39 = vshll.u32 %v16561_v35, %v1216_v60  ;;  %v1232_v26 = vshrl.u32 %v16562_v18, %v10563_v38  ;;  %v1228_v29 = vshll.u32 %v16546_v5, %v1216_v60  ;;  %v1229_v1 = vshrl.u32 %v16561_v35, %v10563_v38 }
 0x11d   : > { %v1100_v22 = vmul.u32 %v1098_v27, %v1096_v10  ;;  %v10599_v59 = vmul.u32 %v1098_v27, %v1097_v51  ;;  %v1104_v28 = vshll.u32 %v10576_v52, 16  ;;  %v1126_v61 = vshll.u32 %v10578_v19, 16 }
 0x11e   : > { %v1222_v31 = vshll.u32 %v16544_v13, %v1216_v60  ;;  %v1223_v57 = vshrl.u32 %v16545_v42, %v10563_v38  ;;  %v1225_v21 = vshll.u32 %v16545_v42, %v1216_v60  ;;  %v1226_v48 = vshrl.u32 %v16546_v5, %v10563_v38 }
 0x11f   : > { %v1209_v49 = vand.u32 8388607, %v16249_v0  ;;  %v1219_v10 = vshll.u32 %v16543_v3, %v1216_v60  ;;  %v1220_v27 = vshrl.u32 %v16544_v13, %v10563_v38  ;;  %v1233_v33 = vor.u32 %v1232_v26, %v1231_v39 }
 0x120   : > { %v991_v47 = vadd.s32 536870912, %v10587_v63  ;;  %v1125_v54 = vmul.u32 %v1121_v45, %v1097_v51  ;;  %v1230_v53 = vor.u32 %v1229_v1, %v1228_v29  ;;  %vm1237_vm1 = vcmp.lt.s32.totalorder %v10589_v43, 4 }
 0x121   : > { %v1106_v32 = vshll.u32 %v10599_v59, 16  ;;  %v1128_v24 = vshll.u32 %v10594_v30, 16  ;;  %vm1130_vm2 = vc.u32 %v1122_v8, %v1126_v61  ;;  %v10618_v20 = vadd.s32 %v1126_v61, %v1122_v8 }
 0x122   : > { %vm1108_vm3 = vc.u32 %v1100_v22, %v1104_v28  ;;  %v1110_v0 = vadd.s32 %v1104_v28, %v1100_v22  ;;  %v10620_v60 = vor.u32 %v1223_v57, %v1222_v31  ;;  %v10622_v58 = vor.u32 %v1226_v48, %v1225_v21 }
 0x123   : > { %v10624_v39 = vor.u32 %v1220_v27, %v1219_v10  ;;  %vm1234_vm4 = vcmp.lt.s32.totalorder %v10589_v43, 1  ;;  %vm1236_vm5 = vcmp.lt.s32.totalorder %v10589_v43, 3  ;;  %v1247_v45 = vsel %vm1237_vm1, %v1233_v33, 1326507024 }
 0x124   : > { %v1103_v26 = vmul.u32 %v1099_v16, %v1097_v51  ;;  %v16563_v29 = vmov 0   ;;  %v1210_v8 = vor.u32 8388608, %v1209_v49  ;;  %v1243_v22 = vsel %vm1237_vm1, %v1230_v53, 920167782 }
 0x125   : > { %v1131_v1 = vsel %vm1130_vm2, 1, %v16563_v29  ;;  %v843_v57 = vclz %v10584_v44  ;;  %v10634_v48 = vshrl.u32 %v991_v47, 30  ;;  %v1109_v28 = vsel %vm1108_vm3, 1, %v16563_v29 }
 0x126   : > { %vm1134_vm6 = vc.u32 %v10618_v20, %v1128_v24  ;;  %vm1112_vm7 = vc.u32 %v1110_v0, %v1106_v32  ;;  %vm1235_vm8 = vcmp.lt.s32.totalorder %v10589_v43, 2  ;;  %v1246_v49 = vsel %vm1234_vm4, %v10620_v60, %v10622_v58 }
 0x127   : > { %v1248_v16 = vsel %vm1236_vm5, %v1230_v53, %v1247_v45  ;;  %v16564_v47 = vcvt.s32.f32 %v10373_v9  ;;  %v1133_v51 = vadd.s32 %v1131_v1, %v1125_v54  ;;  %v1242_v32 = vsel %vm1234_vm4, %v10624_v39, %v10620_v60 }
 0x128   : > { %v1244_v44 = vsel %vm1236_vm5, %v10622_v58, %v1243_v22  ;;  %v693_v0 = vshll.u32 %v10380_v2, %v10530_v40  ;;  %v1111_v61 = vadd.s32 %v1109_v28, %v1103_v26  ;;  %v1135_v53 = vsel %vm1134_vm6, 1, %v16563_v29 }
 0x129   : > { %v10650_v33 = vmul.f32 %v10022_v62, %v16564_v47  ;;  %v10662_v31 = vshll.u32 %v1210_v8, 8  ;;  %v694_v21 = vshrl.u32 %v10573_v14, %v692_v15  ;;  %v1113_v54 = vsel %vm1112_vm7, 1, %v16563_v29 }
 0x12a   : > { %v10668_v10 = vsel %vm1235_vm8, %v1246_v49, %v1248_v16  ;;  %v1360_v27 = vand.u32 2139095040, %v10536_v56  ;;  %v698_v45 = vshll.u32 %v10581_v6, 23  ;;  %v9300_v1 = vadd.s32 4294967294, %v843_v57 }
 0x12b   : > { %16565 = vst [vmem:[#allocation31_spill] sm:$0xff] %v10650_v33  ;;  %v993_v2 = vshll.u32 %v10634_v48, 30  ;;  %v10675_v40 = vsel %vm1235_vm8, %v1242_v32, %v1244_v44  ;;  %v16566_v26 = vmov %v16564_v47  ;;  %v16568_v15 = vcvt.s32.f32 %v10376_v41 }
 0x12c   : > { %v10680_v14 = vmul.f32 %v10046_v23, %v16566_v26  ;;  %v1127_v22 = vshrl.u32 %v10578_v19, 16  ;;  %v1137_v6 = vadd.s32 %v1135_v53, %v1133_v51  ;;  %v1105_v57 = vshrl.u32 %v10576_v52, 16 }
 0x12d   : > { %v10685_v8 = vmul.f32 %v10022_v62, %v16568_v15  ;;  %v1115_v28 = vadd.s32 %v1113_v54, %v1111_v61  ;;  %v1251_v49 = vand.u32 65535, %v10662_v31  ;;  %v1254_v16 = vshrl.u32 %v10668_v10, 16 }
 0x12e   : > { %16567 = vst [vmem:[#allocation32_spill] sm:$0xff] %v10680_v14  ;;  %v16570_v9 = vmov %v16568_v15  ;;  %v695_v32 = vor.u32 %v694_v21, %v693_v0  ;;  %v1276_v44 = vshrl.u32 %v10675_v40, 16  ;;  %v1361_v26 = vshrl.u32 %v1360_v27, 23 }
 0x12f   : > { %16569 = vst [vmem:[#allocation33_spill] sm:$0xff] %v10685_v8  ;;  %v10694_v47 = vmul.f32 %v10046_v23, %v16570_v9  ;;  %v699_v15 = vor.u32 4788187, %v698_v45  ;;  %vm9301_vm13 = vcmp.lt.s32.totalorder %v9300_v1, 0  ;;  %v10698_v19 = vsub.s32 %v10587_v63, %v993_v2 }
 0x130   : > { %v1063_v52 = vshrl.u32 %v16543_v3, %v10430_v50  ;;  %v1084_v51 = vsel %vm1082_vm9, %v10473_v46, 2102212464  ;;  %v1107_v41 = vshrl.u32 %v10599_v59, 16  ;;  %v1129_v61 = vshrl.u32 %v10594_v30, 16 }
 0x131   : > { %16571 = vst [vmem:[#allocation34_spill] sm:$0xff] %v10694_v47  ;;  %v1138_v0 = vadd.s32 %v1137_v6, %v1127_v22  ;;  %v1116_v53 = vadd.s32 %v1115_v28, %v1105_v57  ;;  %v1252_v21 = vshrl.u32 %v10662_v31, 16  ;;  %v1253_v54 = vand.u32 65535, %v10668_v10 }
 0x132   : > { %v10709_v27 = vmul.u32 %v1254_v16, %v1251_v49  ;;  %v702_v63 = vcvt.s32.f32 %v695_v32  ;;  %v1275_v45 = vand.u32 65535, %v10675_v40  ;;  %v10712_v50 = vmul.u32 %v1276_v44, %v1251_v49 }
 0x133   : > { %v9311_v2 = vadd.s32 4294967169, %v1361_v26  ;;  %v700_v9 = vand.u32 2147483647, %v699_v15  ;;  %v10715_v46 = vsel %vm9301_vm13, 0, %v9300_v1  ;;  %vm995_vm9 = vcmp.lt.s32.totalorder %v10698_v19, 0 }
 0x134   : > { %v996_v59 = vsub.s32 0, %v10698_v19  ;;  %v1083_v10 = vsel %vm1079_vm10, %v1063_v52, %v10469_v11  ;;  %v1085_v22 = vsel %vm1081_vm11, %v10471_v55, %v1084_v51  ;;  %v10728_v40 = vadd.s32 %v10618_v20, %v1128_v24  ;;  %v16572_v55 = vld [vmem:[#allocation22_spill] sm:$0xff] }
 0x135   : > { %v1139_v6 = vadd.s32 %v1138_v0, %v1129_v61  ;;  %v10730_v1 = vadd.s32 %v1116_v53, %v1107_v41  ;;  %v1255_v57 = vmul.u32 %v1253_v54, %v1251_v49  ;;  %v10732_v28 = vmul.u32 %v1253_v54, %v1252_v21  ;;  %v16577_v41 = vld [vmem:[#allocation23_spill] sm:$0xff] }
 0x136   : > { %v1259_v32 = vshll.u32 %v10709_v27, 16  ;;  %v1277_v26 = vmul.u32 %v1275_v45, %v1251_v49  ;;  %v10735_v15 = vmul.u32 %v1275_v45, %v1252_v21  ;;  %v1281_v11 = vshll.u32 %v10712_v50, 16 }
 0x137   : > { %v1367_v52 = vadd.s32 1, %v9311_v2  ;;  %v16573_v51 = vcvt.s32.f32 %v16572_v55  ;;  %v16578_v61 = vcvt.s32.f32 %v16577_v41  ;;  %v703_v49 = vmul.f32 %v702_v63, %v700_v9 }
 0x138   : > { %v851_v53 = vsub.s32 4294967266, %v10715_v46  ;;  %v997_v54 = vsel %vm995_vm9, %v996_v59, %v10698_v19  ;;  %v1086_v45 = vsel %vm1080_vm14, %v1083_v10, %v1085_v22  ;;  %v1143_v2 = vadd.s32 1, %v1139_v6 }
 0x139   : > { %v10741_v30 = vmul.f32 %v10022_v62, %v16573_v51  ;;  %v16575_v20 = vmov %v16573_v51  ;;  %v10751_v0 = vmul.f32 %v10022_v62, %v16578_v61  ;;  %vm1142_vm10 = vc.u32 %v10730_v1, %v10728_v40 }
 0x13a   : > { %v10746_v24 = vmul.f32 %v10046_v23, %v16575_v20  ;;  %v1261_v55 = vshll.u32 %v10732_v28, 16  ;;  %vm1263_vm11 = vc.u32 %v1255_v57, %v1259_v32  ;;  %v1265_v51 = vadd.s32 %v1259_v32, %v1255_v57  ;;  %v16584_v57 = vld [vmem:[#allocation20_spill] sm:$0xff]  ;;  %v16585_v32 = vld [vmem:[#allocation19_spill] sm:$0xff] }
 0x13b   : > { %16574 = vst [vmem:[#allocation22_spill] sm:$0xff] %v10741_v30  ;;  %vm1285_vm12 = vc.u32 %v1277_v26, %v1281_v11  ;;  %v10763_v63 = vadd.s32 %v1281_v11, %v1277_v26  ;;  %vm1368_vm15 = vcmp.gt.s32.totalorder %v1367_v52, 0  ;;  %v16580_v9 = vmov %v16578_v61 }
 0x13c   : > { %16576 = vst [vmem:[#allocation35_spill] sm:$0xff] %v10746_v24  ;;  %v10768_v59 = vmul.f32 %v10046_v23, %v16580_v9  ;;  %v16582_v17 = vcvt.s32.f32 %v10413_v34  ;;  %v998_v22 = vclz %v997_v54  ;;  %v1140_v61 = vmul.u32 %v10516_v25, %v1086_v45 }
 0x13d   : > { %16579 = vst [vmem:[#allocation23_spill] sm:$0xff] %v10751_v0  ;;  %v831_v20 = vadd.s32 %v16585_v32, %v16584_v57  ;;  %v1144_v0 = vsel %vm1142_vm10, %v1143_v2, %v1139_v6  ;;  %v1258_v26 = vmul.u32 %v1254_v16, %v1252_v21  ;;  %v1280_v11 = vmul.u32 %v1276_v44, %v1252_v21  ;;  %v16589_v16 = vld [vmem:[#allocation14_spill] sm:$0xff] }
 0x13e   : > { %16581 = vst [vmem:[#allocation36_spill] sm:$0xff] %v10768_v59  ;;  %v10773_v10 = vmul.f32 %v10022_v62, %v16582_v17  ;;  %v704_v24 = vxor.u32 2147483648, %v703_v49  ;;  %v1264_v41 = vsel %vm1263_vm11, 1, %v16563_v29  ;;  %v1286_v9 = vsel %vm1285_vm12, 1, %v16563_v29 }
 0x13f   : > { %v1369_v59 = vsel %vm1368_vm15, %v1367_v52, 0  ;;  %v847_v30 = vsub.s32 32, %v10715_v46  ;;  %v852_v47 = vadd.s32 127, %v851_v53  ;;  %vm1267_vm14 = vc.u32 %v1265_v51, %v1261_v55 }
 0x140   : > { %16583 = vst [vmem:[#allocation37_spill] sm:$0xff] %v10773_v10  ;;  %v16586_v54 = vshll.u32 %v10735_v15, 16  ;;  %v16587_v25 = vmov %v16582_v17  ;;  %vm584_vm2 = vcmp.lt.s32.totalorder %v16589_v16, 0  ;;  %v9303_v44 = vadd.s32 4294967294, %v998_v22 }
 0x141   : > { %v10787_v6 = vmul.f32 %v10046_v23, %v16587_v25  ;;  %v10790_v21 = vadd.s32 %v1144_v0, %v1140_v61  ;;  %v16590_v52 = vcvt.s32.f32 %v10418_v7  ;;  %v1266_v53 = vadd.s32 %v1264_v41, %v1258_v26 }
 0x142   : > { %vm1289_vm0 = vc.u32 %v10763_v63, %v16586_v54  ;;  %v1288_v2 = vadd.s32 %v1286_v9, %v1280_v11  ;;  %v1371_v55 = vand.u32 31, %v1369_v59  ;;  %v16594_v17 = vand.u32 2147483647, %v16589_v16 }
 0x143   : > { %16588 = vst [vmem:[#allocation20_spill] sm:$0xff] %v10787_v6  ;;  %v10795_v45 = vmul.f32 %v10022_v62, %v16590_v52  ;;  %v16592_v51 = vmov %v16590_v52  ;;  %v1268_v0 = vsel %vm1267_vm14, 1, %v16563_v29  ;;  %v1290_v22 = vsel %vm1289_vm0, 1, %v16563_v29 }
 0x144   : > { %v10800_v34 = vmul.f32 %v10046_v23, %v16592_v51  ;;  %vm10804_vm3 = vcmp.le.f32.partialorder %v16594_v17, 0.7853982  ;;  %v705_v61 = vsel %vm584_vm2, %v704_v24, %v703_v49  ;;  %v848_v32 = vshll.u32 %v10520_v37, %v10715_v46 }
 0x145   : > { %16591 = vst [vmem:[#allocation19_spill] sm:$0xff] %v10795_v45  ;;  %v849_v7 = vshrl.u32 %v831_v20, %v847_v30  ;;  %v853_v26 = vshll.u32 %v852_v47, 23  ;;  %v16597_v11 = vcvt.s32.f32 %v10405_v12  ;;  %vm9304_vm6 = vcmp.lt.s32.totalorder %v9303_v44, 0 }
 0x146   : > { %16593 = vst [vmem:[#allocation38_spill] sm:$0xff] %v10800_v34  ;;  %v1146_v9 = vadd.s32 536870912, %v10790_v21  ;;  %v1260_v54 = vshrl.u32 %v10709_v27, 16  ;;  %v1270_v25 = vadd.s32 %v1268_v0, %v1266_v53  ;;  %v1282_v52 = vshrl.u32 %v10712_v50, 16 }
 0x147   : > { %v10817_v41 = vmul.f32 %v10022_v62, %v16597_v11  ;;  %v1292_v51 = vadd.s32 %v1290_v22, %v1288_v2  ;;  %v10822_v24 = vsub.s32 32, %v1371_v55  ;;  %v16599_v37 = vmov %v16597_v11 }
 0x148   : > { %v10827_v47 = vmul.f32 %v10046_v23, %v16599_v37  ;;  %v16601_v46 = vcvt.s32.f32 %v10483_v36  ;;  %v10842_v50 = vsel %vm10804_vm3, %v16589_v16, %v705_v61  ;;  %v850_v20 = vor.u32 %v849_v7, %v848_v32 }
 0x149   : > { %16598 = vst [vmem:[#allocation39_spill] sm:$0xff] %v10817_v41  ;;  %v854_v12 = vor.u32 4788187, %v853_v26  ;;  %v10844_v53 = vsel %vm9304_vm6, 0, %v9303_v44  ;;  %v1218_v2 = vshrl.u32 %v16543_v3, %v10563_v38  ;;  %v10848_v17 = vshrl.u32 %v1146_v9, 30 }
 0x14a   : > { %16600 = vst [vmem:[#allocation40_spill] sm:$0xff] %v10827_v47  ;;  %v10832_v30 = vmul.f32 %v10022_v62, %v16601_v46  ;;  %v16603_v49 = vmov %v16601_v46  ;;  %v1239_v62 = vsel %vm1237_vm1, %v10622_v58, 2102212464  ;;  %v1284_v36 = vshrl.u32 %v10735_v15, 16 }
 0x14b   : > { %v10837_v27 = vmul.f32 %v10046_v23, %v16603_v49  ;;  %v1262_v23 = vshrl.u32 %v10732_v28, 16  ;;  %v1271_v0 = vadd.s32 %v1270_v25, %v1260_v54  ;;  %v1293_v22 = vadd.s32 %v1292_v51, %v1282_v52 }
 0x14c   : > { %16602 = vst [vmem:[#allocation41_spill] sm:$0xff] %v10832_v30  ;;  %v1383_v61 = vshll.u32 %v16546_v5, %v1371_v55  ;;  %v1384_v44 = vshrl.u32 %v16561_v35, %v10822_v24  ;;  %v16258_v32 = vand.u32 2147483647, %v10536_v56  ;;  %v10859_v38 = vshrl.u32 %v1369_v59, 5 }
 0x14d   : > { %16604 = vst [vmem:[#allocation42_spill] sm:$0xff] %v10837_v27  ;;  %v1386_v7 = vshll.u32 %v16561_v35, %v1371_v55  ;;  %v1387_v58 = vshrl.u32 %v16562_v18, %v10822_v24  ;;  %v1238_v28 = vsel %vm1234_vm4, %v1218_v2, %v10624_v39  ;;  %v1240_v26 = vsel %vm1236_vm5, %v10620_v60, %v1239_v62 }
 0x14e   : > { %v1374_v11 = vshll.u32 %v16543_v3, %v1371_v55  ;;  %v1377_v9 = vshll.u32 %v16544_v13, %v1371_v55  ;;  %v1375_v59 = vshrl.u32 %v16544_v13, %v10822_v24  ;;  %v1378_v54 = vshrl.u32 %v16545_v42, %v10822_v24 }
 0x14f   : > { %v1380_v25 = vshll.u32 %v16545_v42, %v1371_v55  ;;  %v1381_v52 = vshrl.u32 %v16546_v5, %v10822_v24  ;;  %v1148_v39 = vshll.u32 %v10848_v17, 30  ;;  %v10880_v51 = vadd.s32 %v1271_v0, %v1262_v23 }
 0x150   : > { %v1294_v60 = vadd.s32 %v1293_v22, %v1284_v36  ;;  %v1385_v37 = vor.u32 %v1384_v44, %v1383_v61  ;;  %v16605_v46 = vshll.u32 %v10735_v15, 16  ;;  %v1364_v2 = vand.u32 8388607, %v16258_v32 }
 0x151   : > { %v1388_v62 = vor.u32 %v1387_v58, %v1386_v7  ;;  %vm1392_vm1 = vcmp.lt.s32.totalorder %v10859_v38, 4  ;;  %v10892_v55 = vmul.f32 %v10842_v50, %v10842_v50  ;;  %v855_v27 = vand.u32 2147483647, %v854_v12  ;;  %v16607_v58 = vld [vmem:[#allocation18_spill] sm:$0xff] }
 0x152   : > { %v10885_v49 = vadd.s32 %v10763_v63, %v16605_v46  ;;  %v857_v23 = vcvt.s32.f32 %v850_v20  ;;  %v1006_v36 = vsub.s32 4294967266, %v10844_v53  ;;  %v1241_v15 = vsel %vm1235_vm8, %v1238_v28, %v1240_v26  ;;  %v16606_v20 = vld [vmem:[#allocation15_spill] sm:$0xff] }
 0x153   : > { %v10897_v0 = vor.u32 %v1375_v59, %v1374_v11  ;;  %v10899_v63 = vor.u32 %v1378_v54, %v1377_v9  ;;  %v10901_v22 = vor.u32 %v1381_v52, %v1380_v25  ;;  %v1298_v61 = vadd.s32 1, %v1294_v60  ;;  %v16608_v9 = vld [vmem:[#allocation25_spill] sm:$0xff] }
 0x154   : > { %vm1389_vm4 = vcmp.lt.s32.totalorder %v10859_v38, 1  ;;  %vm1391_vm5 = vcmp.lt.s32.totalorder %v10859_v38, 3  ;;  %v1398_v12 = vsel %vm1392_vm1, %v1385_v37, 920167782  ;;  %vm739_vm7 = vcmp.lt.s32.totalorder %v16606_v20, 0 }
 0x155   : > { %v10909_v44 = vsub.s32 %v10790_v21, %v1148_v39  ;;  %vm1297_vm8 = vc.u32 %v10880_v51, %v10885_v49  ;;  %v1365_v43 = vor.u32 8388608, %v1364_v2  ;;  %v1402_v7 = vsel %vm1392_vm1, %v1388_v62, 1326507024  ;;  %v16619_v62 = vld [vmem:[#allocation16_spill] sm:$0xff] }
 0x156   : > { %v706_v28 = vsub.s32 4, %v16607_v58  ;;  %v718_v26 = vmul.f32 -0.00019511016, %v10892_v55  ;;  %v858_v11 = vmul.f32 %v857_v23, %v855_v27  ;;  %v986_v59 = vadd.s32 %v16608_v9, %v10509_v4 }
 0x157   : > { %v1295_v54 = vmul.u32 %v10662_v31, %v1241_v15  ;;  %vm1390_vm13 = vcmp.lt.s32.totalorder %v10859_v38, 2  ;;  %v1397_v21 = vsel %vm1389_vm4, %v10897_v0, %v10899_v63  ;;  %v1399_v25 = vsel %vm1391_vm5, %v10901_v22, %v1398_v12  ;;  %v16614_v12 = vld [vmem:[#allocation27_spill] sm:$0xff] }
 0x158   : > { %v1002_v52 = vsub.s32 32, %v10844_v53  ;;  %v1299_v39 = vsel %vm1297_vm8, %v1298_v61, %v1294_v60  ;;  %v1401_v4 = vsel %vm1389_vm4, %v10899_v63, %v10901_v22  ;;  %v1403_v31 = vsel %vm1391_vm5, %v1385_v37, %v1402_v7 }
 0x159   : > { %v16609_v27 = vlaneseq  ;;  %v16611_v2 = vand.u32 2147483647, %v16606_v20  ;;  %v1007_v23 = vadd.s32 127, %v1006_v36  ;;  %v1151_v60 = vsub.s32 0, %v10909_v44 }
 0x15a   : > { %v10945_v15 = vshll.u32 %v1365_v43, 8  ;;  %v707_v61 = vsel %vm584_vm2, %v706_v28, %v16607_v58  ;;  %vm1150_vm10 = vcmp.lt.s32.totalorder %v10909_v44, 0  ;;  %v10953_v37 = vsel %vm1390_vm13, %v1397_v21, %v1399_v25 }
 0x15b   : > { %v10936_v46 = vand.u32 127, %v16609_v27  ;;  %vm10940_vm9 = vcmp.le.f32.partialorder %v16611_v2, 0.7853982  ;;  %v1515_v7 = vand.u32 2139095040, %v16614_v12  ;;  %v711_v9 = vmul.f32 -0.001358992, %v10892_v55 }
 0x15c   : > { %v16615_v27 = vld [vmem:[#allocation24_spill] sm:$0xff]  ;;  %v10958_v2 = vadd.s32 %v1299_v39, %v1295_v54  ;;  %v10962_v43 = vsel %vm1390_vm13, %v1401_v4, %v1403_v31  ;;  %v719_v32 = vadd.f32 0.008332121, %v718_v26  ;;  %v859_v58 = vxor.u32 2147483648, %v858_v11 }
 0x15d   : > { %16610 = vst [vmem:[#allocation18_spill] sm:$0xff] %v10936_v46  ;;  %v861_v36 = vsub.s32 4, %v16615_v27  ;;  %v1003_v28 = vshll.u32 %v10698_v19, %v10844_v53  ;;  %v1004_v30 = vshrl.u32 %v986_v59, %v1002_v52  ;;  %v1008_v21 = vshll.u32 %v1007_v23, 23 }
 0x15e   : > { %v1152_v25 = vsel %vm1150_vm10, %v1151_v60, %v10909_v44  ;;  %v1406_v47 = vand.u32 65535, %v10945_v15  ;;  %v1431_v41 = vshrl.u32 %v10953_v37, 16  ;;  %v10970_v54 = vadd.s32 128, %v10936_v46 }
 0x15f   : > { %v1409_v4 = vshrl.u32 %v10962_v43, 16  ;;  %v1516_v26 = vshrl.u32 %v1515_v7, 23  ;;  %v10976_v31 = vsel %vm10804_vm3, 0, %v707_v61  ;;  %v712_v19 = vadd.f32 0.041655596, %v711_v9 }
 0x160   : > { %16616 = vst [vmem:[#allocation25_spill] sm:$0xff] %v10970_v54  ;;  %v862_v53 = vsel %vm739_vm7, %v861_v36, %v16615_v27  ;;  %v1301_v59 = vadd.s32 536870912, %v10958_v2  ;;  %v720_v52 = vmul.f32 %v719_v32, %v10892_v55  ;;  %v860_v23 = vsel %vm739_vm7, %v859_v58, %v858_v11 }
 0x161   : > { %16617 = vst [vmem:[#allocation24_spill] sm:$0xff] %v10976_v31  ;;  %v1005_v60 = vor.u32 %v1004_v30, %v1003_v28  ;;  %v1153_v39 = vclz %v1152_v25  ;;  %v1009_v46 = vor.u32 4788187, %v1008_v21  ;;  %v1407_v7 = vshrl.u32 %v10945_v15, 16 }
 0x162   : > { %v1430_v57 = vand.u32 65535, %v10953_v37  ;;  %v10987_v61 = vmul.u32 %v1431_v41, %v1406_v47  ;;  %v1408_v27 = vand.u32 65535, %v10962_v43  ;;  %v10991_v36 = vmul.u32 %v1409_v4, %v1406_v47 }
 0x163   : > { %v9314_v34 = vadd.s32 4294967169, %v1516_v26  ;;  %v713_v32 = vmul.f32 %v712_v19, %v10892_v55  ;;  %v726_v11 = vadd.s32 3, %v10976_v31  ;;  %v10997_v30 = vsel %vm10940_vm9, 0, %v862_v53 }
 0x164   : > { %16618 = vst [vmem:[#allocation43_spill] sm:$0xff] %v10997_v30  ;;  %v10999_v58 = vshrl.u32 %v1301_v59, 30  ;;  %v721_v37 = vadd.f32 -0.16666654, %v720_v52  ;;  %v11004_v28 = vsel %vm10940_vm9, %v16606_v20, %v860_v23  ;;  %v1012_v43 = vcvt.s32.f32 %v1005_v60 }
 0x165   : > { %v9306_v21 = vadd.s32 4294967294, %v1153_v39  ;;  %v1010_v25 = vand.u32 2147483647, %v1009_v46  ;;  %v1432_v26 = vmul.u32 %v1430_v57, %v1406_v47  ;;  %v11006_v9 = vmul.u32 %v1430_v57, %v1407_v7 }
 0x166   : > { %v1436_v19 = vshll.u32 %v10987_v61, 16  ;;  %v1410_v54 = vmul.u32 %v1408_v27, %v1406_v47  ;;  %v11009_v31 = vmul.u32 %v1408_v27, %v1407_v7  ;;  %v1414_v53 = vshll.u32 %v10991_v36, 16 }
 0x167   : > { %v1522_v59 = vadd.s32 1, %v9314_v34  ;;  %v714_v52 = vadd.f32 -0.4999988, %v713_v32  ;;  %v11012_v45 = vand.u32 3, %v726_v11  ;;  %vm894_vm11 = vcmp.lt.s32.totalorder %v16619_v62, 0 }
 0x168   : > { %v1303_v23 = vshll.u32 %v10999_v58, 30  ;;  %v722_v46 = vmul.f32 %v721_v37, %v10892_v55  ;;  %v11019_v39 = vmul.f32 %v11004_v28, %v11004_v28  ;;  %v881_v47 = vadd.s32 3, %v10997_v30 }
 0x169   : > { %vm9307_vm12 = vcmp.lt.s32.totalorder %v9306_v21, 0  ;;  %v1013_v60 = vmul.f32 %v1012_v43, %v1010_v25  ;;  %vm1440_vm15 = vc.u32 %v1432_v26, %v1436_v19  ;;  %v11023_v34 = vadd.s32 %v1436_v19, %v1432_v26 }
 0x16a   : > { %v1416_v27 = vshll.u32 %v11009_v31, 16  ;;  %vm1418_vm14 = vc.u32 %v1410_v54, %v1414_v53  ;;  %v1420_v32 = vadd.s32 %v1414_v53, %v1410_v54  ;;  %vm1523_vm0 = vcmp.gt.s32.totalorder %v1522_v59, 0 }
 0x16b   : > { %v715_v11 = vmul.f32 %v714_v52, %v10892_v55  ;;  %v11027_v37 = vsel %vm9307_vm12, 0, %v9306_v21  ;;  %v11030_v6 = vsub.s32 %v10958_v2, %v1303_v23  ;;  %v1435_v30 = vmul.u32 %v1431_v41, %v1407_v7 }
 0x16c   : > { %v723_v10 = vadd.f32 1.0, %v722_v46  ;;  %v866_v43 = vmul.f32 -0.001358992, %v11019_v39  ;;  %v1413_v25 = vmul.u32 %v1409_v4, %v1407_v7  ;;  %v1441_v26 = vsel %vm1440_vm15, 1, %v16563_v29 }
 0x16d   : > { %v873_v19 = vmul.f32 -0.00019511016, %v11019_v39  ;;  %v1419_v57 = vsel %vm1418_vm14, 1, %v16563_v29  ;;  %v16620_v54 = vshll.u32 %v11006_v9, 16  ;;  %v1524_v55 = vsel %vm1523_vm0, %v1522_v59, 0 }
 0x16e   : > { %v16621_v21 = vand.u32 2147483647, %v16619_v62  ;;  %v1014_v41 = vxor.u32 2147483648, %v1013_v60  ;;  %v1161_v4 = vsub.s32 4294967266, %v11027_v37  ;;  %vm1422_vm6 = vc.u32 %v1420_v32, %v1416_v27 }
 0x16f   : > { %vm1444_vm2 = vc.u32 %v11023_v34, %v16620_v54  ;;  %v11046_v7 = vadd.f32 1.0, %v715_v11  ;;  %v11048_v53 = vand.u32 3, %v881_v47  ;;  %v1306_v52 = vsub.s32 0, %v11030_v6 }
 0x170   : > { %vm11041_vm3 = vcmp.le.f32.partialorder %v16621_v21, 0.7853982  ;;  %v1443_v23 = vadd.s32 %v1441_v26, %v1435_v30  ;;  %vm1305_vm7 = vcmp.lt.s32.totalorder %v11030_v6, 0  ;;  %v1421_v59 = vadd.s32 %v1419_v57, %v1413_v25 }
 0x171   : > { %16624 = vst [vmem:[#allocation44_spill] sm:$0xff] %v11046_v7  ;;  %v1445_v46 = vsel %vm1444_vm2, 1, %v16563_v29  ;;  %v1526_v54 = vand.u32 31, %v1524_v55  ;;  %v11054_v21 = vmul.f32 %v723_v10, %v10842_v50  ;;  %v867_v8 = vadd.f32 0.041655596, %v866_v43 }
 0x172   : > { %v874_v14 = vadd.f32 0.008332121, %v873_v19  ;;  %v1423_v27 = vsel %vm1422_vm6, 1, %v16563_v29  ;;  %v1015_v47 = vsel %vm894_vm11, %v1014_v41, %v1013_v60  ;;  %v1141_v32 = vadd.s32 %v10728_v40, %v10730_v1 }
 0x173   : > { %16625 = vst [vmem:[#allocation45_spill] sm:$0xff] %v11054_v21  ;;  %v1157_v30 = vsub.s32 32, %v11027_v37  ;;  %v1162_v11 = vadd.s32 127, %v1161_v4  ;;  %v1307_v57 = vsel %vm1305_vm7, %v1306_v52, %v11030_v6  ;;  %v1373_v25 = vshrl.u32 %v16543_v3, %v10822_v24 }
 0x174   : > { %v1437_v10 = vshrl.u32 %v10987_v61, 16  ;;  %v1447_v50 = vadd.s32 %v1445_v46, %v1443_v23  ;;  %v1415_v26 = vshrl.u32 %v10991_v36, 16  ;;  %v1425_v19 = vadd.s32 %v1423_v27, %v1421_v59 }
 0x175   : > { %v11068_v60 = vsub.s32 32, %v1526_v54  ;;  %v868_v40 = vmul.f32 %v867_v8, %v11019_v39  ;;  %v875_v1 = vmul.f32 %v874_v14, %v11019_v39  ;;  %v11075_v41 = vsel %vm11041_vm3, %v16619_v62, %v1015_v47 }
 0x176   : > { %v1158_v24 = vshll.u32 %v10909_v44, %v11027_v37  ;;  %v1159_v61 = vshrl.u32 %v1141_v32, %v1157_v30  ;;  %v1163_v4 = vshll.u32 %v1162_v11, 23  ;;  %v1308_v52 = vclz %v1307_v57 }
 0x177   : > { %v1394_v36 = vsel %vm1392_vm1, %v10901_v22, 2102212464  ;;  %v1393_v8 = vsel %vm1389_vm4, %v1373_v25, %v10897_v0  ;;  %v1439_v14 = vshrl.u32 %v11006_v9, 16  ;;  %v1448_v23 = vadd.s32 %v1447_v50, %v1437_v10 }
 0x178   : > { %v16273_v59 = vand.u32 2147483647, %v16614_v12  ;;  %v1417_v46 = vshrl.u32 %v11009_v31, 16  ;;  %v1426_v27 = vadd.s32 %v1425_v19, %v1415_v26  ;;  %v1538_v44 = vshll.u32 %v16546_v5, %v1526_v54 }
 0x179   : > { %v1539_v37 = vshrl.u32 %v16561_v35, %v11068_v60  ;;  %v1395_v22 = vsel %vm1391_vm5, %v10899_v63, %v1394_v36  ;;  %v11094_v47 = vshrl.u32 %v1524_v55, 5  ;;  %v1541_v0 = vshll.u32 %v16561_v35, %v1526_v54 }
 0x17a   : > { %v1542_v32 = vshrl.u32 %v16562_v18, %v11068_v60  ;;  %vm732_vm1 = vcmp.eq.s32.totalorder %v11012_v45, 2  ;;  %v9309_v31 = vadd.s32 4294967294, %v1308_v52  ;;  %v1529_v30 = vshll.u32 %v16543_v3, %v1526_v54 }
 0x17b   : > { %v1530_v11 = vshrl.u32 %v16544_v13, %v11068_v60  ;;  %v1532_v57 = vshll.u32 %v16544_v13, %v1526_v54  ;;  %vm729_vm4 = vcmp.eq.s32.totalorder %v11012_v45, 0  ;;  %v1449_v63 = vadd.s32 %v1448_v23, %v1439_v14 }
 0x17c   : > { %v1533_v55 = vshrl.u32 %v16545_v42, %v11068_v60  ;;  %v1535_v25 = vshll.u32 %v16545_v42, %v1526_v54  ;;  %v1536_v10 = vshrl.u32 %v16546_v5, %v11068_v60  ;;  %v876_v50 = vadd.f32 -0.16666654, %v875_v1 }
 0x17d   : > { %v11110_v26 = vadd.s32 %v1426_v27, %v1417_v46  ;;  %v16626_v19 = vshll.u32 %v11006_v9, 16  ;;  %v1540_v36 = vor.u32 %v1539_v37, %v1538_v44  ;;  %v11119_v14 = vmul.f32 %v11075_v41, %v11075_v41 }
 0x17e   : > { %v1519_v23 = vand.u32 8388607, %v16273_v59  ;;  %v1543_v54 = vor.u32 %v1542_v32, %v1541_v0  ;;  %vm1547_vm5 = vcmp.lt.s32.totalorder %v11094_v47, 4  ;;  %v1160_v43 = vor.u32 %v1159_v61, %v1158_v24 }
 0x17f   : > { %v11115_v52 = vadd.s32 %v11023_v34, %v16626_v19  ;;  %v1164_v1 = vor.u32 4788187, %v1163_v4  ;;  %vm9310_vm8 = vcmp.lt.s32.totalorder %v9309_v31, 0  ;;  %v1396_v9 = vsel %vm1390_vm13, %v1393_v8, %v1395_v22 }
 0x180   : > { %v1453_v46 = vadd.s32 1, %v1449_v63  ;;  %v11126_v34 = vor.u32 %v1530_v11, %v1529_v30  ;;  %v11128_v27 = vor.u32 %v1533_v55, %v1532_v57  ;;  %v11130_v44 = vor.u32 %v1536_v10, %v1535_v25 }
 0x181   : > { %vm1452_vm9 = vc.u32 %v11110_v26, %v11115_v52  ;;  %vm1544_vm10 = vcmp.lt.s32.totalorder %v11094_v47, 1  ;;  %vm1546_vm12 = vcmp.lt.s32.totalorder %v11094_v47, 3  ;;  %v1553_v24 = vsel %vm1547_vm5, %v1540_v36, 920167782 }
 0x182   : > { %v16272_v38 = vxor.u32 2147483648, %v11054_v21  ;;  %v869_v61 = vadd.f32 -0.4999988, %v868_v40  ;;  %v1520_v4 = vor.u32 8388608, %v1519_v23  ;;  %v1557_v8 = vsel %vm1547_vm5, %v1543_v54, 1326507024 }
 0x183   : > { %v877_v37 = vmul.f32 %v876_v50, %v11019_v39  ;;  %v1028_v22 = vmul.f32 -0.00019511016, %v11119_v14  ;;  %v1311_v0 = vsel %vm9310_vm8, 0, %v9309_v31  ;;  %v1450_v32 = vmul.u32 %v10945_v15, %v1396_v9 }
 0x184   : > { %v1454_v30 = vsel %vm1452_vm9, %v1453_v46, %v1449_v63  ;;  %vm1545_vm13 = vcmp.lt.s32.totalorder %v11094_v47, 2  ;;  %v1552_v40 = vsel %vm1544_vm10, %v11126_v34, %v11128_v27  ;;  %v1554_v11 = vsel %vm1546_vm12, %v11130_v44, %v1553_v24 }
 0x185   : > { %v1165_v57 = vand.u32 2147483647, %v1164_v1  ;;  %v1167_v55 = vcvt.s32.f32 %v1160_v43  ;;  %v1556_v31 = vsel %vm1544_vm10, %v11128_v27, %v11130_v44  ;;  %v1558_v15 = vsel %vm1546_vm12, %v1540_v36, %v1557_v8 }
 0x186   : > { %vm728_vm15 = vcmp.lt.s32.totalorder %v11012_v45, 2  ;;  %v16627_v63 = vxor.u32 2147483648, %v11046_v7  ;;  %v1316_v10 = vsub.s32 4294967266, %v1311_v0  ;;  %v11165_v50 = vshll.u32 %v1520_v4, 8  ;;  %v16628_v4 = vld [vmem:[#allocation28_spill] sm:$0xff] }
 0x187   : > { %v731_v43 = vsel %vm729_vm4, %v11046_v7, %v16272_v38  ;;  %v870_v19 = vmul.f32 %v869_v61, %v11019_v39  ;;  %v11173_v36 = vadd.s32 %v1454_v30, %v1450_v32  ;;  %v11177_v23 = vsel %vm1545_vm13, %v1552_v40, %v1554_v11 }
 0x188   : > { %v734_v25 = vsel %vm732_vm1, %v16627_v63, %v11054_v21  ;;  %v878_v54 = vadd.f32 1.0, %v877_v37  ;;  %v1021_v1 = vmul.f32 -0.001358992, %v11119_v14  ;;  %v1029_v9 = vadd.f32 0.008332121, %v1028_v22 }
 0x189   : > { %v11182_v46 = vsel %vm1545_vm13, %v1556_v31, %v1558_v15  ;;  %vm884_vm14 = vcmp.eq.s32.totalorder %v11048_v53, 0  ;;  %v1168_v24 = vmul.f32 %v1167_v55, %v1165_v57  ;;  %v1296_v39 = vadd.s32 %v10885_v49, %v10880_v51  ;;  %v16631_v31 = vld [vmem:[#allocation17_spill] sm:$0xff] }
 0x18a   : > { %v1312_v61 = vsub.s32 32, %v1311_v0  ;;  %v1670_v8 = vand.u32 2139095040, %v16628_v4  ;;  %vm887_vm0 = vcmp.eq.s32.totalorder %v11048_v53, 2  ;;  %v1317_v32 = vadd.s32 127, %v1316_v10 }
 0x18b   : > { %v1561_v37 = vand.u32 65535, %v11165_v50  ;;  %v1586_v22 = vshrl.u32 %v11177_v23, 16  ;;  %v735_v30 = vsel %vm728_vm15, %v731_v43, %v734_v25  ;;  %v11193_v40 = vadd.f32 1.0, %v870_v19 }
 0x18c   : > { %v1456_v11 = vadd.s32 536870912, %v11173_v36  ;;  %v1564_v57 = vshrl.u32 %v11182_v46, 16  ;;  %v11198_v51 = vmul.f32 %v878_v54, %v11004_v28  ;;  %v1022_v49 = vadd.f32 0.041655596, %v1021_v1 }
 0x18d   : > { %16629 = vst [vmem:[#allocation46_spill] sm:$0xff] %v11193_v40  ;;  %v1030_v55 = vmul.f32 %v1029_v9, %v11119_v14  ;;  %vm1049_vm2 = vcmp.lt.s32.totalorder %v16631_v31, 0  ;;  %vm725_vm6 = vweird.f32 %v16589_v16  ;;  %vm883_vm7 = vcmp.lt.s32.totalorder %v11048_v53, 2 }
 0x18e   : > { %16630 = vst [vmem:[#allocation47_spill] sm:$0xff] %v11198_v51  ;;  %v1169_v45 = vxor.u32 2147483648, %v1168_v24  ;;  %v1313_v15 = vshll.u32 %v11030_v6, %v1311_v0  ;;  %v1314_v63 = vshrl.u32 %v1296_v39, %v1312_v61  ;;  %v1671_v25 = vshrl.u32 %v1670_v8, 23 }
 0x18f   : > { %v1318_v10 = vshll.u32 %v1317_v32, 23  ;;  %v1562_v43 = vshrl.u32 %v11165_v50, 16  ;;  %v1585_v28 = vand.u32 65535, %v11177_v23  ;;  %v11207_v19 = vmul.u32 %v1586_v22, %v1561_v37 }
 0x190   : > { %v11210_v1 = vshrl.u32 %v1456_v11, 30  ;;  %v1563_v9 = vand.u32 65535, %v11182_v46  ;;  %v11213_v38 = vmul.u32 %v1564_v57, %v1561_v37  ;;  %v1016_v6 = vsub.s32 4, %v10634_v48 }
 0x191   : > { %v1023_v0 = vmul.f32 %v1022_v49, %v11119_v14  ;;  %v16632_v39 = vand.u32 2147483647, %v16631_v31  ;;  %v1031_v61 = vadd.f32 -0.16666654, %v1030_v55  ;;  %v1170_v8 = vsel %vm1049_vm2, %v1169_v45, %v1168_v24 }
 0x192   : > { %v1315_v32 = vor.u32 %v1314_v63, %v1313_v15  ;;  %v9317_v46 = vadd.s32 4294967169, %v1671_v25  ;;  %v1319_v11 = vor.u32 4788187, %v1318_v10  ;;  %v1587_v54 = vmul.u32 %v1585_v28, %v1561_v37 }
 0x193   : > { %vm11220_vm1 = vcmp.le.f32.partialorder %v16632_v39, 0.7853982  ;;  %v11226_v7 = vmul.u32 %v1585_v28, %v1562_v43  ;;  %v1591_v59 = vshll.u32 %v11207_v19, 16  ;;  %v1458_v49 = vshll.u32 %v11210_v1, 30 }
 0x194   : > { %v1565_v21 = vmul.u32 %v1563_v9, %v1561_v37  ;;  %v11230_v12 = vmul.u32 %v1563_v9, %v1562_v43  ;;  %v1569_v39 = vshll.u32 %v11213_v38, 16  ;;  %v16635_v55 = vxor.u32 2147483648, %v11198_v51 }
 0x195   : > { %v16636_v45 = vxor.u32 2147483648, %v11193_v40  ;;  %v1017_v37 = vsel %vm894_vm11, %v1016_v6, %v10634_v48  ;;  %v1024_v63 = vadd.f32 -0.4999988, %v1023_v0  ;;  %v1032_v25 = vmul.f32 %v1031_v61, %v11119_v14 }
 0x196   : > { %v886_v24 = vsel %vm884_vm14, %v11193_v40, %v16635_v55  ;;  %v11250_v10 = vsel %vm11220_vm1, %v16631_v31, %v1170_v8  ;;  %v1322_v28 = vcvt.s32.f32 %v1315_v32  ;;  %v1677_v9 = vadd.s32 1, %v9317_v46 }
 0x197   : > { %v889_v15 = vsel %vm887_vm0, %v16636_v45, %v11198_v51  ;;  %v1320_v55 = vand.u32 2147483647, %v1319_v11  ;;  %v16282_v40 = vshll.u32 %v11226_v7, 16  ;;  %vm1595_vm4 = vc.u32 %v1587_v54, %v1591_v59 }
 0x198   : > { %v11253_v33 = vadd.s32 %v1591_v59, %v1587_v54  ;;  %v11256_v45 = vsub.s32 %v11173_v36, %v1458_v49  ;;  %v1571_v48 = vshll.u32 %v11230_v12, 16  ;;  %vm1573_vm11 = vc.u32 %v1565_v21, %v1569_v39 }
 0x199   : > { %v1575_v6 = vadd.s32 %v1569_v39, %v1565_v21  ;;  %v11261_v0 = vsel %vm725_vm6, nan, %v735_v30  ;;  %vm16420_vm8 = vweird.f32 %v16606_v20  ;;  %v890_v61 = vsel %vm883_vm7, %v886_v24, %v889_v15 }
 0x19a   : > { %16637 = vst [vmem:[#allocation48_spill] sm:$0xff] %v11261_v0  ;;  %v1590_v8 = vmul.u32 %v1586_v22, %v1562_v43  ;;  %v11268_v59 = vmul.f32 %v11250_v10, %v11250_v10  ;;  %v1568_v36 = vmul.u32 %v1564_v57, %v1562_v43  ;;  %v1596_v54 = vsel %vm1595_vm4, 1, %v16563_v29 }
 0x19b   : > { %vm1678_vm9 = vcmp.gt.s32.totalorder %v1677_v9, 0  ;;  %v11273_v21 = vsel %vm11041_vm3, 0, %v1017_v37  ;;  %v1025_v30 = vmul.f32 %v1024_v63, %v11119_v14  ;;  %v1574_v32 = vsel %vm1573_vm11, 1, %v16563_v29  ;;  %v16640_v37 = vld [vmem:[#allocation21_spill] sm:$0xff] }
 0x19c   : > { %16638 = vst [vmem:[#allocation49_spill] sm:$0xff] %v11273_v21  ;;  %vm1599_vm15 = vc.u32 %v11253_v33, %v16282_v40  ;;  %v1033_v53 = vadd.f32 1.0, %v1032_v25  ;;  %v1323_v22 = vmul.f32 %v1322_v28, %v1320_v55  ;;  %v1461_v46 = vsub.s32 0, %v11256_v45 }
 0x19d   : > { %vm1577_vm14 = vc.u32 %v1575_v6, %v1571_v48  ;;  %v1171_v57 = vsub.s32 4, %v10848_v17  ;;  %vm1460_vm0 = vcmp.lt.s32.totalorder %v11256_v45, 0  ;;  %v1598_v2 = vadd.s32 %v1596_v54, %v1590_v8 }
 0x19e   : > { %v1679_v43 = vsel %vm1678_vm9, %v1677_v9, 0  ;;  %v1176_v11 = vmul.f32 -0.001358992, %v11268_v59  ;;  %v1183_v14 = vmul.f32 -0.00019511016, %v11268_v59  ;;  %v1576_v49 = vadd.s32 %v1574_v32, %v1568_v36 }
 0x19f   : > { %v1600_v39 = vsel %vm1599_vm15, 1, %v16563_v29  ;;  %v11288_v24 = vsel %vm16420_vm8, nan, %v890_v61  ;;  %v1036_v15 = vadd.s32 3, %v11273_v21  ;;  %vm1204_vm3 = vcmp.lt.s32.totalorder %v16640_v37, 0 }
 0x1a0   : > { %16639 = vst [vmem:[#allocation50_spill] sm:$0xff] %v11288_v24  ;;  %v1578_v63 = vsel %vm1577_vm14, 1, %v16563_v29  ;;  %v11293_v25 = vadd.f32 1.0, %v1025_v30  ;;  %v1324_v28 = vxor.u32 2147483648, %v1323_v22  ;;  %v1462_v9 = vsel %vm1460_vm0, %v1461_v46, %v11256_v45 }
 0x1a1   : > { %v1681_v55 = vand.u32 31, %v1679_v43  ;;  %v11297_v48 = vmul.f32 %v1033_v53, %v11075_v41  ;;  %v1172_v6 = vsel %vm1049_vm2, %v1171_v57, %v10848_v17  ;;  %v1592_v61 = vshrl.u32 %v11207_v19, 16 }
 0x1a2   : > { %16641 = vst [vmem:[#allocation51_spill] sm:$0xff] %v11293_v25  ;;  %v1602_v8 = vadd.s32 %v1600_v39, %v1598_v2  ;;  %v1177_v36 = vadd.f32 0.041655596, %v1176_v11  ;;  %v1184_v54 = vadd.f32 0.008332121, %v1183_v14  ;;  %v1570_v32 = vshrl.u32 %v11213_v38, 16 }
 0x1a3   : > { %16642 = vst [vmem:[#allocation52_spill] sm:$0xff] %v11297_v48  ;;  %v1580_v30 = vadd.s32 %v1578_v63, %v1576_v49  ;;  %v11304_v40 = vand.u32 3, %v1036_v15  ;;  %v16643_v46 = vand.u32 2147483647, %v16640_v37  ;;  %v1463_v41 = vclz %v1462_v9 }
 0x1a4   : > { %v1528_v17 = vshrl.u32 %v16543_v3, %v11068_v60  ;;  %v1325_v53 = vsel %vm1204_vm3, %v1324_v28, %v1323_v22  ;;  %v1549_v38 = vsel %vm1547_vm5, %v11130_v44, 2102212464  ;;  %v11320_v57 = vsub.s32 32, %v1681_v55 }
 0x1a5   : > { %vm11308_vm7 = vcmp.le.f32.partialorder %v16643_v46, 0.7853982  ;;  %v11325_v11 = vsel %vm11220_vm1, 0, %v1172_v6  ;;  %v1594_v14 = vshrl.u32 %v11226_v7, 16  ;;  %v1603_v60 = vadd.s32 %v1602_v8, %v1592_v61 }
 0x1a6   : > { %16646 = vst [vmem:[#allocation53_spill] sm:$0xff] %v11325_v11  ;;  %v1178_v49 = vmul.f32 %v1177_v36, %v11268_v59  ;;  %v1185_v39 = vmul.f32 %v1184_v54, %v11268_v59  ;;  %v1572_v22 = vshrl.u32 %v11230_v12, 16  ;;  %v1581_v15 = vadd.s32 %v1580_v30, %v1570_v32 }
 0x1a7   : > { %v11334_v44 = vsel %vm11308_vm7, %v16640_v37, %v1325_v53  ;;  %v9312_v63 = vadd.s32 4294967294, %v1463_v41  ;;  %v1548_v23 = vsel %vm1544_vm10, %v1528_v17, %v11126_v34  ;;  %v1550_v28 = vsel %vm1546_vm12, %v11128_v27, %v1549_v38  ;;  %v16647_v34 = vld [vmem:[#allocation29_spill] sm:$0xff] }
 0x1a8   : > { %v1693_v9 = vshll.u32 %v16546_v5, %v1681_v55  ;;  %v1694_v12 = vshrl.u32 %v16561_v35, %v11320_v57  ;;  %v1696_v6 = vshll.u32 %v16561_v35, %v1681_v55  ;;  %v1697_v61 = vshrl.u32 %v16562_v18, %v11320_v57 }
 0x1a9   : > { %v1604_v8 = vadd.s32 %v1603_v60, %v1594_v14  ;;  %v16283_v36 = vand.u32 2147483647, %v16628_v4  ;;  %v11349_v54 = vshrl.u32 %v1679_v43, 5  ;;  %v1825_v32 = vand.u32 2139095040, %v16647_v34 }
 0x1aa   : > { %vm1042_vm5 = vcmp.eq.s32.totalorder %v11304_v40, 2  ;;  %v11353_v27 = vadd.s32 %v1581_v15, %v1572_v22  ;;  %v16648_v30 = vshll.u32 %v11226_v7, 16  ;;  %v1684_v41 = vshll.u32 %v16543_v3, %v1681_v55 }
 0x1ab   : > { %v1687_v17 = vshll.u32 %v16544_v13, %v1681_v55  ;;  %v1685_v53 = vshrl.u32 %v16544_v13, %v11320_v57  ;;  %v1688_v43 = vshrl.u32 %v16545_v42, %v11320_v57  ;;  %v1690_v38 = vshll.u32 %v16545_v42, %v1681_v55 }
 0x1ac   : > { %v11358_v46 = vadd.s32 %v11253_v33, %v16648_v30  ;;  %v1691_v14 = vshrl.u32 %v16546_v5, %v11320_v57  ;;  %v1326_v7 = vsub.s32 4, %v10999_v58  ;;  %v1551_v33 = vsel %vm1545_vm13, %v1548_v23, %v1550_v28 }
 0x1ad   : > { %v1695_v60 = vor.u32 %v1694_v12, %v1693_v9  ;;  %v1698_v22 = vor.u32 %v1697_v61, %v1696_v6  ;;  %v1608_v15 = vadd.s32 1, %v1604_v8  ;;  %v1674_v30 = vand.u32 8388607, %v16283_v36 }
 0x1ae   : > { %vm1702_vm10 = vcmp.lt.s32.totalorder %v11349_v54, 4  ;;  %v1826_v2 = vshrl.u32 %v1825_v32, 23  ;;  %v1186_v19 = vadd.f32 -0.16666654, %v1185_v39  ;;  %v11377_v55 = vmul.f32 %v11334_v44, %v11334_v44 }
 0x1af   : > { %vm9313_vm12 = vcmp.lt.s32.totalorder %v9312_v63, 0  ;;  %vm1607_vm2 = vc.u32 %v11353_v27, %v11358_v46  ;;  %v1605_v47 = vmul.u32 %v11165_v50, %v1551_v33  ;;  %v11382_v23 = vor.u32 %v1685_v53, %v1684_v41 }
 0x1b0   : > { %v11384_v28 = vor.u32 %v1688_v43, %v1687_v17  ;;  %v11386_v9 = vor.u32 %v1691_v14, %v1690_v38  ;;  %vm1699_vm13 = vcmp.lt.s32.totalorder %v11349_v54, 1  ;;  %vm1701_vm1 = vcmp.lt.s32.totalorder %v11349_v54, 3 }
 0x1b1   : > { %v1708_v39 = vsel %vm1702_vm10, %v1695_v60, 920167782  ;;  %v1712_v12 = vsel %vm1702_vm10, %v1698_v22, 1326507024  ;;  %v11394_v6 = vsel %vm9313_vm12, 0, %v9312_v63  ;;  %v1609_v61 = vsel %vm1607_vm2, %v1608_v15, %v1604_v8 }
 0x1b2   : > { %v1675_v50 = vor.u32 8388608, %v1674_v30  ;;  %v9320_v32 = vadd.s32 4294967169, %v1826_v2  ;;  %v1179_v41 = vadd.f32 -0.4999988, %v1178_v49  ;;  %v1187_v17 = vmul.f32 %v1186_v19, %v11268_v59 }
 0x1b3   : > { %v1338_v53 = vmul.f32 -0.00019511016, %v11377_v55  ;;  %vm1700_vm4 = vcmp.lt.s32.totalorder %v11349_v54, 2  ;;  %v1707_v43 = vsel %vm1699_vm13, %v11382_v23, %v11384_v28  ;;  %v1709_v63 = vsel %vm1701_vm1, %v11386_v9, %v1708_v39 }
 0x1b4   : > { %v1711_v2 = vsel %vm1699_vm13, %v11384_v28, %v11386_v9  ;;  %v1713_v19 = vsel %vm1701_vm1, %v1695_v60, %v1712_v12  ;;  %vm1038_vm11 = vcmp.lt.s32.totalorder %v11304_v40, 2  ;;  %vm1039_vm9 = vcmp.eq.s32.totalorder %v11304_v40, 0 }
 0x1b5   : > { %v1471_v49 = vsub.s32 4294967266, %v11394_v6  ;;  %v11415_v8 = vadd.s32 %v1609_v61, %v1605_v47  ;;  %v16649_v38 = vxor.u32 2147483648, %v11293_v25  ;;  %v1191_v33 = vadd.s32 3, %v11325_v11 }
 0x1b6   : > { %v11423_v22 = vshll.u32 %v1675_v50, 8  ;;  %v1832_v15 = vadd.s32 1, %v9320_v32  ;;  %v1180_v60 = vmul.f32 %v1179_v41, %v11268_v59  ;;  %v1188_v30 = vadd.f32 1.0, %v1187_v17 }
 0x1b7   : > { %v1044_v14 = vsel %vm1042_vm5, %v16649_v38, %v11297_v48  ;;  %v11428_v39 = vsel %vm1700_vm4, %v1707_v43, %v1709_v63  ;;  %v11432_v47 = vsel %vm1700_vm4, %v1711_v2, %v1713_v19  ;;  %vm16313_vm15 = vweird.f32 %v16619_v62 }
 0x1b8   : > { %v16650_v12 = vxor.u32 2147483648, %v11297_v48  ;;  %v1327_v50 = vsel %vm1204_vm3, %v1326_v7, %v10999_v58  ;;  %v1331_v59 = vmul.f32 -0.001358992, %v11377_v55  ;;  %v1339_v32 = vadd.f32 0.008332121, %v1338_v53 }
 0x1b9   : > { %v1451_v41 = vadd.s32 %v11115_v52, %v11110_v26  ;;  %v1467_v17 = vsub.s32 32, %v11394_v6  ;;  %v1472_v43 = vadd.s32 127, %v1471_v49  ;;  %v1611_v63 = vadd.s32 536870912, %v11415_v8 }
 0x1ba   : > { %v1041_v61 = vsel %vm1039_vm9, %v11293_v25, %v16650_v12  ;;  %v1716_v2 = vand.u32 65535, %v11423_v22  ;;  %v1719_v19 = vshrl.u32 %v11432_v47, 16  ;;  %v1741_v38 = vshrl.u32 %v11428_v39, 16 }
 0x1bb   : > { %vm1833_vm14 = vcmp.gt.s32.totalorder %v1832_v15, 0  ;;  %v1045_v58 = vsel %vm1038_vm11, %v1041_v61, %v1044_v14  ;;  %v11451_v7 = vadd.f32 1.0, %v1180_v60  ;;  %v11454_v53 = vmul.f32 %v1188_v30, %v11250_v10 }
 0x1bc   : > { %v11456_v26 = vand.u32 3, %v1191_v33  ;;  %v11460_v52 = vsel %vm11308_vm7, 0, %v1327_v50  ;;  %v1332_v49 = vadd.f32 0.041655596, %v1331_v59  ;;  %v1340_v12 = vmul.f32 %v1339_v32, %v11377_v55 }
 0x1bd   : > { %16651 = vst [vmem:[#allocation54_spill] sm:$0xff] %v11451_v7  ;;  %v1468_v36 = vshll.u32 %v11256_v45, %v11394_v6  ;;  %v1469_v0 = vshrl.u32 %v1451_v41, %v1467_v17  ;;  %v1473_v40 = vshll.u32 %v1472_v43, 23  ;;  %v11465_v14 = vshrl.u32 %v1611_v63, 30 }
 0x1be   : > { %16652 = vst [vmem:[#allocation55_spill] sm:$0xff] %v11454_v53  ;;  %v1834_v60 = vsel %vm1833_vm14, %v1832_v15, 0  ;;  %v1718_v10 = vand.u32 65535, %v11432_v47  ;;  %v11468_v30 = vmul.u32 %v1719_v19, %v1716_v2  ;;  %v1740_v33 = vand.u32 65535, %v11428_v39 }
 0x1bf   : > { %16653 = vst [vmem:[#allocation56_spill] sm:$0xff] %v11460_v52  ;;  %v11471_v24 = vmul.u32 %v1741_v38, %v1716_v2  ;;  %vm1194_vm0 = vcmp.eq.s32.totalorder %v11456_v26, 0  ;;  %v1717_v45 = vshrl.u32 %v11423_v22, 16  ;;  %vm1197_vm3 = vcmp.eq.s32.totalorder %v11456_v26, 2 }
 0x1c0   : > { %16654 = vst [vmem:[#allocation57_spill] sm:$0xff] %v11465_v14  ;;  %v1333_v6 = vmul.f32 %v1332_v49, %v11377_v55  ;;  %v1346_v15 = vadd.s32 3, %v11460_v52  ;;  %v1836_v47 = vand.u32 31, %v1834_v60  ;;  %v1341_v59 = vadd.f32 -0.16666654, %v1340_v12 }
 0x1c1   : > { %v1470_v32 = vor.u32 %v1469_v0, %v1468_v36  ;;  %v1474_v39 = vor.u32 4788187, %v1473_v40  ;;  %v1613_v41 = vshll.u32 %v11465_v14, 30  ;;  %v1720_v17 = vmul.u32 %v1718_v10, %v1716_v2 }
 0x1c2   : > { %v1724_v43 = vshll.u32 %v11468_v30, 16  ;;  %v1742_v63 = vmul.u32 %v1740_v33, %v1716_v2  ;;  %v1746_v50 = vshll.u32 %v11471_v24, 16  ;;  %v11485_v61 = vsel %vm16313_vm15, nan, %v1045_v58 }
 0x1c3   : > { %16655 = vst [vmem:[#allocation58_spill] sm:$0xff] %v11485_v61  ;;  %v16656_v49 = vxor.u32 2147483648, %v11454_v53  ;;  %v16657_v0 = vxor.u32 2147483648, %v11451_v7  ;;  %v11499_v40 = vmul.u32 %v1718_v10, %v1717_v45  ;;  %v1334_v2 = vadd.f32 -0.4999988, %v1333_v6  ;;  %v16659_v10 = vld [vmem:[#allocation30_spill] sm:$0xff] }
 0x1c4   : > { %v11501_v20 = vand.u32 3, %v1346_v15  ;;  %v11503_v62 = vmul.u32 %v1740_v33, %v1717_v45  ;;  %v11505_v58 = vsub.s32 32, %v1836_v47  ;;  %v11508_v61 = vmul.f32 %v1341_v59, %v11377_v55 }
 0x1c5   : > { %v11492_v12 = vsel %vm1194_vm0, %v11451_v7, %v16656_v49  ;;  %v11497_v36 = vsel %vm1197_vm3, %v16657_v0, %v11454_v53  ;;  %v1475_v16 = vand.u32 2147483647, %v1474_v39  ;;  %v1477_v49 = vcvt.s32.f32 %v1470_v32 }
 0x1c6   : > { %16658 = vst [vmem:[#allocation59_spill] sm:$0xff] %v11505_v58  ;;  %v11512_v7 = vsub.s32 %v11415_v8, %v1613_v41  ;;  %vm1728_vm7 = vc.u32 %v1720_v17, %v1724_v43  ;;  %vm1750_vm5 = vc.u32 %v1742_v63, %v1746_v50  ;;  %v1980_v6 = vand.u32 2139095040, %v16659_v10 }
 0x1c7   : > { %v1723_v15 = vmul.u32 %v1719_v19, %v1717_v45  ;;  %v1726_v33 = vshll.u32 %v11499_v40, 16  ;;  %v1730_v0 = vadd.s32 %v1724_v43, %v1720_v17  ;;  %v1745_v53 = vmul.u32 %v1741_v38, %v1717_v45 }
 0x1c8   : > { %v16305_v48 = vshll.u32 %v11503_v62, 16  ;;  %v11517_v59 = vadd.s32 %v1746_v50, %v1742_v63  ;;  %v1848_v32 = vshll.u32 %v16546_v5, %v1836_v47  ;;  %v1849_v39 = vshrl.u32 %v16561_v35, %v11505_v58 }
 0x1c9   : > { %v1729_v8 = vsel %vm1728_vm7, 1, %v16563_v29  ;;  %v1751_v41 = vsel %vm1750_vm5, 1, %v16563_v29  ;;  %v11524_v25 = vshrl.u32 %v1834_v60, 5  ;;  %v1981_v19 = vshrl.u32 %v1980_v6, 23 }
 0x1ca   : > { %v1839_v52 = vshll.u32 %v16543_v3, %v1836_v47  ;;  %v1842_v38 = vshll.u32 %v16544_v13, %v1836_v47  ;;  %v1851_v45 = vshll.u32 %v16561_v35, %v1836_v47  ;;  %v1852_v50 = vshrl.u32 %v16562_v18, %v11505_v58 }
 0x1cb   : > { %v1840_v17 = vshrl.u32 %v16544_v13, %v11505_v58  ;;  %v1843_v43 = vshrl.u32 %v16545_v42, %v11505_v58  ;;  %v1845_v63 = vshll.u32 %v16545_v42, %v1836_v47  ;;  %v1846_v60 = vshrl.u32 %v16546_v5, %v11505_v58 }
 0x1cc   : > { %vm1193_vm12 = vcmp.lt.s32.totalorder %v11456_v26, 2  ;;  %v1478_v6 = vmul.f32 %v1477_v49, %v1475_v16  ;;  %vm1754_vm2 = vc.u32 %v11517_v59, %v16305_v48  ;;  %v16660_v51 = vand.u32 2147483647, %v16647_v34 }
 0x1cd   : > { %v1850_v21 = vor.u32 %v1849_v39, %v1848_v32  ;;  %v1616_v4 = vsub.s32 0, %v11512_v7  ;;  %vm1732_vm11 = vc.u32 %v1730_v0, %v1726_v33  ;;  %vm1857_vm9 = vcmp.lt.s32.totalorder %v11524_v25, 4 }
 0x1ce   : > { %v1829_v11 = vand.u32 8388607, %v16660_v51  ;;  %v9323_v47 = vadd.s32 4294967169, %v1981_v19  ;;  %vm1615_vm14 = vcmp.lt.s32.totalorder %v11512_v7, 0  ;;  %v1731_v14 = vadd.s32 %v1729_v8, %v1723_v15 }
 0x1cf   : > { %v1753_v37 = vadd.s32 %v1751_v41, %v1745_v53  ;;  %v1853_v58 = vor.u32 %v1852_v50, %v1851_v45  ;;  %vm1359_vm0 = vcmp.lt.s32.totalorder %v10536_v56, 0  ;;  %v1755_v16 = vsel %vm1754_vm2, 1, %v16563_v29 }
 0x1d0   : > { %v11549_v49 = vor.u32 %v1840_v17, %v1839_v52  ;;  %v11551_v48 = vor.u32 %v1843_v43, %v1842_v38  ;;  %v11553_v51 = vor.u32 %v1846_v60, %v1845_v63  ;;  %v1733_v33 = vsel %vm1732_vm11, 1, %v16563_v29 }
 0x1d1   : > { %vm1854_vm3 = vcmp.lt.s32.totalorder %v11524_v25, 1  ;;  %vm1856_vm7 = vcmp.lt.s32.totalorder %v11524_v25, 3  ;;  %v1863_v53 = vsel %vm1857_vm9, %v1850_v21, 920167782  ;;  %v1335_v15 = vmul.f32 %v1334_v2, %v11377_v55 }
 0x1d2   : > { %v1617_v0 = vsel %vm1615_vm14, %v1616_v4, %v11512_v7  ;;  %v1830_v32 = vor.u32 8388608, %v1829_v11  ;;  %v1987_v52 = vadd.s32 1, %v9323_v47  ;;  %vm16312_vm5 = vweird.f32 %v16631_v31 }
 0x1d3   : > { %v1725_v39 = vshrl.u32 %v11468_v30, 16  ;;  %v1747_v8 = vshrl.u32 %v11471_v24, 16  ;;  %v1757_v41 = vadd.s32 %v1755_v16, %v1753_v37  ;;  %v1867_v19 = vsel %vm1857_vm9, %v1853_v58, 1326507024 }
 0x1d4   : > { %v16661_v38 = vand.u32 2147483647, %v10536_v56  ;;  %v1735_v55 = vadd.s32 %v1733_v33, %v1731_v14  ;;  %vm1855_vm11 = vcmp.lt.s32.totalorder %v11524_v25, 2  ;;  %v1862_v4 = vsel %vm1854_vm3, %v11549_v49, %v11551_v48 }
 0x1d5   : > { %v1864_v37 = vsel %vm1856_vm7, %v11553_v51, %v1863_v53  ;;  %v1343_v11 = vadd.f32 1.0, %v11508_v61  ;;  %v1479_v30 = vxor.u32 2147483648, %v1478_v6  ;;  %v1481_v24 = vsub.s32 4, %v11210_v1 }
 0x1d6   : > { %vm11569_vm2 = vcmp.le.f32.partialorder %v16661_v38, 0.7853982  ;;  %v1618_v2 = vclz %v1617_v0  ;;  %v1866_v14 = vsel %vm1854_vm3, %v11551_v48, %v11553_v51  ;;  %v1868_v58 = vsel %vm1856_vm7, %v1850_v21, %v1867_v19 }
 0x1d7   : > { %v11589_v50 = vshll.u32 %v1830_v32, 8  ;;  %vm1988_vm14 = vcmp.gt.s32.totalorder %v1987_v52, 0  ;;  %v1683_v17 = vshrl.u32 %v16543_v3, %v11320_v57  ;;  %v1749_v61 = vshrl.u32 %v11503_v62, 16 }
 0x1d8   : > { %v1758_v43 = vadd.s32 %v1757_v41, %v1747_v8  ;;  %v11596_v63 = vsel %vm1855_vm11, %v1862_v4, %v1864_v37  ;;  %v1200_v60 = vsel %vm1193_vm12, %v11492_v12, %v11497_v36  ;;  %v1704_v21 = vsel %vm1702_vm10, %v11386_v9, 2102212464 }
 0x1d9   : > { %v1727_v47 = vshrl.u32 %v11499_v40, 16  ;;  %v1736_v16 = vadd.s32 %v1735_v55, %v1725_v39  ;;  %v11606_v57 = vadd.f32 1.0, %v1335_v15  ;;  %v9315_v33 = vadd.s32 4294967294, %v1618_v2 }
 0x1da   : > { %v11610_v53 = vsel %vm1855_vm11, %v1866_v14, %v1868_v58  ;;  %v1989_v0 = vsel %vm1988_vm14, %v1987_v52, 0  ;;  %v11613_v32 = vmul.f32 %v1343_v11, %v11334_v44  ;;  %v1482_v26 = vsel %vm1359_vm0, %v1481_v24, %v11210_v1 }
 0x1db   : > { %16664 = vst [vmem:[#allocation60_spill] sm:$0xff] %v11606_v57  ;;  %v1871_v9 = vand.u32 65535, %v11589_v50  ;;  %v16306_v12 = vshrl.u32 %v11596_v63, 16  ;;  %v1480_v36 = vsel %vm1359_vm0, %v1479_v30, %v1478_v6  ;;  %v1703_v40 = vsel %vm1699_vm13, %v1683_v17, %v11382_v23 }
 0x1dc   : > { %16665 = vst [vmem:[#allocation61_spill] sm:$0xff] %v11613_v32  ;;  %v1705_v44 = vsel %vm1701_vm1, %v11384_v28, %v1704_v21  ;;  %v1759_v15 = vadd.s32 %v1758_v43, %v1749_v61  ;;  %v11628_v52 = vadd.s32 %v1736_v16, %v1727_v47  ;;  %v16666_v1 = vshll.u32 %v11503_v62, 16 }
 0x1dd   : > { %v1874_v8 = vshrl.u32 %v11610_v53, 16  ;;  %v1991_v41 = vand.u32 31, %v1989_v0  ;;  %vm9316_vm10 = vcmp.lt.s32.totalorder %v9315_v33, 0  ;;  %v1872_v6 = vshrl.u32 %v11589_v50, 16 }
 0x1de   : > { %v11633_v39 = vadd.s32 %v11517_v59, %v16666_v1  ;;  %v1873_v23 = vand.u32 65535, %v11610_v53  ;;  %v1895_v19 = vand.u32 65535, %v11596_v63  ;;  %v11641_v28 = vsel %vm16312_vm5, nan, %v1200_v60  ;;  %v16668_v59 = vld [vmem:[#allocation31_spill] sm:$0xff] }
 0x1df   : > { %16667 = vst [vmem:[#allocation62_spill] sm:$0xff] %v11641_v28  ;;  %v11646_v62 = vmul.u32 %v16306_v12, %v1871_v9  ;;  %v2135_v55 = vand.u32 2139095040, %v16668_v59  ;;  %v11652_v4 = vsel %vm11569_vm2, %v10536_v56, %v1480_v36  ;;  %v11656_v37 = vsel %vm11569_vm2, 0, %v1482_v26 }
 0x1e0   : > { %16669 = vst [vmem:[#allocation63_spill] sm:$0xff] %v11652_v4  ;;  %v11660_v11 = vsel %vm1700_vm4, %v1703_v40, %v1705_v44  ;;  %v1763_v30 = vadd.s32 1, %v1759_v15  ;;  %v11662_v24 = vsel %vm9316_vm10, 0, %v9315_v33  ;;  %vm1762_vm13 = vc.u32 %v11628_v52, %v11633_v39 }
 0x1e1   : > { %16670 = vst [vmem:[#allocation64_spill] sm:$0xff] %v11656_v37  ;;  %v11666_v2 = vmul.u32 %v1874_v8, %v1871_v9  ;;  %v11668_v14 = vsub.s32 32, %v1991_v41  ;;  %v1606_v45 = vadd.s32 %v11358_v46, %v11353_v27  ;;  %v11673_v17 = vmul.u32 %v1873_v23, %v1872_v6 }
 0x1e2   : > { %v11675_v54 = vmul.u32 %v1895_v19, %v1872_v6  ;;  %v11679_v61 = vmul.f32 %v11652_v4, %v11652_v4  ;;  %v1897_v43 = vmul.u32 %v1895_v19, %v1871_v9  ;;  %v1901_v60 = vshll.u32 %v11646_v62, 16 }
 0x1e3   : > { %v2136_v21 = vshrl.u32 %v2135_v55, 23  ;;  %v1622_v47 = vsub.s32 32, %v11662_v24  ;;  %v1626_v16 = vsub.s32 4294967266, %v11662_v24  ;;  %v1760_v33 = vmul.u32 %v11423_v22, %v11660_v11 }
 0x1e4   : > { %v1764_v27 = vsel %vm1762_vm13, %v1763_v30, %v1759_v15  ;;  %v1875_v46 = vmul.u32 %v1873_v23, %v1871_v9  ;;  %v1879_v53 = vshll.u32 %v11666_v2, 16  ;;  %v2003_v26 = vshll.u32 %v16546_v5, %v1991_v41 }
 0x1e5   : > { %v2004_v36 = vshrl.u32 %v16561_v35, %v11668_v14  ;;  %v1881_v40 = vshll.u32 %v11673_v17, 16  ;;  %v16314_v1 = vand.u32 2147483647, %v16659_v10  ;;  %v11693_v19 = vshrl.u32 %v1989_v0, 5 }
 0x1e6   : > { %vm11695_vm1 = vc.u32 %v1897_v43, %v1901_v60  ;;  %v1994_v22 = vshll.u32 %v16543_v3, %v1991_v41  ;;  %v1997_v9 = vshll.u32 %v16544_v13, %v1991_v41  ;;  %v9326_v15 = vadd.s32 4294967169, %v2136_v21 }
 0x1e7   : > { %v1995_v23 = vshrl.u32 %v16544_v13, %v11668_v14  ;;  %v1998_v11 = vshrl.u32 %v16545_v42, %v11668_v14  ;;  %v2000_v30 = vshll.u32 %v16545_v42, %v1991_v41  ;;  %v2001_v0 = vshrl.u32 %v16546_v5, %v11668_v14 }
 0x1e8   : > { %vm1883_vm4 = vc.u32 %v1875_v46, %v1879_v53  ;;  %v2005_v38 = vor.u32 %v2004_v36, %v2003_v26  ;;  %v2006_v58 = vshll.u32 %v16561_v35, %v1991_v41  ;;  %v2007_v44 = vshrl.u32 %v16562_v18, %v11668_v14 }
 0x1e9   : > { %vm1349_vm12 = vcmp.eq.s32.totalorder %v11501_v20, 0  ;;  %vm1352_vm0 = vcmp.eq.s32.totalorder %v11501_v20, 2  ;;  %v1885_v21 = vadd.s32 %v1879_v53, %v1875_v46  ;;  %v11713_v12 = vadd.s32 %v1901_v60, %v1897_v43 }
 0x1ea   : > { %v1984_v28 = vand.u32 8388607, %v16314_v1  ;;  %vm2012_vm2 = vcmp.lt.s32.totalorder %v11693_v19, 4  ;;  %v1878_v31 = vmul.u32 %v1874_v8, %v1872_v6  ;;  %v16673_v26 = vshrl.u32 %v11596_v63, 16 }
 0x1eb   : > { %v1906_v41 = vsel %vm11695_vm1, 1, %v16563_v29  ;;  %v2142_v56 = vadd.s32 1, %v9326_v15  ;;  %v1884_v34 = vsel %vm1883_vm4, 1, %v16563_v29  ;;  %v11724_v4 = vor.u32 %v1995_v23, %v1994_v22 }
 0x1ec   : > { %v1900_v36 = vmul.u32 %v16673_v26, %v1872_v6  ;;  %v11726_v43 = vor.u32 %v1998_v11, %v1997_v9  ;;  %v11728_v60 = vor.u32 %v2001_v0, %v2000_v30  ;;  %v2008_v46 = vor.u32 %v2007_v44, %v2006_v58 }
 0x1ed   : > { %vm2009_vm14 = vcmp.lt.s32.totalorder %v11693_v19, 1  ;;  %vm2011_vm10 = vcmp.lt.s32.totalorder %v11693_v19, 3  ;;  %v2018_v63 = vsel %vm2012_vm2, %v2005_v38, 920167782  ;;  %vm1348_vm13 = vcmp.lt.s32.totalorder %v11501_v20, 2 }
 0x1ee   : > { %v1623_v8 = vshll.u32 %v11512_v7, %v11662_v24  ;;  %vm1887_vm1 = vc.u32 %v1885_v21, %v1881_v40  ;;  %v16674_v6 = vshll.u32 %v11675_v54, 16  ;;  %v1985_v53 = vor.u32 8388608, %v1984_v28 }
 0x1ef   : > { %v1624_v55 = vshrl.u32 %v1606_v45, %v1622_v47  ;;  %v11740_v58 = vadd.s32 %v1764_v27, %v1760_v33  ;;  %v1908_v44 = vadd.s32 %v1906_v41, %v1900_v36  ;;  %vm2143_vm5 = vcmp.gt.s32.totalorder %v2142_v56, 0 }
 0x1f0   : > { %vm1909_vm4 = vc.u32 %v11713_v12, %v16674_v6  ;;  %v1886_v22 = vadd.s32 %v1884_v34, %v1878_v31  ;;  %vm2010_vm15 = vcmp.lt.s32.totalorder %v11693_v19, 2  ;;  %v2017_v9 = vsel %vm2009_vm14, %v11724_v4, %v11726_v43  ;;  %v16675_v31 = vld [vmem:[#allocation59_spill] sm:$0xff] }
 0x1f1   : > { %v2019_v7 = vsel %vm2011_vm10, %v11728_v60, %v2018_v63  ;;  %v1627_v24 = vadd.s32 127, %v1626_v16  ;;  %v1888_v28 = vsel %vm1887_vm1, 1, %v16563_v29  ;;  %v1910_v45 = vsel %vm1909_vm4, 1, %v16563_v29 }
 0x1f2   : > { %v2022_v47 = vsel %vm2012_vm2, %v2008_v46, 1326507024  ;;  %v1838_v34 = vshrl.u32 %v16543_v3, %v16675_v31  ;;  %v1859_v33 = vsel %vm1857_vm9, %v11553_v51, 2102212464  ;;  %v11759_v27 = vshll.u32 %v1985_v53, 8 }
 0x1f3   : > { %v2144_v40 = vsel %vm2143_vm5, %v2142_v56, 0  ;;  %v1766_v15 = vadd.s32 536870912, %v11740_v58  ;;  %v1880_v16 = vshrl.u32 %v11666_v2, 16  ;;  %v1902_v23 = vshrl.u32 %v11646_v62, 16 }
 0x1f4   : > { %v11766_v11 = vsel %vm2010_vm15, %v2017_v9, %v2019_v7  ;;  %v1890_v30 = vadd.s32 %v1888_v28, %v1886_v22  ;;  %v1912_v0 = vadd.s32 %v1910_v45, %v1908_v44  ;;  %v2021_v51 = vsel %vm2009_vm14, %v11726_v43, %v11728_v60 }
 0x1f5   : > { %v2023_v56 = vsel %vm2011_vm10, %v2005_v38, %v2022_v47  ;;  %v16676_v21 = vxor.u32 2147483648, %v11613_v32  ;;  %v16677_v2 = vxor.u32 2147483648, %v11606_v57  ;;  %v1486_v36 = vmul.f32 -0.001358992, %v11679_v61 }
 0x1f6   : > { %v2146_v41 = vand.u32 31, %v2144_v40  ;;  %v11785_v46 = vor.u32 %v1624_v55, %v1623_v8  ;;  %v1628_v63 = vshll.u32 %v1627_v24, 23  ;;  %v2026_v38 = vand.u32 65535, %v11759_v27 }
 0x1f7   : > { %v1351_v62 = vsel %vm1349_vm12, %v11606_v57, %v16676_v21  ;;  %v1354_v26 = vsel %vm1352_vm0, %v16677_v2, %v11613_v32  ;;  %v16315_v6 = vshrl.u32 %v11766_v11, 16  ;;  %v11789_v53 = vshrl.u32 %v1766_v15, 30 }
 0x1f8   : > { %v1858_v44 = vsel %vm1854_vm3, %v1838_v34, %v11549_v49  ;;  %v1860_v22 = vsel %vm1856_vm7, %v11551_v48, %v1859_v33  ;;  %v11799_v9 = vsel %vm2010_vm15, %v2021_v51, %v2023_v56  ;;  %v1882_v8 = vshrl.u32 %v11673_v17, 16 }
 0x1f9   : > { %v1891_v55 = vadd.s32 %v1890_v30, %v1880_v16  ;;  %v1904_v7 = vshrl.u32 %v11675_v54, 16  ;;  %v1913_v24 = vadd.s32 %v1912_v0, %v1902_v23  ;;  %v11805_v28 = vsel %vm1348_vm13, %v1351_v62, %v1354_v26 }
 0x1fa   : > { %v11808_v49 = vmul.f32 -0.00019511016, %v11679_v61  ;;  %v2050_v45 = vand.u32 65535, %v11766_v11  ;;  %v11811_v48 = vsub.s32 32, %v2146_v41  ;;  %v11813_v47 = vadd.f32 0.041655596, %v1486_v36 }
 0x1fb   : > { %v2027_v31 = vshrl.u32 %v11759_v27, 16  ;;  %v2029_v17 = vshrl.u32 %v11799_v9, 16  ;;  %v11819_v34 = vmul.u32 %v16315_v6, %v2026_v38  ;;  %v11821_v20 = vor.u32 4788187, %v1628_v63 }
 0x1fc   : > { %v1768_v15 = vshll.u32 %v11789_v53, 30  ;;  %v1861_v16 = vsel %vm1855_vm11, %v1858_v44, %v1860_v22  ;;  %v11827_v23 = vadd.s32 %v1891_v55, %v1882_v8  ;;  %v16678_v30 = vshll.u32 %v11675_v54, 16 }
 0x1fd   : > { %v1914_v51 = vadd.s32 %v1913_v24, %v1904_v7  ;;  %v16318_v56 = vand.u32 2147483647, %v16668_v59  ;;  %v2028_v21 = vand.u32 65535, %v11799_v9  ;;  %v2052_v62 = vmul.u32 %v2050_v45, %v2026_v38 }
 0x1fe   : > { %v11832_v0 = vadd.s32 %v11713_v12, %v16678_v30  ;;  %v2158_v2 = vshll.u32 %v16546_v5, %v2146_v41  ;;  %v2159_v26 = vshrl.u32 %v16561_v35, %v11811_v48  ;;  %v11839_v25 = vmul.u32 %v2029_v17, %v2026_v38 }
 0x1ff   : > { %v11841_v36 = vmul.u32 %v2050_v45, %v2027_v31  ;;  %v2056_v54 = vshll.u32 %v11819_v34, 16  ;;  %v11844_v63 = vshrl.u32 %v2144_v40, 5  ;;  %v2149_v12 = vshll.u32 %v16543_v3, %v2146_v41 }
 0x200   : > { %v2150_v44 = vshrl.u32 %v16544_v13, %v11811_v48  ;;  %v2152_v22 = vshll.u32 %v16544_v13, %v2146_v41  ;;  %v2155_v9 = vshll.u32 %v16545_v42, %v2146_v41  ;;  %v2153_v8 = vshrl.u32 %v16545_v42, %v11811_v48 }
 0x201   : > { %v2156_v55 = vshrl.u32 %v16546_v5, %v11811_v48  ;;  %v2161_v7 = vshll.u32 %v16561_v35, %v2146_v41  ;;  %v2162_v40 = vshrl.u32 %v16562_v18, %v11811_v48  ;;  %v11859_v24 = vsub.s32 %v11740_v58, %v1768_v15 }
 0x202   : > { %v1915_v45 = vmul.u32 %v11589_v50, %v1861_v16  ;;  %v2139_v30 = vand.u32 8388607, %v16318_v56  ;;  %v2160_v1 = vor.u32 %v2159_v26, %v2158_v2  ;;  %v2030_v33 = vmul.u32 %v2028_v21, %v2026_v38  ;;  %v16681_v50 = vld [vmem:[#allocation21_spill] sm:$0xff] }
 0x203   : > { %v11864_v6 = vmul.u32 %v2028_v21, %v2027_v31  ;;  %v2034_v57 = vshll.u32 %v11839_v25, 16  ;;  %vm2167_vm9 = vcmp.lt.s32.totalorder %v11844_v63, 4  ;;  %vm1917_vm3 = vc.u32 %v11827_v23, %v11832_v0 }
 0x204   : > { %v1918_v41 = vadd.s32 1, %v1914_v51  ;;  %vm11871_vm7 = vc.u32 %v2052_v62, %v2056_v54  ;;  %vm16419_vm5 = vweird.f32 %v16681_v50  ;;  %v11876_v16 = vor.u32 %v2150_v44, %v2149_v12  ;;  %v16682_v44 = vld [vmem:[#allocation27_spill] sm:$0xff] }
 0x205   : > { %v11878_v38 = vor.u32 %v2153_v8, %v2152_v22  ;;  %v11880_v21 = vor.u32 %v2156_v55, %v2155_v9  ;;  %v2163_v2 = vor.u32 %v2162_v40, %v2161_v7  ;;  %v11882_v26 = vadd.s32 %v2056_v54, %v2052_v62 }
 0x206   : > { %vm2164_vm11 = vcmp.lt.s32.totalorder %v11844_v63, 1  ;;  %vm2166_vm12 = vcmp.lt.s32.totalorder %v11844_v63, 3  ;;  %v2173_v56 = vsel %vm2167_vm9, %v2160_v1, 920167782  ;;  %v2036_v58 = vshll.u32 %v11864_v6, 16 }
 0x207   : > { %vm2038_vm0 = vc.u32 %v2030_v33, %v2034_v57  ;;  %v2040_v32 = vadd.s32 %v2034_v57, %v2030_v33  ;;  %v2140_v12 = vor.u32 8388608, %v2139_v30  ;;  %vm1514_vm13 = vcmp.lt.s32.totalorder %v16682_v44, 0 }
 0x208   : > { %v1919_v22 = vsel %vm1917_vm3, %v1918_v41, %v1914_v51  ;;  %v2033_v62 = vmul.u32 %v2029_v17, %v2027_v31  ;;  %v16683_v54 = vshrl.u32 %v11766_v11, 16  ;;  %v2061_v8 = vsel %vm11871_vm7, 1, %v16563_v29 }
 0x209   : > { %vm2165_vm1 = vcmp.lt.s32.totalorder %v11844_v63, 2  ;;  %v2172_v57 = vsel %vm2164_vm11, %v11876_v16, %v11878_v38  ;;  %v2174_v33 = vsel %vm2166_vm12, %v11880_v21, %v2173_v56  ;;  %v2177_v17 = vsel %vm2167_vm9, %v2163_v2, 1326507024 }
 0x20a   : > { %v2055_v9 = vmul.u32 %v16683_v54, %v2027_v31  ;;  %v1630_v11 = vand.u32 2147483647, %v11821_v20  ;;  %v1771_v31 = vsub.s32 0, %v11859_v24  ;;  %v2039_v51 = vsel %vm2038_vm0, 1, %v16563_v29 }
 0x20b   : > { %v16684_v55 = vshll.u32 %v11841_v36, 16  ;;  %vm1770_vm3 = vcmp.lt.s32.totalorder %v11859_v24, 0  ;;  %v11915_v7 = vadd.s32 %v1919_v22, %v1915_v45  ;;  %vm2042_vm7 = vc.u32 %v2040_v32, %v2036_v58  ;;  %v16685_v45 = vld [vmem:[#allocation57_spill] sm:$0xff] }
 0x20c   : > { %v11917_v40 = vshll.u32 %v2140_v12, 8  ;;  %v2063_v56 = vadd.s32 %v2061_v8, %v2055_v9  ;;  %v11921_v30 = vsel %vm2165_vm1, %v2172_v57, %v2174_v33  ;;  %v2176_v20 = vsel %vm2164_vm11, %v11878_v38, %v11880_v21 }
 0x20d   : > { %vm2064_vm4 = vc.u32 %v11882_v26, %v16684_v55  ;;  %v2178_v41 = vsel %vm2166_vm12, %v2160_v1, %v2177_v17  ;;  %v1494_v15 = vadd.f32 0.008332121, %v11808_v49  ;;  %v1636_v2 = vsub.s32 4, %v16685_v45 }
 0x20e   : > { %v2041_v32 = vadd.s32 %v2039_v51, %v2033_v62  ;;  %v2065_v58 = vsel %vm2064_vm4, 1, %v16563_v29  ;;  %v1488_v12 = vmul.f32 %v11813_v47, %v11679_v61  ;;  %v16686_v22 = vcvt.s32.f32 %v11785_v46 }
 0x20f   : > { %v1772_v9 = vsel %vm1770_vm3, %v1771_v31, %v11859_v24  ;;  %v2043_v8 = vsel %vm2042_vm7, 1, %v16563_v29  ;;  %v16687_v57 = vand.u32 2147483647, %v16682_v44  ;;  %v1921_v49 = vadd.s32 536870912, %v11915_v7 }
 0x210   : > { %v1633_v54 = vmul.f32 %v16686_v22, %v1630_v11  ;;  %v11947_v62 = vsel %vm2165_vm1, %v2176_v20, %v2178_v41  ;;  %v2181_v47 = vand.u32 65535, %v11917_v40  ;;  %v2206_v46 = vshrl.u32 %v11921_v30, 16 }
 0x211   : > { %vm11940_vm0 = vcmp.le.f32.partialorder %v16687_v57, 0.7853982  ;;  %v11954_v33 = vsel %vm16419_vm5, nan, %v11805_v28  ;;  %v11957_v17 = vadd.s32 3, %v11656_v37  ;;  %v2057_v11 = vshrl.u32 %v11819_v34, 16 }
 0x212   : > { %16690 = vst [vmem:[#allocation59_spill] sm:$0xff] %v11954_v33  ;;  %v2067_v31 = vadd.s32 %v2065_v58, %v2063_v56  ;;  %v1495_v51 = vmul.f32 %v1494_v15, %v11679_v61  ;;  %v11964_v55 = vsel %vm1514_vm13, %v1636_v2, %v16685_v45  ;;  %v2035_v20 = vshrl.u32 %v11839_v25, 16 }
 0x213   : > { %v2045_v41 = vadd.s32 %v2043_v8, %v2041_v32  ;;  %v1489_v22 = vadd.f32 -0.4999988, %v1488_v12  ;;  %v1634_v57 = vxor.u32 2147483648, %v1633_v54  ;;  %v1773_v28 = vclz %v1772_v9  ;;  %v16692_v32 = vld [vmem:[#allocation32_spill] sm:$0xff] }
 0x214   : > { %v2184_v33 = vshrl.u32 %v11947_v62, 16  ;;  %v11968_v50 = vshrl.u32 %v1921_v49, 30  ;;  %v2182_v34 = vshrl.u32 %v11917_v40, 16  ;;  %v2205_v56 = vand.u32 65535, %v11921_v30 }
 0x215   : > { %v11972_v15 = vmul.u32 %v2206_v46, %v2181_v47  ;;  %v1993_v45 = vshrl.u32 %v16543_v3, %v11668_v14  ;;  %v2059_v2 = vshrl.u32 %v11841_v36, 16  ;;  %v2068_v25 = vadd.s32 %v2067_v31, %v2057_v11 }
 0x216   : > { %16691 = vst [vmem:[#allocation57_spill] sm:$0xff] %v11968_v50  ;;  %v2290_v58 = vand.u32 2139095040, %v16692_v32  ;;  %v11978_v12 = vadd.f32 -0.16666654, %v1495_v51  ;;  %v2037_v9 = vshrl.u32 %v11864_v6, 16  ;;  %v2046_v8 = vadd.s32 %v2045_v41, %v2035_v20 }
 0x217   : > { %v2183_v49 = vand.u32 65535, %v11947_v62  ;;  %v1635_v30 = vsel %vm1514_vm13, %v1634_v57, %v1633_v54  ;;  %v2014_v37 = vsel %vm2012_vm2, %v11728_v60, 2102212464  ;;  %v11987_v14 = vmul.u32 %v2184_v33, %v2181_v47 }
 0x218   : > { %v2291_v59 = vshrl.u32 %v2290_v58, 23  ;;  %v1923_v11 = vshll.u32 %v11968_v50, 30  ;;  %v2207_v31 = vmul.u32 %v2205_v56, %v2181_v47  ;;  %v11990_v51 = vmul.u32 %v2205_v56, %v2182_v34 }
 0x219   : > { %v2211_v6 = vshll.u32 %v11972_v15, 16  ;;  %v9318_v20 = vadd.s32 4294967294, %v1773_v28  ;;  %v2013_v62 = vsel %vm2009_vm14, %v1993_v45, %v11724_v4  ;;  %v2069_v54 = vadd.s32 %v2068_v25, %v2059_v2 }
 0x21a   : > { %v9329_v41 = vadd.s32 4294967169, %v2291_v59  ;;  %v2015_v60 = vsel %vm2011_vm10, %v11726_v43, %v2014_v37  ;;  %v11999_v57 = vadd.s32 %v2046_v8, %v2037_v9  ;;  %v16694_v58 = vshll.u32 %v11841_v36, 16 }
 0x21b   : > { %v12006_v10 = vmul.u32 %v2183_v49, %v2182_v34  ;;  %v12011_v28 = vsel %vm11940_vm0, %v16682_v44, %v1635_v30  ;;  %v2185_v4 = vmul.u32 %v2183_v49, %v2181_v47  ;;  %v2189_v59 = vshll.u32 %v11987_v14, 16 }
 0x21c   : > { %16693 = vst [vmem:[#allocation65_spill] sm:$0xff] %v11999_v57  ;;  %v12004_v56 = vadd.s32 %v11882_v26, %v16694_v58  ;;  %v2297_v45 = vadd.s32 1, %v9329_v41  ;;  %v12015_v37 = vsub.s32 %v11915_v7, %v1923_v11  ;;  %v16325_v43 = vshll.u32 %v11990_v51, 16 }
 0x21d   : > { %vm2215_vm2 = vc.u32 %v2207_v31, %v2211_v6  ;;  %v12018_v36 = vadd.s32 %v2211_v6, %v2207_v31  ;;  %vm9319_vm14 = vcmp.lt.s32.totalorder %v9318_v20, 0  ;;  %v2016_v26 = vsel %vm2010_vm15, %v2013_v62, %v2015_v60 }
 0x21e   : > { %16695 = vst [vmem:[#allocation66_spill] sm:$0xff] %v12004_v56  ;;  %v2073_v2 = vadd.s32 1, %v2069_v54  ;;  %vm2298_vm10 = vcmp.gt.s32.totalorder %v2297_v45, 0  ;;  %vm2072_vm13 = vc.u32 %v11999_v57, %v12004_v56  ;;  %v2191_v47 = vshll.u32 %v12006_v10, 16 }
 0x21f   : > { %v2210_v25 = vmul.u32 %v2206_v46, %v2182_v34  ;;  %v2299_v9 = vsel %vm2298_vm10, %v2297_v45, 0  ;;  %vm2193_vm4 = vc.u32 %v2185_v4, %v2189_v59  ;;  %v2195_v7 = vadd.s32 %v2189_v59, %v2185_v4 }
 0x220   : > { %v2216_v8 = vsel %vm2215_vm2, 1, %v16563_v29  ;;  %v2301_v49 = vand.u32 31, %v2299_v9  ;;  %v12027_v30 = vmul.f32 %v1489_v22, %v11679_v61  ;;  %v12031_v19 = vmul.f32 %v12011_v28, %v12011_v28 }
 0x221   : > { %v1926_v11 = vsub.s32 0, %v12015_v37  ;;  %vm2219_vm15 = vc.u32 %v12018_v36, %v16325_v43  ;;  %v12038_v46 = vsel %vm9319_vm14, 0, %v9318_v20  ;;  %vm1925_vm3 = vcmp.lt.s32.totalorder %v12015_v37, 0 }
 0x222   : > { %v2070_v31 = vmul.u32 %v11759_v27, %v2016_v26  ;;  %v2188_v6 = vmul.u32 %v2184_v33, %v2182_v34  ;;  %v2074_v22 = vsel %vm2072_vm13, %v2073_v2, %v2069_v54  ;;  %v2194_v62 = vsel %vm2193_vm4, 1, %v16563_v29 }
 0x223   : > { %v2218_v41 = vadd.s32 %v2216_v8, %v2210_v25  ;;  %v12046_v60 = vsub.s32 32, %v2301_v49  ;;  %v12049_v58 = vmul.f32 -0.001358992, %v12031_v19  ;;  %v1761_v20 = vadd.s32 %v11633_v39, %v11628_v52 }
 0x224   : > { %vm2197_vm7 = vc.u32 %v2195_v7, %v2191_v47  ;;  %v2220_v4 = vsel %vm2219_vm15, 1, %v16563_v29  ;;  %v1777_v27 = vsub.s32 32, %v12038_v46  ;;  %v1781_v33 = vsub.s32 4294967266, %v12038_v46 }
 0x225   : > { %v1927_v34 = vsel %vm1925_vm3, %v1926_v11, %v12015_v37  ;;  %v12058_v59 = vadd.s32 %v2074_v22, %v2070_v31  ;;  %v2196_v45 = vadd.s32 %v2194_v62, %v2188_v6  ;;  %v2212_v26 = vshrl.u32 %v11972_v15, 16 }
 0x226   : > { %v2313_v2 = vshll.u32 %v16546_v5, %v2301_v49  ;;  %v2198_v52 = vsel %vm2197_vm7, 1, %v16563_v29  ;;  %v2222_v39 = vadd.s32 %v2220_v4, %v2218_v41  ;;  %v12063_v47 = vshrl.u32 %v2299_v9, 5 }
 0x227   : > { %v2314_v25 = vshrl.u32 %v16561_v35, %v12046_v60  ;;  %v2304_v7 = vshll.u32 %v16543_v3, %v2301_v49  ;;  %v2307_v8 = vshll.u32 %v16544_v13, %v2301_v49  ;;  %v2316_v11 = vshll.u32 %v16561_v35, %v2301_v49 }
 0x228   : > { %v2317_v31 = vshrl.u32 %v16562_v18, %v12046_v60  ;;  %v2305_v15 = vshrl.u32 %v16544_v13, %v12046_v60  ;;  %v2308_v6 = vshrl.u32 %v16545_v42, %v12046_v60  ;;  %v2310_v9 = vshll.u32 %v16545_v42, %v2301_v49 }
 0x229   : > { %v2311_v22 = vshrl.u32 %v16546_v5, %v12046_v60  ;;  %v1782_v62 = vadd.s32 127, %v1781_v33  ;;  %v2190_v41 = vshrl.u32 %v11987_v14, 16  ;;  %v2200_v4 = vadd.s32 %v2198_v52, %v2196_v45 }
 0x22a   : > { %v2315_v43 = vor.u32 %v2314_v25, %v2313_v2  ;;  %v1928_v54 = vclz %v1927_v34  ;;  %v2076_v44 = vadd.s32 536870912, %v12058_v59  ;;  %v2148_v50 = vshrl.u32 %v16543_v3, %v11811_v48 }
 0x22b   : > { %v16696_v56 = vand.u32 2147483647, %v16692_v32  ;;  %v2192_v13 = vshrl.u32 %v12006_v10, 16  ;;  %v2214_v49 = vshrl.u32 %v11990_v51, 16  ;;  %v2318_v42 = vor.u32 %v2317_v31, %v2316_v11 }
 0x22c   : > { %vm2322_vm2 = vcmp.lt.s32.totalorder %v12063_v47, 4  ;;  %v2223_v33 = vadd.s32 %v2222_v39, %v2212_v26  ;;  %v12088_v14 = vor.u32 %v2305_v15, %v2304_v7  ;;  %v12090_v45 = vor.u32 %v2308_v6, %v2307_v8 }
 0x22d   : > { %v2294_v57 = vand.u32 8388607, %v16696_v56  ;;  %v12092_v34 = vor.u32 %v2311_v22, %v2310_v9  ;;  %v2201_v2 = vadd.s32 %v2200_v4, %v2190_v41  ;;  %vm2319_vm14 = vcmp.lt.s32.totalorder %v12063_v47, 1 }
 0x22e   : > { %vm2321_vm10 = vcmp.lt.s32.totalorder %v12063_v47, 3  ;;  %v2328_v10 = vsel %vm2322_vm2, %v2315_v43, 920167782  ;;  %v1778_v48 = vshll.u32 %v11859_v24, %v12038_v46  ;;  %v1779_v56 = vshrl.u32 %v1761_v20, %v1777_v27 }
 0x22f   : > { %v2169_v26 = vsel %vm2167_vm9, %v11880_v21, 2102212464  ;;  %v2295_v52 = vor.u32 8388608, %v2294_v57  ;;  %v1783_v39 = vshll.u32 %v1782_v62, 23  ;;  %v9321_v25 = vadd.s32 4294967294, %v1928_v54 }
 0x230   : > { %v12103_v7 = vshrl.u32 %v2076_v44, 30  ;;  %v2332_v8 = vsel %vm2322_vm2, %v2318_v42, 1326507024  ;;  %v2224_v11 = vadd.s32 %v2223_v33, %v2214_v49  ;;  %vm2320_vm13 = vcmp.lt.s32.totalorder %v12063_v47, 2 }
 0x231   : > { %v2327_v24 = vsel %vm2319_vm14, %v12088_v14, %v12090_v45  ;;  %v2329_v21 = vsel %vm2321_vm10, %v12092_v34, %v2328_v10  ;;  %v2168_v44 = vsel %vm2164_vm11, %v2148_v50, %v11876_v16  ;;  %v2170_v42 = vsel %vm2166_vm12, %v11878_v38, %v2169_v26 }
 0x232   : > { %v12121_v57 = vadd.s32 %v2201_v2, %v2192_v13  ;;  %v16697_v46 = vshll.u32 %v11990_v51, 16  ;;  %v1497_v27 = vmul.f32 %v11978_v12, %v11679_v61  ;;  %v2331_v54 = vsel %vm2319_vm14, %v12090_v45, %v12092_v34 }
 0x233   : > { %v2333_v50 = vsel %vm2321_vm10, %v2315_v43, %v2332_v8  ;;  %v12136_v16 = vshll.u32 %v2295_v52, 8  ;;  %v1648_v13 = vmul.f32 -0.00019511016, %v12031_v19  ;;  %v2078_v38 = vshll.u32 %v12103_v7, 30  ;;  %v16701_v52 = vld [vmem:[#allocation63_spill] sm:$0xff] }
 0x234   : > { %v12126_v20 = vadd.s32 %v12018_v36, %v16697_v46  ;;  %v12142_v51 = vsel %vm2320_vm13, %v2327_v24, %v2329_v21  ;;  %v16698_v36 = vld [vmem:[#allocation33_spill] sm:$0xff]  ;;  %v1642_v12 = vadd.f32 0.041655596, %v12049_v58  ;;  %v1780_v31 = vor.u32 %v1779_v56, %v1778_v48 }
 0x235   : > { %v2445_v61 = vand.u32 2139095040, %v16698_v36  ;;  %v2171_v15 = vsel %vm2165_vm1, %v2168_v44, %v2170_v42  ;;  %v2228_v6 = vadd.s32 1, %v2224_v11  ;;  %v1784_v43 = vor.u32 4788187, %v1783_v39 }
 0x236   : > { %vm9322_vm9 = vcmp.lt.s32.totalorder %v9321_v25, 0  ;;  %vm2227_vm11 = vc.u32 %v12121_v57, %v12126_v20  ;;  %v12152_v9 = vsel %vm2320_vm13, %v2331_v54, %v2333_v50  ;;  %v1498_v22 = vadd.f32 1.0, %v1497_v27 }
 0x237   : > { %v12155_v62 = vand.u32 3, %v11957_v17  ;;  %v2336_v58 = vand.u32 65535, %v12136_v16  ;;  %v2361_v41 = vshrl.u32 %v12142_v51, 16  ;;  %v12162_v63 = vsel %vm11940_vm0, 0, %v11964_v55 }
 0x238   : > { %16699 = vst [vmem:[#allocation67_spill] sm:$0xff] %v12162_v63  ;;  %v12165_v4 = vsub.s32 %v12058_v59, %v2078_v38  ;;  %v2225_v49 = vmul.u32 %v11917_v40, %v2171_v15  ;;  %v2446_v33 = vshrl.u32 %v2445_v61, 23  ;;  %v12169_v2 = vadd.f32 1.0, %v12027_v30  ;;  %v16703_v59 = vld [vmem:[#allocation28_spill] sm:$0xff] }
 0x239   : > { %v12171_v17 = vsel %vm9322_vm9, 0, %v9321_v25  ;;  %v2229_v10 = vsel %vm2227_vm11, %v2228_v6, %v2224_v11  ;;  %v2339_v48 = vshrl.u32 %v12152_v9, 16  ;;  %v1643_v56 = vmul.f32 %v1642_v12, %v12031_v19 }
 0x23a   : > { %16700 = vst [vmem:[#allocation68_spill] sm:$0xff] %v12169_v2  ;;  %v1649_v26 = vadd.f32 0.008332121, %v1648_v13  ;;  %v1785_v1 = vand.u32 2147483647, %v1784_v43  ;;  %v1787_v55 = vcvt.s32.f32 %v1780_v31  ;;  %v12176_v39 = vmul.f32 %v1498_v22, %v16701_v52 }
 0x23b   : > { %vm1669_vm12 = vcmp.lt.s32.totalorder %v16703_v59, 0  ;;  %v2337_v40 = vshrl.u32 %v12136_v16, 16  ;;  %v2360_v30 = vand.u32 65535, %v12142_v51  ;;  %v12181_v8 = vmul.u32 %v2361_v41, %v2336_v58 }
 0x23c   : > { %16702 = vst [vmem:[#allocation63_spill] sm:$0xff] %v12176_v39  ;;  %v1936_v25 = vsub.s32 4294967266, %v12171_v17  ;;  %v2081_v11 = vsub.s32 0, %v12165_v4  ;;  %v12185_v24 = vadd.s32 %v2229_v10, %v2225_v49  ;;  %v9332_v21 = vadd.s32 4294967169, %v2446_v33 }
 0x23d   : > { %v16333_v44 = vxor.u32 2147483648, %v12169_v2  ;;  %vm2080_vm1 = vcmp.lt.s32.totalorder %v12165_v4, 0  ;;  %v2338_v42 = vand.u32 65535, %v12152_v9  ;;  %v12190_v46 = vmul.u32 %v2339_v48, %v2336_v58 }
 0x23e   : > { %vm1507_vm0 = vcmp.eq.s32.totalorder %v12155_v62, 2  ;;  %v1644_v27 = vadd.f32 -0.4999988, %v1643_v56  ;;  %v1650_v54 = vmul.f32 %v1649_v26, %v12031_v19  ;;  %v1788_v50 = vmul.f32 %v1787_v55, %v1785_v1 }
 0x23f   : > { %v1916_v13 = vadd.s32 %v11832_v0, %v11827_v23  ;;  %v16704_v38 = vand.u32 2147483647, %v16703_v59  ;;  %v1932_v61 = vsub.s32 32, %v12171_v17  ;;  %v2362_v12 = vmul.u32 %v2360_v30, %v2336_v58 }
 0x240   : > { %v12203_v31 = vmul.u32 %v2360_v30, %v2337_v40  ;;  %v2366_v15 = vshll.u32 %v12181_v8, 16  ;;  %v1937_v6 = vadd.s32 127, %v1936_v25  ;;  %v2082_v43 = vsel %vm2080_vm1, %v2081_v11, %v12165_v4 }
 0x241   : > { %vm12198_vm4 = vcmp.le.f32.partialorder %v16704_v38, 0.7853982  ;;  %v2231_v9 = vadd.s32 536870912, %v12185_v24  ;;  %v2452_v22 = vadd.s32 1, %v9332_v21  ;;  %v1656_v23 = vadd.s32 3, %v12162_v63  ;;  %v16714_v63 = vld [vmem:[#allocation26_spill] sm:$0xff] }
 0x242   : > { %v2340_v0 = vmul.u32 %v2338_v42, %v2336_v58  ;;  %v12209_v49 = vmul.u32 %v2338_v42, %v2337_v40  ;;  %v2344_v33 = vshll.u32 %v12190_v46, 16  ;;  %vm1504_vm15 = vcmp.eq.s32.totalorder %v12155_v62, 0 }
 0x243   : > { %v1645_v10 = vmul.f32 %v1644_v27, %v12031_v19  ;;  %v1651_v56 = vadd.f32 -0.16666654, %v1650_v54  ;;  %v1789_v26 = vxor.u32 2147483648, %v1788_v50  ;;  %v1933_v1 = vshll.u32 %v12015_v37, %v12171_v17 }
 0x244   : > { %v2083_v55 = vclz %v2082_v43  ;;  %v2368_v52 = vshll.u32 %v12203_v31, 16  ;;  %vm2370_vm3 = vc.u32 %v2362_v12, %v2366_v15  ;;  %v12217_v30 = vadd.s32 %v2366_v15, %v2362_v12 }
 0x245   : > { %v1934_v58 = vshrl.u32 %v1916_v13, %v1932_v61  ;;  %v1938_v25 = vshll.u32 %v1937_v6, 23  ;;  %v12219_v11 = vshrl.u32 %v2231_v9, 30  ;;  %vm2453_vm7 = vcmp.gt.s32.totalorder %v2452_v22, 0 }
 0x246   : > { %v2346_v21 = vshll.u32 %v12209_v49, 16  ;;  %vm2348_vm9 = vc.u32 %v2340_v0, %v2344_v33  ;;  %v2350_v42 = vadd.s32 %v2344_v33, %v2340_v0  ;;  %v2365_v27 = vmul.u32 %v2361_v41, %v2337_v40 }
 0x247   : > { %v16334_v54 = vxor.u32 2147483648, %v12176_v39  ;;  %v1652_v37 = vmul.f32 %v1651_v56, %v12031_v19  ;;  %v1790_v17 = vsel %vm1669_vm12, %v1789_v26, %v1788_v50  ;;  %v2371_v38 = vsel %vm2370_vm3, 1, %v16563_v29 }
 0x248   : > { %v9324_v12 = vadd.s32 4294967294, %v2083_v55  ;;  %v2343_v13 = vmul.u32 %v2339_v48, %v2337_v40  ;;  %vm2374_vm11 = vc.u32 %v12217_v30, %v2368_v52  ;;  %v2454_v61 = vsel %vm2453_vm7, %v2452_v22, 0 }
 0x249   : > { %v1935_v15 = vor.u32 %v1934_v58, %v1933_v1  ;;  %v1939_v6 = vor.u32 4788187, %v1938_v25  ;;  %v2233_v41 = vshll.u32 %v12219_v11, 30  ;;  %v2349_v43 = vsel %vm2348_vm9, 1, %v16563_v29 }
 0x24a   : > { %v12237_v19 = vsel %vm1507_vm0, %v16333_v44, %v12176_v39  ;;  %v12239_v50 = vadd.f32 1.0, %v1645_v10  ;;  %vm2352_vm1 = vc.u32 %v2350_v42, %v2346_v21  ;;  %v2373_v48 = vadd.s32 %v2371_v38, %v2365_v27 }
 0x24b   : > { %v1653_v40 = vadd.f32 1.0, %v1652_v37  ;;  %v12244_v9 = vsel %vm12198_vm4, %v16703_v59, %v1790_v17  ;;  %v2375_v22 = vsel %vm2374_vm11, 1, %v16563_v29  ;;  %v2456_v0 = vand.u32 31, %v2454_v61 }
 0x24c   : > { %16707 = vst [vmem:[#allocation69_spill] sm:$0xff] %v12239_v50  ;;  %v12247_v33 = vand.u32 3, %v1656_v23  ;;  %v1791_v56 = vsub.s32 4, %v11789_v53  ;;  %vm9325_vm3 = vcmp.lt.s32.totalorder %v9324_v12, 0  ;;  %v2351_v26 = vadd.s32 %v2349_v43, %v2343_v13 }
 0x24d   : > { %v1940_v1 = vand.u32 2147483647, %v1939_v6  ;;  %v1942_v10 = vcvt.s32.f32 %v1935_v15  ;;  %v12251_v55 = vsub.s32 %v12185_v24, %v2233_v41  ;;  %v2353_v58 = vsel %vm2352_vm1, 1, %v16563_v29 }
 0x24e   : > { %v12259_v25 = vsel %vm1504_vm15, %v12169_v2, %v16334_v54  ;;  %v12263_v23 = vmul.f32 %v12244_v9, %v12244_v9  ;;  %v2367_v21 = vshrl.u32 %v12181_v8, 16  ;;  %v2377_v42 = vadd.s32 %v2375_v22, %v2373_v48 }
 0x24f   : > { %v12267_v27 = vmul.f32 %v1653_v40, %v12011_v28  ;;  %v12270_v37 = vsel %vm9325_vm3, 0, %v9324_v12  ;;  %v12272_v17 = vsub.s32 32, %v2456_v0  ;;  %v12277_v38 = vsel %vm1669_vm12, %v1791_v56, %v11789_v53 }
 0x250   : > { %v12280_v13 = vmul.f32 -0.001358992, %v12263_v23  ;;  %v2345_v8 = vshrl.u32 %v12190_v46, 16  ;;  %v2355_v15 = vadd.s32 %v2353_v58, %v2351_v26  ;;  %v12283_v6 = vmul.f32 %v1942_v10, %v1940_v1  ;;  %v16709_v58 = vld [vmem:[#allocation29_spill] sm:$0xff] }
 0x251   : > { %16708 = vst [vmem:[#allocation70_spill] sm:$0xff] %v12267_v27  ;;  %v2236_v28 = vsub.s32 0, %v12251_v55  ;;  %v2303_v12 = vshrl.u32 %v16543_v3, %v12046_v60  ;;  %v16335_v41 = vand.u32 2147483647, %v16698_v36  ;;  %v2091_v43 = vsub.s32 4294967266, %v12270_v37 }
 0x252   : > { %vm2235_vm12 = vcmp.lt.s32.totalorder %v12251_v55, 0  ;;  %v2369_v53 = vshrl.u32 %v12203_v31, 16  ;;  %v2378_v48 = vadd.s32 %v2377_v42, %v2367_v21  ;;  %v2324_v46 = vsel %vm2322_vm2, %v12092_v34, 2102212464 }
 0x253   : > { %v2347_v40 = vshrl.u32 %v12209_v49, 16  ;;  %v2471_v22 = vshll.u32 %v16561_v35, %v2456_v0  ;;  %v2472_v60 = vshrl.u32 %v16562_v18, %v12272_v17  ;;  %v2356_v56 = vadd.s32 %v2355_v15, %v2345_v8 }
 0x254   : > { %v12299_v26 = vshrl.u32 %v2454_v61, 5  ;;  %v2468_v1 = vshll.u32 %v16546_v5, %v2456_v0  ;;  %v2469_v10 = vshrl.u32 %v16561_v35, %v12272_v17  ;;  %vm1824_vm0 = vcmp.lt.s32.totalorder %v16709_v58, 0 }
 0x255   : > { %v2237_v21 = vsel %vm2235_vm12, %v2236_v28, %v12251_v55  ;;  %v2323_v34 = vsel %vm2319_vm14, %v2303_v12, %v12088_v14  ;;  %v2449_v49 = vand.u32 8388607, %v16335_v41  ;;  %v16710_v42 = vmov 2475754826  }
 0x256   : > { %v2462_v8 = vshll.u32 %v16710_v42, %v2456_v0  ;;  %vm1503_vm2 = vcmp.lt.s32.totalorder %v12155_v62, 2  ;;  %v2379_v61 = vadd.s32 %v2378_v48, %v2369_v53  ;;  %v16711_v15 = vmov 2131351028  }
 0x257   : > { %v2463_v44 = vshrl.u32 %v16711_v15, %v12272_v17  ;;  %v2465_v54 = vshll.u32 %v16711_v15, %v2456_v0  ;;  %v2466_v28 = vshrl.u32 %v16546_v5, %v12272_v17  ;;  %v2325_v14 = vsel %vm2321_vm10, %v12090_v45, %v2324_v46  ;;  %v16712_v45 = vld [vmem:[#allocation65_spill] sm:$0xff] }
 0x258   : > { %v2459_v12 = vshll.u32 %v16543_v3, %v2456_v0  ;;  %v2460_v41 = vshrl.u32 %v16710_v42, %v12272_v17  ;;  %v2473_v24 = vor.u32 %v2472_v60, %v2471_v22  ;;  %vm1662_vm14 = vcmp.eq.s32.totalorder %v12247_v33, 2  ;;  %v16713_v0 = vld [vmem:[#allocation66_spill] sm:$0xff] }
 0x259   : > { %v12325_v53 = vadd.s32 %v2356_v56, %v2347_v40  ;;  %v12330_v48 = vadd.s32 %v12217_v30, %v2368_v52  ;;  %v2470_v2 = vor.u32 %v2469_v10, %v2468_v1  ;;  %vm2477_vm15 = vcmp.lt.s32.totalorder %v12299_v26, 4 }
 0x25a   : > { %vm1659_vm10 = vcmp.eq.s32.totalorder %v12247_v33, 0  ;;  %v2071_v46 = vadd.s32 %v16713_v0, %v16712_v45  ;;  %v2087_v39 = vsub.s32 32, %v12270_v37  ;;  %v2092_v22 = vadd.s32 127, %v2091_v43 }
 0x25b   : > { %v2238_v60 = vclz %v2237_v21  ;;  %vm16352_vm7 = vweird.f32 %v16714_v63  ;;  %v2326_v31 = vsel %vm2320_vm13, %v2323_v34, %v2325_v14  ;;  %v2383_v40 = vadd.s32 1, %v2379_v61 }
 0x25c   : > { %v12340_v52 = vor.u32 %v2463_v44, %v2462_v8  ;;  %v12342_v30 = vor.u32 %v2466_v28, %v2465_v54  ;;  %v12344_v56 = vor.u32 %v2460_v41, %v2459_v12  ;;  %vm2474_vm9 = vcmp.lt.s32.totalorder %v12299_v26, 1 }
 0x25d   : > { %vm2476_vm11 = vcmp.lt.s32.totalorder %v12299_v26, 3  ;;  %v2487_v43 = vsel %vm2477_vm15, %v2473_v24, 1326507024  ;;  %vm1658_vm1 = vcmp.lt.s32.totalorder %v12247_v33, 2  ;;  %v1944_v1 = vxor.u32 2147483648, %v12283_v6 }
 0x25e   : > { %vm2382_vm13 = vc.u32 %v12325_v53, %v12330_v48  ;;  %v2450_v47 = vor.u32 8388608, %v2449_v49  ;;  %v2483_v44 = vsel %vm2477_vm15, %v2470_v2, 920167782  ;;  %v1803_v54 = vmul.f32 -0.00019511016, %v12263_v23 }
 0x25f   : > { %v2088_v41 = vshll.u32 %v12165_v4, %v12270_v37  ;;  %v2089_v10 = vshrl.u32 %v2071_v46, %v2087_v39  ;;  %v9327_v21 = vadd.s32 4294967294, %v2238_v60  ;;  %v2380_v24 = vmul.u32 %v12136_v16, %v2326_v31 }
 0x260   : > { %vm2475_vm3 = vcmp.lt.s32.totalorder %v12299_v26, 2  ;;  %v2486_v34 = vsel %vm2474_vm9, %v12340_v52, %v12342_v30  ;;  %v2488_v49 = vsel %vm2476_vm11, %v2470_v2, %v2487_v43  ;;  %v2093_v8 = vshll.u32 %v2092_v22, 23 }
 0x261   : > { %v2384_v28 = vsel %vm2382_vm13, %v2383_v40, %v2379_v61  ;;  %v2482_v4 = vsel %vm2474_vm9, %v12344_v56, %v12340_v52  ;;  %v2484_v16 = vsel %vm2476_vm11, %v12342_v30, %v2483_v44  ;;  %v16341_v39 = vxor.u32 2147483648, %v12267_v27 }
 0x262   : > { %v16715_v37 = vand.u32 2147483647, %v16709_v58  ;;  %v1945_v2 = vsel %vm1824_vm0, %v1944_v1, %v12283_v6  ;;  %v12384_v61 = vshll.u32 %v2450_v47, 8  ;;  %v1510_v12 = vsel %vm1503_vm2, %v12259_v25, %v12237_v19 }
 0x263   : > { %v1797_v45 = vadd.f32 0.041655596, %v12280_v13  ;;  %vm9328_vm13 = vcmp.lt.s32.totalorder %v9327_v21, 0  ;;  %v12393_v0 = vsel %vm2475_vm3, %v2486_v34, %v2488_v49  ;;  %v12398_v46 = vsel %vm12198_vm4, 0, %v12277_v38 }
 0x264   : > { %vm12377_vm12 = vcmp.le.f32.partialorder %v16715_v37, 0.7853982  ;;  %16718 = vst [vmem:[#allocation65_spill] sm:$0xff] %v12398_v46  ;;  %v1804_v6 = vadd.f32 0.008332121, %v1803_v54  ;;  %v12400_v22 = vadd.s32 %v2384_v28, %v2380_v24  ;;  %v12404_v60 = vsel %vm2475_vm3, %v2482_v4, %v2484_v16 }
 0x265   : > { %v16719_v62 = vxor.u32 2147483648, %v12239_v50  ;;  %v12414_v25 = vsel %vm12377_vm12, %v16709_v58, %v1945_v2  ;;  %v2090_v51 = vor.u32 %v2089_v10, %v2088_v41  ;;  %v2094_v38 = vor.u32 4788187, %v2093_v8  ;;  %v16721_v10 = vld [vmem:[#allocation57_spill] sm:$0xff] }
 0x266   : > { %v1661_v13 = vsel %vm1659_vm10, %v12239_v50, %v16341_v39  ;;  %v12421_v31 = vsel %vm9328_vm13, 0, %v9327_v21  ;;  %v2491_v40 = vand.u32 65535, %v12384_v61  ;;  %v2494_v43 = vshrl.u32 %v12393_v0, 16 }
 0x267   : > { %v1664_v19 = vsel %vm1662_vm14, %v16719_v62, %v12267_v27  ;;  %v12427_v1 = vsel %vm16352_vm7, nan, %v1510_v12  ;;  %v1798_v47 = vmul.f32 %v1797_v45, %v12263_v23  ;;  %v1811_v44 = vadd.s32 3, %v12398_v46  ;;  %v16722_v12 = vld [vmem:[#allocation34_spill] sm:$0xff] }
 0x268   : > { %16720 = vst [vmem:[#allocation66_spill] sm:$0xff] %v12427_v1  ;;  %v2516_v54 = vshrl.u32 %v12404_v60, 16  ;;  %v1805_v41 = vmul.f32 %v1804_v6, %v12263_v23  ;;  %v1946_v24 = vsub.s32 4, %v16721_v10  ;;  %v12436_v21 = vmul.f32 %v12414_v25, %v12414_v25 }
 0x269   : > { %v2386_v34 = vadd.s32 536870912, %v12400_v22  ;;  %v12441_v49 = vsel %vm1658_vm1, %v1661_v13, %v1664_v19  ;;  %v2095_v8 = vand.u32 2147483647, %v2094_v38  ;;  %v2097_v28 = vcvt.s32.f32 %v2090_v51 }
 0x26a   : > { %v2246_v4 = vsub.s32 4294967266, %v12421_v31  ;;  %v2492_v16 = vshrl.u32 %v12384_v61, 16  ;;  %v2493_v37 = vand.u32 65535, %v12393_v0  ;;  %v12446_v2 = vmul.u32 %v2494_v43, %v2491_v40 }
 0x26b   : > { %v2600_v45 = vand.u32 2139095040, %v16722_v12  ;;  %v1799_v6 = vadd.f32 -0.4999988, %v1798_v47  ;;  %v12449_v62 = vand.u32 3, %v1811_v44  ;;  %v2515_v39 = vand.u32 65535, %v12404_v60 }
 0x26c   : > { %v12452_v33 = vmul.u32 %v2516_v54, %v2491_v40  ;;  %v1806_v19 = vadd.f32 -0.16666654, %v1805_v41  ;;  %v1947_v51 = vsel %vm1824_vm0, %v1946_v24, %v16721_v10  ;;  %v1958_v38 = vmul.f32 -0.00019511016, %v12436_v21 }
 0x26d   : > { %v12458_v13 = vshrl.u32 %v2386_v34, 30  ;;  %v2098_v0 = vmul.f32 %v2097_v28, %v2095_v8  ;;  %v2226_v1 = vadd.s32 %v12126_v20, %v12121_v57  ;;  %v2242_v47 = vsub.s32 32, %v12421_v31  ;;  %v16724_v20 = vld [vmem:[#allocation30_spill] sm:$0xff] }
 0x26e   : > { %v2247_v44 = vadd.s32 127, %v2246_v4  ;;  %v2495_v63 = vmul.u32 %v2493_v37, %v2491_v40  ;;  %v12463_v60 = vmul.u32 %v2493_v37, %v2492_v16  ;;  %v2499_v41 = vshll.u32 %v12446_v2, 16 }
 0x26f   : > { %16723 = vst [vmem:[#allocation57_spill] sm:$0xff] %v12458_v13  ;;  %v2601_v50 = vshrl.u32 %v2600_v45, 23  ;;  %v1800_v27 = vmul.f32 %v1799_v6, %v12263_v23  ;;  %v2517_v10 = vmul.u32 %v2515_v39, %v2491_v40  ;;  %v12467_v24 = vmul.u32 %v2515_v39, %v2492_v16 }
 0x270   : > { %v2521_v34 = vshll.u32 %v12452_v33, 16  ;;  %v1807_v8 = vmul.f32 %v1806_v19, %v12263_v23  ;;  %v1951_v57 = vmul.f32 -0.001358992, %v12436_v21  ;;  %vm1979_vm4 = vcmp.lt.s32.totalorder %v16724_v20, 0  ;;  %v16727_v19 = vld [vmem:[#allocation27_spill] sm:$0xff] }
 0x271   : > { %v2388_v28 = vshll.u32 %v12458_v13, 30  ;;  %v1959_v4 = vadd.f32 0.008332121, %v1958_v38  ;;  %v2099_v37 = vxor.u32 2147483648, %v2098_v0  ;;  %v2243_v45 = vshll.u32 %v12251_v55, %v12421_v31 }
 0x272   : > { %v2244_v46 = vshrl.u32 %v2226_v1, %v2242_v47  ;;  %v2248_v6 = vshll.u32 %v2247_v44, 23  ;;  %v2501_v39 = vshll.u32 %v12463_v60, 16  ;;  %vm12477_vm0 = vc.u32 %v2495_v63, %v2499_v41 }
 0x273   : > { %v9335_v23 = vadd.s32 4294967169, %v2601_v50  ;;  %vm16382_vm2 = vweird.f32 %v16727_v19  ;;  %v2505_v36 = vadd.s32 %v2499_v41, %v2495_v63  ;;  %v2523_v32 = vshll.u32 %v12467_v24, 16 }
 0x274   : > { %vm2525_vm14 = vc.u32 %v2517_v10, %v2521_v34  ;;  %v12483_v38 = vadd.s32 %v2521_v34, %v2517_v10  ;;  %v12485_v13 = vadd.f32 1.0, %v1800_v27  ;;  %v1808_v55 = vadd.f32 1.0, %v1807_v8 }
 0x275   : > { %v16729_v31 = vand.u32 2147483647, %v16724_v20  ;;  %v12494_v47 = vsub.s32 %v12400_v22, %v2388_v28  ;;  %vm1814_vm1 = vcmp.eq.s32.totalorder %v12449_v62, 0  ;;  %v1952_v63 = vadd.f32 0.041655596, %v1951_v57 }
 0x276   : > { %16728 = vst [vmem:[#allocation71_spill] sm:$0xff] %v12485_v13  ;;  %v2100_v50 = vsel %vm1979_vm4, %v2099_v37, %v2098_v0  ;;  %v2498_v44 = vmul.u32 %v2494_v43, %v2492_v16  ;;  %v2520_v41 = vmul.u32 %v2516_v54, %v2492_v16  ;;  %v1960_v27 = vmul.f32 %v1959_v4, %v12436_v21 }
 0x277   : > { %vm12489_vm10 = vcmp.le.f32.partialorder %v16729_v31, 0.7853982  ;;  %v2504_v10 = vsel %vm12477_vm0, 1, %v16563_v29  ;;  %v2526_v34 = vsel %vm2525_vm14, 1, %v16563_v29  ;;  %v2607_v8 = vadd.s32 1, %v9335_v23 }
 0x278   : > { %v2245_v31 = vor.u32 %v2244_v46, %v2243_v45  ;;  %v2249_v22 = vor.u32 4788187, %v2248_v6  ;;  %vm2507_vm13 = vc.u32 %v2505_v36, %v2501_v39  ;;  %vm2529_vm7 = vc.u32 %v12483_v38, %v2523_v32 }
 0x279   : > { %v12508_v0 = vmul.f32 %v1808_v55, %v12244_v9  ;;  %v12512_v43 = vsel %vm12377_vm12, 0, %v1947_v51  ;;  %v12517_v54 = vsel %vm12489_vm10, %v16724_v20, %v2100_v50  ;;  %v2391_v46 = vsub.s32 0, %v12494_v47 }
 0x27a   : > { %16733 = vst [vmem:[#allocation73_spill] sm:$0xff] %v12512_v43  ;;  %v1953_v36 = vmul.f32 %v1952_v63, %v12436_v21  ;;  %vm2390_vm0 = vcmp.lt.s32.totalorder %v12494_v47, 0  ;;  %v2506_v16 = vadd.s32 %v2504_v10, %v2498_v44  ;;  %v2528_v57 = vadd.s32 %v2526_v34, %v2520_v41 }
 0x27b   : > { %16732 = vst [vmem:[#allocation72_spill] sm:$0xff] %v12508_v0  ;;  %v1961_v28 = vadd.f32 -0.16666654, %v1960_v27  ;;  %v2508_v9 = vsel %vm2507_vm13, 1, %v16563_v29  ;;  %v2530_v14 = vsel %vm2529_vm7, 1, %v16563_v29  ;;  %vm2608_vm12 = vcmp.gt.s32.totalorder %v2607_v8, 0 }
 0x27c   : > { %v16353_v51 = vxor.u32 2147483648, %v12485_v13  ;;  %v12527_v4 = vmul.f32 %v12517_v54, %v12517_v54  ;;  %v2250_v37 = vand.u32 2147483647, %v2249_v22  ;;  %v2252_v45 = vcvt.s32.f32 %v2245_v31 }
 0x27d   : > { %v16354_v6 = vxor.u32 2147483648, %v12508_v0  ;;  %vm1817_vm14 = vcmp.eq.s32.totalorder %v12449_v62, 2  ;;  %v2392_v39 = vsel %vm2390_vm0, %v2391_v46, %v12494_v47  ;;  %v2500_v40 = vshrl.u32 %v12446_v2, 16 }
 0x27e   : > { %v2510_v23 = vadd.s32 %v2508_v9, %v2506_v16  ;;  %v2522_v55 = vshrl.u32 %v12452_v33, 16  ;;  %v2532_v63 = vadd.s32 %v2530_v14, %v2528_v57  ;;  %v2609_v50 = vsel %vm2608_vm12, %v2607_v8, 0 }
 0x27f   : > { %v12537_v44 = vsel %vm16382_vm2, nan, %v12441_v49  ;;  %v1954_v41 = vadd.f32 -0.4999988, %v1953_v36  ;;  %v1962_v27 = vmul.f32 %v1961_v28, %v12436_v21  ;;  %v1966_v10 = vadd.s32 3, %v12512_v43 }
 0x280   : > { %16734 = vst [vmem:[#allocation74_spill] sm:$0xff] %v12537_v44  ;;  %vm1813_vm7 = vcmp.lt.s32.totalorder %v12449_v62, 2  ;;  %v1819_v2 = vsel %vm1817_vm14, %v16353_v51, %v12508_v0  ;;  %v2113_v33 = vmul.f32 -0.00019511016, %v12527_v4  ;;  %v2253_v34 = vmul.f32 %v2252_v45, %v2250_v37 }
 0x281   : > { %v1816_v49 = vsel %vm1814_vm1, %v12485_v13, %v16354_v6  ;;  %v2393_v8 = vclz %v2392_v39  ;;  %v2458_v31 = vshrl.u32 %v16543_v3, %v12272_v17  ;;  %v2611_v22 = vand.u32 31, %v2609_v50 }
 0x282   : > { %v2502_v46 = vshrl.u32 %v12463_v60, 16  ;;  %v2511_v36 = vadd.s32 %v2510_v23, %v2500_v40  ;;  %v2524_v16 = vshrl.u32 %v12467_v24, 16  ;;  %v2533_v57 = vadd.s32 %v2532_v63, %v2522_v55  ;;  %v16735_v40 = vld [vmem:[#allocation31_spill] sm:$0xff] }
 0x283   : > { %v1955_v28 = vmul.f32 %v1954_v41, %v12436_v21  ;;  %v1963_v9 = vadd.f32 1.0, %v1962_v27  ;;  %v12556_v14 = vand.u32 3, %v1966_v10  ;;  %v2479_v37 = vsel %vm2477_vm15, %v12342_v30, 2102212464 }
 0x284   : > { %v12563_v45 = vsel %vm1813_vm7, %v1816_v49, %v1819_v2  ;;  %v2106_v17 = vmul.f32 -0.001358992, %v12527_v4  ;;  %v2114_v60 = vadd.f32 0.008332121, %v2113_v33  ;;  %v2254_v39 = vxor.u32 2147483648, %v2253_v34 }
 0x285   : > { %vm2134_vm1 = vcmp.lt.s32.totalorder %v16735_v40, 0  ;;  %v9330_v23 = vadd.s32 4294967294, %v2393_v8  ;;  %v2478_v21 = vsel %vm2474_vm9, %v2458_v31, %v12344_v56  ;;  %v12570_v55 = vsub.s32 32, %v2611_v22 }
 0x286   : > { %v2480_v30 = vsel %vm2476_vm11, %v12340_v52, %v2479_v37  ;;  %v12575_v62 = vadd.s32 %v2511_v36, %v2502_v46  ;;  %v12580_v63 = vadd.s32 %v12483_v38, %v2523_v32  ;;  %v2534_v41 = vadd.s32 %v2533_v57, %v2524_v16  ;;  %v16741_v36 = vld [vmem:[#allocation22_spill] sm:$0xff] }
 0x287   : > { %v12582_v27 = vadd.f32 1.0, %v1955_v28  ;;  %v12585_v10 = vmul.f32 %v1963_v9, %v12414_v25  ;;  %v2101_v56 = vsub.s32 4, %v12103_v7  ;;  %v16738_v2 = vand.u32 2147483647, %v16735_v40 }
 0x288   : > { %v2107_v52 = vadd.f32 0.041655596, %v2106_v17  ;;  %v2115_v24 = vmul.f32 %v2114_v60, %v12527_v4  ;;  %v2255_v32 = vsel %vm2134_vm1, %v2254_v39, %v2253_v34  ;;  %v16356_v38 = vand.u32 2147483647, %v16722_v12 }
 0x289   : > { %16736 = vst [vmem:[#allocation75_spill] sm:$0xff] %v12582_v27  ;;  %vm12590_vm15 = vcmp.le.f32.partialorder %v16738_v2, 0.7853982  ;;  %vm9331_vm9 = vcmp.lt.s32.totalorder %v9330_v23, 0  ;;  %v2481_v25 = vsel %vm2475_vm3, %v2478_v21, %v2480_v30  ;;  %v2623_v49 = vshll.u32 %v16546_v5, %v2611_v22 }
 0x28a   : > { %16737 = vst [vmem:[#allocation76_spill] sm:$0xff] %v12585_v10  ;;  %v2624_v8 = vshrl.u32 %v16561_v35, %v12570_v55  ;;  %vm2537_vm11 = vc.u32 %v12575_v62, %v12580_v63  ;;  %v2538_v31 = vadd.s32 1, %v2534_v41  ;;  %v12605_v46 = vshrl.u32 %v2609_v50, 5 }
 0x28b   : > { %v2755_v16 = vand.u32 2139095040, %v16741_v36  ;;  %v2614_v34 = vshll.u32 %v16543_v3, %v2611_v22  ;;  %v2617_v57 = vshll.u32 %v16710_v42, %v2611_v22  ;;  %v2626_v26 = vshll.u32 %v16561_v35, %v2611_v22 }
 0x28c   : > { %v2627_v28 = vshrl.u32 %v16562_v18, %v12570_v55  ;;  %vm1969_vm3 = vcmp.eq.s32.totalorder %v12556_v14, 0  ;;  %vm1972_vm13 = vcmp.eq.s32.totalorder %v12556_v14, 2  ;;  %v2615_v9 = vshrl.u32 %v16710_v42, %v12570_v55 }
 0x28d   : > { %v2618_v50 = vshrl.u32 %v16711_v15, %v12570_v55  ;;  %v2620_v37 = vshll.u32 %v16711_v15, %v2611_v22  ;;  %v2621_v17 = vshrl.u32 %v16546_v5, %v12570_v55  ;;  %v2102_v39 = vsel %vm1979_vm4, %v2101_v56, %v12103_v7 }
 0x28e   : > { %v2108_v21 = vmul.f32 %v2107_v52, %v12527_v4  ;;  %v2625_v30 = vor.u32 %v2624_v8, %v2623_v49  ;;  %v12628_v2 = vsel %vm9331_vm9, 0, %v9330_v23  ;;  %v2535_v51 = vmul.u32 %v12384_v61, %v2481_v25 }
 0x28f   : > { %v2604_v22 = vand.u32 8388607, %v16356_v38  ;;  %vm2632_vm0 = vcmp.lt.s32.totalorder %v12605_v46, 4  ;;  %v2116_v6 = vadd.f32 -0.16666654, %v2115_v24  ;;  %v12637_v60 = vsel %vm12590_vm15, %v16735_v40, %v2255_v32 }
 0x290   : > { %v2539_v7 = vsel %vm2537_vm11, %v2538_v31, %v2534_v41  ;;  %v2628_v56 = vor.u32 %v2627_v28, %v2626_v26  ;;  %vm16380_vm4 = vweird.f32 %v16703_v59  ;;  %vm1968_vm12 = vcmp.lt.s32.totalorder %v12556_v14, 2 }
 0x291   : > { %v12644_v61 = vor.u32 %v2615_v9, %v2614_v34  ;;  %v12646_v23 = vor.u32 %v2618_v50, %v2617_v57  ;;  %v12648_v52 = vor.u32 %v2621_v17, %v2620_v37  ;;  %v2756_v24 = vshrl.u32 %v2755_v16, 23 }
 0x292   : > { %v2401_v25 = vsub.s32 4294967266, %v12628_v2  ;;  %vm2629_vm14 = vcmp.lt.s32.totalorder %v12605_v46, 1  ;;  %vm2631_vm7 = vcmp.lt.s32.totalorder %v12605_v46, 3  ;;  %v2638_v41 = vsel %vm2632_vm0, %v2625_v30, 920167782 }
 0x293   : > { %v16355_v32 = vxor.u32 2147483648, %v12585_v10  ;;  %v12658_v49 = vsel %vm12489_vm10, 0, %v2102_v39  ;;  %v2540_v8 = vadd.s32 %v2539_v7, %v2535_v51  ;;  %v2605_v31 = vor.u32 8388608, %v2604_v22 }
 0x294   : > { %16742 = vst [vmem:[#allocation77_spill] sm:$0xff] %v12658_v49  ;;  %v2109_v34 = vadd.f32 -0.4999988, %v2108_v21  ;;  %v2117_v16 = vmul.f32 %v2116_v6, %v12527_v4  ;;  %v12663_v57 = vmul.f32 %v12637_v60, %v12637_v60  ;;  %v2642_v26 = vsel %vm2632_vm0, %v2628_v56, 1326507024 }
 0x295   : > { %vm2630_vm9 = vcmp.lt.s32.totalorder %v12605_v46, 2  ;;  %v2637_v1 = vsel %vm2629_vm14, %v12644_v61, %v12646_v23  ;;  %v2639_v51 = vsel %vm2631_vm7, %v12648_v52, %v2638_v41  ;;  %v9338_v28 = vadd.s32 4294967169, %v2756_v24 }
 0x296   : > { %v2121_v6 = vadd.s32 3, %v12658_v49  ;;  %v2381_v9 = vadd.s32 %v12330_v48, %v12325_v53  ;;  %v2397_v50 = vsub.s32 32, %v12628_v2  ;;  %v2402_v37 = vadd.s32 127, %v2401_v25 }
 0x297   : > { %v2541_v17 = vadd.s32 536870912, %v2540_v8  ;;  %v2641_v39 = vsel %vm2629_vm14, %v12646_v23, %v12648_v52  ;;  %v2643_v21 = vsel %vm2631_vm7, %v2625_v30, %v2642_v26  ;;  %v12685_v22 = vshll.u32 %v2605_v31, 8 }
 0x298   : > { %v1971_v53 = vsel %vm1969_vm3, %v12582_v27, %v16355_v32  ;;  %v16743_v48 = vxor.u32 2147483648, %v12582_v27  ;;  %v2261_v56 = vmul.f32 -0.001358992, %v12663_v57  ;;  %v12700_v24 = vsel %vm2630_vm9, %v2637_v1, %v2639_v51 }
 0x299   : > { %v2110_v30 = vmul.f32 %v2109_v34, %v12527_v4  ;;  %v2118_v25 = vadd.f32 1.0, %v2117_v16  ;;  %v2268_v41 = vmul.f32 -0.00019511016, %v12663_v57  ;;  %v2762_v31 = vadd.s32 1, %v9338_v28 }
 0x29a   : > { %v1974_v7 = vsel %vm1972_vm13, %v16743_v48, %v12585_v10  ;;  %v2398_v26 = vshll.u32 %v12494_v47, %v12628_v2  ;;  %v2399_v32 = vshrl.u32 %v2381_v9, %v2397_v50  ;;  %v2403_v38 = vshll.u32 %v2402_v37, 23 }
 0x29b   : > { %v12708_v48 = vsel %vm2630_vm9, %v2641_v39, %v2643_v21  ;;  %v12710_v44 = vand.u32 3, %v2121_v6  ;;  %v12712_v27 = vshrl.u32 %v2541_v17, 30  ;;  %v2646_v1 = vand.u32 65535, %v12685_v22 }
 0x29c   : > { %v2671_v4 = vshrl.u32 %v12700_v24, 16  ;;  %v12719_v34 = vsel %vm16380_vm4, nan, %v12563_v45  ;;  %vm16379_vm10 = vweird.f32 %v16709_v58  ;;  %v1975_v47 = vsel %vm1968_vm12, %v1971_v53, %v1974_v7 }
 0x29d   : > { %16744 = vst [vmem:[#allocation78_spill] sm:$0xff] %v12712_v27  ;;  %v2262_v2 = vadd.f32 0.041655596, %v2261_v56  ;;  %v2256_v16 = vsub.s32 4, %v12219_v11  ;;  %v2269_v51 = vadd.f32 0.008332121, %v2268_v41  ;;  %v12729_v9 = vmul.f32 %v2118_v25, %v12517_v54 }
 0x29e   : > { %16745 = vst [vmem:[#allocation79_spill] sm:$0xff] %v12719_v34  ;;  %v2649_v28 = vshrl.u32 %v12708_v48, 16  ;;  %vm2763_vm11 = vcmp.gt.s32.totalorder %v2762_v31, 0  ;;  %v12726_v6 = vadd.f32 1.0, %v2110_v30  ;;  %v2400_v50 = vor.u32 %v2399_v32, %v2398_v26 }
 0x29f   : > { %16747 = vst [vmem:[#allocation81_spill] sm:$0xff] %v12729_v9  ;;  %v2404_v45 = vor.u32 4788187, %v2403_v38  ;;  %vm2124_vm3 = vcmp.eq.s32.totalorder %v12710_v44, 0  ;;  %v2543_v37 = vshll.u32 %v12712_v27, 30  ;;  %v2670_v14 = vand.u32 65535, %v12700_v24 }
 0x2a0   : > { %16746 = vst [vmem:[#allocation80_spill] sm:$0xff] %v12726_v6  ;;  %v12734_v17 = vmul.u32 %v2671_v4, %v2646_v1  ;;  %vm2127_vm13 = vcmp.eq.s32.totalorder %v12710_v44, 2  ;;  %v2263_v39 = vmul.f32 %v2262_v2, %v12663_v57  ;;  %v2647_v21 = vshrl.u32 %v12685_v22, 16 }
 0x2a1   : > { %v2764_v53 = vsel %vm2763_vm11, %v2762_v31, 0  ;;  %v2257_v54 = vsel %vm2134_vm1, %v2256_v16, %v12219_v11  ;;  %v2270_v38 = vmul.f32 %v2269_v51, %v12663_v57  ;;  %v2648_v32 = vand.u32 65535, %v12708_v48 }
 0x2a2   : > { %v12744_v7 = vmul.u32 %v2649_v28, %v2646_v1  ;;  %v16359_v56 = vxor.u32 2147483648, %v12729_v9  ;;  %v2405_v30 = vand.u32 2147483647, %v2404_v45  ;;  %v2407_v25 = vcvt.s32.f32 %v2400_v50 }
 0x2a3   : > { %v12748_v41 = vsub.s32 %v2540_v8, %v2543_v37  ;;  %v2672_v26 = vmul.u32 %v2670_v14, %v2646_v1  ;;  %v2676_v31 = vshll.u32 %v12734_v17, 16  ;;  %v2766_v2 = vand.u32 31, %v2764_v53 }
 0x2a4   : > { %v12753_v11 = vsel %vm16379_vm10, nan, %v1975_v47  ;;  %v12757_v48 = vsel %vm12590_vm15, 0, %v2257_v54  ;;  %v2264_v16 = vadd.f32 -0.4999988, %v2263_v39  ;;  %v12759_v51 = vmul.u32 %v2670_v14, %v2647_v21  ;;  %v16751_v14 = vld [vmem:[#allocation32_spill] sm:$0xff] }
 0x2a5   : > { %16748 = vst [vmem:[#allocation82_spill] sm:$0xff] %v12753_v11  ;;  %v2271_v24 = vadd.f32 -0.16666654, %v2270_v38  ;;  %v2650_v45 = vmul.u32 %v2648_v32, %v2646_v1  ;;  %v12761_v50 = vmul.u32 %v2648_v32, %v2647_v21  ;;  %v2654_v8 = vshll.u32 %v12744_v7, 16 }
 0x2a6   : > { %16749 = vst [vmem:[#allocation83_spill] sm:$0xff] %v12757_v48  ;;  %v12769_v47 = vsel %vm2124_vm3, %v12726_v6, %v16359_v56  ;;  %v16750_v33 = vxor.u32 2147483648, %v12726_v6  ;;  %vm2289_vm1 = vcmp.lt.s32.totalorder %v16751_v14, 0  ;;  %v2408_v1 = vmul.f32 %v2407_v25, %v2405_v30 }
 0x2a7   : > { %v12780_v39 = vadd.s32 3, %v12757_v48  ;;  %v2546_v54 = vsub.s32 0, %v12748_v41  ;;  %vm2680_vm15 = vc.u32 %v2672_v26, %v2676_v31  ;;  %v12783_v38 = vsub.s32 32, %v2766_v2 }
 0x2a8   : > { %v12776_v37 = vsel %vm2127_vm13, %v16750_v33, %v12729_v9  ;;  %v12786_v32 = vmul.f32 %v2264_v16, %v12663_v57  ;;  %vm2545_vm12 = vcmp.lt.s32.totalorder %v12748_v41, 0  ;;  %v12790_v33 = vadd.s32 %v2676_v31, %v2672_v26 }
 0x2a9   : > { %v2272_v11 = vmul.f32 %v2271_v24, %v12663_v57  ;;  %v2656_v30 = vshll.u32 %v12761_v50, 16  ;;  %v2660_v25 = vadd.s32 %v2654_v8, %v2650_v45  ;;  %v2675_v34 = vmul.u32 %v2671_v4, %v2647_v21 }
 0x2aa   : > { %v16752_v58 = vand.u32 2147483647, %v16751_v14  ;;  %v2409_v16 = vxor.u32 2147483648, %v2408_v1  ;;  %vm2658_vm3 = vc.u32 %v2650_v45, %v2654_v8  ;;  %v2681_v6 = vsel %vm2680_vm15, 1, %v16563_v29 }
 0x2ab   : > { %v2547_v26 = vsel %vm2545_vm12, %v2546_v54, %v12748_v41  ;;  %v2653_v31 = vmul.u32 %v2649_v28, %v2647_v21  ;;  %v2781_v57 = vshll.u32 %v16561_v35, %v2766_v2  ;;  %v2782_v4 = vshrl.u32 %v16562_v18, %v12783_v38  ;;  %v16758_v54 = vld [vmem:[#allocation35_spill] sm:$0xff] }
 0x2ac   : > { %vm12796_vm11 = vcmp.le.f32.partialorder %v16752_v58, 0.7853982  ;;  %v16755_v24 = vshll.u32 %v12759_v51, 16  ;;  %v12809_v58 = vshrl.u32 %v2764_v53, 5  ;;  %v2778_v45 = vshll.u32 %v16546_v5, %v2766_v2 }
 0x2ad   : > { %v2779_v8 = vshrl.u32 %v16561_v35, %v12783_v38  ;;  %v2659_v56 = vsel %vm2658_vm3, 1, %v16563_v29  ;;  %vm12815_vm15 = vc.u32 %v2660_v25, %v2656_v30  ;;  %v2683_v21 = vadd.s32 %v2681_v6, %v2675_v34 }
 0x2ae   : > { %vm2684_vm13 = vc.u32 %v12790_v33, %v16755_v24  ;;  %v2910_v9 = vand.u32 2139095040, %v16758_v54  ;;  %vm2123_vm12 = vcmp.lt.s32.totalorder %v12710_v44, 2  ;;  %v2772_v24 = vshll.u32 %v16710_v42, %v2766_v2 }
 0x2af   : > { %v2773_v53 = vshrl.u32 %v16711_v15, %v12783_v38  ;;  %v2775_v10 = vshll.u32 %v16711_v15, %v2766_v2  ;;  %v2776_v48 = vshrl.u32 %v16546_v5, %v12783_v38  ;;  %v2685_v30 = vsel %vm2684_vm13, 1, %v16563_v29 }
 0x2b0   : > { %v2769_v25 = vshll.u32 %v16543_v3, %v2766_v2  ;;  %v2770_v34 = vshrl.u32 %v16710_v42, %v12783_v38  ;;  %v2783_v6 = vor.u32 %v2782_v4, %v2781_v57  ;;  %v2661_v19 = vadd.s32 %v2659_v56, %v2653_v31 }
 0x2b1   : > { %v16759_v13 = vand.u32 2147483647, %v16741_v36  ;;  %v2780_v49 = vor.u32 %v2779_v8, %v2778_v45  ;;  %vm2787_vm3 = vcmp.lt.s32.totalorder %v12809_v58, 4  ;;  %v2410_v43 = vsel %vm2289_vm1, %v2409_v16, %v2408_v1 }
 0x2b2   : > { %v2548_v12 = vclz %v2547_v26  ;;  %v2663_v27 = vsel %vm12815_vm15, 1, %v16563_v29  ;;  %v2677_v2 = vshrl.u32 %v12734_v17, 16  ;;  %vm16381_vm13 = vweird.f32 %v16724_v20 }
 0x2b3   : > { %v2759_v0 = vand.u32 8388607, %v16759_v13  ;;  %v2687_v57 = vadd.s32 %v2685_v30, %v2683_v21  ;;  %v12841_v56 = vor.u32 %v2773_v53, %v2772_v24  ;;  %v12843_v31 = vor.u32 %v2776_v48, %v2775_v10 }
 0x2b4   : > { %v2911_v13 = vshrl.u32 %v2910_v9, 23  ;;  %v12845_v4 = vor.u32 %v2770_v34, %v2769_v25  ;;  %vm2784_vm10 = vcmp.lt.s32.totalorder %v12809_v58, 1  ;;  %vm2786_vm4 = vcmp.lt.s32.totalorder %v12809_v58, 3 }
 0x2b5   : > { %v2797_v1 = vsel %vm2787_vm3, %v2783_v6, 1326507024  ;;  %v2655_v16 = vshrl.u32 %v12744_v7, 16  ;;  %v2665_v17 = vadd.s32 %v2663_v27, %v2661_v19  ;;  %v2760_v26 = vor.u32 8388608, %v2759_v0 }
 0x2b6   : > { %v2793_v45 = vsel %vm2787_vm3, %v2780_v49, 920167782  ;;  %v2273_v8 = vadd.f32 1.0, %v2272_v11  ;;  %v12857_v10 = vsel %vm12796_vm11, %v16751_v14, %v2410_v43  ;;  %v2613_v9 = vshrl.u32 %v16543_v3, %v12570_v55 }
 0x2b7   : > { %v9341_v48 = vadd.s32 4294967169, %v2911_v13  ;;  %v9333_v28 = vadd.s32 4294967294, %v2548_v12  ;;  %vm2785_vm15 = vcmp.lt.s32.totalorder %v12809_v58, 2  ;;  %v2796_v19 = vsel %vm2784_vm10, %v12841_v56, %v12843_v31 }
 0x2b8   : > { %v2798_v0 = vsel %vm2786_vm4, %v2780_v49, %v2797_v1  ;;  %v2679_v27 = vshrl.u32 %v12759_v51, 16  ;;  %v2688_v7 = vadd.s32 %v2687_v57, %v2677_v2  ;;  %v2792_v43 = vsel %vm2784_vm10, %v12845_v4, %v12841_v56 }
 0x2b9   : > { %v2794_v12 = vsel %vm2786_vm4, %v12843_v31, %v2793_v45  ;;  %v2634_v55 = vsel %vm2632_vm0, %v12648_v52, 2102212464  ;;  %v2657_v11 = vshrl.u32 %v12761_v50, 16  ;;  %v2666_v21 = vadd.s32 %v2665_v17, %v2655_v16 }
 0x2ba   : > { %v12880_v49 = vshll.u32 %v2760_v26, 8  ;;  %v2130_v24 = vsel %vm2123_vm12, %v12769_v47, %v12776_v37  ;;  %v2277_v53 = vand.u32 3, %v12780_v39  ;;  %v12889_v30 = vsel %vm2785_vm15, %v2796_v19, %v2798_v0 }
 0x2bb   : > { %v2917_v25 = vadd.s32 1, %v9341_v48  ;;  %v12892_v34 = vadd.f32 1.0, %v12786_v32  ;;  %v12895_v52 = vmul.f32 %v2273_v8, %v12637_v60  ;;  %v12899_v50 = vmul.f32 %v12857_v10, %v12857_v10 }
 0x2bc   : > { %v12903_v44 = vsel %vm2785_vm15, %v2792_v43, %v2794_v12  ;;  %vm9334_vm0 = vcmp.lt.s32.totalorder %v9333_v28, 0  ;;  %v2633_v47 = vsel %vm2629_vm14, %v2613_v9, %v12644_v61  ;;  %v2635_v37 = vsel %vm2631_vm7, %v12646_v23, %v2634_v55 }
 0x2bd   : > { %16760 = vst [vmem:[#allocation84_spill] sm:$0xff] %v12892_v34  ;;  %v2689_v39 = vadd.s32 %v2688_v7, %v2679_v27  ;;  %v12911_v60 = vadd.s32 %v2666_v21, %v2657_v11  ;;  %v16762_v32 = vshll.u32 %v12759_v51, 16  ;;  %v2801_v2 = vand.u32 65535, %v12880_v49  ;;  %v16764_v51 = vld [vmem:[#allocation57_spill] sm:$0xff] }
 0x2be   : > { %16761 = vst [vmem:[#allocation85_spill] sm:$0xff] %v12895_v52  ;;  %v2804_v57 = vshrl.u32 %v12889_v30, 16  ;;  %v12922_v13 = vsel %vm16381_vm13, nan, %v2130_v24  ;;  %vm2282_vm14 = vcmp.eq.s32.totalorder %v2277_v53, 2  ;;  %v2826_v61 = vshrl.u32 %v12903_v44, 16 }
 0x2bf   : > { %v12916_v6 = vadd.s32 %v12790_v33, %v16762_v32  ;;  %16763 = vst [vmem:[#allocation86_spill] sm:$0xff] %v12922_v13  ;;  %vm2918_vm7 = vcmp.gt.s32.totalorder %v2917_v25, 0  ;;  %v16384_v23 = vxor.u32 2147483648, %v12895_v52  ;;  %v16383_v1 = vxor.u32 2147483648, %v12892_v34 }
 0x2c0   : > { %v2411_v16 = vsub.s32 4, %v16764_v51  ;;  %v2416_v33 = vmul.f32 -0.001358992, %v12899_v50  ;;  %v12930_v17 = vsel %vm9334_vm0, 0, %v9333_v28  ;;  %v2636_v26 = vsel %vm2630_vm9, %v2633_v47, %v2635_v37 }
 0x2c1   : > { %v2693_v45 = vadd.s32 1, %v2689_v39  ;;  %v2802_v8 = vshrl.u32 %v12880_v49, 16  ;;  %vm2692_vm12 = vc.u32 %v12911_v60, %v12916_v6  ;;  %v2803_v9 = vand.u32 65535, %v12889_v30 }
 0x2c2   : > { %v12938_v48 = vmul.u32 %v2804_v57, %v2801_v2  ;;  %v2919_v19 = vsel %vm2918_vm7, %v2917_v25, 0  ;;  %vm2278_vm13 = vcmp.lt.s32.totalorder %v2277_v53, 2  ;;  %vm2279_vm2 = vcmp.eq.s32.totalorder %v2277_v53, 0  ;;  %v16766_v53 = vld [vmem:[#allocation23_spill] sm:$0xff] }
 0x2c3   : > { %v2825_v0 = vand.u32 65535, %v12903_v44  ;;  %v12941_v28 = vmul.u32 %v2826_v61, %v2801_v2  ;;  %v2284_v46 = vsel %vm2282_vm14, %v16383_v1, %v12895_v52  ;;  %v2412_v27 = vsel %vm2289_vm1, %v2411_v16, %v16764_v51 }
 0x2c4   : > { %v2556_v7 = vsub.s32 4294967266, %v12930_v17  ;;  %v2690_v43 = vmul.u32 %v12685_v22, %v2636_v26  ;;  %v2417_v12 = vadd.f32 0.041655596, %v2416_v33  ;;  %v2423_v55 = vmul.f32 -0.00019511016, %v12899_v50 }
 0x2c5   : > { %v2694_v11 = vsel %vm2692_vm12, %v2693_v45, %v2689_v39  ;;  %v2921_v21 = vand.u32 31, %v2919_v19  ;;  %v2281_v24 = vsel %vm2279_vm2, %v12892_v34, %v16384_v23  ;;  %v2805_v30 = vmul.u32 %v2803_v9, %v2801_v2 }
 0x2c6   : > { %v12956_v25 = vmul.u32 %v2803_v9, %v2802_v8  ;;  %v2809_v44 = vshll.u32 %v12938_v48, 16  ;;  %v12961_v47 = vsel %vm12796_vm11, 0, %v2412_v27  ;;  %v2827_v37 = vmul.u32 %v2825_v0, %v2801_v2 }
 0x2c7   : > { %16765 = vst [vmem:[#allocation57_spill] sm:$0xff] %v12961_v47  ;;  %v12963_v22 = vmul.u32 %v2825_v0, %v2802_v8  ;;  %v2831_v32 = vshll.u32 %v12941_v28, 16  ;;  %v2536_v39 = vadd.s32 %v12580_v63, %v12575_v62  ;;  %v2552_v51 = vsub.s32 32, %v12930_v17 }
 0x2c8   : > { %v2557_v16 = vadd.s32 127, %v2556_v7  ;;  %v12969_v33 = vadd.s32 %v2694_v11, %v2690_v43  ;;  %v12972_v26 = vsel %vm2278_vm13, %v2281_v24, %v2284_v46  ;;  %v12975_v59 = vmul.f32 %v2417_v12, %v12899_v50 }
 0x2c9   : > { %v2424_v45 = vadd.f32 0.008332121, %v2423_v55  ;;  %v12977_v2 = vsub.s32 32, %v2921_v21  ;;  %v2553_v9 = vshll.u32 %v12748_v41, %v12930_v17  ;;  %v2811_v0 = vshll.u32 %v12956_v25, 16 }
 0x2ca   : > { %vm2813_vm2 = vc.u32 %v2805_v30, %v2809_v44  ;;  %v2815_v62 = vadd.s32 %v2809_v44, %v2805_v30  ;;  %v16385_v63 = vshll.u32 %v12963_v22, 16  ;;  %vm2835_vm9 = vc.u32 %v2827_v37, %v2831_v32 }
 0x2cb   : > { %v12983_v27 = vadd.s32 %v2831_v32, %v2827_v37  ;;  %v3065_v46 = vand.u32 2139095040, %v16766_v53  ;;  %v2554_v7 = vshrl.u32 %v2536_v39, %v2552_v51  ;;  %v2558_v43 = vshll.u32 %v2557_v16, 23 }
 0x2cc   : > { %v2696_v12 = vadd.s32 536870912, %v12969_v33  ;;  %v2808_v11 = vmul.u32 %v2804_v57, %v2802_v8  ;;  %v2830_v24 = vmul.u32 %v2826_v61, %v2802_v8  ;;  %v2936_v41 = vshll.u32 %v16561_v35, %v2921_v21 }
 0x2cd   : > { %v2937_v17 = vshrl.u32 %v16562_v18, %v12977_v2  ;;  %v2814_v30 = vsel %vm2813_vm2, 1, %v16563_v29  ;;  %vm12992_vm1 = vc.u32 %v2815_v62, %v2811_v0  ;;  %v2836_v37 = vsel %vm2835_vm9, 1, %v16563_v29 }
 0x2ce   : > { %v12997_v32 = vshrl.u32 %v2919_v19, 5  ;;  %vm13002_vm11 = vc.u32 %v12983_v27, %v16385_v63  ;;  %v2927_v61 = vshll.u32 %v16710_v42, %v2921_v21  ;;  %v2930_v8 = vshll.u32 %v16711_v15, %v2921_v21 }
 0x2cf   : > { %v3066_v39 = vshrl.u32 %v3065_v46, 23  ;;  %v2928_v51 = vshrl.u32 %v16711_v15, %v12977_v2  ;;  %v2931_v16 = vshrl.u32 %v16546_v5, %v12977_v2  ;;  %v2933_v19 = vshll.u32 %v16546_v5, %v2921_v21 }
 0x2d0   : > { %v2934_v0 = vshrl.u32 %v16561_v35, %v12977_v2  ;;  %v2555_v62 = vor.u32 %v2554_v7, %v2553_v9  ;;  %v2559_v1 = vor.u32 4788187, %v2558_v43  ;;  %v13015_v23 = vshrl.u32 %v2696_v12, 30 }
 0x2d1   : > { %v2938_v63 = vor.u32 %v2937_v17, %v2936_v41  ;;  %v2816_v55 = vadd.s32 %v2814_v30, %v2808_v11  ;;  %v2818_v46 = vsel %vm12992_vm1, 1, %v16563_v29  ;;  %v16771_v13 = vand.u32 2147483647, %v16758_v54 }
 0x2d2   : > { %vm2942_vm13 = vcmp.lt.s32.totalorder %v12997_v32, 4  ;;  %v2838_v34 = vadd.s32 %v2836_v37, %v2830_v24  ;;  %v2840_v52 = vsel %vm13002_vm11, 1, %v16563_v29  ;;  %v2924_v9 = vshll.u32 %v16543_v3, %v2921_v21 }
 0x2d3   : > { %v2914_v20 = vand.u32 8388607, %v16771_v13  ;;  %v2925_v7 = vshrl.u32 %v16710_v42, %v12977_v2  ;;  %vm16418_vm0 = vweird.f32 %v16735_v40  ;;  %v13030_v43 = vor.u32 %v2928_v51, %v2927_v61 }
 0x2d4   : > { %v13032_v12 = vor.u32 %v2931_v16, %v2930_v8  ;;  %v2935_v11 = vor.u32 %v2934_v0, %v2933_v19  ;;  %v9344_v13 = vadd.s32 4294967169, %v3066_v39  ;;  %v2698_v41 = vshll.u32 %v13015_v23, 30 }
 0x2d5   : > { %vm2939_vm14 = vcmp.lt.s32.totalorder %v12997_v32, 1  ;;  %vm2941_vm7 = vcmp.lt.s32.totalorder %v12997_v32, 3  ;;  %v2952_v21 = vsel %vm2942_vm13, %v2938_v63, 1326507024  ;;  %v2425_v24 = vmul.f32 %v2424_v45, %v12899_v50 }
 0x2d6   : > { %v2810_v17 = vshrl.u32 %v12938_v48, 16  ;;  %v2832_v30 = vshrl.u32 %v12941_v28, 16  ;;  %v2915_v44 = vor.u32 8388608, %v2914_v20  ;;  %v2820_v37 = vadd.s32 %v2818_v46, %v2816_v55  ;;  %v16772_v28 = vld [vmem:[#allocation33_spill] sm:$0xff] }
 0x2d7   : > { %v2842_v57 = vadd.s32 %v2840_v52, %v2838_v34  ;;  %v13042_v61 = vor.u32 %v2925_v7, %v2924_v9  ;;  %vm2940_vm12 = vcmp.lt.s32.totalorder %v12997_v32, 2  ;;  %v2948_v8 = vsel %vm2942_vm13, %v2935_v11, 920167782  ;;  %v16773_v52 = vld [vmem:[#allocation78_spill] sm:$0xff] }
 0x2d8   : > { %v2951_v63 = vsel %vm2939_vm14, %v13030_v43, %v13032_v12  ;;  %v2953_v48 = vsel %vm2941_vm7, %v2935_v11, %v2952_v21  ;;  %v3072_v45 = vadd.s32 1, %v9344_v13  ;;  %vm2444_vm2 = vcmp.lt.s32.totalorder %v16772_v28, 0 }
 0x2d9   : > { %v2560_v20 = vand.u32 2147483647, %v2559_v1  ;;  %v2562_v34 = vcvt.s32.f32 %v2555_v62  ;;  %v2566_v55 = vsub.s32 4, %v16773_v52  ;;  %v13056_v39 = vsub.s32 %v12969_v33, %v2698_v41 }
 0x2da   : > { %v2419_v51 = vadd.f32 -0.4999988, %v12975_v59  ;;  %v2426_v16 = vadd.f32 -0.16666654, %v2425_v24  ;;  %v2834_v19 = vshrl.u32 %v12963_v22, 16  ;;  %v13060_v0 = vshll.u32 %v2915_v44, 8 }
 0x2db   : > { %v2843_v46 = vadd.s32 %v2842_v57, %v2832_v30  ;;  %v2947_v9 = vsel %vm2939_vm14, %v13042_v61, %v13030_v43  ;;  %v2949_v1 = vsel %vm2941_vm7, %v13032_v12, %v2948_v8  ;;  %v13071_v33 = vsel %vm2940_vm12, %v2951_v63, %v2953_v48 }
 0x2dc   : > { %v2768_v59 = vshrl.u32 %v16543_v3, %v12783_v38  ;;  %v2812_v62 = vshrl.u32 %v12956_v25, 16  ;;  %v2821_v7 = vadd.s32 %v2820_v37, %v2810_v17  ;;  %vm3073_vm9 = vcmp.gt.s32.totalorder %v3072_v45, 0 }
 0x2dd   : > { %v16774_v11 = vand.u32 2147483647, %v16772_v28  ;;  %v2563_v41 = vmul.f32 %v2562_v34, %v2560_v20  ;;  %vm2700_vm11 = vcmp.lt.s32.totalorder %v13056_v39, 0  ;;  %v2701_v21 = vsub.s32 0, %v13056_v39 }
 0x2de   : > { %v2789_v24 = vsel %vm2787_vm3, %v12843_v31, 2102212464  ;;  %v13089_v38 = vsel %vm2940_vm12, %v2947_v9, %v2949_v1  ;;  %v2956_v25 = vand.u32 65535, %v13060_v0  ;;  %v16392_v17 = vshrl.u32 %v13071_v33, 16 }
 0x2df   : > { %vm13078_vm1 = vcmp.le.f32.partialorder %v16774_v11, 0.7853982  ;;  %v3074_v30 = vsel %vm3073_vm9, %v3072_v45, 0  ;;  %v13096_v44 = vsel %vm16418_vm0, nan, %v12972_v26  ;;  %v2420_v37 = vmul.f32 %v2419_v51, %v12899_v50 }
 0x2e0   : > { %16777 = vst [vmem:[#allocation78_spill] sm:$0xff] %v13096_v44  ;;  %v2427_v57 = vmul.f32 %v2426_v16, %v12899_v50  ;;  %v2844_v8 = vadd.s32 %v2843_v46, %v2834_v19  ;;  %v2788_v31 = vsel %vm2784_vm10, %v2768_v59, %v12845_v4  ;;  %v2790_v63 = vsel %vm2786_vm4, %v12841_v56, %v2789_v24 }
 0x2e1   : > { %v13106_v48 = vadd.s32 %v2821_v7, %v2812_v62  ;;  %v16778_v45 = vshll.u32 %v12963_v22, 16  ;;  %v2564_v20 = vxor.u32 2147483648, %v2563_v41  ;;  %v2702_v50 = vsel %vm2700_vm11, %v2701_v21, %v13056_v39 }
 0x2e2   : > { %v2981_v34 = vshrl.u32 %v13089_v38, 16  ;;  %v3076_v51 = vand.u32 31, %v3074_v30  ;;  %v2431_v4 = vadd.s32 3, %v12961_v47  ;;  %v2567_v56 = vsel %vm2444_vm2, %v2566_v55, %v16773_v52 }
 0x2e3   : > { %v13111_v26 = vadd.s32 %v12983_v27, %v16778_v45  ;;  %v2958_v16 = vand.u32 65535, %v13071_v33  ;;  %v13124_v22 = vmul.u32 %v16392_v17, %v2956_v25  ;;  %v13126_v27 = vadd.f32 1.0, %v2420_v37 }
 0x2e4   : > { %v2428_v19 = vadd.f32 1.0, %v2427_v57  ;;  %v2791_v46 = vsel %vm2785_vm15, %v2788_v31, %v2790_v63  ;;  %v2848_v9 = vadd.s32 1, %v2844_v8  ;;  %v2703_v1 = vclz %v2702_v50 }
 0x2e5   : > { %16779 = vst [vmem:[#allocation87_spill] sm:$0xff] %v13126_v27  ;;  %vm2847_vm4 = vc.u32 %v13106_v48, %v13111_v26  ;;  %v2980_v59 = vand.u32 65535, %v13089_v38  ;;  %v16391_v52 = vand.u32 2147483647, %v16766_v53  ;;  %v2565_v55 = vsel %vm2444_vm2, %v2564_v20, %v2563_v41 }
 0x2e6   : > { %v2957_v62 = vshrl.u32 %v13060_v0, 16  ;;  %v13137_v7 = vmul.u32 %v2981_v34, %v2956_v25  ;;  %v13139_v11 = vsub.s32 32, %v3076_v51  ;;  %v13141_v58 = vand.u32 3, %v2431_v4 }
 0x2e7   : > { %v2845_v21 = vmul.u32 %v12880_v49, %v2791_v46  ;;  %v2960_v24 = vmul.u32 %v2958_v16, %v2956_v25  ;;  %v2964_v37 = vshll.u32 %v13124_v22, 16  ;;  %v13146_v38 = vmul.f32 %v2428_v19, %v12857_v10 }
 0x2e8   : > { %v13151_v41 = vsel %vm13078_vm1, 0, %v2567_v56  ;;  %v2849_v31 = vsel %vm2847_vm4, %v2848_v9, %v2844_v8  ;;  %v13156_v63 = vsel %vm13078_vm1, %v16772_v28, %v2565_v55  ;;  %v9336_v45 = vadd.s32 4294967294, %v2703_v1 }
 0x2e9   : > { %16780 = vst [vmem:[#allocation88_spill] sm:$0xff] %v13146_v38  ;;  %v2982_v49 = vmul.u32 %v2980_v59, %v2956_v25  ;;  %v3069_v20 = vand.u32 8388607, %v16391_v52  ;;  %v13160_v50 = vmul.u32 %v2980_v59, %v2957_v62  ;;  %v2986_v10 = vshll.u32 %v13137_v7, 16 }
 0x2ea   : > { %16781 = vst [vmem:[#allocation89_spill] sm:$0xff] %v13151_v41  ;;  %v3088_v4 = vshll.u32 %v16546_v5, %v3076_v51  ;;  %v3089_v56 = vshrl.u32 %v16561_v35, %v13139_v11  ;;  %v13166_v8 = vadd.s32 %v2849_v31, %v2845_v21  ;;  %v13168_v19 = vmul.u32 %v2958_v16, %v2957_v62 }
 0x2eb   : > { %vm13170_vm10 = vc.u32 %v2960_v24, %v2964_v37  ;;  %v13174_v25 = vshrl.u32 %v3074_v30, 5  ;;  %v3079_v46 = vshll.u32 %v16543_v3, %v3076_v51  ;;  %v3082_v9 = vshll.u32 %v16710_v42, %v3076_v51 }
 0x2ec   : > { %v3091_v1 = vshll.u32 %v16561_v35, %v3076_v51  ;;  %v3092_v59 = vshrl.u32 %v16562_v18, %v13139_v11  ;;  %v3080_v55 = vshrl.u32 %v16710_v42, %v13139_v11  ;;  %v3083_v16 = vshrl.u32 %v16711_v15, %v13139_v11 }
 0x2ed   : > { %v3085_v21 = vshll.u32 %v16711_v15, %v3076_v51  ;;  %v3086_v30 = vshrl.u32 %v16546_v5, %v13139_v11  ;;  %vm2437_vm3 = vcmp.eq.s32.totalorder %v13141_v58, 2  ;;  %vm2990_vm15 = vc.u32 %v2982_v49, %v2986_v10 }
 0x2ee   : > { %v13190_v52 = vadd.s32 %v2986_v10, %v2982_v49  ;;  %v3090_v57 = vor.u32 %v3089_v56, %v3088_v4  ;;  %v2851_v17 = vadd.s32 536870912, %v13166_v8  ;;  %v2966_v44 = vshll.u32 %v13168_v19, 16 }
 0x2ef   : > { %v2970_v40 = vadd.s32 %v2964_v37, %v2960_v24  ;;  %vm3097_vm2 = vcmp.lt.s32.totalorder %v13174_v25, 4  ;;  %v16784_v51 = vshrl.u32 %v13071_v33, 16  ;;  %v2969_v53 = vsel %vm13170_vm10, 1, %v16563_v29 }
 0x2f0   : > { %v2985_v28 = vmul.u32 %v2981_v34, %v2957_v62  ;;  %v3093_v31 = vor.u32 %v3092_v59, %v3091_v1  ;;  %v2991_v49 = vsel %vm2990_vm15, 1, %v16563_v29  ;;  %v13201_v10 = vor.u32 %v3080_v55, %v3079_v46 }
 0x2f1   : > { %v2963_v47 = vmul.u32 %v16784_v51, %v2957_v62  ;;  %v13203_v4 = vor.u32 %v3083_v16, %v3082_v9  ;;  %v13205_v56 = vor.u32 %v3086_v30, %v3085_v21  ;;  %v16785_v24 = vshll.u32 %v13160_v50, 16 }
 0x2f2   : > { %vm3094_vm1 = vcmp.lt.s32.totalorder %v13174_v25, 1  ;;  %vm3096_vm11 = vcmp.lt.s32.totalorder %v13174_v25, 3  ;;  %v3103_v33 = vsel %vm3097_vm2, %v3090_v57, 920167782  ;;  %vm9337_vm4 = vcmp.lt.s32.totalorder %v9336_v45, 0 }
 0x2f3   : > { %vm2994_vm9 = vc.u32 %v13190_v52, %v16785_v24  ;;  %v13214_v34 = vshrl.u32 %v2851_v17, 30  ;;  %vm2972_vm10 = vc.u32 %v2970_v40, %v2966_v44  ;;  %v3070_v62 = vor.u32 8388608, %v3069_v20 }
 0x2f4   : > { %v13218_v37 = vmul.f32 %v13156_v63, %v13156_v63  ;;  %v2971_v13 = vadd.s32 %v2969_v53, %v2963_v47  ;;  %v2993_v46 = vadd.s32 %v2991_v49, %v2985_v28  ;;  %v3107_v9 = vsel %vm3097_vm2, %v3093_v31, 1326507024 }
 0x2f5   : > { %16786 = vst [vmem:[#allocation90_spill] sm:$0xff] %v13214_v34  ;;  %v2995_v1 = vsel %vm2994_vm9, 1, %v16563_v29  ;;  %vm3095_vm15 = vcmp.lt.s32.totalorder %v13174_v25, 2  ;;  %v3102_v17 = vsel %vm3094_vm1, %v13201_v10, %v13203_v4  ;;  %v3104_v40 = vsel %vm3096_vm11, %v13205_v56, %v3103_v33 }
 0x2f6   : > { %v2571_v47 = vmul.f32 -0.001358992, %v13218_v37  ;;  %v13233_v53 = vsel %vm9337_vm4, 0, %v9336_v45  ;;  %v2973_v28 = vsel %vm2972_vm10, 1, %v16563_v29  ;;  %v2853_v20 = vshll.u32 %v13214_v34, 30 }
 0x2f7   : > { %v3106_v59 = vsel %vm3094_vm1, %v13203_v4, %v13205_v56  ;;  %v3108_v55 = vsel %vm3096_vm11, %v3090_v57, %v3107_v9  ;;  %v13243_v16 = vshll.u32 %v3070_v62, 8  ;;  %v2578_v21 = vmul.f32 -0.00019511016, %v13218_v37 }
 0x2f8   : > { %v2987_v30 = vshrl.u32 %v13137_v7, 16  ;;  %v2997_v45 = vadd.s32 %v2995_v1, %v2993_v46  ;;  %v13249_v31 = vsel %vm3095_vm15, %v3102_v17, %v3104_v40  ;;  %v16787_v51 = vxor.u32 2147483648, %v13126_v27 }
 0x2f9   : > { %v13259_v57 = vadd.s32 3, %v13151_v41  ;;  %v2965_v24 = vshrl.u32 %v13124_v22, 16  ;;  %v2975_v33 = vadd.s32 %v2973_v28, %v2971_v13  ;;  %v2572_v62 = vadd.f32 0.041655596, %v2571_v47 }
 0x2fa   : > { %v13256_v49 = vsel %vm2437_vm3, %v16787_v51, %v13146_v38  ;;  %v2711_v7 = vsub.s32 4294967266, %v13233_v53  ;;  %v2923_v46 = vshrl.u32 %v16543_v3, %v12977_v2  ;;  %v13267_v9 = vsel %vm3095_vm15, %v3106_v59, %v3108_v55  ;;  %v16788_v51 = vld [vmem:[#allocation36_spill] sm:$0xff] }
 0x2fb   : > { %v2691_v1 = vadd.s32 %v12916_v6, %v12911_v60  ;;  %v13272_v17 = vsub.s32 %v13166_v8, %v2853_v20  ;;  %v3111_v40 = vand.u32 65535, %v13243_v16  ;;  %v3136_v22 = vshrl.u32 %v13249_v31, 16 }
 0x2fc   : > { %v2579_v13 = vadd.f32 0.008332121, %v2578_v21  ;;  %v2989_v47 = vshrl.u32 %v13160_v50, 16  ;;  %v2998_v28 = vadd.s32 %v2997_v45, %v2987_v30  ;;  %v3220_v2 = vand.u32 2139095040, %v16788_v51 }
 0x2fd   : > { %v2944_v59 = vsel %vm2942_vm13, %v13032_v12, 2102212464  ;;  %v2967_v55 = vshrl.u32 %v13168_v19, 16  ;;  %v2976_v60 = vadd.s32 %v2975_v33, %v2965_v24  ;;  %v3114_v6 = vshrl.u32 %v13267_v9, 16 }
 0x2fe   : > { %v2573_v8 = vmul.f32 %v2572_v62, %v13218_v37  ;;  %v2707_v20 = vsub.s32 32, %v13233_v53  ;;  %v2712_v44 = vadd.s32 127, %v2711_v7  ;;  %v2943_v21 = vsel %vm2939_vm14, %v2923_v46, %v13042_v61 }
 0x2ff   : > { %vm2434_vm3 = vcmp.eq.s32.totalorder %v13141_v58, 0  ;;  %v2856_v30 = vsub.s32 0, %v13272_v17  ;;  %v3112_v12 = vshrl.u32 %v13243_v16, 16  ;;  %v3135_v19 = vand.u32 65535, %v13249_v31 }
 0x300   : > { %v13292_v45 = vmul.u32 %v3136_v22, %v3111_v40  ;;  %vm2855_vm13 = vcmp.lt.s32.totalorder %v13272_v17, 0  ;;  %v2945_v24 = vsel %vm2941_vm7, %v13030_v43, %v2944_v59  ;;  %v2999_v33 = vadd.s32 %v2998_v28, %v2989_v47 }
 0x301   : > { %v3221_v62 = vshrl.u32 %v3220_v2, 23  ;;  %v13298_v7 = vadd.s32 %v2976_v60, %v2967_v55  ;;  %v16789_v61 = vshll.u32 %v13160_v50, 16  ;;  %v3113_v41 = vand.u32 65535, %v13267_v9 }
 0x302   : > { %v13306_v31 = vmul.u32 %v3114_v6, %v3111_v40  ;;  %v2708_v14 = vshll.u32 %v13056_v39, %v13233_v53  ;;  %v2709_v54 = vshrl.u32 %v2691_v1, %v2707_v20  ;;  %v2713_v34 = vshll.u32 %v2712_v44, 23 }
 0x303   : > { %v13303_v46 = vadd.s32 %v13190_v52, %v16789_v61  ;;  %v9347_v36 = vadd.s32 4294967169, %v3221_v62  ;;  %v2857_v43 = vsel %vm2855_vm13, %v2856_v30, %v13272_v17  ;;  %v3137_v47 = vmul.u32 %v3135_v19, %v3111_v40 }
 0x304   : > { %v13311_v28 = vmul.u32 %v3135_v19, %v3112_v12  ;;  %v3141_v50 = vshll.u32 %v13292_v45, 16  ;;  %v2580_v52 = vmul.f32 %v2579_v13, %v13218_v37  ;;  %v2946_v9 = vsel %vm2940_vm12, %v2943_v21, %v2945_v24 }
 0x305   : > { %v3003_v2 = vadd.s32 1, %v2999_v33  ;;  %v3227_v59 = vadd.s32 1, %v9347_v36  ;;  %vm3002_vm14 = vc.u32 %v13298_v7, %v13303_v46  ;;  %v3115_v39 = vmul.u32 %v3113_v41, %v3111_v40 }
 0x306   : > { %v13319_v44 = vmul.u32 %v3113_v41, %v3112_v12  ;;  %v3119_v53 = vshll.u32 %v13306_v31, 16  ;;  %v2710_v1 = vor.u32 %v2709_v54, %v2708_v14  ;;  %v2714_v55 = vor.u32 4788187, %v2713_v34 }
 0x307   : > { %v2858_v60 = vclz %v2857_v43  ;;  %vm3228_vm7 = vcmp.gt.s32.totalorder %v3227_v59, 0  ;;  %v16404_v20 = vshll.u32 %v13311_v28, 16  ;;  %vm3145_vm9 = vc.u32 %v3137_v47, %v3141_v50 }
 0x308   : > { %v13323_v13 = vadd.s32 %v3141_v50, %v3137_v47  ;;  %v3229_v32 = vsel %vm3228_vm7, %v3227_v59, 0  ;;  %v3000_v36 = vmul.u32 %v13060_v0, %v2946_v9  ;;  %v3004_v21 = vsel %vm3002_vm14, %v3003_v2, %v2999_v33 }
 0x309   : > { %v16403_v30 = vand.u32 2147483647, %v16788_v51  ;;  %v3231_v40 = vand.u32 31, %v3229_v32  ;;  %v3121_v41 = vshll.u32 %v13319_v44, 16  ;;  %vm3123_vm12 = vc.u32 %v3115_v39, %v3119_v53 }
 0x30a   : > { %v3125_v19 = vadd.s32 %v3119_v53, %v3115_v39  ;;  %v3140_v14 = vmul.u32 %v3136_v22, %v3112_v12  ;;  %v16790_v54 = vxor.u32 2147483648, %v13146_v38  ;;  %v2574_v24 = vadd.f32 -0.4999988, %v2573_v8 }
 0x30b   : > { %v3146_v62 = vsel %vm3145_vm9, 1, %v16563_v29  ;;  %v13336_v0 = vsub.s32 32, %v3231_v40  ;;  %v13338_v33 = vadd.f32 -0.16666654, %v2580_v52  ;;  %v2715_v61 = vand.u32 2147483647, %v2714_v55 }
 0x30c   : > { %v13333_v34 = vsel %vm2434_vm3, %v13126_v27, %v16790_v54  ;;  %v2717_v43 = vcvt.s32.f32 %v2710_v1  ;;  %vm3149_vm4 = vc.u32 %v13323_v13, %v16404_v20  ;;  %v9339_v22 = vadd.s32 4294967294, %v2858_v60 }
 0x30d   : > { %v13343_v47 = vadd.s32 %v3004_v21, %v3000_v36  ;;  %v3118_v50 = vmul.u32 %v3114_v6, %v3112_v12  ;;  %v3124_v9 = vsel %vm3123_vm12, 1, %v16563_v29  ;;  %vm13346_vm10 = vc.u32 %v3125_v19, %v3121_v41 }
 0x30e   : > { %v3148_v2 = vadd.s32 %v3146_v62, %v3140_v14  ;;  %v3224_v52 = vand.u32 8388607, %v16403_v30  ;;  %v3243_v59 = vshll.u32 %v16546_v5, %v3231_v40  ;;  %v3150_v39 = vsel %vm3149_vm4, 1, %v16563_v29 }
 0x30f   : > { %v13354_v53 = vshrl.u32 %v3229_v32, 5  ;;  %v3237_v1 = vshll.u32 %v16710_v42, %v3231_v40  ;;  %v3244_v6 = vshrl.u32 %v16561_v35, %v13336_v0  ;;  %v3238_v12 = vshrl.u32 %v16711_v15, %v13336_v0 }
 0x310   : > { %v3240_v55 = vshll.u32 %v16711_v15, %v3231_v40  ;;  %v3241_v60 = vshrl.u32 %v16546_v5, %v13336_v0  ;;  %v3246_v36 = vshll.u32 %v16561_v35, %v3231_v40  ;;  %v2718_v21 = vmul.f32 %v2717_v43, %v2715_v61 }
 0x311   : > { %v3126_v41 = vadd.s32 %v3124_v9, %v3118_v50  ;;  %v3234_v32 = vshll.u32 %v16543_v3, %v3231_v40  ;;  %v3235_v19 = vshrl.u32 %v16710_v42, %v13336_v0  ;;  %vm9340_vm3 = vcmp.lt.s32.totalorder %v9339_v22, 0  ;;  %v16793_v50 = vld [vmem:[#allocation34_spill] sm:$0xff] }
 0x312   : > { %v3128_v14 = vsel %vm13346_vm10, 1, %v16563_v29  ;;  %v3245_v54 = vor.u32 %v3244_v6, %v3243_v59  ;;  %v3247_v62 = vshrl.u32 %v16562_v18, %v13336_v0  ;;  %v3006_v30 = vadd.s32 536870912, %v13343_v47 }
 0x313   : > { %v3142_v20 = vshrl.u32 %v13292_v45, 16  ;;  %v3152_v61 = vadd.s32 %v3150_v39, %v3148_v2  ;;  %v3225_v43 = vor.u32 8388608, %v3224_v52  ;;  %vm2599_vm13 = vcmp.lt.s32.totalorder %v16793_v50, 0 }
 0x314   : > { %v13376_v40 = vor.u32 %v3238_v12, %v3237_v1  ;;  %v13378_v9 = vor.u32 %v3241_v60, %v3240_v55  ;;  %v3248_v27 = vor.u32 %v3247_v62, %v3246_v36  ;;  %vm3252_vm14 = vcmp.lt.s32.totalorder %v13354_v53, 4 }
 0x315   : > { %v3120_v8 = vshrl.u32 %v13306_v31, 16  ;;  %v3130_v59 = vadd.s32 %v3128_v14, %v3126_v41  ;;  %v13382_v6 = vor.u32 %v3235_v19, %v3234_v32  ;;  %vm3249_vm7 = vcmp.lt.s32.totalorder %v13354_v53, 1 }
 0x316   : > { %v13386_v45 = vsel %vm9340_vm3, 0, %v9339_v22  ;;  %v3078_v2 = vshrl.u32 %v16543_v3, %v13139_v11  ;;  %vm3251_vm9 = vcmp.lt.s32.totalorder %v13354_v53, 3  ;;  %v3258_v52 = vsel %vm3252_vm14, %v3245_v54, 920167782 }
 0x317   : > { %v16794_v39 = vand.u32 2147483647, %v16793_v50  ;;  %v13399_v1 = vshrl.u32 %v3006_v30, 30  ;;  %v3099_v22 = vsel %vm3097_vm2, %v13205_v56, 2102212464  ;;  %v3144_v12 = vshrl.u32 %v13311_v28, 16 }
 0x318   : > { %v3153_v11 = vadd.s32 %v3152_v61, %v3142_v20  ;;  %vm3250_vm4 = vcmp.lt.s32.totalorder %v13354_v53, 2  ;;  %v3261_v55 = vsel %vm3249_vm7, %v13376_v40, %v13378_v9  ;;  %v3262_v60 = vsel %vm3252_vm14, %v3248_v27, 1326507024 }
 0x319   : > { %vm13395_vm12 = vcmp.le.f32.partialorder %v16794_v39, 0.7853982  ;;  %16797 = vst [vmem:[#allocation91_spill] sm:$0xff] %v13399_v1  ;;  %v13412_v36 = vshll.u32 %v3225_v43, 8  ;;  %v3122_v30 = vshrl.u32 %v13319_v44, 16  ;;  %v3131_v41 = vadd.s32 %v3130_v59, %v3120_v8  ;;  %v16799_v39 = vld [vmem:[#allocation37_spill] sm:$0xff] }
 0x31a   : > { %v3257_v56 = vsel %vm3249_vm7, %v13382_v6, %v13376_v40  ;;  %v3259_v20 = vsel %vm3251_vm9, %v13378_v9, %v3258_v52  ;;  %v2575_v32 = vmul.f32 %v2574_v24, %v13218_v37  ;;  %v2719_v19 = vxor.u32 2147483648, %v2718_v21 }
 0x31b   : > { %v2866_v14 = vsub.s32 4294967266, %v13386_v45  ;;  %v3263_v27 = vsel %vm3251_vm9, %v3245_v54, %v3262_v60  ;;  %vm2433_vm2 = vcmp.lt.s32.totalorder %v13141_v58, 2  ;;  %v3008_v44 = vshll.u32 %v13399_v1, 30 }
 0x31c   : > { %v3098_v62 = vsel %vm3094_vm1, %v3078_v2, %v13201_v10  ;;  %v3100_v61 = vsel %vm3096_vm11, %v13203_v4, %v3099_v22  ;;  %v13436_v24 = vsel %vm3250_vm4, %v3261_v55, %v3263_v27  ;;  %v3154_v43 = vadd.s32 %v3153_v11, %v3144_v12 }
 0x31d   : > { %v13440_v54 = vsel %vm3250_vm4, %v3257_v56, %v3259_v20  ;;  %v3266_v8 = vand.u32 65535, %v13412_v36  ;;  %v3269_v59 = vshrl.u32 %v13436_v24, 16  ;;  %v2582_v10 = vmul.f32 %v13338_v33, %v13218_v37 }
 0x31e   : > { %v13446_v2 = vadd.s32 %v3131_v41, %v3122_v30  ;;  %v16798_v4 = vshll.u32 %v13311_v28, 16  ;;  %v3375_v22 = vand.u32 2139095040, %v16799_v39  ;;  %v2721_v12 = vsub.s32 4, %v13015_v23 }
 0x31f   : > { %v2846_v11 = vadd.s32 %v13111_v26, %v13106_v48  ;;  %v2862_v55 = vsub.s32 32, %v13386_v45  ;;  %v2867_v60 = vadd.s32 127, %v2866_v14  ;;  %v2720_v37 = vsel %vm2599_vm13, %v2719_v19, %v2718_v21 }
 0x320   : > { %v13451_v52 = vadd.s32 %v13323_v13, %v16798_v4  ;;  %v13461_v33 = vsub.s32 %v13343_v47, %v3008_v44  ;;  %v3101_v28 = vsel %vm3095_vm15, %v3098_v62, %v3100_v61  ;;  %v3291_v13 = vshrl.u32 %v13440_v54, 16 }
 0x321   : > { %v3158_v30 = vadd.s32 1, %v3154_v43  ;;  %v3267_v41 = vshrl.u32 %v13412_v36, 16  ;;  %v3268_v56 = vand.u32 65535, %v13436_v24  ;;  %v13468_v48 = vmul.u32 %v3269_v59, %v3266_v8 }
 0x322   : > { %v2583_v26 = vadd.f32 1.0, %v2582_v10  ;;  %vm3157_vm1 = vc.u32 %v13446_v2, %v13451_v52  ;;  %v3290_v21 = vand.u32 65535, %v13440_v54  ;;  %v3376_v47 = vshrl.u32 %v3375_v22, 23 }
 0x323   : > { %v13476_v25 = vsel %vm13395_vm12, %v16793_v50, %v2720_v37  ;;  %v2863_v20 = vshll.u32 %v13272_v17, %v13386_v45  ;;  %v2864_v19 = vshrl.u32 %v2846_v11, %v2862_v55  ;;  %v2868_v14 = vshll.u32 %v2867_v60, 23 }
 0x324   : > { %vm3010_vm11 = vcmp.lt.s32.totalorder %v13461_v33, 0  ;;  %v3011_v27 = vsub.s32 0, %v13461_v33  ;;  %v3155_v44 = vmul.u32 %v13243_v16, %v3101_v28  ;;  %v13483_v62 = vmul.u32 %v3291_v13, %v3266_v8 }
 0x325   : > { %v3159_v61 = vsel %vm3157_vm1, %v3158_v30, %v3154_v43  ;;  %v3270_v24 = vmul.u32 %v3268_v56, %v3266_v8  ;;  %v13485_v54 = vmul.u32 %v3268_v56, %v3267_v41  ;;  %v3274_v10 = vshll.u32 %v13468_v48, 16 }
 0x326   : > { %v3292_v4 = vmul.u32 %v3290_v21, %v3266_v8  ;;  %v13488_v22 = vmul.u32 %v3290_v21, %v3267_v41  ;;  %v3296_v17 = vshll.u32 %v13483_v62, 16  ;;  %v9350_v45 = vadd.s32 4294967169, %v3376_v47 }
 0x327   : > { %v13495_v11 = vsel %vm2433_vm2, %v13333_v34, %v13256_v49  ;;  %v13498_v16 = vand.u32 3, %v13259_v57  ;;  %v2865_v43 = vor.u32 %v2864_v19, %v2863_v20  ;;  %v2869_v55 = vor.u32 4788187, %v2868_v14 }
 0x328   : > { %16800 = vst [vmem:[#allocation92_spill] sm:$0xff] %v13495_v11  ;;  %v13500_v60 = vadd.f32 1.0, %v2575_v32  ;;  %v13505_v8 = vsel %vm2599_vm13, %v2721_v12, %v13015_v23  ;;  %v3012_v37 = vsel %vm3010_vm11, %v3011_v27, %v13461_v33  ;;  %v13510_v28 = vadd.s32 %v3159_v61, %v3155_v44 }
 0x329   : > { %v13513_v58 = vmul.f32 %v2583_v26, %v13156_v63  ;;  %v13517_v49 = vmul.f32 %v13476_v25, %v13476_v25  ;;  %v3276_v57 = vshll.u32 %v13485_v54, 16  ;;  %vm3278_vm15 = vc.u32 %v3270_v24, %v3274_v10 }
 0x32a   : > { %16801 = vst [vmem:[#allocation93_spill] sm:$0xff] %v13500_v60  ;;  %v3280_v34 = vadd.s32 %v3274_v10, %v3270_v24  ;;  %v16408_v23 = vshll.u32 %v13488_v22, 16  ;;  %v13521_v32 = vadd.s32 %v3296_v17, %v3292_v4  ;;  %v3382_v12 = vadd.s32 1, %v9350_v45 }
 0x32b   : > { %16802 = vst [vmem:[#allocation94_spill] sm:$0xff] %v13513_v58  ;;  %v2870_v30 = vand.u32 2147483647, %v2869_v55  ;;  %v2872_v56 = vcvt.s32.f32 %v2865_v43  ;;  %v3013_v21 = vclz %v3012_v37  ;;  %vm3300_vm10 = vc.u32 %v3292_v4, %v3296_v17  ;;  %v16804_v43 = vld [vmem:[#allocation22_spill] sm:$0xff] }
 0x32c   : > { %v3161_v63 = vadd.s32 536870912, %v13510_v28  ;;  %v3273_v26 = vmul.u32 %v3269_v59, %v3267_v41  ;;  %v16407_v47 = vand.u32 2147483647, %v16799_v39  ;;  %vm3383_vm3 = vcmp.gt.s32.totalorder %v3382_v12, 0 }
 0x32d   : > { %v3279_v19 = vsel %vm3278_vm15, 1, %v16563_v29  ;;  %v3295_v14 = vmul.u32 %v3291_v13, %v3267_v41  ;;  %v3384_v27 = vsel %vm3383_vm3, %v3382_v12, 0  ;;  %vm3282_vm13 = vc.u32 %v3280_v34, %v3276_v57 }
 0x32e   : > { %v3301_v44 = vsel %vm3300_vm10, 1, %v16563_v29  ;;  %vm3304_vm2 = vc.u32 %v13521_v32, %v16408_v23  ;;  %v3386_v61 = vand.u32 31, %v3384_v27  ;;  %v2733_v59 = vmul.f32 -0.00019511016, %v13517_v49 }
 0x32f   : > { %v2873_v10 = vmul.f32 %v2872_v56, %v2870_v30  ;;  %v9342_v4 = vadd.s32 4294967294, %v3013_v21  ;;  %v13533_v17 = vshrl.u32 %v3161_v63, 30  ;;  %v3281_v45 = vadd.s32 %v3279_v19, %v3273_v26 }
 0x330   : > { %v3379_v13 = vand.u32 8388607, %v16407_v47  ;;  %v13537_v41 = vsub.s32 32, %v3386_v61  ;;  %vm2754_vm1 = vcmp.lt.s32.totalorder %v16804_v43, 0  ;;  %v3283_v55 = vsel %vm3282_vm13, 1, %v16563_v29 }
 0x331   : > { %16803 = vst [vmem:[#allocation95_spill] sm:$0xff] %v13533_v17  ;;  %v3303_v37 = vadd.s32 %v3301_v44, %v3295_v14  ;;  %v3305_v57 = vsel %vm3304_vm2, 1, %v16563_v29  ;;  %v3392_v34 = vshll.u32 %v16710_v42, %v3386_v61  ;;  %v3395_v30 = vshll.u32 %v16711_v15, %v3386_v61 }
 0x332   : > { %v3393_v12 = vshrl.u32 %v16711_v15, %v13537_v41  ;;  %v3396_v56 = vshrl.u32 %v16546_v5, %v13537_v41  ;;  %v3398_v21 = vshll.u32 %v16546_v5, %v3386_v61  ;;  %v13549_v63 = vshrl.u32 %v3384_v27, 5 }
 0x333   : > { %v3389_v26 = vshll.u32 %v16543_v3, %v3386_v61  ;;  %v3390_v19 = vshrl.u32 %v16710_v42, %v13537_v41  ;;  %v3399_v14 = vshrl.u32 %v16561_v35, %v13537_v41  ;;  %v2874_v44 = vxor.u32 2147483648, %v2873_v10 }
 0x334   : > { %vm9343_vm11 = vcmp.lt.s32.totalorder %v9342_v4, 0  ;;  %v3163_v47 = vshll.u32 %v13533_v17, 30  ;;  %v3401_v20 = vshll.u32 %v16561_v35, %v3386_v61  ;;  %vm2589_vm15 = vcmp.eq.s32.totalorder %v13498_v16, 0 }
 0x335   : > { %vm2592_vm10 = vcmp.eq.s32.totalorder %v13498_v16, 2  ;;  %v3275_v27 = vshrl.u32 %v13468_v48, 16  ;;  %v3285_v24 = vadd.s32 %v3283_v55, %v3281_v45  ;;  %v3297_v23 = vshrl.u32 %v13483_v62, 16 }
 0x336   : > { %v3307_v38 = vadd.s32 %v3305_v57, %v3303_v37  ;;  %v16805_v39 = vand.u32 2147483647, %v16804_v43  ;;  %v13568_v50 = vor.u32 %v3393_v12, %v3392_v34  ;;  %v13570_v17 = vor.u32 %v3396_v56, %v3395_v30 }
 0x337   : > { %v3400_v61 = vor.u32 %v3399_v14, %v3398_v21  ;;  %v3402_v11 = vshrl.u32 %v16562_v18, %v13537_v41  ;;  %v3380_v1 = vor.u32 8388608, %v3379_v13  ;;  %v13574_v48 = vor.u32 %v3390_v19, %v3389_v26 }
 0x338   : > { %vm13564_vm3 = vcmp.le.f32.partialorder %v16805_v39, 0.7853982  ;;  %vm3404_vm13 = vcmp.lt.s32.totalorder %v13549_v63, 1  ;;  %vm3407_vm2 = vcmp.lt.s32.totalorder %v13549_v63, 4  ;;  %v13579_v39 = vsub.s32 %v13510_v28, %v3163_v47 }
 0x339   : > { %v3233_v62 = vshrl.u32 %v16543_v3, %v13336_v0  ;;  %v3403_v45 = vor.u32 %v3402_v11, %v3401_v20  ;;  %vm3406_vm0 = vcmp.lt.s32.totalorder %v13549_v63, 3  ;;  %vm2588_vm5 = vcmp.lt.s32.totalorder %v13498_v16, 2 }
 0x33a   : > { %v3254_v13 = vsel %vm3252_vm14, %v13378_v9, 2102212464  ;;  %v3277_v55 = vshrl.u32 %v13485_v54, 16  ;;  %v3286_v37 = vadd.s32 %v3285_v24, %v3275_v27  ;;  %v3299_v57 = vshrl.u32 %v13488_v22, 16 }
 0x33b   : > { %v3308_v34 = vadd.s32 %v3307_v38, %v3297_v23  ;;  %vm3405_vm8 = vcmp.lt.s32.totalorder %v13549_v63, 2  ;;  %v3413_v0 = vsel %vm3407_vm2, %v3400_v61, 920167782  ;;  %v3416_v11 = vsel %vm3404_vm13, %v13568_v50, %v13570_v17  ;;  %v16822_v63 = vld [vmem:[#allocation32_spill] sm:$0xff] }
 0x33c   : > { %v3412_v9 = vsel %vm3404_vm13, %v13574_v48, %v13568_v50  ;;  %v3414_v54 = vsel %vm3406_vm0, %v13570_v17, %v3413_v0  ;;  %v3417_v38 = vsel %vm3407_vm2, %v3403_v45, 1326507024  ;;  %v13606_v28 = vshll.u32 %v3380_v1, 8 }
 0x33d   : > { %v2726_v23 = vmul.f32 -0.001358992, %v13517_v49  ;;  %v2734_v47 = vadd.f32 0.008332121, %v2733_v59  ;;  %v2875_v20 = vsel %vm2754_vm1, %v2874_v44, %v2873_v10  ;;  %v3418_v24 = vsel %vm3406_vm0, %v3400_v61, %v3417_v38 }
 0x33e   : > { %v3016_v12 = vsel %vm9343_vm11, 0, %v9342_v4  ;;  %vm3165_vm14 = vcmp.lt.s32.totalorder %v13579_v39, 0  ;;  %v3253_v30 = vsel %vm3249_vm7, %v3233_v62, %v13382_v6  ;;  %v13620_v1 = vsel %vm3405_vm8, %v3416_v11, %v3418_v24 }
 0x33f   : > { %v3166_v59 = vsub.s32 0, %v13579_v39  ;;  %v3255_v10 = vsel %vm3251_vm9, %v13376_v40, %v3254_v13  ;;  %v3309_v56 = vadd.s32 %v3308_v34, %v3299_v57  ;;  %v3415_v4 = vsel %vm3405_vm8, %v3412_v9, %v3414_v54 }
 0x340   : > { %v13628_v21 = vadd.s32 %v3286_v37, %v3277_v55  ;;  %v16808_v26 = vshll.u32 %v13488_v22, 16  ;;  %v3421_v19 = vand.u32 65535, %v13606_v28  ;;  %v3424_v14 = vshrl.u32 %v13620_v1, 16 }
 0x341   : > { %v16809_v44 = vxor.u32 2147483648, %v13513_v58  ;;  %v16810_v27 = vxor.u32 2147483648, %v13500_v60  ;;  %v13650_v22 = vsel %vm13395_vm12, 0, %v13505_v8  ;;  %v2735_v62 = vmul.f32 %v2734_v47, %v13517_v49 }
 0x342   : > { %v13633_v6 = vadd.s32 %v13521_v32, %v16808_v26  ;;  %16811 = vst [vmem:[#allocation96_spill] sm:$0xff] %v13650_v22  ;;  %v2727_v32 = vadd.f32 0.041655596, %v2726_v23  ;;  %v13656_v45 = vsel %vm13564_vm3, %v16804_v43, %v2875_v20  ;;  %v3021_v13 = vsub.s32 4294967266, %v3016_v12 }
 0x343   : > { %v2591_v40 = vsel %vm2589_vm15, %v13500_v60, %v16809_v44  ;;  %v2594_v61 = vsel %vm2592_vm10, %v16810_v27, %v13513_v58  ;;  %v3446_v55 = vshrl.u32 %v3415_v4, 16  ;;  %v3167_v37 = vsel %vm3165_vm14, %v3166_v59, %v13579_v39 }
 0x344   : > { %v3256_v57 = vsel %vm3250_vm4, %v3253_v30, %v3255_v10  ;;  %v3313_v31 = vadd.s32 1, %v3309_v56  ;;  %v3422_v8 = vshrl.u32 %v13606_v28, 16  ;;  %vm3312_vm7 = vc.u32 %v13628_v21, %v13633_v6 }
 0x345   : > { %v3423_v34 = vand.u32 65535, %v13620_v1  ;;  %v13667_v0 = vmul.u32 %v3424_v14, %v3421_v19  ;;  %v3445_v11 = vand.u32 65535, %v3415_v4  ;;  %v13671_v9 = vsel %vm2588_vm5, %v2591_v40, %v2594_v61  ;;  %v16812_v61 = vld [vmem:[#allocation90_spill] sm:$0xff] }
 0x346   : > { %v2741_v54 = vadd.s32 3, %v13650_v22  ;;  %v3001_v53 = vadd.s32 %v13303_v46, %v13298_v7  ;;  %v3017_v38 = vsub.s32 32, %v3016_v12  ;;  %v2728_v23 = vmul.f32 %v2727_v32, %v13517_v49 }
 0x347   : > { %v3022_v47 = vadd.s32 127, %v3021_v13  ;;  %v3168_v20 = vclz %v3167_v37  ;;  %v13677_v24 = vmul.u32 %v3446_v55, %v3421_v19  ;;  %v2736_v30 = vadd.f32 -0.16666654, %v2735_v62 }
 0x348   : > { %v13681_v1 = vmul.f32 %v13656_v45, %v13656_v45  ;;  %v3310_v16 = vmul.u32 %v13412_v36, %v3256_v57  ;;  %v3314_v59 = vsel %vm3312_vm7, %v3313_v31, %v3309_v56  ;;  %v3425_v10 = vmul.u32 %v3423_v34, %v3421_v19 }
 0x349   : > { %v13684_v4 = vmul.u32 %v3423_v34, %v3422_v8  ;;  %v3429_v7 = vshll.u32 %v13667_v0, 16  ;;  %v13687_v46 = vmul.u32 %v3445_v11, %v3422_v8  ;;  %v13689_v26 = vand.u32 3, %v2741_v54 }
 0x34a   : > { %v3018_v44 = vshll.u32 %v13461_v33, %v3016_v12  ;;  %v3019_v40 = vshrl.u32 %v3001_v53, %v3017_v38  ;;  %v3447_v27 = vmul.u32 %v3445_v11, %v3421_v19  ;;  %v2876_v32 = vsub.s32 4, %v16812_v61 }
 0x34b   : > { %v3023_v62 = vshll.u32 %v3022_v47, 23  ;;  %v9345_v13 = vadd.s32 4294967294, %v3168_v20  ;;  %v3451_v36 = vshll.u32 %v13677_v24, 16  ;;  %v2729_v56 = vadd.f32 -0.4999988, %v2728_v23 }
 0x34c   : > { %v2737_v37 = vmul.f32 %v2736_v30, %v13517_v49  ;;  %v2888_v57 = vmul.f32 -0.00019511016, %v13681_v1  ;;  %v13696_v31 = vadd.s32 %v3314_v59, %v3310_v16  ;;  %v3431_v34 = vshll.u32 %v13684_v4, 16  ;;  %v16813_v30 = vld [vmem:[#allocation20_spill] sm:$0xff] }
 0x34d   : > { %vm3433_vm5 = vc.u32 %v3425_v10, %v3429_v7  ;;  %v3435_v54 = vadd.s32 %v3429_v7, %v3425_v10  ;;  %v16421_v33 = vshll.u32 %v13687_v46, 16  ;;  %v3020_v12 = vor.u32 %v3019_v40, %v3018_v44 }
 0x34e   : > { %v3450_v19 = vmul.u32 %v3446_v55, %v3422_v8  ;;  %vm3455_vm9 = vc.u32 %v3447_v27, %v3451_v36  ;;  %v13700_v11 = vadd.s32 %v3451_v36, %v3447_v27  ;;  %v3024_v53 = vor.u32 4788187, %v3023_v62 }
 0x34f   : > { %vm9346_vm12 = vcmp.lt.s32.totalorder %v9345_v13, 0  ;;  %v3428_v38 = vmul.u32 %v3424_v14, %v3422_v8  ;;  %v3456_v23 = vsel %vm3455_vm9, 1, %v16563_v29  ;;  %v3316_v47 = vadd.s32 536870912, %v13696_v31 }
 0x350   : > { %v3434_v20 = vsel %vm3433_vm5, 1, %v16563_v29  ;;  %vm3459_vm4 = vc.u32 %v13700_v11, %v16421_v33  ;;  %v3530_v16 = vand.u32 2139095040, %v16813_v30  ;;  %v2730_v55 = vmul.f32 %v2729_v56, %v13517_v49 }
 0x351   : > { %v2738_v59 = vadd.f32 1.0, %v2737_v37  ;;  %v2877_v10 = vsel %vm2754_vm1, %v2876_v32, %v16812_v61  ;;  %vm3437_vm11 = vc.u32 %v3435_v54, %v3431_v34  ;;  %v2881_v14 = vmul.f32 -0.001358992, %v13681_v1  ;;  %v16815_v32 = vld [vmem:[#allocation35_spill] sm:$0xff] }
 0x352   : > { %v3171_v8 = vsel %vm9346_vm12, 0, %v9345_v13  ;;  %v3458_v7 = vadd.s32 %v3456_v23, %v3450_v19  ;;  %v3531_v44 = vshrl.u32 %v3530_v16, 23  ;;  %v2889_v40 = vadd.f32 0.008332121, %v2888_v57 }
 0x353   : > { %v3027_v27 = vcvt.s32.f32 %v3020_v12  ;;  %v3436_v62 = vadd.s32 %v3434_v20, %v3428_v38  ;;  %v3460_v36 = vsel %vm3459_vm4, 1, %v16563_v29  ;;  %v3025_v33 = vand.u32 2147483647, %v3024_v53 }
 0x354   : > { %v13715_v60 = vshrl.u32 %v3316_v47, 30  ;;  %v3438_v49 = vsel %vm3437_vm11, 1, %v16563_v29  ;;  %v9353_v56 = vadd.s32 4294967169, %v3531_v44  ;;  %vm2747_vm15 = vcmp.eq.s32.totalorder %v13689_v26, 2 }
 0x355   : > { %v13721_v61 = vsel %vm13564_vm3, 0, %v2877_v10  ;;  %vm2909_vm1 = vcmp.lt.s32.totalorder %v16815_v32, 0  ;;  %v3176_v13 = vsub.s32 4294967266, %v3171_v8  ;;  %v13724_v37 = vadd.f32 1.0, %v2730_v55 }
 0x356   : > { %16814 = vst [vmem:[#allocation90_spill] sm:$0xff] %v13721_v61  ;;  %v3452_v57 = vshrl.u32 %v13677_v24, 16  ;;  %v3462_v34 = vadd.s32 %v3460_v36, %v3458_v7  ;;  %v3537_v54 = vadd.s32 1, %v9353_v56  ;;  %v13728_v12 = vmul.f32 %v2738_v59, %v13476_v25 }
 0x357   : > { %16816 = vst [vmem:[#allocation97_spill] sm:$0xff] %v13724_v37  ;;  %v2882_v19 = vadd.f32 0.041655596, %v2881_v14  ;;  %v3430_v53 = vshrl.u32 %v13667_v0, 16  ;;  %v3440_v38 = vadd.s32 %v3438_v49, %v3436_v62  ;;  %v2890_v51 = vmul.f32 %v2889_v40, %v13681_v1 }
 0x358   : > { %16817 = vst [vmem:[#allocation98_spill] sm:$0xff] %v13728_v12  ;;  %v3028_v23 = vmul.f32 %v3027_v27, %v3025_v33  ;;  %v3318_v47 = vshll.u32 %v13715_v60, 30  ;;  %vm3538_vm10 = vcmp.gt.s32.totalorder %v3537_v54, 0  ;;  %v3156_v20 = vadd.s32 %v13451_v52, %v13446_v2 }
 0x359   : > { %v3172_v16 = vsub.s32 32, %v3171_v8  ;;  %v3177_v24 = vadd.s32 127, %v3176_v13  ;;  %v3539_v55 = vsel %vm3538_vm10, %v3537_v54, 0  ;;  %v3388_v25 = vshrl.u32 %v16543_v3, %v13537_v41 }
 0x35a   : > { %v3454_v59 = vshrl.u32 %v13687_v46, 16  ;;  %v3463_v10 = vadd.s32 %v3462_v34, %v3452_v57  ;;  %v3541_v0 = vand.u32 31, %v3539_v55  ;;  %vm2744_vm3 = vcmp.eq.s32.totalorder %v13689_v26, 0 }
 0x35b   : > { %v16424_v33 = vxor.u32 2147483648, %v13724_v37  ;;  %v3409_v14 = vsel %vm3407_vm2, %v13570_v17, 2102212464  ;;  %v3432_v2 = vshrl.u32 %v13684_v4, 16  ;;  %v3441_v52 = vadd.s32 %v3440_v38, %v3430_v53 }
 0x35c   : > { %v2883_v7 = vmul.f32 %v2882_v19, %v13681_v1  ;;  %v2891_v44 = vadd.f32 -0.16666654, %v2890_v51  ;;  %v3029_v40 = vxor.u32 2147483648, %v3028_v23  ;;  %v13746_v41 = vsub.s32 %v13696_v31, %v3318_v47 }
 0x35d   : > { %v16425_v27 = vxor.u32 2147483648, %v13728_v12  ;;  %v16818_v62 = vand.u32 2147483647, %v16815_v32  ;;  %v3173_v17 = vshll.u32 %v13579_v39, %v3171_v8  ;;  %v3174_v49 = vshrl.u32 %v3156_v20, %v3172_v16 }
 0x35e   : > { %v3178_v4 = vshll.u32 %v3177_v24, 23  ;;  %v3408_v56 = vsel %vm3404_vm13, %v3388_v25, %v13574_v48  ;;  %v3410_v31 = vsel %vm3406_vm0, %v13568_v50, %v3409_v14  ;;  %v3464_v13 = vadd.s32 %v3463_v10, %v3454_v59  ;;  %v16823_v10 = vld [vmem:[#allocation33_spill] sm:$0xff] }
 0x35f   : > { %vm13751_vm14 = vcmp.le.f32.partialorder %v16818_v62, 0.7853982  ;;  %v13762_v57 = vsub.s32 32, %v3541_v0  ;;  %v13769_v34 = vsel %vm2747_vm15, %v16424_v33, %v13728_v12  ;;  %v2896_v39 = vadd.s32 3, %v13721_v61 }
 0x360   : > { %v13772_v8 = vadd.s32 %v3441_v52, %v3432_v2  ;;  %v16821_v48 = vshll.u32 %v13687_v46, 16  ;;  %v2884_v50 = vadd.f32 -0.4999988, %v2883_v7  ;;  %v2892_v19 = vmul.f32 %v2891_v44, %v13681_v1 }
 0x361   : > { %v3030_v53 = vsel %vm2909_vm1, %v3029_v40, %v3028_v23  ;;  %v3321_v38 = vsub.s32 0, %v13746_v41  ;;  %v3175_v51 = vor.u32 %v3174_v49, %v3173_v17  ;;  %v3179_v47 = vor.u32 4788187, %v3178_v4 }
 0x362   : > { %v13777_v54 = vadd.s32 %v13700_v11, %v16821_v48  ;;  %vm3320_vm0 = vcmp.lt.s32.totalorder %v13746_v41, 0  ;;  %v3411_v20 = vsel %vm3405_vm8, %v3408_v56, %v3410_v31  ;;  %v3468_v16 = vadd.s32 1, %v3464_v13 }
 0x363   : > { %v16426_v46 = vand.u32 2147483647, %v16813_v30  ;;  %v3553_v11 = vshll.u32 %v16546_v5, %v3541_v0  ;;  %v3554_v24 = vshrl.u32 %v16561_v35, %v13762_v57  ;;  %v13792_v23 = vshrl.u32 %v3539_v55, 5 }
 0x364   : > { %vm3467_vm13 = vc.u32 %v13772_v8, %v13777_v54  ;;  %v3556_v25 = vshll.u32 %v16561_v35, %v3541_v0  ;;  %v3557_v59 = vshrl.u32 %v16562_v18, %v13762_v57  ;;  %vm2430_vm8 = vweird.f32 %v16822_v63 }
 0x365   : > { %vm16494_vm2 = vweird.f32 %v16823_v10  ;;  %v3322_v14 = vsel %vm3320_vm0, %v3321_v38, %v13746_v41  ;;  %v3465_v2 = vmul.u32 %v13606_v28, %v3411_v20  ;;  %v3544_v52 = vshll.u32 %v16543_v3, %v3541_v0 }
 0x366   : > { %v3547_v7 = vshll.u32 %v16710_v42, %v3541_v0  ;;  %vm2743_vm7 = vcmp.lt.s32.totalorder %v13689_v26, 2  ;;  %v3545_v55 = vshrl.u32 %v16710_v42, %v13762_v57  ;;  %v3548_v44 = vshrl.u32 %v16711_v15, %v13762_v57 }
 0x367   : > { %v3550_v40 = vshll.u32 %v16711_v15, %v3541_v0  ;;  %v3551_v62 = vshrl.u32 %v16546_v5, %v13762_v57  ;;  %v2746_v28 = vsel %vm2744_vm3, %v13724_v37, %v16425_v27  ;;  %v2885_v17 = vmul.f32 %v2884_v50, %v13681_v1 }
 0x368   : > { %v3469_v49 = vsel %vm3467_vm13, %v3468_v16, %v3464_v13  ;;  %v3555_v4 = vor.u32 %v3554_v24, %v3553_v11  ;;  %v2893_v56 = vadd.f32 1.0, %v2892_v19  ;;  %v3534_v0 = vand.u32 8388607, %v16426_v46 }
 0x369   : > { %v3558_v31 = vor.u32 %v3557_v59, %v3556_v25  ;;  %vm3562_vm5 = vcmp.lt.s32.totalorder %v13792_v23, 4  ;;  %v13826_v48 = vsel %vm13751_vm14, %v16815_v32, %v3030_v53  ;;  %v3180_v38 = vand.u32 2147483647, %v3179_v47  ;;  %v16824_v53 = vld [vmem:[#allocation19_spill] sm:$0xff] }
 0x36a   : > { %v3182_v20 = vcvt.s32.f32 %v3175_v51  ;;  %v3323_v1 = vclz %v3322_v14  ;;  %v13828_v50 = vadd.s32 %v3469_v49, %v3465_v2  ;;  %v13830_v33 = vor.u32 %v3545_v55, %v3544_v52  ;;  %v16825_v51 = vld [vmem:[#allocation91_spill] sm:$0xff]  ;;  %v16828_v49 = vld [vmem:[#allocation92_spill] sm:$0xff] }
 0x36b   : > { %v13832_v13 = vor.u32 %v3548_v44, %v3547_v7  ;;  %v13834_v19 = vor.u32 %v3551_v62, %v3550_v40  ;;  %vm3559_vm9 = vcmp.lt.s32.totalorder %v13792_v23, 1  ;;  %vm3561_vm12 = vcmp.lt.s32.totalorder %v13792_v23, 3 }
 0x36c   : > { %v3568_v16 = vsel %vm3562_vm5, %v3555_v4, 920167782  ;;  %v3685_v11 = vand.u32 2139095040, %v16824_v53  ;;  %v2897_v47 = vand.u32 3, %v2896_v39  ;;  %v3031_v24 = vsub.s32 4, %v16825_v51 }
 0x36d   : > { %v3535_v25 = vor.u32 8388608, %v3534_v0  ;;  %v3572_v59 = vsel %vm3562_vm5, %v3558_v31, 1326507024  ;;  %v13844_v14 = vadd.f32 1.0, %v2885_v17  ;;  %v13847_v2 = vmul.f32 %v2893_v56, %v13656_v45  ;;  %v16831_v31 = vld [vmem:[#allocation34_spill] sm:$0xff] }
 0x36e   : > { %v13851_v52 = vmul.f32 %v13826_v48, %v13826_v48  ;;  %v9348_v7 = vadd.s32 4294967294, %v3323_v1  ;;  %v3471_v55 = vadd.s32 536870912, %v13828_v50  ;;  %vm3560_vm4 = vcmp.lt.s32.totalorder %v13792_v23, 2 }
 0x36f   : > { %16826 = vst [vmem:[#allocation91_spill] sm:$0xff] %v13844_v14  ;;  %v3567_v39 = vsel %vm3559_vm9, %v13830_v33, %v13832_v13  ;;  %v3569_v44 = vsel %vm3561_vm12, %v13834_v19, %v3568_v16  ;;  %v3183_v45 = vmul.f32 %v3182_v20, %v3180_v38  ;;  %v3571_v40 = vsel %vm3559_vm9, %v13832_v13, %v13834_v19 }
 0x370   : > { %16827 = vst [vmem:[#allocation99_spill] sm:$0xff] %v13847_v2  ;;  %v3573_v62 = vsel %vm3561_vm12, %v3555_v4, %v3572_v59  ;;  %v3686_v17 = vshrl.u32 %v3685_v11, 23  ;;  %v13871_v56 = vsel %vm2430_vm8, nan, %v16828_v49  ;;  %v13876_v0 = vsel %vm16494_vm2, nan, %v13671_v9 }
 0x371   : > { %16829 = vst [vmem:[#allocation92_spill] sm:$0xff] %v13871_v56  ;;  %vm16490_vm11 = vweird.f32 %v16831_v31  ;;  %v13879_v38 = vshll.u32 %v3535_v25, 8  ;;  %v2750_v20 = vsel %vm2743_vm7, %v2746_v28, %v13769_v34  ;;  %vm2899_vm15 = vcmp.eq.s32.totalorder %v2897_v47, 0  ;;  %v16838_v31 = vld [vmem:[#allocation95_spill] sm:$0xff] }
 0x372   : > { %16830 = vst [vmem:[#allocation100_spill] sm:$0xff] %v13876_v0  ;;  %v3032_v4 = vsel %vm2909_vm1, %v3031_v24, %v16825_v51  ;;  %v13889_v1 = vsel %vm3560_vm4, %v3567_v39, %v3569_v44  ;;  %v3043_v9 = vmul.f32 -0.00019511016, %v13851_v52  ;;  %vm9349_vm10 = vcmp.lt.s32.totalorder %v9348_v7, 0  ;;  %v16832_v51 = vld [vmem:[#allocation23_spill] sm:$0xff] }
 0x373   : > { %v13892_v16 = vshrl.u32 %v3471_v55, 30  ;;  %v13896_v11 = vsel %vm3560_vm4, %v3571_v40, %v3573_v62  ;;  %v16427_v26 = vxor.u32 2147483648, %v13847_v2  ;;  %v16429_v34 = vxor.u32 2147483648, %v13844_v14 }
 0x374   : > { %v3184_v28 = vxor.u32 2147483648, %v3183_v45  ;;  %v9356_v25 = vadd.s32 4294967169, %v3686_v17  ;;  %vm2902_vm1 = vcmp.eq.s32.totalorder %v2897_v47, 2  ;;  %vm3064_vm3 = vcmp.lt.s32.totalorder %v16832_v51, 0 }
 0x375   : > { %v3576_v24 = vand.u32 65535, %v13879_v38  ;;  %v3601_v59 = vshrl.u32 %v13889_v1, 16  ;;  %vm2898_vm0 = vcmp.lt.s32.totalorder %v2897_v47, 2  ;;  %v3036_v55 = vmul.f32 -0.001358992, %v13851_v52 }
 0x376   : > { %v3326_v39 = vsel %vm9349_vm10, 0, %v9348_v7  ;;  %v3579_v44 = vshrl.u32 %v13896_v11, 16  ;;  %v13907_v40 = vsel %vm13751_vm14, 0, %v3032_v4  ;;  %v3044_v62 = vadd.f32 0.008332121, %v3043_v9 }
 0x377   : > { %16833 = vst [vmem:[#allocation101_spill] sm:$0xff] %v13907_v40  ;;  %v16834_v17 = vand.u32 2147483647, %v16832_v51  ;;  %v3473_v27 = vshll.u32 %v13892_v16, 30  ;;  %v2901_v7 = vsel %vm2899_vm15, %v13844_v14, %v16427_v26  ;;  %v2904_v36 = vsel %vm2902_vm1, %v16429_v34, %v13847_v2 }
 0x378   : > { %v3185_v4 = vsel %vm3064_vm3, %v3184_v28, %v3183_v45  ;;  %v3692_v9 = vadd.s32 1, %v9356_v25  ;;  %vm16451_vm14 = vweird.f32 %v16804_v43  ;;  %v3577_v46 = vshrl.u32 %v13879_v38, 16  ;;  %v16852_v43 = vld [vmem:[#allocation37_spill] sm:$0xff] }
 0x379   : > { %vm13911_vm13 = vcmp.le.f32.partialorder %v16834_v17, 0.7853982  ;;  %v3331_v17 = vsub.s32 4294967266, %v3326_v39  ;;  %v3600_v0 = vand.u32 65535, %v13889_v1  ;;  %v13928_v56 = vmul.u32 %v3601_v59, %v3576_v24 }
 0x37a   : > { %v13932_v26 = vsel %vm16490_vm11, nan, %v2750_v20  ;;  %v3037_v10 = vadd.f32 0.041655596, %v3036_v55  ;;  %v3578_v34 = vand.u32 65535, %v13896_v11  ;;  %v13935_v63 = vmul.u32 %v3579_v44, %v3576_v24 }
 0x37b   : > { %16837 = vst [vmem:[#allocation102_spill] sm:$0xff] %v13932_v26  ;;  %v2905_v45 = vsel %vm2898_vm0, %v2901_v7, %v2904_v36  ;;  %v3045_v28 = vmul.f32 %v3044_v62, %v13851_v52  ;;  %v3051_v25 = vadd.s32 3, %v13907_v40  ;;  %v13941_v14 = vsub.s32 %v13828_v50, %v3473_v27 }
 0x37c   : > { %v13946_v1 = vsel %vm13911_vm13, %v16832_v51, %v3185_v4  ;;  %v3311_v20 = vadd.s32 %v13633_v6, %v13628_v21  ;;  %v3327_v11 = vsub.s32 32, %v3326_v39  ;;  %vm3693_vm7 = vcmp.gt.s32.totalorder %v3692_v9, 0 }
 0x37d   : > { %v3332_v55 = vadd.s32 127, %v3331_v17  ;;  %v3602_v47 = vmul.u32 %v3600_v0, %v3576_v24  ;;  %v13950_v7 = vmul.u32 %v3600_v0, %v3577_v46  ;;  %v3606_v62 = vshll.u32 %v13928_v56, 16 }
 0x37e   : > { %v3038_v36 = vmul.f32 %v3037_v10, %v13851_v52  ;;  %v3580_v27 = vmul.u32 %v3578_v34, %v3576_v24  ;;  %v13954_v50 = vmul.u32 %v3578_v34, %v3577_v46  ;;  %v3584_v26 = vshll.u32 %v13935_v63, 16 }
 0x37f   : > { %v3046_v4 = vadd.f32 -0.16666654, %v3045_v28  ;;  %v3186_v2 = vsub.s32 4, %v16838_v31  ;;  %v3476_v21 = vsub.s32 0, %v13941_v14  ;;  %v3694_v6 = vsel %vm3693_vm7, %v3692_v9, 0 }
 0x380   : > { %v13961_v17 = vmul.f32 %v13946_v1, %v13946_v1  ;;  %v3328_v0 = vshll.u32 %v13746_v41, %v3326_v39  ;;  %v3329_v37 = vshrl.u32 %v3311_v20, %v3327_v11  ;;  %vm3475_vm15 = vcmp.lt.s32.totalorder %v13941_v14, 0 }
 0x381   : > { %v3333_v10 = vshll.u32 %v3332_v55, 23  ;;  %v16444_v34 = vshll.u32 %v13950_v7, 16  ;;  %vm3610_vm10 = vc.u32 %v3602_v47, %v3606_v62  ;;  %v13966_v24 = vadd.s32 %v3606_v62, %v3602_v47 }
 0x382   : > { %v3586_v28 = vshll.u32 %v13954_v50, 16  ;;  %vm3588_vm1 = vc.u32 %v3580_v27, %v3584_v26  ;;  %v3590_v12 = vadd.s32 %v3584_v26, %v3580_v27  ;;  %v3696_v9 = vand.u32 31, %v3694_v6 }
 0x383   : > { %v3039_v58 = vadd.f32 -0.4999988, %v3038_v36  ;;  %v3047_v40 = vmul.f32 %v3046_v4, %v13851_v52  ;;  %v3477_v61 = vsel %vm3475_vm15, %v3476_v21, %v13941_v14  ;;  %v3605_v41 = vmul.u32 %v3601_v59, %v3577_v46 }
 0x384   : > { %v13973_v39 = vsel %vm16451_vm14, nan, %v2905_v45  ;;  %v3191_v20 = vmul.f32 -0.001358992, %v13961_v17  ;;  %v3583_v11 = vmul.u32 %v3579_v44, %v3577_v46  ;;  %v3611_v55 = vsel %vm3610_vm10, 1, %v16563_v29 }
 0x385   : > { %16839 = vst [vmem:[#allocation95_spill] sm:$0xff] %v13973_v39  ;;  %v3330_v47 = vor.u32 %v3329_v37, %v3328_v0  ;;  %v3334_v62 = vor.u32 4788187, %v3333_v10  ;;  %v3589_v26 = vsel %vm3588_vm1, 1, %v16563_v29  ;;  %vm3614_vm0 = vc.u32 %v13966_v24, %v16444_v34 }
 0x386   : > { %v13981_v36 = vand.u32 3, %v3051_v25  ;;  %v3478_v59 = vclz %v3477_v61  ;;  %vm3592_vm7 = vc.u32 %v3590_v12, %v3586_v28  ;;  %v13983_v27 = vsub.s32 32, %v3696_v9 }
 0x387   : > { %v13986_v45 = vmul.f32 %v3039_v58, %v13851_v52  ;;  %v13988_v46 = vadd.f32 1.0, %v3047_v40  ;;  %v3187_v37 = vsel %vm3064_vm3, %v3186_v2, %v16838_v31  ;;  %v3613_v44 = vadd.s32 %v3611_v55, %v3605_v41  ;;  %v16840_v31 = vld [vmem:[#allocation36_spill] sm:$0xff] }
 0x388   : > { %v13993_v4 = vadd.f32 0.041655596, %v3191_v20  ;;  %v3198_v21 = vmul.f32 -0.00019511016, %v13961_v17  ;;  %v3591_v25 = vadd.s32 %v3589_v26, %v3583_v11  ;;  %v3615_v61 = vsel %vm3614_vm0, 1, %v16563_v29 }
 0x389   : > { %v3335_v12 = vand.u32 2147483647, %v3334_v62  ;;  %v3337_v0 = vcvt.s32.f32 %v3330_v47  ;;  %v3593_v10 = vsel %vm3592_vm7, 1, %v16563_v29  ;;  %v16448_v58 = vand.u32 2147483647, %v16824_v53 }
 0x38a   : > { %v9351_v52 = vadd.s32 4294967294, %v3478_v59  ;;  %v3607_v40 = vshrl.u32 %v13928_v56, 16  ;;  %v3708_v28 = vshll.u32 %v16546_v5, %v3696_v9  ;;  %v3709_v2 = vshrl.u32 %v16561_v35, %v13983_v27 }
 0x38b   : > { %vm3219_vm3 = vcmp.lt.s32.totalorder %v16840_v31, 0  ;;  %v3617_v41 = vadd.s32 %v3615_v61, %v3613_v44  ;;  %v14004_v20 = vshrl.u32 %v3694_v6, 5  ;;  %v3711_v11 = vshll.u32 %v16561_v35, %v3696_v9 }
 0x38c   : > { %v3712_v55 = vshrl.u32 %v16562_v18, %v13983_v27  ;;  %v3585_v47 = vshrl.u32 %v13935_v63, 16  ;;  %v3595_v62 = vadd.s32 %v3593_v10, %v3591_v25  ;;  %v3699_v56 = vshll.u32 %v16543_v3, %v3696_v9 }
 0x38d   : > { %v3702_v26 = vshll.u32 %v16710_v42, %v3696_v9  ;;  %v3700_v59 = vshrl.u32 %v16710_v42, %v13983_v27  ;;  %v3703_v44 = vshrl.u32 %v16711_v15, %v13983_v27  ;;  %v3705_v6 = vshll.u32 %v16711_v15, %v3696_v9 }
 0x38e   : > { %v3706_v61 = vshrl.u32 %v16546_v5, %v13983_v27  ;;  %v3338_v34 = vmul.f32 %v3337_v0, %v3335_v12  ;;  %v3543_v63 = vshrl.u32 %v16543_v3, %v13762_v57  ;;  %v3689_v25 = vand.u32 8388607, %v16448_v58 }
 0x38f   : > { %v3710_v10 = vor.u32 %v3709_v2, %v3708_v28  ;;  %v16841_v39 = vand.u32 2147483647, %v16840_v31  ;;  %v3609_v22 = vshrl.u32 %v13950_v7, 16  ;;  %v3618_v9 = vadd.s32 %v3617_v41, %v3607_v40 }
 0x390   : > { %v3713_v30 = vor.u32 %v3712_v55, %v3711_v11  ;;  %vm3717_vm10 = vcmp.lt.s32.totalorder %v14004_v20, 4  ;;  %v3199_v12 = vadd.f32 0.008332121, %v3198_v21  ;;  %v3564_v57 = vsel %vm3562_vm5, %v13834_v19, 2102212464 }
 0x391   : > { %vm14025_vm15 = vcmp.le.f32.partialorder %v16841_v39, 0.7853982  ;;  %v3587_v0 = vshrl.u32 %v13954_v50, 16  ;;  %v3596_v28 = vadd.s32 %v3595_v62, %v3585_v47  ;;  %vm9352_vm1 = vcmp.lt.s32.totalorder %v9351_v52, 0 }
 0x392   : > { %v14035_v2 = vor.u32 %v3700_v59, %v3699_v56  ;;  %v14037_v39 = vor.u32 %v3703_v44, %v3702_v26  ;;  %v14039_v58 = vor.u32 %v3706_v61, %v3705_v6  ;;  %v3339_v53 = vxor.u32 2147483648, %v3338_v34 }
 0x393   : > { %vm3714_vm0 = vcmp.lt.s32.totalorder %v14004_v20, 1  ;;  %vm3716_vm7 = vcmp.lt.s32.totalorder %v14004_v20, 3  ;;  %v3723_v21 = vsel %vm3717_vm10, %v3710_v10, 920167782  ;;  %v3563_v19 = vsel %vm3559_vm9, %v3543_v63, %v13830_v33 }
 0x394   : > { %v3619_v50 = vadd.s32 %v3618_v9, %v3609_v22  ;;  %v3690_v40 = vor.u32 8388608, %v3689_v25  ;;  %v3727_v41 = vsel %vm3717_vm10, %v3713_v30, 1326507024  ;;  %v14050_v11 = vsel %vm9352_vm1, 0, %v9351_v52 }
 0x395   : > { %v3565_v55 = vsel %vm3561_vm12, %v13832_v13, %v3564_v57  ;;  %v14055_v47 = vadd.s32 %v3596_v28, %v3587_v0  ;;  %v16844_v62 = vshll.u32 %v13950_v7, 16  ;;  %vm3057_vm5 = vcmp.eq.s32.totalorder %v13981_v36, 2 }
 0x396   : > { %v3200_v22 = vmul.f32 %v3199_v12, %v13961_v17  ;;  %vm3715_vm9 = vcmp.lt.s32.totalorder %v14004_v20, 2  ;;  %v3722_v30 = vsel %vm3714_vm0, %v14035_v2, %v14037_v39  ;;  %v3724_v33 = vsel %vm3716_vm7, %v14039_v58, %v3723_v21  ;;  %v16848_v21 = vld [vmem:[#allocation38_spill] sm:$0xff] }
 0x397   : > { %v14060_v56 = vadd.s32 %v13966_v24, %v16844_v62  ;;  %vm3054_vm12 = vcmp.eq.s32.totalorder %v13981_v36, 0  ;;  %v14075_v13 = vsel %vm13911_vm13, 0, %v3187_v37  ;;  %v3340_v7 = vsel %vm3219_vm3, %v3339_v53, %v3338_v34 }
 0x398   : > { %16845 = vst [vmem:[#allocation103_spill] sm:$0xff] %v14075_v13  ;;  %v3726_v24 = vsel %vm3714_vm0, %v14037_v39, %v14039_v58  ;;  %v3728_v52 = vsel %vm3716_vm7, %v3710_v10, %v3727_v41  ;;  %v3486_v26 = vsub.s32 4294967266, %v14050_v11  ;;  %v3566_v59 = vsel %vm3560_vm4, %v3563_v19, %v3565_v55 }
 0x399   : > { %v3623_v44 = vadd.s32 1, %v3619_v50  ;;  %v14088_v49 = vshll.u32 %v3690_v40, 8  ;;  %v14091_v37 = vadd.f32 1.0, %v13986_v45  ;;  %v14095_v53 = vmul.f32 %v13988_v46, %v13826_v48 }
 0x39a   : > { %vm3622_vm13 = vc.u32 %v14055_v47, %v14060_v56  ;;  %v14101_v34 = vsel %vm3715_vm9, %v3722_v30, %v3724_v33  ;;  %v3193_v23 = vmul.f32 %v13993_v4, %v13961_v17  ;;  %v3201_v6 = vadd.f32 -0.16666654, %v3200_v22 }
 0x39b   : > { %16846 = vst [vmem:[#allocation104_spill] sm:$0xff] %v14091_v37  ;;  %v3206_v61 = vadd.s32 3, %v14075_v13  ;;  %v14108_v45 = vsel %vm3715_vm9, %v3726_v24, %v3728_v52  ;;  %v14113_v48 = vsel %vm14025_vm15, %v16840_v31, %v3340_v7  ;;  %v3466_v46 = vadd.s32 %v13777_v54, %v13772_v8 }
 0x39c   : > { %16847 = vst [vmem:[#allocation105_spill] sm:$0xff] %v14095_v53  ;;  %v3482_v63 = vsub.s32 32, %v14050_v11  ;;  %v3620_v25 = vmul.u32 %v13879_v38, %v3566_v59  ;;  %v3487_v4 = vadd.s32 127, %v3486_v26  ;;  %v3624_v10 = vsel %vm3622_vm13, %v3623_v44, %v3619_v50 }
 0x39d   : > { %v3731_v9 = vand.u32 65535, %v14088_v49  ;;  %v3756_v12 = vshrl.u32 %v14101_v34, 16  ;;  %v16452_v57 = vxor.u32 2147483648, %v14095_v53  ;;  %v16450_v0 = vxor.u32 2147483648, %v14091_v37 }
 0x39e   : > { %v3734_v28 = vshrl.u32 %v14108_v45, 16  ;;  %v3840_v19 = vand.u32 2139095040, %v16848_v21  ;;  %v3194_v40 = vadd.f32 -0.4999988, %v3193_v23  ;;  %v3202_v8 = vmul.f32 %v3201_v6, %v13961_v17 }
 0x39f   : > { %v14126_v54 = vand.u32 3, %v3206_v61  ;;  %v14130_v38 = vmul.f32 %v14113_v48, %v14113_v48  ;;  %v3483_v50 = vshll.u32 %v13941_v14, %v14050_v11  ;;  %v3484_v41 = vshrl.u32 %v3466_v46, %v3482_v63 }
 0x3a0   : > { %v14134_v55 = vadd.s32 %v3624_v10, %v3620_v25  ;;  %v3841_v62 = vshrl.u32 %v3840_v19, 23  ;;  %v3488_v22 = vshll.u32 %v3487_v4, 23  ;;  %v3732_v30 = vshrl.u32 %v14088_v49, 16 }
 0x3a1   : > { %v3755_v33 = vand.u32 65535, %v14101_v34  ;;  %v14138_v7 = vmul.u32 %v3756_v12, %v3731_v9  ;;  %v3059_v24 = vsel %vm3057_vm5, %v16450_v0, %v14095_v53  ;;  %v3733_v52 = vand.u32 65535, %v14108_v45 }
 0x3a2   : > { %v14146_v14 = vmul.u32 %v3734_v28, %v3731_v9  ;;  %v9359_v11 = vadd.s32 4294967169, %v3841_v62  ;;  %vm3053_vm4 = vcmp.lt.s32.totalorder %v13981_v36, 2  ;;  %v3056_v26 = vsel %vm3054_vm12, %v14091_v37, %v16452_v57 }
 0x3a3   : > { %v3195_v59 = vmul.f32 %v3194_v40, %v13961_v17  ;;  %v3203_v44 = vadd.f32 1.0, %v3202_v8  ;;  %v3346_v34 = vmul.f32 -0.001358992, %v14130_v38  ;;  %vm3209_vm1 = vcmp.eq.s32.totalorder %v14126_v54, 0 }
 0x3a4   : > { %vm3212_vm5 = vcmp.eq.s32.totalorder %v14126_v54, 2  ;;  %v3353_v23 = vmul.f32 -0.00019511016, %v14130_v38  ;;  %v3485_v6 = vor.u32 %v3484_v41, %v3483_v50  ;;  %v3626_v61 = vadd.s32 536870912, %v14134_v55 }
 0x3a5   : > { %v3847_v45 = vadd.s32 1, %v9359_v11  ;;  %v3489_v46 = vor.u32 4788187, %v3488_v22  ;;  %v3757_v63 = vmul.u32 %v3755_v33, %v3731_v9  ;;  %v14160_v25 = vmul.u32 %v3755_v33, %v3732_v30 }
 0x3a6   : > { %v3761_v4 = vshll.u32 %v14138_v7, 16  ;;  %v3735_v17 = vmul.u32 %v3733_v52, %v3731_v9  ;;  %v14163_v10 = vmul.u32 %v3733_v52, %v3732_v30  ;;  %v3739_v19 = vshll.u32 %v14146_v14, 16 }
 0x3a7   : > { %vm3848_vm12 = vcmp.gt.s32.totalorder %v3847_v45, 0  ;;  %v14166_v40 = vadd.f32 1.0, %v3195_v59  ;;  %v14169_v8 = vmul.f32 %v3203_v44, %v13946_v1  ;;  %v3341_v50 = vsub.s32 4, %v13715_v60 }
 0x3a8   : > { %v3849_v41 = vsel %vm3848_vm12, %v3847_v45, 0  ;;  %v3347_v62 = vadd.f32 0.041655596, %v3346_v34  ;;  %v3354_v22 = vadd.f32 0.008332121, %v3353_v23  ;;  %v3492_v33 = vcvt.s32.f32 %v3485_v6 }
 0x3a9   : > { %16849 = vst [vmem:[#allocation38_spill] sm:$0xff] %v14166_v40  ;;  %v14172_v11 = vshrl.u32 %v3626_v61, 30  ;;  %v3490_v0 = vand.u32 2147483647, %v3489_v46  ;;  %v16455_v9 = vshll.u32 %v14160_v25, 16  ;;  %vm3765_vm13 = vc.u32 %v3757_v63, %v3761_v4 }
 0x3aa   : > { %16850 = vst [vmem:[#allocation106_spill] sm:$0xff] %v14169_v8  ;;  %v14175_v52 = vadd.s32 %v3761_v4, %v3757_v63  ;;  %v3741_v59 = vshll.u32 %v14163_v10, 16  ;;  %vm3743_vm14 = vc.u32 %v3735_v17, %v3739_v19  ;;  %v3745_v57 = vadd.s32 %v3739_v19, %v3735_v17 }
 0x3ab   : > { %v3851_v1 = vand.u32 31, %v3849_v41  ;;  %v16454_v44 = vxor.u32 2147483648, %v14169_v8  ;;  %v16453_v45 = vxor.u32 2147483648, %v14166_v40  ;;  %v3342_v34 = vsel %vm3219_vm3, %v3341_v50, %v13715_v60 }
 0x3ac   : > { %v3760_v23 = vmul.u32 %v3756_v12, %v3732_v30  ;;  %v3348_v6 = vmul.f32 %v3347_v62, %v14130_v38  ;;  %v3628_v61 = vshll.u32 %v14172_v11, 30  ;;  %v3738_v46 = vmul.u32 %v3734_v28, %v3732_v30 }
 0x3ad   : > { %v3766_v63 = vsel %vm3765_vm13, 1, %v16563_v29  ;;  %v3355_v4 = vmul.f32 %v3354_v22, %v14130_v38  ;;  %v3493_v17 = vmul.f32 %v3492_v33, %v3490_v0  ;;  %v3744_v19 = vsel %vm3743_vm14, 1, %v16563_v29 }
 0x3ae   : > { %vm3769_vm12 = vc.u32 %v14175_v52, %v16455_v9  ;;  %v14193_v60 = vsel %vm3053_vm4, %v3056_v26, %v3059_v24  ;;  %v14197_v12 = vsel %vm14025_vm15, 0, %v3342_v34  ;;  %vm3747_vm3 = vc.u32 %v3745_v57, %v3741_v59 }
 0x3af   : > { %16851 = vst [vmem:[#allocation107_spill] sm:$0xff] %v14197_v12  ;;  %v14199_v28 = vsub.s32 32, %v3851_v1  ;;  %v14206_v0 = vsel %vm3209_vm1, %v14166_v40, %v16454_v44  ;;  %v14213_v36 = vsel %vm3212_vm5, %v16453_v45, %v14169_v8  ;;  %vm3374_vm14 = vcmp.lt.s32.totalorder %v16852_v43, 0 }
 0x3b0   : > { %v3768_v30 = vadd.s32 %v3766_v63, %v3760_v23  ;;  %v14216_v57 = vadd.f32 -0.4999988, %v3348_v6  ;;  %v14219_v24 = vsub.s32 %v14134_v55, %v3628_v61  ;;  %v3746_v26 = vadd.s32 %v3744_v19, %v3738_v46 }
 0x3b1   : > { %v3770_v50 = vsel %vm3769_vm12, 1, %v16563_v29  ;;  %v3356_v62 = vadd.f32 -0.16666654, %v3355_v4  ;;  %v3494_v22 = vxor.u32 2147483648, %v3493_v17  ;;  %v3698_v33 = vshrl.u32 %v16543_v3, %v13983_v27 }
 0x3b2   : > { %v3748_v59 = vsel %vm3747_vm3, 1, %v16563_v29  ;;  %v16853_v34 = vand.u32 2147483647, %v16852_v43  ;;  %v3762_v23 = vshrl.u32 %v14138_v7, 16  ;;  %v3866_v6 = vshll.u32 %v16561_v35, %v3851_v1 }
 0x3b3   : > { %v3867_v61 = vshrl.u32 %v16562_v18, %v14199_v28  ;;  %v3772_v46 = vadd.s32 %v3770_v50, %v3768_v30  ;;  %v14236_v63 = vshrl.u32 %v3849_v41, 5  ;;  %v3863_v27 = vshll.u32 %v16546_v5, %v3851_v1 }
 0x3b4   : > { %vm14227_vm15 = vcmp.le.f32.partialorder %v16853_v34, 0.7853982  ;;  %v3864_v4 = vshrl.u32 %v16561_v35, %v14199_v28  ;;  %vm3630_vm4 = vcmp.lt.s32.totalorder %v14219_v24, 0  ;;  %v3631_v19 = vsub.s32 0, %v14219_v24 }
 0x3b5   : > { %v3740_v7 = vshrl.u32 %v14146_v14, 16  ;;  %v3750_v34 = vadd.s32 %v3748_v59, %v3746_v26  ;;  %v3857_v44 = vshll.u32 %v16710_v42, %v3851_v1  ;;  %v3858_v9 = vshrl.u32 %v16711_v15, %v14199_v28 }
 0x3b6   : > { %v3860_v41 = vshll.u32 %v16711_v15, %v3851_v1  ;;  %v3861_v30 = vshrl.u32 %v16546_v5, %v14199_v28  ;;  %vm3208_vm1 = vcmp.lt.s32.totalorder %v14126_v54, 2  ;;  %v3764_v50 = vshrl.u32 %v14160_v25, 16 }
 0x3b7   : > { %v3854_v55 = vshll.u32 %v16543_v3, %v3851_v1  ;;  %v3855_v14 = vshrl.u32 %v16710_v42, %v14199_v28  ;;  %v3868_v26 = vor.u32 %v3867_v61, %v3866_v6  ;;  %v3773_v59 = vadd.s32 %v3772_v46, %v3762_v23 }
 0x3b8   : > { %v16856_v40 = vand.u32 2147483647, %v16848_v21  ;;  %v3865_v37 = vor.u32 %v3864_v4, %v3863_v27  ;;  %vm3872_vm5 = vcmp.lt.s32.totalorder %v14236_v63, 4  ;;  %v3495_v53 = vsel %vm3374_vm14, %v3494_v22, %v3493_v17  ;;  %v16858_v27 = vld [vmem:[#allocation39_spill] sm:$0xff] }
 0x3b9   : > { %v3632_v13 = vsel %vm3630_vm4, %v3631_v19, %v14219_v24  ;;  %v3742_v1 = vshrl.u32 %v14163_v10, 16  ;;  %v3751_v31 = vadd.s32 %v3750_v34, %v3740_v7  ;;  %vm16489_vm13 = vweird.f32 %v16815_v32 }
 0x3ba   : > { %v3844_v8 = vand.u32 8388607, %v16856_v40  ;;  %v3718_v23 = vsel %vm3714_vm0, %v3698_v33, %v14035_v2  ;;  %v3719_v40 = vsel %vm3717_vm10, %v14039_v58, 2102212464  ;;  %v14271_v6 = vor.u32 %v3858_v9, %v3857_v44 }
 0x3bb   : > { %v14273_v17 = vor.u32 %v3861_v30, %v3860_v41  ;;  %vm16470_vm12 = vweird.f32 %v16832_v51  ;;  %v14276_v22 = vor.u32 %v3855_v14, %v3854_v55  ;;  %vm3869_vm3 = vcmp.lt.s32.totalorder %v14236_v63, 1 }
 0x3bc   : > { %vm3871_vm4 = vcmp.lt.s32.totalorder %v14236_v63, 3  ;;  %v3882_v10 = vsel %vm3872_vm5, %v3868_v26, 1326507024  ;;  %v3633_v2 = vclz %v3632_v13  ;;  %v3774_v33 = vadd.s32 %v3773_v59, %v3764_v50 }
 0x3bd   : > { %v3845_v61 = vor.u32 8388608, %v3844_v8  ;;  %v3878_v58 = vsel %vm3872_vm5, %v3865_v37, 920167782  ;;  %v3720_v9 = vsel %vm3716_vm7, %v14037_v39, %v3719_v40  ;;  %v14287_v44 = vadd.s32 %v3751_v31, %v3742_v1 }
 0x3be   : > { %v16857_v55 = vshll.u32 %v14160_v25, 16  ;;  %v3995_v4 = vand.u32 2139095040, %v16858_v27  ;;  %v14298_v13 = vsel %vm14227_vm15, %v16852_v43, %v3495_v53  ;;  %vm3870_vm10 = vcmp.lt.s32.totalorder %v14236_v63, 2 }
 0x3bf   : > { %v3881_v31 = vsel %vm3869_vm3, %v14271_v6, %v14273_v17  ;;  %v3883_v39 = vsel %vm3871_vm4, %v3865_v37, %v3882_v10  ;;  %v3357_v25 = vmul.f32 %v3356_v62, %v14130_v38  ;;  %v3496_v8 = vsub.s32 4, %v13892_v16 }
 0x3c0   : > { %v14292_v46 = vadd.s32 %v14175_v52, %v16857_v55  ;;  %v3877_v53 = vsel %vm3869_vm3, %v14276_v22, %v14271_v6  ;;  %v3879_v52 = vsel %vm3871_vm4, %v14273_v17, %v3878_v58  ;;  %v9354_v19 = vadd.s32 4294967294, %v3633_v2 }
 0x3c1   : > { %v3721_v7 = vsel %vm3715_vm9, %v3718_v23, %v3720_v9  ;;  %v3778_v34 = vadd.s32 1, %v3774_v33  ;;  %v14318_v41 = vshll.u32 %v3845_v61, 8  ;;  %v14322_v37 = vmul.f32 %v14298_v13, %v14298_v13 }
 0x3c2   : > { %vm3777_vm0 = vc.u32 %v14287_v44, %v14292_v46  ;;  %v3884_v62 = vsel %vm3870_vm10, %v3881_v31, %v3883_v39  ;;  %v3996_v30 = vshrl.u32 %v3995_v4, 23  ;;  %v3215_v20 = vsel %vm3208_vm1, %v14206_v0, %v14213_v36 }
 0x3c3   : > { %v3350_v50 = vmul.f32 %v14216_v57, %v14130_v38  ;;  %v3361_v14 = vadd.s32 3, %v14197_v12  ;;  %v14337_v26 = vsel %vm3870_vm10, %v3877_v53, %v3879_v52  ;;  %v3358_v59 = vadd.f32 1.0, %v3357_v25 }
 0x3c4   : > { %v3497_v1 = vsel %vm3374_vm14, %v3496_v8, %v13892_v16  ;;  %v3501_v23 = vmul.f32 -0.001358992, %v14322_v37  ;;  %v3775_v40 = vmul.u32 %v14088_v49, %v3721_v7  ;;  %vm9355_vm7 = vcmp.lt.s32.totalorder %v9354_v19, 0 }
 0x3c5   : > { %v3779_v54 = vsel %vm3777_vm0, %v3778_v34, %v3774_v33  ;;  %v3886_v0 = vand.u32 65535, %v14318_v41  ;;  %v3889_v38 = vshrl.u32 %v3884_v62, 16  ;;  %v14348_v36 = vsel %vm16489_vm13, nan, %v14193_v60 }
 0x3c6   : > { %16859 = vst [vmem:[#allocation108_spill] sm:$0xff] %v14348_v36  ;;  %v3508_v57 = vmul.f32 -0.00019511016, %v14322_v37  ;;  %v3911_v10 = vshrl.u32 %v14337_v26, 16  ;;  %v9362_v2 = vadd.s32 4294967169, %v3996_v30  ;;  %v14354_v16 = vsel %vm16470_vm12, nan, %v3215_v20 }
 0x3c7   : > { %16860 = vst [vmem:[#allocation109_spill] sm:$0xff] %v14354_v16  ;;  %v14356_v49 = vadd.f32 1.0, %v3350_v50  ;;  %v14358_v33 = vand.u32 3, %v3361_v14  ;;  %v14362_v61 = vsel %vm14227_vm15, 0, %v3497_v1  ;;  %v14365_v60 = vmul.f32 %v3358_v59, %v14113_v48 }
 0x3c8   : > { %16862 = vst [vmem:[#allocation111_spill] sm:$0xff] %v14362_v61  ;;  %v14367_v58 = vsel %vm9355_vm7, 0, %v9354_v19  ;;  %v14369_v9 = vadd.s32 %v3779_v54, %v3775_v40  ;;  %v16466_v55 = vand.u32 2147483647, %v16858_v27  ;;  %v3502_v4 = vadd.f32 0.041655596, %v3501_v23 }
 0x3c9   : > { %16861 = vst [vmem:[#allocation110_spill] sm:$0xff] %v14356_v49  ;;  %v3887_v31 = vshrl.u32 %v14318_v41, 16  ;;  %v3888_v39 = vand.u32 65535, %v3884_v62  ;;  %v14373_v25 = vmul.u32 %v3889_v38, %v3886_v0  ;;  %v3509_v8 = vadd.f32 0.008332121, %v3508_v57 }
 0x3ca   : > { %16863 = vst [vmem:[#allocation112_spill] sm:$0xff] %v14365_v60  ;;  %v3910_v45 = vand.u32 65535, %v14337_v26  ;;  %v14376_v53 = vmul.u32 %v3911_v10, %v3886_v0  ;;  %v4002_v52 = vadd.s32 1, %v9362_v2  ;;  %v3621_v19 = vadd.s32 %v14060_v56, %v14055_v47 }
 0x3cb   : > { %v3637_v7 = vsub.s32 32, %v14367_v58  ;;  %v3641_v34 = vsub.s32 4294967266, %v14367_v58  ;;  %v3781_v62 = vadd.s32 536870912, %v14369_v9  ;;  %v3999_v20 = vand.u32 8388607, %v16466_v55 }
 0x3cc   : > { %vm4003_vm9 = vcmp.gt.s32.totalorder %v4002_v52, 0  ;;  %v3890_v50 = vmul.u32 %v3888_v39, %v3886_v0  ;;  %v14387_v14 = vmul.u32 %v3888_v39, %v3887_v31  ;;  %v3894_v26 = vshll.u32 %v14373_v25, 16 }
 0x3cd   : > { %v4004_v59 = vsel %vm4003_vm9, %v4002_v52, 0  ;;  %v3503_v47 = vmul.f32 %v3502_v4, %v14322_v37  ;;  %v14392_v56 = vmul.f32 %v3509_v8, %v14322_v37  ;;  %v3912_v1 = vmul.u32 %v3910_v45, %v3886_v0 }
 0x3ce   : > { %v3916_v23 = vshll.u32 %v14376_v53, 16  ;;  %v3638_v40 = vshll.u32 %v14219_v24, %v14367_v58  ;;  %v3639_v54 = vshrl.u32 %v3621_v19, %v3637_v7  ;;  %v3642_v57 = vadd.s32 127, %v3641_v34 }
 0x3cf   : > { %v4006_v2 = vand.u32 31, %v4004_v59  ;;  %v14397_v55 = vshrl.u32 %v3781_v62, 30  ;;  %v3893_v39 = vmul.u32 %v3889_v38, %v3887_v31  ;;  %v14399_v30 = vmul.u32 %v3910_v45, %v3887_v31 }
 0x3d0   : > { %v4000_v52 = vor.u32 8388608, %v3999_v20  ;;  %vm3367_vm14 = vcmp.eq.s32.totalorder %v14358_v33, 2  ;;  %v3896_v4 = vshll.u32 %v14387_v14, 16  ;;  %vm3898_vm15 = vc.u32 %v3890_v50, %v3894_v26 }
 0x3d1   : > { %v3900_v0 = vadd.s32 %v3894_v26, %v3890_v50  ;;  %v14403_v8 = vsub.s32 32, %v4006_v2  ;;  %vm14405_vm1 = vc.u32 %v3912_v1, %v3916_v23  ;;  %v14409_v24 = vshrl.u32 %v4004_v59, 5 }
 0x3d2   : > { %v4009_v58 = vshll.u32 %v16543_v3, %v4006_v2  ;;  %v4012_v38 = vshll.u32 %v16710_v42, %v4006_v2  ;;  %v4015_v7 = vshll.u32 %v16711_v15, %v4006_v2  ;;  %v4018_v34 = vshll.u32 %v16546_v5, %v4006_v2 }
 0x3d3   : > { %v4010_v45 = vshrl.u32 %v16710_v42, %v14403_v8  ;;  %v4013_v19 = vshrl.u32 %v16711_v15, %v14403_v8  ;;  %v14420_v20 = vadd.s32 %v3916_v23, %v3912_v1  ;;  %v4016_v50 = vshrl.u32 %v16546_v5, %v14403_v8 }
 0x3d4   : > { %v4019_v26 = vshrl.u32 %v16561_v35, %v14403_v8  ;;  %v3899_v59 = vsel %vm3898_vm15, 1, %v16563_v29  ;;  %vm14427_vm0 = vc.u32 %v3900_v0, %v3896_v4  ;;  %v3915_v36 = vmul.u32 %v3911_v10, %v3887_v31 }
 0x3d5   : > { %v4021_v51 = vshll.u32 %v16561_v35, %v4006_v2  ;;  %v3921_v1 = vsel %vm14405_vm1, 1, %v16563_v29  ;;  %v14435_v23 = vor.u32 %v4010_v45, %v4009_v58  ;;  %v14437_v62 = vor.u32 %v4013_v19, %v4012_v38 }
 0x3d6   : > { %vm4024_vm7 = vcmp.lt.s32.totalorder %v14409_v24, 1  ;;  %v14440_v32 = vor.u32 %v4016_v50, %v4015_v7  ;;  %v4020_v12 = vor.u32 %v4019_v26, %v4018_v34  ;;  %v4022_v4 = vshrl.u32 %v16562_v18, %v14403_v8 }
 0x3d7   : > { %vm4027_vm9 = vcmp.lt.s32.totalorder %v14409_v24, 4  ;;  %v14445_v10 = vor.u32 %v3639_v54, %v3638_v40  ;;  %v3783_v31 = vshll.u32 %v14397_v55, 30  ;;  %v16868_v48 = vshll.u32 %v14399_v30, 16 }
 0x3d8   : > { %vm4026_vm1 = vcmp.lt.s32.totalorder %v14409_v24, 3  ;;  %v3643_v2 = vshll.u32 %v3642_v57, 23  ;;  %v3901_v0 = vadd.s32 %v3899_v59, %v3893_v39  ;;  %v4023_v58 = vor.u32 %v4022_v4, %v4021_v51 }
 0x3d9   : > { %vm3924_vm15 = vc.u32 %v14420_v20, %v16868_v48  ;;  %v4033_v38 = vsel %vm4027_vm9, %v4020_v12, 920167782  ;;  %v3903_v45 = vsel %vm14427_vm0, 1, %v16563_v29  ;;  %v3923_v40 = vadd.s32 %v3921_v1, %v3915_v36 }
 0x3da   : > { %vm4025_vm12 = vcmp.lt.s32.totalorder %v14409_v24, 2  ;;  %v4032_v54 = vsel %vm4024_vm7, %v14435_v23, %v14437_v62  ;;  %v3925_v19 = vsel %vm3924_vm15, 1, %v16563_v29  ;;  %v4034_v51 = vsel %vm4026_vm1, %v14440_v32, %v4033_v38 }
 0x3db   : > { %v4037_v57 = vsel %vm4027_vm9, %v4023_v58, 1326507024  ;;  %v14468_v39 = vshll.u32 %v4000_v52, 8  ;;  %v16869_v36 = vxor.u32 2147483648, %v14356_v49  ;;  %v3504_v7 = vadd.f32 -0.4999988, %v3503_v47 }
 0x3dc   : > { %v14478_v34 = vsub.s32 %v14369_v9, %v3783_v31  ;;  %v4036_v50 = vsel %vm4024_vm7, %v14437_v62, %v14440_v32  ;;  %vm3364_vm0 = vcmp.eq.s32.totalorder %v14358_v33, 0  ;;  %v3895_v52 = vshrl.u32 %v14373_v25, 16 }
 0x3dd   : > { %v14475_v16 = vsel %vm3367_vm14, %v16869_v36, %v14365_v60  ;;  %v3905_v26 = vadd.s32 %v3903_v45, %v3901_v0  ;;  %v4035_v59 = vsel %vm4025_vm12, %v4032_v54, %v4034_v51  ;;  %v4038_v1 = vsel %vm4026_vm1, %v4020_v12, %v4037_v57 }
 0x3de   : > { %v3511_v47 = vadd.f32 -0.16666654, %v14392_v56  ;;  %v3644_v9 = vor.u32 4788187, %v3643_v2  ;;  %v3917_v4 = vshrl.u32 %v14376_v53, 16  ;;  %v3927_v31 = vadd.s32 %v3925_v19, %v3923_v40 }
 0x3df   : > { %v3647_v48 = vcvt.s32.f32 %v14445_v10  ;;  %v4039_v58 = vsel %vm4025_vm12, %v4036_v50, %v4038_v1  ;;  %v4041_v25 = vand.u32 65535, %v14468_v39  ;;  %v4066_v0 = vshrl.u32 %v4035_v59, 16 }
 0x3e0   : > { %vm3785_vm14 = vcmp.lt.s32.totalorder %v14478_v34, 0  ;;  %v3786_v38 = vsub.s32 0, %v14478_v34  ;;  %v3853_v12 = vshrl.u32 %v16543_v3, %v14199_v28  ;;  %v4042_v56 = vshrl.u32 %v14468_v39, 16 }
 0x3e1   : > { %v3897_v53 = vshrl.u32 %v14387_v14, 16  ;;  %v3906_v2 = vadd.s32 %v3905_v26, %v3895_v52  ;;  %v4043_v45 = vand.u32 65535, %v4039_v58  ;;  %v4044_v10 = vshrl.u32 %v4039_v58, 16 }
 0x3e2   : > { %v3874_v40 = vsel %vm3872_vm5, %v14273_v17, 2102212464  ;;  %v3919_v54 = vshrl.u32 %v14399_v30, 16  ;;  %v3928_v19 = vadd.s32 %v3927_v31, %v3917_v4  ;;  %v4065_v51 = vand.u32 65535, %v4035_v59  ;;  %v16870_v17 = vld [vmem:[#allocation40_spill] sm:$0xff] }
 0x3e3   : > { %v3645_v57 = vand.u32 2147483647, %v3644_v9  ;;  %v4045_v36 = vmul.u32 %v4043_v45, %v4041_v25  ;;  %v14506_v50 = vmul.u32 %v4044_v10, %v4041_v25  ;;  %v14508_v28 = vmul.u32 %v4066_v0, %v4041_v25 }
 0x3e4   : > { %v3787_v14 = vsel %vm3785_vm14, %v3786_v38, %v14478_v34  ;;  %v3873_v52 = vsel %vm3869_vm3, %v3853_v12, %v14276_v22  ;;  %v14516_v26 = vmul.u32 %v4043_v45, %v4042_v56  ;;  %v4150_v1 = vand.u32 2139095040, %v16870_v17  ;;  %v16872_v38 = vld [vmem:[#allocation20_spill] sm:$0xff] }
 0x3e5   : > { %v3875_v59 = vsel %vm3871_vm4, %v14271_v6, %v3874_v40  ;;  %v14522_v9 = vadd.s32 %v3906_v2, %v3897_v53  ;;  %v16871_v4 = vshll.u32 %v14399_v30, 16  ;;  %v4049_v58 = vshll.u32 %v14506_v50, 16 }
 0x3e6   : > { %vm3529_vm5 = vcmp.lt.s32.totalorder %v16872_v38, 0  ;;  %v3929_v22 = vadd.s32 %v3928_v19, %v3919_v54  ;;  %v4051_v12 = vshll.u32 %v14516_v26, 16  ;;  %v4067_v45 = vmul.u32 %v4065_v51, %v4041_v25 }
 0x3e7   : > { %v14527_v31 = vadd.s32 %v14420_v20, %v16871_v4  ;;  %v14532_v43 = vmul.u32 %v4065_v51, %v4042_v56  ;;  %v4048_v27 = vmul.u32 %v4044_v10, %v4042_v56  ;;  %vm4053_vm3 = vc.u32 %v4045_v36, %v4049_v58 }
 0x3e8   : > { %v4055_v6 = vadd.s32 %v4049_v58, %v4045_v36  ;;  %v4071_v53 = vshll.u32 %v14508_v28, 16  ;;  %v16873_v30 = vxor.u32 2147483648, %v14365_v60  ;;  %v3516_v2 = vadd.s32 3, %v14362_v61 }
 0x3e9   : > { %v4054_v40 = vsel %vm4053_vm3, 1, %v16563_v29  ;;  %v4151_v54 = vshrl.u32 %v4150_v1, 23  ;;  %vm3363_vm4 = vcmp.lt.s32.totalorder %v14358_v33, 2  ;;  %v3505_v25 = vmul.f32 %v3504_v7, %v14322_v37 }
 0x3ea   : > { %v3366_v20 = vsel %vm3364_vm0, %v14356_v49, %v16873_v30  ;;  %v3648_v10 = vmul.f32 %v3647_v48, %v3645_v57  ;;  %v3788_v19 = vclz %v3787_v14  ;;  %v4070_v51 = vmul.u32 %v4066_v0, %v4042_v56 }
 0x3eb   : > { %v3512_v36 = vmul.f32 %v3511_v47, %v14322_v37  ;;  %v16874_v4 = vand.u32 2147483647, %v16872_v38  ;;  %v3876_v30 = vsel %vm3870_vm10, %v3873_v52, %v3875_v59  ;;  %vm4057_vm0 = vc.u32 %v4055_v6, %v4051_v12 }
 0x3ec   : > { %v4073_v1 = vshll.u32 %v14532_v43, 16  ;;  %vm3932_vm14 = vc.u32 %v14522_v9, %v14527_v31  ;;  %v3933_v7 = vadd.s32 1, %v3929_v22  ;;  %v4056_v48 = vadd.s32 %v4054_v40, %v4048_v27 }
 0x3ed   : > { %vm14547_vm15 = vcmp.le.f32.partialorder %v16874_v4, 0.7853982  ;;  %vm4075_vm3 = vc.u32 %v4067_v45, %v4071_v53  ;;  %v4058_v37 = vsel %vm4057_vm0, 1, %v16563_v29  ;;  %v4077_v0 = vadd.s32 %v4071_v53, %v4067_v45 }
 0x3ee   : > { %v4076_v47 = vsel %vm4075_vm3, 1, %v16563_v29  ;;  %v9365_v56 = vadd.s32 4294967169, %v4151_v54  ;;  %v3649_v57 = vxor.u32 2147483648, %v3648_v10  ;;  %v9357_v14 = vadd.s32 4294967294, %v3788_v19 }
 0x3ef   : > { %v3930_v63 = vmul.u32 %v14318_v41, %v3876_v30  ;;  %v4078_v52 = vadd.s32 %v4076_v47, %v4070_v51  ;;  %v4008_v59 = vshrl.u32 %v16543_v3, %v14403_v8  ;;  %v4072_v12 = vshrl.u32 %v14508_v28, 16 }
 0x3f0   : > { %vm4079_vm10 = vc.u32 %v4077_v0, %v4073_v1  ;;  %v4157_v6 = vadd.s32 1, %v9365_v56  ;;  %v3934_v27 = vsel %vm3932_vm14, %v3933_v7, %v3929_v22  ;;  %v4050_v40 = vshrl.u32 %v14506_v50, 16 }
 0x3f1   : > { %v4060_v45 = vadd.s32 %v4058_v37, %v4056_v48  ;;  %v4080_v53 = vsel %vm4079_vm10, 1, %v16563_v29  ;;  %v3513_v54 = vadd.f32 1.0, %v3512_v36  ;;  %v4029_v41 = vsel %vm4027_vm9, %v14440_v32, 2102212464 }
 0x3f2   : > { %v4082_v19 = vadd.s32 %v4080_v53, %v4078_v52  ;;  %vm4158_vm0 = vcmp.gt.s32.totalorder %v4157_v6, 0  ;;  %v3650_v8 = vsel %vm3529_vm5, %v3649_v57, %v3648_v10  ;;  %vm9358_vm3 = vcmp.lt.s32.totalorder %v9357_v14, 0 }
 0x3f3   : > { %v16475_v28 = vand.u32 2147483647, %v16870_v17  ;;  %v4159_v51 = vsel %vm4158_vm0, %v4157_v6, 0  ;;  %v14573_v22 = vadd.s32 %v3934_v27, %v3930_v63  ;;  %v4028_v50 = vsel %vm4024_vm7, %v4008_v59, %v14435_v23 }
 0x3f4   : > { %v4074_v36 = vshrl.u32 %v14532_v43, 16  ;;  %v4083_v4 = vadd.s32 %v4082_v19, %v4072_v12  ;;  %v4030_v32 = vsel %vm4026_vm1, %v14437_v62, %v4029_v41  ;;  %v4052_v30 = vshrl.u32 %v14516_v26, 16 }
 0x3f5   : > { %v4061_v10 = vadd.s32 %v4060_v45, %v4050_v40  ;;  %v4161_v7 = vand.u32 31, %v4159_v51  ;;  %v14586_v48 = vsel %vm3363_vm4, %v3366_v20, %v14475_v16  ;;  %v14588_v37 = vadd.f32 1.0, %v3505_v25 }
 0x3f6   : > { %v14590_v47 = vand.u32 3, %v3516_v2  ;;  %v3651_v43 = vsub.s32 4, %v14172_v11  ;;  %v14594_v23 = vmul.f32 %v3513_v54, %v14298_v13  ;;  %v14599_v62 = vsel %vm14547_vm15, %v16872_v38, %v3650_v8  ;;  %v16879_v8 = vld [vmem:[#allocation36_spill] sm:$0xff] }
 0x3f7   : > { %16877 = vst [vmem:[#allocation40_spill] sm:$0xff] %v14588_v37  ;;  %v14602_v26 = vsel %vm9358_vm3, 0, %v9357_v14  ;;  %v14604_v33 = vsub.s32 32, %v4161_v7  ;;  %v3936_v16 = vadd.s32 536870912, %v14573_v22  ;;  %v4031_v20 = vsel %vm4025_vm12, %v4028_v50, %v4030_v32 }
 0x3f8   : > { %16878 = vst [vmem:[#allocation20_spill] sm:$0xff] %v14594_v23  ;;  %v4084_v2 = vadd.s32 %v4083_v4, %v4074_v36  ;;  %v4173_v25 = vshll.u32 %v16546_v5, %v4161_v7  ;;  %v14610_v13 = vadd.s32 %v4061_v10, %v4052_v30  ;;  %v14612_v56 = vadd.s32 %v4077_v0, %v4073_v1 }
 0x3f9   : > { %v4154_v57 = vand.u32 8388607, %v16475_v28  ;;  %v14616_v63 = vshrl.u32 %v4159_v51, 5  ;;  %v4164_v14 = vshll.u32 %v16543_v3, %v4161_v7  ;;  %v4167_v52 = vshll.u32 %v16710_v42, %v4161_v7 }
 0x3fa   : > { %v4170_v59 = vshll.u32 %v16711_v15, %v4161_v7  ;;  %v4174_v24 = vshrl.u32 %v16561_v35, %v14604_v33  ;;  %v4165_v12 = vshrl.u32 %v16710_v42, %v14604_v33  ;;  %v4168_v1 = vshrl.u32 %v16711_v15, %v14604_v33 }
 0x3fb   : > { %v4171_v0 = vshrl.u32 %v16546_v5, %v14604_v33  ;;  %v4176_v6 = vshll.u32 %v16561_v35, %v4161_v7  ;;  %vm3522_vm12 = vcmp.eq.s32.totalorder %v14590_v47, 2  ;;  %v16473_v27 = vxor.u32 2147483648, %v14588_v37 }
 0x3fc   : > { %v3652_v40 = vsel %vm3529_vm5, %v3651_v43, %v14172_v11  ;;  %v4088_v45 = vadd.s32 1, %v4084_v2  ;;  %v4175_v53 = vor.u32 %v4174_v24, %v4173_v25  ;;  %vm3519_vm7 = vcmp.eq.s32.totalorder %v14590_v47, 0 }
 0x3fd   : > { %v3796_v54 = vsub.s32 4294967266, %v14602_v26  ;;  %v14637_v41 = vshrl.u32 %v3936_v16, 30  ;;  %vm4087_vm9 = vc.u32 %v14610_v13, %v14612_v56  ;;  %v4177_v19 = vshrl.u32 %v16562_v18, %v14604_v33 }
 0x3fe   : > { %vm16488_vm1 = vweird.f32 %v16879_v8  ;;  %v14646_v51 = vmul.f32 %v14599_v62, %v14599_v62  ;;  %v4085_v11 = vmul.u32 %v14468_v39, %v4031_v20  ;;  %v4155_v50 = vor.u32 8388608, %v4154_v57 }
 0x3ff   : > { %vm4182_vm5 = vcmp.lt.s32.totalorder %v14616_v63, 4  ;;  %v14650_v36 = vor.u32 %v4165_v12, %v4164_v14  ;;  %v14652_v4 = vor.u32 %v4168_v1, %v4167_v52  ;;  %v14654_v32 = vor.u32 %v4171_v0, %v4170_v59 }
 0x400   : > { %v4178_v30 = vor.u32 %v4177_v19, %v4176_v6  ;;  %vm3518_vm4 = vcmp.lt.s32.totalorder %v14590_v47, 2  ;;  %v4089_v10 = vsel %vm4087_vm9, %v4088_v45, %v4084_v2  ;;  %vm4179_vm14 = vcmp.lt.s32.totalorder %v14616_v63, 1 }
 0x401   : > { %vm4181_vm10 = vcmp.lt.s32.totalorder %v14616_v63, 3  ;;  %v4188_v39 = vsel %vm4182_vm5, %v4175_v53, 920167782  ;;  %v3776_v7 = vadd.s32 %v14292_v46, %v14287_v44  ;;  %v3792_v43 = vsub.s32 32, %v14602_v26 }
 0x402   : > { %v3797_v16 = vadd.s32 127, %v3796_v54  ;;  %v3938_v20 = vshll.u32 %v14637_v41, 30  ;;  %v3656_v25 = vmul.f32 -0.001358992, %v14646_v51  ;;  %vm4180_vm0 = vcmp.lt.s32.totalorder %v14616_v63, 2 }
 0x403   : > { %v4192_v2 = vsel %vm4182_vm5, %v4178_v30, 1326507024  ;;  %v14669_v57 = vshll.u32 %v4155_v50, 8  ;;  %v14671_v14 = vadd.s32 %v4089_v10, %v4085_v11  ;;  %v4187_v44 = vsel %vm4179_vm14, %v14650_v36, %v14652_v4 }
 0x404   : > { %v4189_v46 = vsel %vm4181_vm10, %v14654_v32, %v4188_v39  ;;  %v4191_v52 = vsel %vm4179_vm14, %v14652_v4, %v14654_v32  ;;  %v16474_v59 = vxor.u32 2147483648, %v14594_v23  ;;  %v14687_v24 = vsel %vm14547_vm15, 0, %v3652_v40 }
 0x405   : > { %16880 = vst [vmem:[#allocation113_spill] sm:$0xff] %v14687_v24  ;;  %v3663_v12 = vmul.f32 -0.00019511016, %v14646_v51  ;;  %v4193_v1 = vsel %vm4181_vm10, %v4175_v53, %v4192_v2  ;;  %v3793_v0 = vshll.u32 %v14478_v34, %v14602_v26  ;;  %v3794_v6 = vshrl.u32 %v3776_v7, %v3792_v43 }
 0x406   : > { %v3798_v45 = vshll.u32 %v3797_v16, 23  ;;  %v14695_v54 = vsub.s32 %v14573_v22, %v3938_v20  ;;  %v4190_v19 = vsel %vm4180_vm0, %v4187_v44, %v4189_v46  ;;  %v4194_v58 = vsel %vm4180_vm0, %v4191_v52, %v4193_v1 }
 0x407   : > { %v4196_v40 = vand.u32 65535, %v14669_v57  ;;  %v4197_v11 = vshrl.u32 %v14669_v57, 16  ;;  %v3524_v34 = vsel %vm3522_vm12, %v16473_v27, %v14594_v23  ;;  %v3657_v26 = vadd.f32 0.041655596, %v3656_v25 }
 0x408   : > { %v4091_v22 = vadd.s32 536870912, %v14671_v14  ;;  %v4198_v53 = vand.u32 65535, %v4194_v58  ;;  %v3521_v50 = vsel %vm3519_vm7, %v14588_v37, %v16474_v59  ;;  %v3664_v30 = vadd.f32 0.008332121, %v3663_v12 }
 0x409   : > { %v3671_v10 = vadd.s32 3, %v14687_v24  ;;  %v4199_v39 = vshrl.u32 %v4194_v58, 16  ;;  %v14718_v7 = vsel %vm16488_vm1, nan, %v14586_v48  ;;  %v3795_v43 = vor.u32 %v3794_v6, %v3793_v0  ;;  %v16882_v58 = vld [vmem:[#allocation19_spill] sm:$0xff] }
 0x40a   : > { %16881 = vst [vmem:[#allocation114_spill] sm:$0xff] %v14718_v7  ;;  %v3941_v16 = vsub.s32 0, %v14695_v54  ;;  %v4221_v20 = vshrl.u32 %v4190_v19, 16  ;;  %v3799_v25 = vor.u32 4788187, %v3798_v45  ;;  %vm3940_vm15 = vcmp.lt.s32.totalorder %v14695_v54, 0 }
 0x40b   : > { %v4201_v2 = vmul.u32 %v4199_v39, %v4196_v40  ;;  %v14722_v44 = vmul.u32 %v4198_v53, %v4197_v11  ;;  %v14726_v46 = vsel %vm3518_vm4, %v3521_v50, %v3524_v34  ;;  %v3658_v52 = vmul.f32 %v3657_v26, %v14646_v51  ;;  %v16883_v34 = vld [vmem:[#allocation41_spill] sm:$0xff] }
 0x40c   : > { %v14729_v12 = vshrl.u32 %v4091_v22, 30  ;;  %v4220_v48 = vand.u32 65535, %v4190_v19  ;;  %v3665_v1 = vmul.f32 %v3664_v30, %v14646_v51  ;;  %v14732_v0 = vand.u32 3, %v3671_v10 }
 0x40d   : > { %v4200_v6 = vmul.u32 %v4198_v53, %v4196_v40  ;;  %v4204_v45 = vshll.u32 %v4201_v2, 16  ;;  %vm3684_vm3 = vcmp.lt.s32.totalorder %v16882_v58, 0  ;;  %v3806_v27 = vsub.s32 4, %v14397_v55 }
 0x40e   : > { %v3942_v59 = vsel %vm3940_vm15, %v3941_v16, %v14695_v54  ;;  %v4223_v47 = vmul.u32 %v4221_v20, %v4196_v40  ;;  %v4305_v50 = vand.u32 2139095040, %v16883_v34  ;;  %v3800_v28 = vand.u32 2147483647, %v3799_v25 }
 0x40f   : > { %v3802_v26 = vcvt.s32.f32 %v3795_v43  ;;  %v4203_v22 = vmul.u32 %v4199_v39, %v4197_v11  ;;  %v4206_v19 = vshll.u32 %v14722_v44, 16  ;;  %v3659_v7 = vadd.f32 -0.4999988, %v3658_v52 }
 0x410   : > { %v4093_v30 = vshll.u32 %v14729_v12, 30  ;;  %v4222_v10 = vmul.u32 %v4220_v48, %v4196_v40  ;;  %v4224_v53 = vmul.u32 %v4220_v48, %v4197_v11  ;;  %v3666_v8 = vadd.f32 -0.16666654, %v3665_v1 }
 0x411   : > { %v3943_v37 = vclz %v3942_v59  ;;  %vm4208_vm12 = vc.u32 %v4200_v6, %v4204_v45  ;;  %v4210_v23 = vadd.s32 %v4204_v45, %v4200_v6  ;;  %v4225_v16 = vmul.u32 %v4221_v20, %v4197_v11 }
 0x412   : > { %v4209_v49 = vsel %vm4208_vm12, 1, %v16563_v29  ;;  %v4226_v60 = vshll.u32 %v4223_v47, 16  ;;  %v4306_v24 = vshrl.u32 %v4305_v50, 23  ;;  %v3803_v61 = vmul.f32 %v3802_v26, %v3800_v28 }
 0x413   : > { %v4205_v25 = vshrl.u32 %v4201_v2, 16  ;;  %v4211_v43 = vadd.s32 %v4209_v49, %v4203_v22  ;;  %vm4212_vm7 = vc.u32 %v4210_v23, %v4206_v19  ;;  %v16884_v39 = vand.u32 2147483647, %v16882_v58 }
 0x414   : > { %v14748_v40 = vsub.s32 %v14671_v14, %v4093_v30  ;;  %v4213_v59 = vsel %vm4212_vm7, 1, %v16563_v29  ;;  %v4228_v48 = vshll.u32 %v4224_v53, 16  ;;  %vm4230_vm4 = vc.u32 %v4222_v10, %v4226_v60 }
 0x415   : > { %vm14743_vm9 = vcmp.le.f32.partialorder %v16884_v39, 0.7853982  ;;  %v9360_v11 = vadd.s32 4294967294, %v3943_v37  ;;  %v4163_v28 = vshrl.u32 %v16543_v3, %v14604_v33  ;;  %v4215_v20 = vadd.s32 %v4213_v59, %v4211_v43 }
 0x416   : > { %v4231_v49 = vsel %vm4230_vm4, 1, %v16563_v29  ;;  %v4184_v23 = vsel %vm4182_vm5, %v14654_v32, 2102212464  ;;  %v4232_v2 = vadd.s32 %v4226_v60, %v4222_v10  ;;  %v9368_v6 = vadd.s32 4294967169, %v4306_v24 }
 0x417   : > { %v4233_v1 = vadd.s32 %v4231_v49, %v4225_v16  ;;  %v3804_v14 = vxor.u32 2147483648, %v3803_v61  ;;  %v3807_v45 = vsel %vm3684_vm3, %v3806_v27, %v14397_v55  ;;  %v4207_v37 = vshrl.u32 %v14722_v44, 16 }
 0x418   : > { %v4216_v50 = vadd.s32 %v4215_v20, %v4205_v25  ;;  %v4096_v33 = vsub.s32 0, %v14748_v40  ;;  %v4227_v26 = vshrl.u32 %v4223_v47, 16  ;;  %vm4234_vm15 = vc.u32 %v4232_v2, %v4228_v48 }
 0x419   : > { %v4312_v22 = vadd.s32 1, %v9368_v6  ;;  %vm4095_vm12 = vcmp.lt.s32.totalorder %v14748_v40, 0  ;;  %v4183_v60 = vsel %vm4179_vm14, %v4163_v28, %v14650_v36  ;;  %v4185_v32 = vsel %vm4181_vm10, %v14652_v4, %v4184_v23 }
 0x41a   : > { %v4235_v55 = vsel %vm4234_vm15, 1, %v16563_v29  ;;  %vm9361_vm5 = vcmp.lt.s32.totalorder %v9360_v11, 0  ;;  %v4229_v27 = vshrl.u32 %v4224_v53, 16  ;;  %v14770_v44 = vadd.s32 %v4216_v50, %v4207_v37 }
 0x41b   : > { %v4237_v24 = vadd.s32 %v4235_v55, %v4233_v1  ;;  %vm4313_vm7 = vcmp.gt.s32.totalorder %v4312_v22, 0  ;;  %v14772_v47 = vadd.s32 %v4232_v2, %v4228_v48  ;;  %v16487_v19 = vand.u32 2147483647, %v16883_v34 }
 0x41c   : > { %v4314_v30 = vsel %vm4313_vm7, %v4312_v22, 0  ;;  %v4097_v10 = vsel %vm4095_vm12, %v4096_v33, %v14748_v40  ;;  %v4186_v36 = vsel %vm4180_vm0, %v4183_v60, %v4185_v32  ;;  %v3660_v25 = vmul.f32 %v3659_v7, %v14646_v51 }
 0x41d   : > { %v4238_v16 = vadd.s32 %v4237_v24, %v4227_v26  ;;  %v4316_v4 = vand.u32 31, %v4314_v30  ;;  %v3667_v53 = vmul.f32 %v3666_v8, %v14646_v51  ;;  %v3805_v43 = vsel %vm3684_vm3, %v3804_v14, %v3803_v61 }
 0x41e   : > { %v14784_v39 = vsel %vm14743_vm9, 0, %v3807_v45  ;;  %v3931_v59 = vadd.s32 %v14527_v31, %v14522_v9  ;;  %v3946_v48 = vsel %vm9361_vm5, 0, %v9360_v11  ;;  %v4098_v49 = vclz %v4097_v10 }
 0x41f   : > { %16887 = vst [vmem:[#allocation19_spill] sm:$0xff] %v14784_v39  ;;  %v4239_v63 = vadd.s32 %v4238_v16, %v4229_v27  ;;  %v14789_v28 = vsub.s32 32, %v4316_v4  ;;  %v3947_v20 = vsub.s32 32, %v3946_v48  ;;  %v4240_v7 = vmul.u32 %v14669_v57, %v4186_v36 }
 0x420   : > { %vm4242_vm14 = vc.u32 %v14770_v44, %v14772_v47  ;;  %v4309_v8 = vand.u32 8388607, %v16487_v19  ;;  %v4322_v51 = vshll.u32 %v16710_v42, %v4316_v4  ;;  %v4328_v9 = vshll.u32 %v16546_v5, %v4316_v4 }
 0x421   : > { %v4243_v61 = vadd.s32 1, %v4239_v63  ;;  %v4323_v31 = vshrl.u32 %v16711_v15, %v14789_v28  ;;  %v4325_v11 = vshll.u32 %v16711_v15, %v4316_v4  ;;  %v4326_v23 = vshrl.u32 %v16546_v5, %v14789_v28 }
 0x422   : > { %v4329_v57 = vshrl.u32 %v16561_v35, %v14789_v28  ;;  %v3951_v2 = vsub.s32 4294967266, %v3946_v48  ;;  %v14805_v6 = vshrl.u32 %v4314_v30, 5  ;;  %v4331_v14 = vshll.u32 %v16561_v35, %v4316_v4 }
 0x423   : > { %v4244_v1 = vsel %vm4242_vm14, %v4243_v61, %v4239_v63  ;;  %v9363_v45 = vadd.s32 4294967294, %v4098_v49  ;;  %v4319_v50 = vshll.u32 %v16543_v3, %v4316_v4  ;;  %v4320_v33 = vshrl.u32 %v16710_v42, %v14789_v28 }
 0x424   : > { %v4245_v37 = vadd.s32 %v4244_v1, %v4240_v7  ;;  %v3948_v26 = vshll.u32 %v14695_v54, %v3946_v48  ;;  %v4310_v22 = vor.u32 8388608, %v4309_v8  ;;  %v4330_v60 = vor.u32 %v4329_v57, %v4328_v9 }
 0x425   : > { %v4332_v32 = vshrl.u32 %v16562_v18, %v14789_v28  ;;  %v3949_v55 = vshrl.u32 %v3931_v59, %v3947_v20  ;;  %v14814_v24 = vor.u32 %v4323_v31, %v4322_v51  ;;  %v4327_v30 = vor.u32 %v4326_v23, %v4325_v11  ;;  %v16888_v31 = vld [vmem:[#allocation42_spill] sm:$0xff] }
 0x426   : > { %v4246_v27 = vadd.s32 536870912, %v4245_v37  ;;  %v3952_v10 = vadd.s32 127, %v3951_v2  ;;  %vm4334_vm10 = vcmp.lt.s32.totalorder %v14805_v6, 1  ;;  %vm4337_vm0 = vcmp.lt.s32.totalorder %v14805_v6, 4 }
 0x427   : > { %v4333_v36 = vor.u32 %v4332_v32, %v4331_v14  ;;  %vm9364_vm3 = vcmp.lt.s32.totalorder %v9363_v45, 0  ;;  %v14820_v54 = vor.u32 %v4320_v33, %v4319_v50  ;;  %vm4336_vm4 = vcmp.lt.s32.totalorder %v14805_v6, 3 }
 0x428   : > { %v14818_v16 = vshrl.u32 %v4246_v27, 30  ;;  %v3668_v4 = vadd.f32 1.0, %v3667_v53  ;;  %v4343_v59 = vsel %vm4337_vm0, %v4330_v60, 920167782  ;;  %v14827_v63 = vshll.u32 %v4310_v22, 8 }
 0x429   : > { %v4347_v48 = vsel %vm4337_vm0, %v4333_v36, 1326507024  ;;  %v14832_v20 = vsel %vm14743_vm9, %v16882_v58, %v3805_v43  ;;  %vm4335_vm15 = vcmp.lt.s32.totalorder %v14805_v6, 2  ;;  %v4346_v53 = vsel %vm4334_vm10, %v14814_v24, %v4327_v30 }
 0x42a   : > { %v4248_v49 = vshll.u32 %v14818_v16, 30  ;;  %v14839_v7 = vor.u32 %v3949_v55, %v3948_v26  ;;  %v3953_v61 = vshll.u32 %v3952_v10, 23  ;;  %v14841_v8 = vsel %vm9364_vm3, 0, %v9363_v45 }
 0x42b   : > { %v4348_v51 = vsel %vm4336_vm4, %v4330_v60, %v4347_v48  ;;  %v4342_v52 = vsel %vm4334_vm10, %v14820_v54, %v14814_v24  ;;  %v4344_v43 = vsel %vm4336_vm4, %v4327_v30, %v4343_v59  ;;  %v4460_v11 = vand.u32 2139095040, %v16888_v31 }
 0x42c   : > { %v14845_v9 = vsub.s32 %v4245_v37, %v4248_v49  ;;  %v14854_v23 = vadd.f32 1.0, %v3660_v25  ;;  %v4349_v57 = vsel %vm4335_vm15, %v4346_v53, %v4348_v51  ;;  %v4351_v2 = vand.u32 65535, %v14827_v63 }
 0x42d   : > { %v4352_v1 = vshrl.u32 %v14827_v63, 16  ;;  %v14861_v14 = vmul.f32 %v3668_v4, %v14599_v62  ;;  %v14865_v45 = vmul.f32 %v14832_v20, %v14832_v20  ;;  %v4106_v25 = vsub.s32 4294967266, %v14841_v8 }
 0x42e   : > { %vm4250_vm9 = vcmp.lt.s32.totalorder %v14845_v9, 0  ;;  %v4251_v37 = vsub.s32 0, %v14845_v9  ;;  %v4345_v50 = vsel %vm4335_vm15, %v4342_v52, %v4344_v43  ;;  %v4353_v33 = vand.u32 65535, %v4349_v57 }
 0x42f   : > { %v4354_v26 = vshrl.u32 %v4349_v57, 16  ;;  %v14872_v22 = vor.u32 4788187, %v3953_v61  ;;  %v4461_v32 = vshrl.u32 %v4460_v11, 23  ;;  %v4086_v4 = vadd.s32 %v14612_v56, %v14610_v13 }
 0x430   : > { %v4252_v60 = vsel %vm4250_vm9, %v4251_v37, %v14845_v9  ;;  %v4355_v27 = vmul.u32 %v4353_v33, %v4351_v2  ;;  %v4357_v36 = vmul.u32 %v4353_v33, %v4352_v1  ;;  %v4102_v59 = vsub.s32 32, %v14841_v8 }
 0x431   : > { %v4253_v55 = vclz %v4252_v60  ;;  %v4356_v10 = vmul.u32 %v4354_v26, %v4351_v2  ;;  %v4375_v48 = vand.u32 65535, %v4345_v50  ;;  %v4376_v49 = vshrl.u32 %v4345_v50, 16 }
 0x432   : > { %v4107_v53 = vadd.s32 127, %v4106_v25  ;;  %v4358_v61 = vmul.u32 %v4354_v26, %v4352_v1  ;;  %v3955_v43 = vand.u32 2147483647, %v14872_v22  ;;  %v4318_v11 = vshrl.u32 %v16543_v3, %v14789_v28 }
 0x433   : > { %v9366_v51 = vadd.s32 4294967294, %v4253_v55  ;;  %v4359_v52 = vshll.u32 %v4356_v10, 16  ;;  %v4361_v57 = vshll.u32 %v4357_v36, 16  ;;  %v9371_v37 = vadd.s32 4294967169, %v4461_v32 }
 0x434   : > { %v4339_v33 = vsel %vm4337_vm0, %v4327_v30, 2102212464  ;;  %v4378_v50 = vmul.u32 %v4376_v49, %v4351_v2  ;;  %v4379_v26 = vmul.u32 %v4375_v48, %v4352_v1  ;;  %v4103_v22 = vshll.u32 %v14748_v40, %v14841_v8 }
 0x435   : > { %vm9367_vm12 = vcmp.lt.s32.totalorder %v9366_v51, 0  ;;  %vm4363_vm5 = vc.u32 %v4355_v27, %v4359_v52  ;;  %v4365_v13 = vadd.s32 %v4359_v52, %v4355_v27  ;;  %v4104_v60 = vshrl.u32 %v4086_v4, %v4102_v59 }
 0x436   : > { %v14884_v56 = vsel %vm9367_vm12, 0, %v9366_v51  ;;  %v4364_v25 = vsel %vm4363_vm5, 1, %v16563_v29  ;;  %v4108_v55 = vshll.u32 %v4107_v53, 23  ;;  %v4338_v32 = vsel %vm4334_vm10, %v4318_v11, %v14820_v54 }
 0x437   : > { %v4366_v28 = vadd.s32 %v4364_v25, %v4358_v61  ;;  %v4360_v19 = vshrl.u32 %v4356_v10, 16  ;;  %vm4367_vm7 = vc.u32 %v4365_v13, %v4361_v57  ;;  %v4377_v30 = vmul.u32 %v4375_v48, %v4351_v2 }
 0x438   : > { %v4261_v27 = vsub.s32 4294967266, %v14884_v56  ;;  %v4340_v51 = vsel %vm4336_vm4, %v14814_v24, %v4339_v33  ;;  %v4368_v52 = vsel %vm4367_vm7, 1, %v16563_v29  ;;  %v4467_v62 = vadd.s32 1, %v9371_v37 }
 0x439   : > { %v4370_v40 = vadd.s32 %v4368_v52, %v4366_v28  ;;  %v4380_v8 = vmul.u32 %v4376_v49, %v4352_v1  ;;  %v4381_v4 = vshll.u32 %v4378_v50, 16  ;;  %v4383_v59 = vshll.u32 %v4379_v26, 16 }
 0x43a   : > { %v4105_v53 = vor.u32 %v4104_v60, %v4103_v22  ;;  %v4109_v61 = vor.u32 4788187, %v4108_v55  ;;  %v4362_v25 = vshrl.u32 %v4357_v36, 16  ;;  %v16491_v54 = vand.u32 2147483647, %v16888_v31 }
 0x43b   : > { %v4241_v2 = vadd.s32 %v14772_v47, %v14770_v44  ;;  %v4371_v10 = vadd.s32 %v4370_v40, %v4360_v19  ;;  %vm4385_vm14 = vc.u32 %v4377_v30, %v4381_v4  ;;  %v4387_v48 = vadd.s32 %v4381_v4, %v4377_v30 }
 0x43c   : > { %v4257_v24 = vsub.s32 32, %v14884_v56  ;;  %v4341_v11 = vsel %vm4335_vm15, %v4338_v32, %v4340_v51  ;;  %v4386_v1 = vsel %vm4385_vm14, 1, %v16563_v29  ;;  %vm4468_vm10 = vcmp.gt.s32.totalorder %v4467_v62, 0 }
 0x43d   : > { %v4262_v49 = vadd.s32 127, %v4261_v27  ;;  %v4382_v57 = vshrl.u32 %v4378_v50, 16  ;;  %v4388_v37 = vadd.s32 %v4386_v1, %v4380_v8  ;;  %vm4389_vm0 = vc.u32 %v4387_v48, %v4383_v59 }
 0x43e   : > { %v14904_v36 = vadd.s32 %v4371_v10, %v4362_v25  ;;  %v4390_v33 = vsel %vm4389_vm0, 1, %v16563_v29  ;;  %v14907_v44 = vadd.s32 %v4387_v48, %v4383_v59  ;;  %v4469_v47 = vsel %vm4468_vm10, %v4467_v62, 0 }
 0x43f   : > { %v3811_v19 = vmul.f32 -0.001358992, %v14865_v45  ;;  %v3818_v13 = vmul.f32 -0.00019511016, %v14865_v45  ;;  %v4384_v6 = vshrl.u32 %v4379_v26, 16  ;;  %v4392_v22 = vadd.s32 %v4390_v33, %v4388_v37 }
 0x440   : > { %v16889_v60 = vcvt.s32.f32 %v14839_v7  ;;  %v4110_v28 = vand.u32 2147483647, %v4109_v61  ;;  %v4112_v50 = vcvt.s32.f32 %v4105_v53  ;;  %v4471_v32 = vand.u32 31, %v4469_v47 }
 0x441   : > { %v4258_v30 = vshll.u32 %v14845_v9, %v14884_v56  ;;  %v4393_v27 = vadd.s32 %v4392_v22, %v4382_v57  ;;  %v4395_v51 = vmul.u32 %v14827_v63, %v4341_v11  ;;  %v4464_v62 = vand.u32 8388607, %v16491_v54  ;;  %v16893_v22 = vld [vmem:[#allocation39_spill] sm:$0xff] }
 0x442   : > { %v3958_v55 = vmul.f32 %v16889_v60, %v3955_v43  ;;  %vm3839_vm3 = vcmp.lt.s32.totalorder %v16848_v21, 0  ;;  %v4259_v52 = vshrl.u32 %v4241_v2, %v4257_v24  ;;  %v4263_v26 = vshll.u32 %v4262_v49, 23 }
 0x443   : > { %vm4397_vm4 = vc.u32 %v14904_v36, %v14907_v44  ;;  %v14921_v7 = vsub.s32 32, %v4471_v32  ;;  %v4394_v43 = vadd.s32 %v4393_v27, %v4384_v6  ;;  %v14923_v40 = vshrl.u32 %v4469_v47, 5 }
 0x444   : > { %v4474_v9 = vshll.u32 %v16543_v3, %v4471_v32  ;;  %v4483_v56 = vshll.u32 %v16546_v5, %v4471_v32  ;;  %v4477_v8 = vshll.u32 %v16710_v42, %v4471_v32  ;;  %v4480_v59 = vshll.u32 %v16711_v15, %v4471_v32 }
 0x445   : > { %v4475_v63 = vshrl.u32 %v16710_v42, %v14921_v7  ;;  %v4478_v4 = vshrl.u32 %v16711_v15, %v14921_v7  ;;  %v16890_v53 = vand.u32 2147483647, %v16848_v21  ;;  %v4398_v25 = vadd.s32 1, %v4394_v43 }
 0x446   : > { %v4481_v2 = vshrl.u32 %v16546_v5, %v14921_v7  ;;  %v4484_v10 = vshrl.u32 %v16561_v35, %v14921_v7  ;;  %v4486_v42 = vshll.u32 %v16561_v35, %v4471_v32  ;;  %v3959_v48 = vxor.u32 2147483648, %v3958_v55 }
 0x447   : > { %vm14935_vm15 = vcmp.le.f32.partialorder %v16890_v53, 0.7853982  ;;  %v4113_v24 = vmul.f32 %v4112_v50, %v4110_v28  ;;  %v4260_v11 = vor.u32 %v4259_v52, %v4258_v30  ;;  %v4487_v15 = vshrl.u32 %v16562_v18, %v14921_v7 }
 0x448   : > { %v4264_v1 = vor.u32 4788187, %v4263_v26  ;;  %v4399_v49 = vsel %vm4397_vm4, %v4398_v25, %v4394_v43  ;;  %v14949_v57 = vor.u32 %v4475_v63, %v4474_v9  ;;  %v4485_v37 = vor.u32 %v4484_v10, %v4483_v56 }
 0x449   : > { %v4400_v5 = vadd.s32 %v4399_v49, %v4395_v51  ;;  %v14951_v33 = vor.u32 %v4478_v4, %v4477_v8  ;;  %v14953_v47 = vor.u32 %v4481_v2, %v4480_v59  ;;  %vm4492_vm9 = vcmp.lt.s32.totalorder %v14923_v40, 4 }
 0x44a   : > { %v4465_v35 = vor.u32 8388608, %v4464_v62  ;;  %v4488_v6 = vor.u32 %v4487_v15, %v4486_v42  ;;  %vm4489_vm12 = vcmp.lt.s32.totalorder %v14923_v40, 1  ;;  %vm4491_vm5 = vcmp.lt.s32.totalorder %v14923_v40, 3 }
 0x44b   : > { %v3812_v18 = vadd.f32 0.041655596, %v3811_v19  ;;  %vm3994_vm7 = vcmp.lt.s32.totalorder %v16893_v22, 0  ;;  %v4114_v60 = vxor.u32 2147483648, %v4113_v24  ;;  %v4401_v28 = vadd.s32 536870912, %v4400_v5 }
 0x44c   : > { %v3819_v50 = vadd.f32 0.008332121, %v3818_v13  ;;  %v4265_v32 = vand.u32 2147483647, %v4264_v1  ;;  %v4267_v30 = vcvt.s32.f32 %v4260_v11  ;;  %v4498_v27 = vsel %vm4492_vm9, %v4485_v37, 920167782 }
 0x44d   : > { %v14961_v51 = vshrl.u32 %v4401_v28, 30  ;;  %vm4490_vm14 = vcmp.lt.s32.totalorder %v14923_v40, 2  ;;  %v4497_v62 = vsel %vm4489_vm12, %v14949_v57, %v14951_v33  ;;  %v4499_v19 = vsel %vm4491_vm5, %v14953_v47, %v4498_v27 }
 0x44e   : > { %v3960_v13 = vsel %vm3839_vm3, %v3959_v48, %v3958_v55  ;;  %v16894_v52 = vand.u32 2147483647, %v16893_v22  ;;  %v4502_v43 = vsel %vm4492_vm9, %v4488_v6, 1326507024  ;;  %v14981_v9 = vshll.u32 %v4465_v35, 8 }
 0x44f   : > { %v3813_v56 = vmul.f32 %v3812_v18, %v14865_v45  ;;  %v4115_v63 = vsel %vm3994_vm7, %v4114_v60, %v4113_v24  ;;  %v4403_v8 = vshll.u32 %v14961_v51, 30  ;;  %v4501_v55 = vsel %vm4489_vm12, %v14951_v33, %v14953_v47 }
 0x450   : > { %vm14975_vm10 = vcmp.le.f32.partialorder %v16894_v52, 0.7853982  ;;  %v3820_v59 = vmul.f32 %v3819_v50, %v14865_v45  ;;  %v4500_v53 = vsel %vm4490_vm14, %v4497_v62, %v4499_v19  ;;  %v4503_v25 = vsel %vm4491_vm5, %v4485_v37, %v4502_v43 }
 0x451   : > { %v15001_v10 = vsel %vm14935_vm15, %v16848_v21, %v3960_v13  ;;  %v4268_v42 = vmul.f32 %v4267_v30, %v4265_v32  ;;  %v15003_v48 = vsub.s32 %v4400_v5, %v4403_v8  ;;  %v15008_v24 = vsel %vm14975_vm10, %v16893_v22, %v4115_v63 }
 0x452   : > { %v4504_v11 = vsel %vm4490_vm14, %v4501_v55, %v4503_v25  ;;  %v4506_v15 = vand.u32 65535, %v14981_v9  ;;  %v4507_v1 = vshrl.u32 %v14981_v9, 16  ;;  %v3814_v49 = vadd.f32 -0.4999988, %v3813_v56 }
 0x453   : > { %vm4405_vm0 = vcmp.lt.s32.totalorder %v15003_v48, 0  ;;  %v4406_v37 = vsub.s32 0, %v15003_v48  ;;  %v4531_v35 = vshrl.u32 %v4500_v53, 16  ;;  %v3821_v5 = vadd.f32 -0.16666654, %v3820_v59 }
 0x454   : > { %v15018_v6 = vmul.f32 %v15001_v10, %v15001_v10  ;;  %v4508_v18 = vand.u32 65535, %v4504_v11  ;;  %v4509_v60 = vshrl.u32 %v4504_v11, 16  ;;  %v15022_v28 = vmul.f32 %v15008_v24, %v15008_v24 }
 0x455   : > { %v4269_v50 = vxor.u32 2147483648, %v4268_v42  ;;  %v4407_v32 = vsel %vm4405_vm0, %v4406_v37, %v15003_v48  ;;  %v4530_v30 = vand.u32 65535, %v4500_v53  ;;  %v15026_v52 = vmul.f32 %v3814_v49, %v14865_v45 }
 0x456   : > { %v4408_v27 = vclz %v4407_v32  ;;  %v4510_v62 = vmul.u32 %v4508_v18, %v4506_v15  ;;  %v4511_v19 = vmul.u32 %v4509_v60, %v4506_v15  ;;  %v4512_v13 = vmul.u32 %v4508_v18, %v4507_v1 }
 0x457   : > { %v15029_v43 = vadd.s32 3, %v14784_v39  ;;  %vm4149_vm4 = vcmp.lt.s32.totalorder %v16870_v17, 0  ;;  %v4533_v56 = vmul.u32 %v4531_v35, %v4506_v15  ;;  %v3822_v63 = vmul.f32 %v3821_v5, %v14865_v45 }
 0x458   : > { %v16897_v8 = vand.u32 2147483647, %v16870_v17  ;;  %v9369_v59 = vadd.s32 4294967294, %v4408_v27  ;;  %v4514_v53 = vshll.u32 %v4511_v19, 16  ;;  %v3973_v25 = vmul.f32 -0.00019511016, %v15018_v6 }
 0x459   : > { %v4128_v11 = vmul.f32 -0.00019511016, %v15022_v28  ;;  %v4513_v49 = vmul.u32 %v4509_v60, %v4507_v1  ;;  %v4534_v37 = vmul.u32 %v4530_v30, %v4507_v1  ;;  %v4270_v18 = vsel %vm4149_vm4, %v4269_v50, %v4268_v42 }
 0x45a   : > { %vm15035_vm1 = vcmp.le.f32.partialorder %v16897_v8, 0.7853982  ;;  %vm9370_vm0 = vcmp.lt.s32.totalorder %v9369_v59, 0  ;;  %v4516_v32 = vshll.u32 %v4512_v13, 16  ;;  %vm4518_vm13 = vc.u32 %v4510_v62, %v4514_v53 }
 0x45b   : > { %vm3677_vm11 = vcmp.eq.s32.totalorder %v14732_v0, 2  ;;  %v4411_v45 = vsel %vm9370_vm0, 0, %v9369_v59  ;;  %v4519_v5 = vsel %vm4518_vm13, 1, %v16563_v29  ;;  %v4532_v8 = vmul.u32 %v4530_v30, %v4506_v15 }
 0x45c   : > { %v4536_v27 = vshll.u32 %v4533_v56, 16  ;;  %v4396_v54 = vadd.s32 %v14907_v44, %v14904_v36  ;;  %v4416_v2 = vsub.s32 4294967266, %v4411_v45  ;;  %v4473_v60 = vshrl.u32 %v16543_v3, %v14921_v7 }
 0x45d   : > { %v4520_v4 = vadd.s32 %v4514_v53, %v4510_v62  ;;  %v15052_v42 = vsel %vm15035_vm1, %v16870_v17, %v4270_v18  ;;  %v4521_v50 = vadd.s32 %v4519_v5, %v4513_v49  ;;  %v4535_v39 = vmul.u32 %v4531_v35, %v4507_v1 }
 0x45e   : > { %v4538_v59 = vshll.u32 %v4534_v37, 16  ;;  %v4412_v31 = vsub.s32 32, %v4411_v45  ;;  %v4494_v15 = vsel %vm4492_vm9, %v14953_v47, 2102212464  ;;  %v4515_v30 = vshrl.u32 %v4511_v19, 16 }
 0x45f   : > { %vm4522_vm13 = vc.u32 %v4520_v4, %v4516_v32  ;;  %v4417_v36 = vadd.s32 127, %v4416_v2  ;;  %vm4540_vm0 = vc.u32 %v4532_v8, %v4536_v27  ;;  %v4542_v3 = vadd.s32 %v4536_v27, %v4532_v8 }
 0x460   : > { %v4523_v44 = vsel %vm4522_vm13, 1, %v16563_v29  ;;  %v15060_v7 = vmul.f32 %v15052_v42, %v15052_v42  ;;  %v4517_v62 = vshrl.u32 %v4512_v13, 16  ;;  %v4541_v1 = vsel %vm4540_vm0, 1, %v16563_v29 }
 0x461   : > { %v4525_v53 = vadd.s32 %v4523_v44, %v4521_v50  ;;  %vm3674_vm2 = vcmp.eq.s32.totalorder %v14732_v0, 0  ;;  %v4493_v47 = vsel %vm4489_vm12, %v4473_v60, %v14949_v57  ;;  %v4537_v4 = vshrl.u32 %v4533_v56, 16 }
 0x462   : > { %v4543_v2 = vadd.s32 %v4541_v1, %v4535_v39  ;;  %vm4544_vm9 = vc.u32 %v4542_v3, %v4538_v59  ;;  %v4413_v35 = vshll.u32 %v15003_v48, %v4411_v45  ;;  %v4495_v19 = vsel %vm4491_vm5, %v14951_v33, %v4494_v15 }
 0x463   : > { %v4526_v49 = vadd.s32 %v4525_v53, %v4515_v30  ;;  %v4545_v13 = vsel %vm4544_vm9, 1, %v16563_v29  ;;  %v4414_v18 = vshrl.u32 %v4396_v54, %v4412_v31  ;;  %v4418_v32 = vshll.u32 %v4417_v36, 23 }
 0x464   : > { %v4539_v5 = vshrl.u32 %v4534_v37, 16  ;;  %v4547_v8 = vadd.s32 %v4545_v13, %v4543_v2  ;;  %v3966_v27 = vmul.f32 -0.001358992, %v15018_v6  ;;  %v3974_v50 = vadd.f32 0.008332121, %v3973_v25  ;;  %v16902_v13 = vld [vmem:[#allocation37_spill] sm:$0xff] }
 0x465   : > { %v15073_v57 = vadd.s32 %v4526_v49, %v4517_v62  ;;  %v15075_v39 = vadd.s32 %v4542_v3, %v4538_v59  ;;  %v3823_v56 = vadd.f32 1.0, %v3822_v63  ;;  %v4121_v48 = vmul.f32 -0.001358992, %v15022_v28 }
 0x466   : > { %v4496_v33 = vsel %vm4490_vm14, %v4493_v47, %v4495_v19  ;;  %v4548_v45 = vadd.s32 %v4547_v8, %v4537_v4  ;;  %v16900_v29 = vxor.u32 2147483648, %v14854_v23  ;;  %v15086_v54 = vand.u32 3, %v15029_v43 }
 0x467   : > { %v3961_v25 = vsub.s32 4, %v14637_v41  ;;  %v4129_v37 = vadd.f32 0.008332121, %v4128_v11  ;;  %v4283_v63 = vmul.f32 -0.00019511016, %v15060_v7  ;;  %v4415_v60 = vor.u32 %v4414_v18, %v4413_v35 }
 0x468   : > { %v3679_v31 = vsel %vm3677_vm11, %v16900_v29, %v14861_v14  ;;  %v4419_v59 = vor.u32 4788187, %v4418_v32  ;;  %v4549_v15 = vadd.s32 %v4548_v45, %v4539_v5  ;;  %vm3673_vm12 = vcmp.lt.s32.totalorder %v14732_v0, 2 }
 0x469   : > { %v3967_v40 = vadd.f32 0.041655596, %v3966_v27  ;;  %v3975_v30 = vmul.f32 %v3974_v50, %v15018_v6  ;;  %v4550_v36 = vmul.u32 %v14981_v9, %v4496_v33  ;;  %vm4552_vm11 = vc.u32 %v15073_v57, %v15075_v39 }
 0x46a   : > { %v15096_v43 = vadd.f32 1.0, %v15026_v52  ;;  %v15099_v11 = vmul.f32 %v3823_v56, %v14832_v20  ;;  %v4122_v44 = vadd.f32 0.041655596, %v4121_v48  ;;  %v4553_v3 = vadd.s32 1, %v4549_v15 }
 0x46b   : > { %v3962_v62 = vsel %vm3839_vm3, %v3961_v25, %v14637_v41  ;;  %v4116_v53 = vsub.s32 4, %v14729_v12  ;;  %v4130_v1 = vmul.f32 %v4129_v37, %v15022_v28  ;;  %v4276_v9 = vmul.f32 -0.001358992, %v15060_v7 }
 0x46c   : > { %v4284_v47 = vadd.f32 0.008332121, %v4283_v63  ;;  %v4420_v4 = vand.u32 2147483647, %v4419_v59  ;;  %v4422_v2 = vcvt.s32.f32 %v4415_v60  ;;  %v4554_v52 = vsel %vm4552_vm11, %v4553_v3, %v4549_v15 }
 0x46d   : > { %v16901_v35 = vxor.u32 2147483648, %v14861_v14  ;;  %v3968_v19 = vmul.f32 %v3967_v40, %v15018_v6  ;;  %v3976_v49 = vadd.f32 -0.16666654, %v3975_v30  ;;  %v4555_v41 = vadd.s32 %v4554_v52, %v4550_v36 }
 0x46e   : > { %vm16515_vm3 = vweird.f32 %v16902_v13  ;;  %vm3829_vm5 = vcmp.eq.s32.totalorder %v15086_v54, 0  ;;  %v16509_v18 = vxor.u32 2147483648, %v15099_v11  ;;  %v16507_v32 = vxor.u32 2147483648, %v15096_v43 }
 0x46f   : > { %v3676_v20 = vsel %vm3674_vm2, %v14854_v23, %v16901_v35  ;;  %v4123_v5 = vmul.f32 %v4122_v44, %v15022_v28  ;;  %vm16502_vm14 = vweird.f32 %v16872_v38  ;;  %vm3832_vm13 = vcmp.eq.s32.totalorder %v15086_v54, 2 }
 0x470   : > { %v15122_v8 = vsel %vm14935_vm15, 0, %v3962_v62  ;;  %v4131_v27 = vadd.f32 -0.16666654, %v4130_v1  ;;  %v4556_v50 = vadd.s32 536870912, %v4555_v41  ;;  %vm16501_vm2 = vweird.f32 %v16882_v58 }
 0x471   : > { %v4117_v56 = vsel %vm3994_vm7, %v4116_v53, %v14729_v12  ;;  %v4277_v48 = vadd.f32 0.041655596, %v4276_v9  ;;  %v4285_v33 = vmul.f32 %v4284_v47, %v15060_v7  ;;  %v4423_v45 = vmul.f32 %v4422_v2, %v4420_v4 }
 0x472   : > { %vm3828_vm0 = vcmp.lt.s32.totalorder %v15086_v54, 2  ;;  %v3969_v29 = vadd.f32 -0.4999988, %v3968_v19  ;;  %v3977_v25 = vmul.f32 %v3976_v49, %v15018_v6  ;;  %v15131_v61 = vshrl.u32 %v4556_v50, 30 }
 0x473   : > { %v3831_v37 = vsel %vm3829_vm5, %v15096_v43, %v16509_v18  ;;  %v3834_v12 = vsel %vm3832_vm13, %v16507_v32, %v15099_v11  ;;  %v3981_v63 = vadd.s32 3, %v15122_v8  ;;  %v4124_v60 = vadd.f32 -0.4999988, %v4123_v5 }
 0x474   : > { %v15144_v59 = vsel %vm14975_vm10, 0, %v4117_v56  ;;  %v4132_v15 = vmul.f32 %v4131_v27, %v15022_v28  ;;  %v4271_v40 = vsub.s32 4, %v14818_v16  ;;  %v4558_v30 = vshll.u32 %v15131_v61, 30 }
 0x475   : > { %v3680_v36 = vsel %vm3673_vm12, %v3676_v20, %v3679_v31  ;;  %v4278_v44 = vmul.f32 %v4277_v48, %v15060_v7  ;;  %v4286_v3 = vadd.f32 -0.16666654, %v4285_v33  ;;  %v4424_v62 = vxor.u32 2147483648, %v4423_v45 }
 0x476   : > { %v3970_v53 = vmul.f32 %v3969_v29, %v15018_v6  ;;  %v3978_v1 = vadd.f32 1.0, %v3977_v25  ;;  %vm4304_vm15 = vcmp.lt.s32.totalorder %v16883_v34, 0  ;;  %v15154_v26 = vsub.s32 %v4555_v41, %v4558_v30 }
 0x477   : > { %v3835_v9 = vsel %vm3828_vm0, %v3831_v37, %v3834_v12  ;;  %v15158_v47 = vand.u32 3, %v3981_v63  ;;  %v4125_v4 = vmul.f32 %v4124_v60, %v15022_v28  ;;  %v4136_v0 = vadd.s32 3, %v15144_v59 }
 0x478   : > { %v4133_v31 = vadd.f32 1.0, %v4132_v15  ;;  %v4272_v2 = vsel %vm4149_vm4, %v4271_v40, %v14818_v16  ;;  %vm4560_vm7 = vcmp.lt.s32.totalorder %v15154_v26, 0  ;;  %v4561_v6 = vsub.s32 0, %v15154_v26 }
 0x479   : > { %v4279_v52 = vadd.f32 -0.4999988, %v4278_v44  ;;  %v4287_v35 = vmul.f32 %v4286_v3, %v15060_v7  ;;  %v16903_v54 = vand.u32 2147483647, %v16883_v34  ;;  %v4425_v28 = vsel %vm4304_vm15, %v4424_v62, %v4423_v45 }
 0x47a   : > { %v15179_v16 = vsel %vm16515_vm3, nan, %v14726_v46  ;;  %v15181_v19 = vadd.f32 1.0, %v3970_v53  ;;  %v15184_v49 = vmul.f32 %v3978_v1, %v15001_v10  ;;  %v4562_v41 = vsel %vm4560_vm7, %v4561_v6, %v15154_v26  ;;  %v16909_v6 = vld [vmem:[#allocation24_spill] sm:$0xff] }
 0x47b   : > { %vm15170_vm10 = vcmp.le.f32.partialorder %v16903_v54, 0.7853982  ;;  %16906 = vst [vmem:[#allocation41_spill] sm:$0xff] %v15179_v16  ;;  %v15189_v5 = vsel %vm16502_vm14, nan, %v3680_v36  ;;  %v4137_v27 = vand.u32 3, %v4136_v0  ;;  %v15193_v50 = vsel %vm15035_vm1, 0, %v4272_v2 }
 0x47c   : > { %16907 = vst [vmem:[#allocation39_spill] sm:$0xff] %v15189_v5  ;;  %v4563_v56 = vclz %v4562_v41  ;;  %v15197_v46 = vsel %vm16501_vm2, nan, %v3835_v9  ;;  %v15199_v48 = vadd.f32 1.0, %v4125_v4  ;;  %v15202_v10 = vmul.f32 %v4133_v31, %v15008_v24  ;;  %v17001_v16 = vld [vmem:[#allocation98_spill] sm:$0xff] }
 0x47d   : > { %16908 = vst [vmem:[#allocation37_spill] sm:$0xff] %v15197_v46  ;;  %v15207_v33 = vsel %vm15170_vm10, %v16883_v34, %v4425_v28  ;;  %vm3984_vm4 = vcmp.eq.s32.totalorder %v15158_v47, 0  ;;  %v4280_v55 = vmul.f32 %v4279_v52, %v15060_v7  ;;  %v4288_v45 = vadd.f32 1.0, %v4287_v35 }
 0x47e   : > { %v9372_v29 = vadd.s32 4294967294, %v4563_v56  ;;  %v16506_v25 = vxor.u32 2147483648, %v15184_v49  ;;  %vm3987_vm1 = vcmp.eq.s32.totalorder %v15158_v47, 2  ;;  %v16504_v37 = vxor.u32 2147483648, %v15181_v19 }
 0x47f   : > { %v4291_v24 = vadd.s32 3, %v15193_v50  ;;  %vm4139_vm9 = vcmp.eq.s32.totalorder %v4137_v27, 0  ;;  %v15217_v12 = vmul.f32 %v15207_v33, %v15207_v33  ;;  %v4551_v63 = vadd.s32 %v15075_v39, %v15073_v57 }
 0x480   : > { %vm9373_vm12 = vcmp.lt.s32.totalorder %v9372_v29, 0  ;;  %v16503_v7 = vxor.u32 2147483648, %v15202_v10  ;;  %vm4142_vm11 = vcmp.eq.s32.totalorder %v4137_v27, 2  ;;  %v16498_v60 = vxor.u32 2147483648, %v15199_v48 }
 0x481   : > { %v4566_v15 = vsel %vm9373_vm12, 0, %v9372_v29  ;;  %v15223_v40 = vadd.f32 1.0, %v4280_v55  ;;  %v15226_v30 = vmul.f32 %v4288_v45, %v15052_v42  ;;  %vm3983_vm5 = vcmp.lt.s32.totalorder %v15158_v47, 2 }
 0x482   : > { %v4567_v36 = vsub.s32 32, %v4566_v15  ;;  %v4571_v44 = vsub.s32 4294967266, %v4566_v15  ;;  %v4292_v3 = vand.u32 3, %v4291_v24  ;;  %v4426_v62 = vsub.s32 4, %v14961_v51 }
 0x483   : > { %v4568_v57 = vshll.u32 %v15154_v26, %v4566_v15  ;;  %v3989_v39 = vsel %vm3987_vm1, %v16504_v37, %v15184_v49  ;;  %v4438_v53 = vmul.f32 -0.00019511016, %v15217_v12  ;;  %v3986_v9 = vsel %vm3984_vm4, %v15181_v19, %v16506_v25  ;;  %v16910_v15 = vld [vmem:[#allocation43_spill] sm:$0xff] }
 0x484   : > { %v4569_v1 = vshrl.u32 %v4551_v63, %v4567_v36  ;;  %v4572_v42 = vadd.s32 127, %v4571_v44  ;;  %vm4138_vm13 = vcmp.lt.s32.totalorder %v4137_v27, 2  ;;  %v4141_v26 = vsel %vm4139_vm9, %v15199_v48, %v16503_v7 }
 0x485   : > { %v4144_v4 = vsel %vm4142_vm11, %v16498_v60, %v15202_v10  ;;  %v16497_v0 = vxor.u32 2147483648, %v15226_v30  ;;  %v16496_v31 = vxor.u32 2147483648, %v15223_v40  ;;  %v4756_v52 = vand.u32 3, %v16909_v6  ;;  %v16936_v60 = vld [vmem:[#allocation55_spill] sm:$0xff] }
 0x486   : > { %v4573_v2 = vshll.u32 %v4572_v42, 23  ;;  %vm4294_vm0 = vcmp.eq.s32.totalorder %v4292_v3, 0  ;;  %vm4297_vm7 = vcmp.eq.s32.totalorder %v4292_v3, 2  ;;  %v4427_v35 = vsel %vm4304_vm15, %v4426_v62, %v14961_v51 }
 0x487   : > { %v4570_v54 = vor.u32 %v4569_v1, %v4568_v57  ;;  %vm16500_vm4 = vweird.f32 %v16848_v21  ;;  %v4431_v28 = vmul.f32 -0.001358992, %v15217_v12  ;;  %v4439_v41 = vadd.f32 0.008332121, %v4438_v53  ;;  %v16912_v57 = vld [vmem:[#allocation49_spill] sm:$0xff]  ;;  %v16914_v1 = vld [vmem:[#allocation42_spill] sm:$0xff] }
 0x488   : > { %v4574_v56 = vor.u32 4788187, %v4573_v2  ;;  %v3990_v55 = vsel %vm3983_vm5, %v3986_v9, %v3989_v39  ;;  %vm16495_vm1 = vweird.f32 %v16893_v22  ;;  %v4145_v45 = vsel %vm4138_vm13, %v4141_v26, %v4144_v4  ;;  %v16915_v9 = vld [vmem:[#allocation45_spill] sm:$0xff]  ;;  %v16917_v4 = vld [vmem:[#allocation44_spill] sm:$0xff] }
 0x489   : > { %vm4293_vm9 = vcmp.lt.s32.totalorder %v4292_v3, 2  ;;  %v4296_v29 = vsel %vm4294_vm0, %v15223_v40, %v16497_v0  ;;  %v4299_v51 = vsel %vm4297_vm7, %v16496_v31, %v15226_v30  ;;  %v15270_v24 = vsel %vm15170_vm10, 0, %v4427_v35  ;;  %v16935_v31 = vld [vmem:[#allocation67_spill] sm:$0xff] }
 0x48a   : > { %vm4758_vm15 = vcmp.eq.s32.totalorder %v4756_v52, 0  ;;  %v4575_v47 = vand.u32 2147483647, %v4574_v56  ;;  %v4577_v63 = vcvt.s32.f32 %v4570_v54  ;;  %vm4761_vm12 = vcmp.eq.s32.totalorder %v4756_v52, 2 }
 0x48b   : > { %v4910_v27 = vand.u32 3, %v16910_v15  ;;  %v15275_v36 = vsel %vm16500_vm4, nan, %v3990_v55  ;;  %v4432_v44 = vadd.f32 0.041655596, %v4431_v28  ;;  %v4440_v62 = vmul.f32 %v4439_v41, %v15217_v12  ;;  %v16919_v28 = vld [vmem:[#allocation53_spill] sm:$0xff] }
 0x48c   : > { %16911 = vst [vmem:[#allocation24_spill] sm:$0xff] %v15275_v36  ;;  %v5064_v39 = vand.u32 3, %v16912_v57  ;;  %v15281_v20 = vsel %vm16495_vm1, nan, %v4145_v45  ;;  %vm16499_vm10 = vweird.f32 %v16870_v17  ;;  %v4446_v53 = vadd.s32 3, %v15270_v24  ;;  %v16928_v57 = vld [vmem:[#allocation56_spill] sm:$0xff]  ;;  %v15472_v36 = vpop.permute.xlu0 %8877 }
 0x48d   : > { %16913 = vst [vmem:[#allocation43_spill] sm:$0xff] %v15281_v20  ;;  %vm4459_vm11 = vcmp.lt.s32.totalorder %v16914_v1, 0  ;;  %v4300_v42 = vsel %vm4293_vm9, %v4296_v29, %v4299_v51  ;;  %vm4757_vm5 = vcmp.lt.s32.totalorder %v4756_v52, 2  ;;  %v16916_v26 = vxor.u32 2147483648, %v16915_v9  ;;  %v16924_v51 = vld [vmem:[#allocation47_spill] sm:$0xff]  ;;  %v16982_v20 = vld [vmem:[#allocation28_spill] sm:$0xff] }
 0x48e   : > { %v16918_v6 = vxor.u32 2147483648, %v16917_v4  ;;  %v4578_v54 = vmul.f32 %v4577_v63, %v4575_v47  ;;  %vm4912_vm13 = vcmp.eq.s32.totalorder %v4910_v27, 0  ;;  %vm4915_vm0 = vcmp.eq.s32.totalorder %v4910_v27, 2  ;;  %v16926_v63 = vld [vmem:[#allocation46_spill] sm:$0xff]  ;;  %16996 = vst [vmem:[#allocation45_spill] sm:$0xff] %v15472_v36 }
 0x48f   : > { %v4760_v2 = vsel %vm4758_vm15, %v16917_v4, %v16916_v26  ;;  %v5218_v41 = vand.u32 3, %v16919_v28  ;;  %v4433_v56 = vmul.f32 %v4432_v44, %v15217_v12  ;;  %v4441_v55 = vadd.f32 -0.16666654, %v4440_v62  ;;  %v16929_v26 = vld [vmem:[#allocation52_spill] sm:$0xff] }
 0x490   : > { %v4763_v35 = vsel %vm4761_vm12, %v16918_v6, %v16915_v9  ;;  %vm5066_vm7 = vcmp.eq.s32.totalorder %v5064_v39, 0  ;;  %vm5069_vm1 = vcmp.eq.s32.totalorder %v5064_v39, 2  ;;  %v15297_v3 = vsel %vm16499_vm10, nan, %v4300_v42  ;;  %v16931_v6 = vld [vmem:[#allocation51_spill] sm:$0xff] }
 0x491   : > { %16920 = vst [vmem:[#allocation49_spill] sm:$0xff] %v15297_v3  ;;  %v16921_v52 = vand.u32 2147483647, %v16914_v1  ;;  %v4764_v29 = vsel %vm4757_vm5, %v4760_v2, %v4763_v35  ;;  %vm4911_vm15 = vcmp.lt.s32.totalorder %v4910_v27, 2  ;;  %v16925_v47 = vxor.u32 2147483648, %v16924_v51 }
 0x492   : > { %v16927_v44 = vxor.u32 2147483648, %v16926_v63  ;;  %vm5065_vm12 = vcmp.lt.s32.totalorder %v5064_v39, 2  ;;  %v5372_v42 = vand.u32 3, %v16928_v57  ;;  %v4579_v9 = vxor.u32 2147483648, %v4578_v54  ;;  %v16945_v39 = vld [vmem:[#allocation63_spill] sm:$0xff] }
 0x493   : > { %vm15301_vm9 = vcmp.le.f32.partialorder %v16921_v52, 0.7853982  ;;  %v4914_v15 = vsel %vm4912_vm13, %v16926_v63, %v16925_v47  ;;  %v16930_v4 = vxor.u32 2147483648, %v16929_v26  ;;  %v16932_v2 = vxor.u32 2147483648, %v16931_v6  ;;  %v16933_v63 = vld [vmem:[#allocation64_spill] sm:$0xff] }
 0x494   : > { %v4917_v62 = vsel %vm4915_vm0, %v16927_v44, %v16924_v51  ;;  %vm5220_vm5 = vcmp.eq.s32.totalorder %v5218_v41, 0  ;;  %v4434_v35 = vadd.f32 -0.4999988, %v4433_v56  ;;  %v4442_v52 = vmul.f32 %v4441_v55, %v15217_v12 }
 0x495   : > { %v5068_v28 = vsel %vm5066_vm7, %v16931_v6, %v16930_v4  ;;  %v5071_v27 = vsel %vm5069_vm1, %v16932_v2, %v16929_v26  ;;  %v15319_v47 = vand.u32 3, %v4446_v53  ;;  %v5526_v51 = vand.u32 3, %v16933_v63  ;;  %v16938_v26 = vld [vmem:[#allocation54_spill] sm:$0xff] }
 0x496   : > { %v15324_v44 = vsel %vm725_vm6, nan, %v4764_v29  ;;  %v4918_v57 = vsel %vm4911_vm15, %v4914_v15, %v4917_v62  ;;  %vm5219_vm13 = vcmp.lt.s32.totalorder %v5218_v41, 2  ;;  %v5680_v4 = vand.u32 3, %v16935_v31  ;;  %v16940_v62 = vld [vmem:[#allocation61_spill] sm:$0xff] }
 0x497   : > { %v5072_v0 = vsel %vm5065_vm12, %v5068_v28, %v5071_v27  ;;  %v16937_v6 = vxor.u32 2147483648, %v16936_v60  ;;  %vm5223_vm1 = vcmp.eq.s32.totalorder %v5218_v41, 2  ;;  %vm5374_vm0 = vcmp.eq.s32.totalorder %v5372_v42, 0 }
 0x498   : > { %v4580_v53 = vsel %vm4459_vm11, %v4579_v9, %v4578_v54  ;;  %v4581_v56 = vsub.s32 4, %v15131_v61  ;;  %vm5373_vm7 = vcmp.lt.s32.totalorder %v5372_v42, 2  ;;  %vm5377_vm10 = vcmp.eq.s32.totalorder %v5372_v42, 2  ;;  %v16942_v54 = vld [vmem:[#allocation60_spill] sm:$0xff] }
 0x499   : > { %v5222_v2 = vsel %vm5220_vm5, %v16938_v26, %v16937_v6  ;;  %v4435_v55 = vmul.f32 %v4434_v35, %v15217_v12  ;;  %v4443_v29 = vadd.f32 1.0, %v4442_v52  ;;  %vm5528_vm6 = vcmp.eq.s32.totalorder %v5526_v51, 0  ;;  %v16944_v52 = vld [vmem:[#allocation65_spill] sm:$0xff] }
 0x49a   : > { %vm5531_vm15 = vcmp.eq.s32.totalorder %v5526_v51, 2  ;;  %vm4449_vm12 = vcmp.eq.s32.totalorder %v15319_v47, 0  ;;  %vm4452_vm4 = vcmp.eq.s32.totalorder %v15319_v47, 2  ;;  %v16939_v31 = vxor.u32 2147483648, %v16938_v26  ;;  %v16947_v26 = vld [vmem:[#allocation68_spill] sm:$0xff] }
 0x49b   : > { %v16941_v28 = vxor.u32 2147483648, %v16940_v62  ;;  %vm5682_vm5 = vcmp.eq.s32.totalorder %v5680_v4, 0  ;;  %vm5685_vm2 = vcmp.eq.s32.totalorder %v5680_v4, 2  ;;  %v15345_v12 = vsel %vm15301_vm9, %v16914_v1, %v4580_v53 }
 0x49c   : > { %v5225_v15 = vsel %vm5223_vm1, %v16939_v31, %v16936_v60  ;;  %v16943_v27 = vxor.u32 2147483648, %v16942_v54  ;;  %vm5527_vm14 = vcmp.lt.s32.totalorder %v5526_v51, 2  ;;  %v5834_v63 = vand.u32 3, %v16944_v52  ;;  %v16951_v52 = vld [vmem:[#allocation69_spill] sm:$0xff] }
 0x49d   : > { %v5376_v9 = vsel %vm5374_vm0, %v16942_v54, %v16941_v28  ;;  %v4582_v60 = vsel %vm4459_vm11, %v4581_v56, %v15131_v61  ;;  %v16946_v6 = vxor.u32 2147483648, %v16945_v39  ;;  %v16948_v28 = vxor.u32 2147483648, %v16947_v26  ;;  %v16949_v54 = vld [vmem:[#allocation70_spill] sm:$0xff] }
 0x49e   : > { %v5379_v35 = vsel %vm5377_vm10, %v16943_v27, %v16940_v62  ;;  %vm5681_vm1 = vcmp.lt.s32.totalorder %v5680_v4, 2  ;;  %v15360_v7 = vadd.f32 1.0, %v4435_v55  ;;  %v15363_v62 = vmul.f32 %v4443_v29, %v15207_v33  ;;  %v16955_v33 = vld [vmem:[#allocation16_spill] sm:$0xff] }
 0x49f   : > { %v5530_v31 = vsel %vm5528_vm6, %v16947_v26, %v16946_v6  ;;  %v5533_v53 = vsel %vm5531_vm15, %v16948_v28, %v16945_v39  ;;  %v16950_v27 = vxor.u32 2147483648, %v16949_v54  ;;  %v16952_v61 = vxor.u32 2147483648, %v16951_v52  ;;  %v16953_v39 = vld [vmem:[#allocation15_spill] sm:$0xff] }
 0x4a0   : > { %vm4448_vm10 = vcmp.lt.s32.totalorder %v15319_v47, 2  ;;  %v15374_v6 = vmul.f32 %v15345_v12, %v15345_v12  ;;  %vm16954_vm11 = vweird.f32 %v16953_v39  ;;  %vm16956_vm0 = vweird.f32 %v16955_v33  ;;  %v16958_v39 = vld [vmem:[#allocation77_spill] sm:$0xff]  ;;  %v16989_v47 = vld [vmem:[#allocation90_spill] sm:$0xff] }
 0x4a1   : > { %v5684_v37 = vsel %vm5682_vm5, %v16951_v52, %v16950_v27  ;;  %v5687_v56 = vsel %vm5685_vm2, %v16952_v61, %v16949_v54  ;;  %v15378_v55 = vsel %vm16954_vm11, nan, %v4918_v57  ;;  %v15382_v29 = vsel %vm16956_vm0, nan, %v5072_v0  ;;  %v16957_v54 = vld [vmem:[#allocation73_spill] sm:$0xff] }
 0x4a2   : > { %v5226_v26 = vsel %vm5219_vm13, %v5222_v2, %v5225_v15  ;;  %v15387_v28 = vsel %vm15301_vm9, 0, %v4582_v60  ;;  %vm5836_vm2 = vcmp.eq.s32.totalorder %v5834_v63, 0  ;;  %vm5839_vm6 = vcmp.eq.s32.totalorder %v5834_v63, 2  ;;  %v16959_v2 = vld [vmem:[#allocation17_spill] sm:$0xff] }
 0x4a3   : > { %v5988_v27 = vand.u32 3, %v16957_v54  ;;  %v5380_v52 = vsel %vm5373_vm7, %v5376_v9, %v5379_v35  ;;  %v5534_v61 = vsel %vm5527_vm14, %v5530_v31, %v5533_v53  ;;  %v5688_v57 = vsel %vm5681_vm1, %v5684_v37, %v5687_v56  ;;  %v16961_v9 = vld [vmem:[#allocation72_spill] sm:$0xff]  ;;  %v16963_v35 = vld [vmem:[#allocation71_spill] sm:$0xff]  ;;  %v16965_v31 = vld [vmem:[#allocation21_spill] sm:$0xff] }
 0x4a4   : > { %v6142_v33 = vand.u32 3, %v16958_v39  ;;  %v16505_v0 = vxor.u32 2147483648, %v15363_v62  ;;  %v16508_v41 = vxor.u32 2147483648, %v15360_v7  ;;  %vm16960_vm13 = vweird.f32 %v16959_v2  ;;  %v16967_v56 = vld [vmem:[#allocation26_spill] sm:$0xff]  ;;  %v16971_v2 = vld [vmem:[#allocation83_spill] sm:$0xff] }
 0x4a5   : > { %v15398_v45 = vsel %vm16960_vm13, nan, %v5226_v26  ;;  %vm5835_vm9 = vcmp.lt.s32.totalorder %v5834_v63, 2  ;;  %v4593_v15 = vmul.f32 -0.00019511016, %v15374_v6  ;;  %v4601_v42 = vadd.s32 3, %v15387_v28  ;;  %v16969_v63 = vld [vmem:[#allocation27_spill] sm:$0xff] }
 0x4a6   : > { %v16962_v51 = vxor.u32 2147483648, %v16961_v9  ;;  %v16964_v37 = vxor.u32 2147483648, %v16963_v35  ;;  %vm16966_vm14 = vweird.f32 %v16965_v31  ;;  %vm16968_vm7 = vweird.f32 %v16967_v56  ;;  %v16973_v56 = vld [vmem:[#allocation76_spill] sm:$0xff] }
 0x4a7   : > { %v15410_v53 = vsel %vm16966_vm14, nan, %v5380_v52  ;;  %v15414_v26 = vsel %vm16968_vm7, nan, %v5534_v61  ;;  %vm16970_vm15 = vweird.f32 %v16969_v63  ;;  %vm5990_vm5 = vcmp.eq.s32.totalorder %v5988_v27, 0 }
 0x4a8   : > { %v5838_v4 = vsel %vm5836_vm2, %v16963_v35, %v16962_v51  ;;  %v5841_v60 = vsel %vm5839_vm6, %v16964_v37, %v16961_v9  ;;  %v15418_v54 = vsel %vm16970_vm15, nan, %v5688_v57  ;;  %v4586_v39 = vmul.f32 -0.001358992, %v15374_v6  ;;  %v16972_v37 = vld [vmem:[#allocation57_spill] sm:$0xff] }
 0x4a9   : > { %vm5993_vm1 = vcmp.eq.s32.totalorder %v5988_v27, 2  ;;  %vm6144_vm11 = vcmp.eq.s32.totalorder %v6142_v33, 0  ;;  %v6296_v51 = vand.u32 3, %v16971_v2  ;;  %v4451_v52 = vsel %vm4449_vm12, %v15360_v7, %v16505_v0  ;;  %v16975_v2 = vld [vmem:[#allocation75_spill] sm:$0xff] }
 0x4aa   : > { %v4454_v61 = vsel %vm4452_vm4, %v16508_v41, %v15363_v62  ;;  %v5842_v57 = vsel %vm5835_vm9, %v5838_v4, %v5841_v60  ;;  %vm6147_vm0 = vcmp.eq.s32.totalorder %v6142_v33, 2  ;;  %vm16514_vm2 = vweird.f32 %v16883_v34  ;;  %v16977_v41 = vld [vmem:[#allocation81_spill] sm:$0xff]  ;;  %v16979_v60 = vld [vmem:[#allocation80_spill] sm:$0xff] }
 0x4ab   : > { %v4594_v9 = vadd.f32 0.008332121, %v4593_v15  ;;  %v15433_v35 = vand.u32 3, %v4601_v42  ;;  %vm5989_vm6 = vcmp.lt.s32.totalorder %v5988_v27, 2  ;;  %v6450_v31 = vand.u32 3, %v16972_v37  ;;  %v16981_v42 = vld [vmem:[#allocation89_spill] sm:$0xff] }
 0x4ac   : > { %v16974_v63 = vxor.u32 2147483648, %v16973_v56  ;;  %v16976_v25 = vxor.u32 2147483648, %v16975_v2  ;;  %vm6143_vm12 = vcmp.lt.s32.totalorder %v6142_v33, 2  ;;  %v16978_v4 = vxor.u32 2147483648, %v16977_v41 }
 0x4ad   : > { %v4587_v3 = vadd.f32 0.041655596, %v4586_v39  ;;  %v16980_v15 = vxor.u32 2147483648, %v16979_v60  ;;  %vm6298_vm4 = vcmp.eq.s32.totalorder %v6296_v51, 0  ;;  %v6604_v37 = vand.u32 3, %v16981_v42 }
 0x4ae   : > { %v5992_v0 = vsel %vm5990_vm5, %v16975_v2, %v16974_v63  ;;  %v5995_v32 = vsel %vm5993_vm1, %v16976_v25, %v16973_v56  ;;  %v6146_v18 = vsel %vm6144_vm11, %v16979_v60, %v16978_v4  ;;  %v4455_v63 = vsel %vm4448_vm10, %v4451_v52, %v4454_v61  ;;  %v16985_v25 = vld [vmem:[#allocation96_spill] sm:$0xff] }
 0x4af   : > { %v6149_v27 = vsel %vm6147_vm0, %v16980_v15, %v16977_v41  ;;  %vm16983_vm13 = vweird.f32 %v16982_v20  ;;  %vm6301_vm9 = vcmp.eq.s32.totalorder %v6296_v51, 2  ;;  %v6758_v33 = vand.u32 3, %v16985_v25  ;;  %v16986_v41 = vld [vmem:[#allocation85_spill] sm:$0xff]  ;;  %v16988_v15 = vld [vmem:[#allocation84_spill] sm:$0xff] }
 0x4b0   : > { %v15453_v2 = vsel %vm16983_vm13, nan, %v5842_v57  ;;  %v4595_v56 = vmul.f32 %v4594_v9, %v15374_v6  ;;  %v5996_v39 = vsel %vm5989_vm6, %v5992_v0, %v5995_v32  ;;  %vm6297_vm14 = vcmp.lt.s32.totalorder %v6296_v51, 2  ;;  %v16991_v32 = vld [vmem:[#allocation88_spill] sm:$0xff]  ;;  %v16993_v9 = vld [vmem:[#allocation87_spill] sm:$0xff] }
 0x4b1   : > { %16984 = vst [vmem:[#allocation42_spill] sm:$0xff] %v15453_v2  ;;  %vm6452_vm7 = vcmp.eq.s32.totalorder %v6450_v31, 0  ;;  %v6150_v4 = vsel %vm6143_vm12, %v6146_v18, %v6149_v27  ;;  %v16987_v60 = vxor.u32 2147483648, %v16986_v41  ;;  %vm6455_vm15 = vcmp.eq.s32.totalorder %v6450_v31, 2  ;;  %v15486_v2 = vpop.permute.xlu1 %8883 }
 0x4b2   : > { %v6912_v52 = vand.u32 3, %v16989_v47  ;;  %v4588_v20 = vmul.f32 %v4587_v3, %v15374_v6  ;;  %v16990_v61 = vxor.u32 2147483648, %v16988_v15  ;;  %vm6606_vm10 = vcmp.eq.s32.totalorder %v6604_v37, 0  ;;  %v16995_v3 = vld [vmem:[#allocation101_spill] sm:$0xff]  ;;  %17005 = vst [vmem:[#allocation44_spill] sm:$0xff] %v15486_v2 }
 0x4b3   : > { %v6300_v42 = vsel %vm6298_vm4, %v16988_v15, %v16987_v60  ;;  %vm6609_vm5 = vcmp.eq.s32.totalorder %v6604_v37, 2  ;;  %vm6451_vm1 = vcmp.lt.s32.totalorder %v6450_v31, 2  ;;  %v16992_v0 = vxor.u32 2147483648, %v16991_v32  ;;  %v17015_v31 = vld [vmem:[#allocation103_spill] sm:$0xff] }
 0x4b4   : > { %v6303_v57 = vsel %vm6301_vm9, %v16990_v61, %v16986_v41  ;;  %vm6760_vm11 = vcmp.eq.s32.totalorder %v6758_v33, 0  ;;  %vm6763_vm0 = vcmp.eq.s32.totalorder %v6758_v33, 2  ;;  %v4596_v27 = vadd.f32 -0.16666654, %v4595_v56  ;;  %v16997_v41 = vld [vmem:[#allocation94_spill] sm:$0xff]  ;;  %v16999_v61 = vld [vmem:[#allocation93_spill] sm:$0xff] }
 0x4b5   : > { %v6454_v18 = vsel %vm6452_vm7, %v16993_v9, %v16992_v0  ;;  %v16994_v25 = vxor.u32 2147483648, %v16993_v9  ;;  %vm6605_vm6 = vcmp.lt.s32.totalorder %v6604_v37, 2  ;;  %v7066_v47 = vand.u32 3, %v16995_v3 }
 0x4b6   : > { %v16998_v15 = vxor.u32 2147483648, %v16997_v41  ;;  %v17000_v5 = vxor.u32 2147483648, %v16999_v61  ;;  %vm6914_vm12 = vcmp.eq.s32.totalorder %v6912_v52, 0  ;;  %vm6917_vm4 = vcmp.eq.s32.totalorder %v6912_v52, 2 }
 0x4b7   : > { %v6457_v60 = vsel %vm6455_vm15, %v16994_v25, %v16991_v32  ;;  %v4589_v56 = vadd.f32 -0.4999988, %v4588_v20  ;;  %vm6759_vm13 = vcmp.lt.s32.totalorder %v6758_v33, 2  ;;  %v17002_v9 = vxor.u32 2147483648, %v17001_v16  ;;  %v17003_v32 = vld [vmem:[#allocation97_spill] sm:$0xff] }
 0x4b8   : > { %v6608_v46 = vsel %vm6606_vm10, %v16999_v61, %v16998_v15  ;;  %v6611_v0 = vsel %vm6609_vm5, %v17000_v5, %v16997_v41  ;;  %v17004_v3 = vxor.u32 2147483648, %v17003_v32  ;;  %v15490_v15 = vsel %vm16514_vm2, nan, %v4455_v63  ;;  %v17007_v61 = vld [vmem:[#allocation29_spill] sm:$0xff] }
 0x4b9   : > { %v6762_v25 = vsel %vm6760_vm11, %v17003_v32, %v17002_v9  ;;  %17006 = vst [vmem:[#allocation53_spill] sm:$0xff] %v15490_v15  ;;  %vm17008_vm9 = vweird.f32 %v17007_v61  ;;  %v6304_v33 = vsel %vm6297_vm14, %v6300_v42, %v6303_v57  ;;  %v6458_v20 = vsel %vm6451_vm1, %v6454_v18, %v6457_v60  ;;  %v17009_v9 = vld [vmem:[#allocation99_spill] sm:$0xff]  ;;  %v17013_v15 = vld [vmem:[#allocation30_spill] sm:$0xff] }
 0x4ba   : > { %v6765_v36 = vsel %vm6763_vm0, %v17004_v3, %v17001_v16  ;;  %v15494_v5 = vsel %vm17008_vm9, nan, %v5996_v39  ;;  %v4597_v41 = vmul.f32 %v4596_v27, %v15374_v6  ;;  %vm6913_vm7 = vcmp.lt.s32.totalorder %v6912_v52, 2  ;;  %v17011_v16 = vld [vmem:[#allocation91_spill] sm:$0xff] }
 0x4bb   : > { %v17010_v32 = vxor.u32 2147483648, %v17009_v9  ;;  %v17012_v2 = vxor.u32 2147483648, %v17011_v16  ;;  %vm17014_vm15 = vweird.f32 %v17013_v15  ;;  %v6612_v51 = vsel %vm6605_vm6, %v6608_v46, %v6611_v0  ;;  %v17016_v52 = vld [vmem:[#allocation107_spill] sm:$0xff] }
 0x4bc   : > { %v15507_v61 = vsel %vm17014_vm15, nan, %v6150_v4  ;;  %v6766_v39 = vsel %vm6759_vm13, %v6762_v25, %v6765_v36  ;;  %v7220_v42 = vand.u32 3, %v17015_v31  ;;  %v4590_v57 = vmul.f32 %v4589_v56, %v15374_v6  ;;  %v17017_v27 = vld [vmem:[#allocation31_spill] sm:$0xff]  ;;  %v17021_v25 = vld [vmem:[#allocation33_spill] sm:$0xff]  ;;  %v17023_v56 = vld [vmem:[#allocation34_spill] sm:$0xff]  ;;  %v15546_v31 = vpop.permute.xlu0 %8880 }
 0x4bd   : > { %v6916_v3 = vsel %vm6914_vm12, %v17011_v16, %v17010_v32  ;;  %v6919_v63 = vsel %vm6917_vm4, %v17012_v2, %v17009_v9  ;;  %vm7068_vm14 = vcmp.eq.s32.totalorder %v7066_v47, 0  ;;  %vm7071_vm10 = vcmp.eq.s32.totalorder %v7066_v47, 2  ;;  %v17020_v36 = vld [vmem:[#allocation111_spill] sm:$0xff]  ;;  %v15531_v9 = vpop.permute.xlu2 %8889  ;;  %v17028_v32 = vld [vmem:[#allocation104_spill] sm:$0xff]  ;;  %17032 = vst [vmem:[#allocation46_spill] sm:$0xff] %v15546_v31 }
 0x4be   : > { %v7374_v18 = vand.u32 3, %v17016_v52  ;;  %vm4607_vm5 = vcmp.eq.s32.totalorder %v15433_v35, 2  ;;  %vm17018_vm1 = vweird.f32 %v17017_v27  ;;  %v15520_v4 = vsel %vm2430_vm8, nan, %v6458_v20  ;;  %17025 = vst [vmem:[#allocation47_spill] sm:$0xff] %v15531_v9  ;;  %v17033_v52 = vld [vmem:[#allocation113_spill] sm:$0xff] }
 0x4bf   : > { %v15516_v2 = vsel %vm17018_vm1, nan, %v6304_v33  ;;  %v6920_v46 = vsel %vm6913_vm7, %v6916_v3, %v6919_v63  ;;  %v7528_v37 = vand.u32 3, %v17020_v36  ;;  %v4598_v0 = vadd.f32 1.0, %v4597_v41  ;;  %v17026_v33 = vld [vmem:[#allocation105_spill] sm:$0xff]  ;;  %v17034_v36 = vld [vmem:[#allocation106_spill] sm:$0xff] }
 0x4c0   : > { %vm17022_vm11 = vweird.f32 %v17021_v25  ;;  %vm17024_vm0 = vweird.f32 %v17023_v56  ;;  %vm7067_vm6 = vcmp.lt.s32.totalorder %v7066_v47, 2  ;;  %vm4604_vm12 = vcmp.eq.s32.totalorder %v15433_v35, 0 }
 0x4c1   : > { %v15525_v6 = vsel %vm17022_vm11, nan, %v6612_v51  ;;  %v15529_v15 = vsel %vm17024_vm0, nan, %v6766_v39  ;;  %v17027_v20 = vxor.u32 2147483648, %v17026_v33  ;;  %v17029_v41 = vxor.u32 2147483648, %v17028_v32  ;;  %v17030_v51 = vld [vmem:[#allocation22_spill] sm:$0xff] }
 0x4c2   : > { %vm7222_vm8 = vcmp.eq.s32.totalorder %v7220_v42, 0  ;;  %vm7225_vm4 = vcmp.eq.s32.totalorder %v7220_v42, 2  ;;  %v15540_v63 = vadd.f32 1.0, %v4590_v57  ;;  %vm17031_vm13 = vweird.f32 %v17030_v51 }
 0x4c3   : > { %v7070_v16 = vsel %vm7068_vm14, %v17028_v32, %v17027_v20  ;;  %v7073_v3 = vsel %vm7071_vm10, %v17029_v41, %v17026_v33  ;;  %v15544_v39 = vsel %vm17031_vm13, nan, %v6920_v46  ;;  %vm7376_vm9 = vcmp.eq.s32.totalorder %v7374_v18, 0  ;;  %v17036_v46 = vld [vmem:[#allocation38_spill] sm:$0xff]  ;;  %v15563_v32 = vpop.permute.xlu1 %8886  ;;  %v17039_v41 = vld [vmem:[#allocation112_spill] sm:$0xff] }
 0x4c4   : > { %vm7379_vm7 = vcmp.eq.s32.totalorder %v7374_v18, 2  ;;  %vm7221_vm15 = vcmp.lt.s32.totalorder %v7220_v42, 2  ;;  %vm7530_vm1 = vcmp.eq.s32.totalorder %v7528_v37, 0  ;;  %vm7533_vm11 = vcmp.eq.s32.totalorder %v7528_v37, 2  ;;  %17038 = vst [vmem:[#allocation56_spill] sm:$0xff] %v15563_v32 }
 0x4c5   : > { %v15549_v27 = vand.u32 3, %v17033_v52  ;;  %v15552_v60 = vmul.f32 %v4598_v0, %v15345_v12  ;;  %v15555_v57 = vsel %vm7067_vm6, %v7070_v16, %v7073_v3  ;;  %v17035_v25 = vxor.u32 2147483648, %v17034_v36  ;;  %v17041_v52 = vld [vmem:[#allocation110_spill] sm:$0xff]  ;;  %v17043_v0 = vld [vmem:[#allocation19_spill] sm:$0xff] }
 0x4c6   : > { %v17037_v33 = vxor.u32 2147483648, %v17036_v46  ;;  %vm7375_vm14 = vcmp.lt.s32.totalorder %v7374_v18, 2  ;;  %v17040_v51 = vxor.u32 2147483648, %v17039_v41  ;;  %v17042_v12 = vxor.u32 2147483648, %v17041_v52 }
 0x4c7   : > { %v7224_v56 = vsel %vm7222_vm8, %v17036_v46, %v17035_v25  ;;  %v7836_v16 = vand.u32 3, %v17043_v0  ;;  %v4608_v3 = vxor.u32 2147483648, %v15540_v63  ;;  %vm7529_vm10 = vcmp.lt.s32.totalorder %v7528_v37, 2  ;;  %v17044_v25 = vld [vmem:[#allocation20_spill] sm:$0xff] }
 0x4c8   : > { %v7227_v20 = vsel %vm7225_vm4, %v17037_v33, %v17034_v36  ;;  %v7378_v9 = vsel %vm7376_vm9, %v17041_v52, %v17040_v51  ;;  %v7381_v47 = vsel %vm7379_vm7, %v17042_v12, %v17039_v41  ;;  %v17045_v31 = vxor.u32 2147483648, %v17044_v25  ;;  %v17046_v46 = vld [vmem:[#allocation40_spill] sm:$0xff] }
 0x4c9   : > { %v17047_v18 = vxor.u32 2147483648, %v17046_v46  ;;  %vm4603_vm0 = vcmp.lt.s32.totalorder %v15433_v35, 2  ;;  %v7228_v51 = vsel %vm7221_vm15, %v7224_v56, %v7227_v20  ;;  %vm7684_vm6 = vcmp.eq.s32.totalorder %v15549_v27, 0  ;;  %v17074_v35 = vld [vmem:[#allocation23_spill] sm:$0xff] }
 0x4ca   : > { %v7532_v36 = vsel %vm7530_vm1, %v17046_v46, %v17045_v31  ;;  %vm7687_vm8 = vcmp.eq.s32.totalorder %v15549_v27, 2  ;;  %v7990_v41 = vand.u32 3, %v15122_v8  ;;  %v4605_v37 = vxor.u32 2147483648, %v15552_v60 }
 0x4cb   : > { %v7535_v33 = vsel %vm7533_vm11, %v17047_v18, %v17044_v25  ;;  %v7382_v52 = vsel %vm7375_vm14, %v7378_v9, %v7381_v47  ;;  %vm7683_vm4 = vcmp.lt.s32.totalorder %v15549_v27, 2  ;;  %v8144_v31 = vand.u32 3, %v15144_v59  ;;  %v15599_v47 = vpop.permute.xlu2 %8892  ;;  %v17051_v25 = vld [vmem:[#allocation18_spill] sm:$0xff]  ;;  %v17055_v18 = vld [vmem:[#allocation25_spill] sm:$0xff] }
 0x4cc   : > { %v7536_v12 = vsel %vm7529_vm10, %v7532_v36, %v7535_v33  ;;  %vm7838_vm13 = vcmp.eq.s32.totalorder %v7836_v16, 0  ;;  %vm7841_vm9 = vcmp.eq.s32.totalorder %v7836_v16, 2  ;;  %v8298_v0 = vand.u32 3, %v15193_v50  ;;  %17050 = vst [vmem:[#allocation52_spill] sm:$0xff] %v15599_v47 }
 0x4cd   : > { %v4609_v42 = vsel %vm4607_vm5, %v4608_v3, %v15552_v60  ;;  %v17048_v8 = vxor.u32 2147483648, %v14861_v14  ;;  %v17049_v9 = vxor.u32 2147483648, %v14854_v23  ;;  %v8452_v59 = vand.u32 3, %v15270_v24 }
 0x4ce   : > { %vm7837_vm15 = vcmp.lt.s32.totalorder %v7836_v16, 2  ;;  %vm7992_vm1 = vcmp.eq.s32.totalorder %v7990_v41, 0  ;;  %vm7995_vm11 = vcmp.eq.s32.totalorder %v7990_v41, 2  ;;  %v8606_v50 = vand.u32 3, %v15387_v28 }
 0x4cf   : > { %v7686_v56 = vsel %vm7684_vm6, %v14854_v23, %v17048_v8  ;;  %v7689_v20 = vsel %vm7687_vm8, %v17049_v9, %v14861_v14  ;;  %v17052_v46 = vand.u32 1, %v17051_v25  ;;  %v17056_v33 = vand.u32 1, %v17055_v18  ;;  %v15625_v25 = vpop.permute.xlu0 %8895 }
 0x4d0   : > { %v4606_v14 = vsel %vm4604_vm12, %v15540_v63, %v4605_v37  ;;  %v17059_v24 = vxor.u32 2147483648, %v15099_v11  ;;  %v17060_v8 = vxor.u32 2147483648, %v15096_v43  ;;  %vm8146_vm10 = vcmp.eq.s32.totalorder %v8144_v31, 0  ;;  %17061 = vst [vmem:[#allocation51_spill] sm:$0xff] %v15625_v25 }
 0x4d1   : > { %vm15604_vm5 = vcmp.eq.s32.totalorder %v17052_v46, 0  ;;  %vm15610_vm14 = vcmp.eq.s32.totalorder %v17056_v33, 0  ;;  %vm8149_vm8 = vcmp.eq.s32.totalorder %v8144_v31, 2  ;;  %vm8300_vm2 = vcmp.eq.s32.totalorder %v8298_v0, 0 }
 0x4d2   : > { %v7840_v28 = vsel %vm7838_vm13, %v15096_v43, %v17059_v24  ;;  %v7843_v9 = vsel %vm7841_vm9, %v17060_v8, %v15099_v11  ;;  %vm8303_vm3 = vcmp.eq.s32.totalorder %v8298_v0, 2  ;;  %v17062_v46 = vxor.u32 2147483648, %v15184_v49  ;;  %v15633_v43 = vpop.permute.xlu1 %8898 }
 0x4d3   : > { %v17063_v33 = vxor.u32 2147483648, %v15181_v19  ;;  %vm8454_vm12 = vcmp.eq.s32.totalorder %v8452_v59, 0  ;;  %vm8457_vm13 = vcmp.eq.s32.totalorder %v8452_v59, 2  ;;  %17064 = vst [vmem:[#allocation64_spill] sm:$0xff] %v15633_v43  ;;  %vm8145_vm9 = vcmp.lt.s32.totalorder %v8144_v31, 2  ;;  %v15669_v16 = vpop.permute.xlu2 %8901  ;;  %v8643_v31 = vld [vmem:[%s9969_s30 + $0x8] sm:$0xff] }
 0x4d4   : > { %v7994_v18 = vsel %vm7992_vm1, %v15181_v19, %v17062_v46  ;;  %v17065_v11 = vxor.u32 2147483648, %v15202_v10  ;;  %vm8608_vm7 = vcmp.eq.s32.totalorder %v8606_v50, 0  ;;  %vm8611_vm6 = vcmp.eq.s32.totalorder %v8606_v50, 2 }
 0x4d5   : > { %v7997_v24 = vsel %vm7995_vm11, %v17063_v33, %v15184_v49  ;;  %v17066_v25 = vxor.u32 2147483648, %v15199_v48  ;;  %vm8299_vm1 = vcmp.lt.s32.totalorder %v8298_v0, 2  ;;  %v17067_v46 = vxor.u32 2147483648, %v15226_v30 }
 0x4d6   : > { %v8148_v8 = vsel %vm8146_vm10, %v15199_v48, %v17065_v11  ;;  %v17068_v49 = vxor.u32 2147483648, %v15223_v40  ;;  %v7690_v43 = vsel %vm7683_vm4, %v7686_v56, %v7689_v20  ;;  %vm8453_vm11 = vcmp.lt.s32.totalorder %v8452_v59, 2  ;;  %v17076_v59 = vld [vmem:[#allocation36_spill] sm:$0xff] }
 0x4d7   : > { %v8151_v47 = vsel %vm8149_vm8, %v17066_v25, %v15202_v10  ;;  %v8302_v19 = vsel %vm8300_vm2, %v15223_v40, %v17067_v46  ;;  %v17069_v11 = vxor.u32 2147483648, %v15363_v62  ;;  %v17070_v48 = vxor.u32 2147483648, %v15360_v7  ;;  %v17093_v46 = vld [vmem:[#allocation74_spill] sm:$0xff] }
 0x4d8   : > { %v8305_v33 = vsel %vm8303_vm3, %v17068_v49, %v15226_v30  ;;  %v4610_v0 = vsel %vm4603_vm0, %v4606_v14, %v4609_v42  ;;  %vm8607_vm2 = vcmp.lt.s32.totalorder %v8606_v50, 2  ;;  %v8610_v25 = vsel %vm8608_vm7, %v15540_v63, %v4605_v37  ;;  %v17088_v50 = vld [vmem:[#allocation58_spill] sm:$0xff]  ;;  %v17095_v49 = vld [vmem:[#allocation79_spill] sm:$0xff] }
 0x4d9   : > { %v8456_v32 = vsel %vm8454_vm12, %v15360_v7, %v17069_v11  ;;  %v8459_v10 = vsel %vm8457_vm13, %v17070_v48, %v15363_v62  ;;  %v8613_v40 = vsel %vm8611_vm6, %v4608_v3, %v15552_v60  ;;  %v7844_v30 = vsel %vm7837_vm15, %v7840_v28, %v7843_v9  ;;  %v17072_v7 = vld [vmem:[#allocation35_spill] sm:$0xff]  ;;  %v8645_v28 = vld [vmem:[%s9969_s30 + $0x18] sm:$0xff]  ;;  %v17096_v48 = vld [vmem:[#allocation82_spill] sm:$0xff] }
 0x4da   : > { %vm17071_vm3 = vcmp.lt.s32.totalorder %v7990_v41, 2  ;;  %v8152_v56 = vsel %vm8145_vm9, %v8148_v8, %v8151_v47  ;;  %v8306_v20 = vsel %vm8299_vm1, %v8302_v19, %v8305_v33  ;;  %vm17073_vm4 = vweird.f32 %v17072_v7  ;;  %v17087_v47 = vld [vmem:[#allocation50_spill] sm:$0xff]  ;;  %v15750_v8 = vpop.permute.xlu1 %8907  ;;  %v8647_v33 = vld [vmem:[%s9969_s30 + $0x28] sm:$0xff] }
 0x4db   : > { %v7998_v27 = vsel %vm17071_vm3, %v7994_v18, %v7997_v24  ;;  %v7075_v62 = vsel %vm17073_vm4, nan, %v15555_v57  ;;  %vm17075_vm0 = vweird.f32 %v17074_v35  ;;  %vm17077_vm7 = vweird.f32 %v17076_v59  ;;  %v17094_v19 = vld [vmem:[#allocation42_spill] sm:$0xff]  ;;  %v8649_v35 = vld [vmem:[%s9969_s30 + $0x38] sm:$0xff] }
 0x4dc   : > { %v7229_v42 = vsel %vm17075_vm0, nan, %v7228_v51  ;;  %v7383_v63 = vsel %vm17077_vm7, nan, %v7382_v52  ;;  %v8460_v60 = vsel %vm8453_vm11, %v8456_v32, %v8459_v10  ;;  %vm17078_vm15 = vweird.f32 %v16914_v1  ;;  %v8646_v1 = vld [vmem:[%s9969_s30 + $0x20] sm:$0xff] }
 0x4dd   : > { %v15673_v3 = vsel %vm17078_vm15, nan, %v4610_v0  ;;  %vm17079_vm10 = vweird.f32 %v16902_v13  ;;  %vm17080_vm6 = vweird.f32 %v16872_v38  ;;  %v8614_v51 = vsel %vm8607_vm2, %v8610_v25, %v8613_v40  ;;  %v8642_v38 = vld [vmem:[%s9969_s30] sm:$0xff]  ;;  %vm17089_vm11 = vmmov %vm17078_vm15  ;;  %v8648_v25 = vld [vmem:[%s9969_s30 + $0x30] sm:$0xff] }
 0x4de   : > { %v15677_v41 = vsel %vm17079_vm10, nan, %v7536_v12  ;;  %v15681_v57 = vsel %vm17080_vm6, nan, %v7690_v43  ;;  %vm17081_vm8 = vweird.f32 %v16882_v58  ;;  %vm17082_vm12 = vweird.f32 %v16848_v21  ;;  %v15701_v12 = vpop.permute.xlu0 %8904  ;;  %v17086_v21 = vld [vmem:[#allocation48_spill] sm:$0xff]  ;;  %v17097_v0 = vld [vmem:[#allocation86_spill] sm:$0xff] }
 0x4df   : > { %v15685_v32 = vsel %vm17081_vm8, nan, %v7844_v30  ;;  %v15689_v37 = vsel %vm17082_vm12, nan, %v7998_v27  ;;  %vm17083_vm13 = vweird.f32 %v16893_v22  ;;  %vm17084_vm9 = vweird.f32 %v16870_v17  ;;  %v17098_v27 = vld [vmem:[#allocation78_spill] sm:$0xff] }
 0x4e0   : > { %v15693_v13 = vsel %vm17083_vm13, nan, %v8152_v56  ;;  %v15697_v52 = vsel %vm17084_vm9, nan, %v8306_v20  ;;  %vm17085_vm1 = vweird.f32 %v16883_v34  ;;  %v15711_v22 = vsel %vm15604_vm5, %v17086_v21, %v15324_v44  ;;  %v8644_v34 = vld [vmem:[%s9969_s30 + $0x10] sm:$0xff]  ;;  %v17090_v44 = vld [vmem:[#allocation62_spill] sm:$0xff] }
 0x4e1   : > { %v15705_v58 = vsel %vm17085_vm1, nan, %v8460_v60  ;;  %v15717_v17 = vsel %vm15610_vm14, %v17087_v47, %v15378_v55  ;;  %v15723_v14 = vsel %vm15604_vm5, %v17088_v50, %v15382_v29  ;;  %v15729_v9 = vsel %vm17089_vm11, nan, %v8614_v51  ;;  %v17091_v55 = vld [vmem:[#allocation59_spill] sm:$0xff]  ;;  %v17092_v29 = vld [vmem:[#allocation66_spill] sm:$0xff]  ;;  %v17104_v47 = vld [vmem:[#allocation109_spill] sm:$0xff] }
 0x4e2   : > { %v15735_v18 = vsel %vm15610_vm14, %v17090_v44, %v15398_v45  ;;  %v15741_v24 = vsel %vm15604_vm5, %v17091_v55, %v15410_v53  ;;  %v15747_v43 = vsel %vm15610_vm14, %v17092_v29, %v15414_v26  ;;  %v15756_v45 = vsel %vm15604_vm5, %v17093_v46, %v15418_v54  ;;  %v17101_v60 = vld [vmem:[#allocation102_spill] sm:$0xff]  ;;  %v17102_v51 = vld [vmem:[#allocation95_spill] sm:$0xff]  ;;  %v8653_v55 = vld [vmem:[%s9969_s30 + $0x58] sm:$0xff] }
 0x4e3   : > { %v15762_v53 = vsel %vm15610_vm14, %v17095_v49, %v17094_v19  ;;  %v8694_v26 = vmul.f32 16.0, %v8642_v38  ;;  %v8695_v11 = vmul.f32 16.0, %v8643_v31  ;;  %v15769_v10 = vsel %vm15604_vm5, %v17096_v48, %v15494_v5  ;;  %v17099_v5 = vld [vmem:[#allocation92_spill] sm:$0xff]  ;;  %v17105_v46 = vld [vmem:[#allocation45_spill] sm:$0xff]  ;;  %v15828_v19 = vpop.permute.xlu2 %8910  ;;  %v8654_v48 = vld [vmem:[%s9969_s30 + $0x60] sm:$0xff] }
 0x4e4   : > { %v15775_v54 = vsel %vm15610_vm14, %v17097_v0, %v15507_v61  ;;  %v8696_v40 = vmul.f32 16.0, %v8644_v34  ;;  %v8697_v30 = vmul.f32 16.0, %v8645_v28  ;;  %v15782_v56 = vsel %vm15604_vm5, %v17098_v27, %v15516_v2  ;;  %v17100_v61 = vld [vmem:[#allocation100_spill] sm:$0xff] }
 0x4e5   : > { %v15788_v20 = vsel %vm15610_vm14, %v17099_v5, %v15520_v4  ;;  %v15794_v7 = vsel %vm15604_vm5, %v17100_v61, %v15525_v6  ;;  %v8698_v59 = vmul.f32 16.0, %v8646_v1  ;;  %v15801_v2 = vsel %vm15610_vm14, %v17101_v60, %v15529_v15  ;;  %v17103_v38 = vld [vmem:[#allocation108_spill] sm:$0xff]  ;;  %v8650_v6 = vld [vmem:[%s9969_s30 + $0x40] sm:$0xff]  ;;  %v8651_v15 = vld [vmem:[%s9969_s30 + $0x48] sm:$0xff] }
 0x4e6   : > { %v15807_v4 = vsel %vm15604_vm5, %v17102_v51, %v15544_v39  ;;  %v15812_v31 = vsel %vm15610_vm14, %v17103_v38, %v7075_v62  ;;  %v8699_v21 = vmul.f32 16.0, %v8647_v33  ;;  %v15818_v50 = vsel %vm15604_vm5, %v17104_v47, %v7229_v42  ;;  %v8652_v34 = vld [vmem:[%s9969_s30 + $0x50] sm:$0xff]  ;;  %v17106_v42 = vld [vmem:[#allocation114_spill] sm:$0xff]  ;;  %v15840_v27 = vpop.permute.xlu0 %8913  ;;  %v8655_v5 = vld [vmem:[%s9969_s30 + $0x68] sm:$0xff]  ;;  %v15860_v47 = vpop.permute.xlu1 %8916 }
 0x4e7   : > { %v8700_v28 = vmul.f32 16.0, %v8648_v25  ;;  %v8746_v44 = vadd.f32 %v8694_v26, %v15711_v22  ;;  %v8747_v39 = vadd.f32 %v8695_v11, %v15717_v17  ;;  %v8701_v29 = vmul.f32 16.0, %v8649_v35  ;;  %v17107_v11 = vld [vmem:[#allocation46_spill] sm:$0xff]  ;;  %v8656_v60 = vld [vmem:[%s9969_s30 + $0x70] sm:$0xff] }
 0x4e8   : > { %v8748_v62 = vadd.f32 %v8696_v40, %v15723_v14  ;;  %v8749_v1 = vadd.f32 %v8697_v30, %v15735_v18  ;;  %vm8954_vm2 = vcmp.eq.s32.totalorder %v17105_v46, 1  ;;  %v15833_v49 = vsel %vm15610_vm14, %v17106_v42, %v7383_v63  ;;  %v17108_v30 = vld [vmem:[#allocation44_spill] sm:$0xff]  ;;  %v17111_v46 = vld [vmem:[#allocation47_spill] sm:$0xff] }
 0x4e9   : > { %v8702_v33 = vmul.f32 16.0, %v8650_v6  ;;  %v8750_v26 = vadd.f32 %v8698_v59, %v15741_v24  ;;  %vm8955_vm3 = vcmp.eq.s32.totalorder %v17107_v11, 1  ;;  %v8703_v0 = vmul.f32 16.0, %v8651_v15  ;;  %v17109_v38 = vld [vmem:[#allocation56_spill] sm:$0xff]  ;;  %v17110_v15 = vld [vmem:[#allocation41_spill] sm:$0xff]  ;;  %v17112_v42 = vld [vmem:[#allocation39_spill] sm:$0xff] }
 0x4ea   : > { %v8704_v25 = vmul.f32 16.0, %v8652_v34  ;;  %v8751_v40 = vadd.f32 %v8699_v21, %v15747_v43  ;;  %vm8956_vm4 = vcmp.eq.s32.totalorder %v17108_v30, 1  ;;  %v8705_v61 = vmul.f32 16.0, %v8653_v55  ;;  %v8660_v30 = vld [vmem:[%s9969_s30 + $0x90] sm:$0xff] }
 0x4eb   : > { %v8752_v63 = vadd.f32 %v8700_v28, %v15756_v45  ;;  %v8980_v35 = vsel %vm8954_vm2, %v8746_v44, 0.0  ;;  %v8981_v59 = vsel %vm8954_vm2, %v8747_v39, 0.0  ;;  %v8753_v51 = vadd.f32 %v8701_v29, %v15762_v53  ;;  %v8657_v28 = vld [vmem:[%s9969_s30 + $0x78] sm:$0xff]  ;;  %v8658_v29 = vld [vmem:[%s9969_s30 + $0x80] sm:$0xff] }
 0x4ec   : > { %vm8957_vm0 = vcmp.eq.s32.totalorder %v17109_v38, 1  ;;  %v8982_v6 = vsel %vm8955_vm3, %v8748_v62, 0.0  ;;  %v8983_v21 = vsel %vm8955_vm3, %v8749_v1, 0.0  ;;  %9032 = vst [vmem:[%s15857_s20] sm:$0xff] %v8980_v35  ;;  %v15866_v34 = vsel %vm15604_vm5, %v17110_v15, %v15677_v41  ;;  %v17113_v35 = vld [vmem:[#allocation52_spill] sm:$0xff]  ;;  %v8662_v38 = vld [vmem:[%s9969_s30 + $0xa0] sm:$0xff]  ;;  %v17115_v15 = vld [vmem:[#allocation51_spill] sm:$0xff] }
 0x4ed   : > { %v8706_v44 = vmul.f32 16.0, %v8654_v48  ;;  %v8754_v39 = vadd.f32 %v8702_v33, %v15769_v10  ;;  %v8984_v55 = vsel %vm8956_vm4, %v8750_v26, 0.0  ;;  %9033 = vst [vmem:[%s15857_s20 + $0x8] sm:$0xff] %v8981_v59  ;;  %v8707_v62 = vmul.f32 16.0, %v8655_v5  ;;  %v8659_v26 = vld [vmem:[%s9969_s30 + $0x88] sm:$0xff]  ;;  %v17114_v59 = vld [vmem:[#allocation37_spill] sm:$0xff] }
 0x4ee   : > { %v8755_v1 = vadd.f32 %v8703_v0, %v15775_v54  ;;  %vm8958_vm7 = vcmp.eq.s32.totalorder %v17111_v46, 1  ;;  %v8985_v41 = vsel %vm8956_vm4, %v8751_v40, 0.0  ;;  %9034 = vst [vmem:[%s15857_s20 + $0x10] sm:$0xff] %v8982_v6  ;;  %v15883_v33 = vsel %vm15610_vm14, %v17112_v42, %v15681_v57 }
 0x4ef   : > { %v8708_v11 = vmul.f32 16.0, %v8656_v60  ;;  %v8756_v48 = vadd.f32 %v8704_v25, %v15782_v56  ;;  %v8986_v0 = vsel %vm8957_vm0, %v8752_v63, 0.0  ;;  %9035 = vst [vmem:[%s15857_s20 + $0x18] sm:$0xff] %v8983_v21  ;;  %v8709_v5 = vmul.f32 16.0, %v8657_v28  ;;  %v8661_v63 = vld [vmem:[%s9969_s30 + $0x98] sm:$0xff]  ;;  %v15913_v28 = vpop.permute.xlu2 %8919 }
 0x4f0   : > { %v8757_v40 = vadd.f32 %v8705_v61, %v15788_v20  ;;  %vm8959_vm15 = vcmp.eq.s32.totalorder %v17113_v35, 1  ;;  %v8987_v57 = vsel %vm8957_vm0, %v8753_v51, 0.0  ;;  %9036 = vst [vmem:[%s15857_s20 + $0x20] sm:$0xff] %v8984_v55  ;;  %v15900_v25 = vsel %vm15604_vm5, %v17114_v59, %v15685_v32  ;;  %v8663_v55 = vld [vmem:[%s9969_s30 + $0xa8] sm:$0xff] }
 0x4f1   : > { %v8710_v60 = vmul.f32 16.0, %v8658_v29  ;;  %v8758_v6 = vadd.f32 %v8706_v44, %v15794_v7  ;;  %v8988_v61 = vsel %vm8958_vm7, %v8754_v39, 0.0  ;;  %9037 = vst [vmem:[%s15857_s20 + $0x28] sm:$0xff] %v8985_v41  ;;  %v8711_v51 = vmul.f32 16.0, %v8659_v26  ;;  %v17116_v44 = vld [vmem:[#allocation24_spill] sm:$0xff] }
 0x4f2   : > { %v8759_v21 = vadd.f32 %v8707_v62, %v15801_v2  ;;  %vm8960_vm10 = vcmp.eq.s32.totalorder %v17115_v15, 1  ;;  %v8989_v32 = vsel %vm8958_vm7, %v8755_v1, 0.0  ;;  %9038 = vst [vmem:[%s15857_s20 + $0x30] sm:$0xff] %v8986_v0  ;;  %v15919_v39 = vsel %vm15610_vm14, %v17116_v44, %v15689_v37  ;;  %v8664_v1 = vld [vmem:[%s9969_s30 + $0xb0] sm:$0xff]  ;;  %v15932_v0 = vpop.permute.xlu0 %8922 }
 0x4f3   : > { %v8712_v29 = vmul.f32 16.0, %v8660_v30  ;;  %v8760_v62 = vadd.f32 %v8708_v11, %v15807_v4  ;;  %v8990_v46 = vsel %vm8959_vm15, %v8756_v48, 0.0  ;;  %9039 = vst [vmem:[%s15857_s20 + $0x38] sm:$0xff] %v8987_v57  ;;  %v8713_v41 = vmul.f32 16.0, %v8661_v63  ;;  %v17117_v26 = vld [vmem:[#allocation64_spill] sm:$0xff]  ;;  %v17118_v11 = vld [vmem:[#allocation43_spill] sm:$0xff] }
 0x4f4   : > { %v8761_v42 = vadd.f32 %v8709_v5, %v15812_v31  ;;  %vm8961_vm6 = vcmp.eq.s32.totalorder %v17117_v26, 1  ;;  %v8991_v37 = vsel %vm8959_vm15, %v8757_v40, 0.0  ;;  %9040 = vst [vmem:[%s15857_s20 + $0x40] sm:$0xff] %v8988_v61  ;;  %v15938_v48 = vsel %vm15604_vm5, %v17118_v11, %v15693_v13  ;;  %v8665_v30 = vld [vmem:[%s9969_s30 + $0xb8] sm:$0xff]  ;;  %v8666_v40 = vld [vmem:[%s9969_s30 + $0xc0] sm:$0xff]  ;;  %v15951_v61 = vpop.permute.xlu1 %8925 }
 0x4f5   : > { %v8714_v57 = vmul.f32 16.0, %v8662_v38  ;;  %v8762_v5 = vadd.f32 %v8710_v60, %v15818_v50  ;;  %v8992_v35 = vsel %vm8960_vm10, %v8758_v6, 0.0  ;;  %9041 = vst [vmem:[%s15857_s20 + $0x48] sm:$0xff] %v8989_v32  ;;  %v8715_v59 = vmul.f32 16.0, %v8663_v55  ;;  %v17119_v60 = vld [vmem:[#allocation49_spill] sm:$0xff]  ;;  %v8667_v38 = vld [vmem:[%s9969_s30 + $0xc8] sm:$0xff] }
 0x4f6   : > { %v8763_v63 = vadd.f32 %v8711_v51, %v15833_v49  ;;  %vm8962_vm8 = vcmp.eq.s32.totalorder %v15669_v16, 1  ;;  %v8993_v13 = vsel %vm8960_vm10, %v8759_v21, 0.0  ;;  %9042 = vst [vmem:[%s15857_s20 + $0x50] sm:$0xff] %v8990_v46  ;;  %v15957_v6 = vsel %vm15610_vm14, %v17119_v60, %v15697_v52  ;;  %v8668_v21 = vld [vmem:[%s9969_s30 + $0xd0] sm:$0xff]  ;;  %v17120_v46 = vld [vmem:[#allocation53_spill] sm:$0xff]  ;;  %v8670_v26 = vld [vmem:[%s9969_s30 + $0xe0] sm:$0xff] }
 0x4f7   : > { %v8716_v32 = vmul.f32 16.0, %v8664_v1  ;;  %v8764_v51 = vadd.f32 %v8712_v29, %v15866_v34  ;;  %v8994_v15 = vsel %vm8961_vm6, %v8760_v62, 0.0  ;;  %9043 = vst [vmem:[%s15857_s20 + $0x58] sm:$0xff] %v8991_v37  ;;  %v8717_v44 = vmul.f32 16.0, %v8665_v30  ;;  %v8669_v62 = vld [vmem:[%s9969_s30 + $0xd8] sm:$0xff]  ;;  %v8671_v30 = vld [vmem:[%s9969_s30 + $0xe8] sm:$0xff] }
 0x4f8   : > { %v8765_v55 = vadd.f32 %v8713_v41, %v15883_v33  ;;  %vm8963_vm12 = vcmp.eq.s32.totalorder %v15701_v12, 1  ;;  %v8995_v52 = vsel %vm8961_vm6, %v8761_v42, 0.0  ;;  %9044 = vst [vmem:[%s15857_s20 + $0x60] sm:$0xff] %v8992_v35  ;;  %v15974_v29 = vsel %vm15604_vm5, %v17120_v46, %v15705_v58  ;;  %v8672_v16 = vld [vmem:[%s9969_s30 + $0xf0] sm:$0xff] }
 0x4f9   : > { %v8718_v1 = vmul.f32 16.0, %v8666_v40  ;;  %v8766_v37 = vadd.f32 %v8714_v57, %v15900_v25  ;;  %v8996_v41 = vsel %vm8962_vm8, %v8762_v5, 0.0  ;;  %9045 = vst [vmem:[%s15857_s20 + $0x68] sm:$0xff] %v8993_v13  ;;  %v8719_v11 = vmul.f32 16.0, %v8667_v38  ;;  %v8674_v38 = vld [vmem:[%s9969_s30 + $0x100] sm:$0xff]  ;;  %v8676_v46 = vld [vmem:[%s9969_s30 + $0x110] sm:$0xff] }
 0x4fa   : > { %v8767_v42 = vadd.f32 %v8715_v59, %v15919_v39  ;;  %vm8964_vm13 = vcmp.eq.s32.totalorder %v15750_v8, 1  ;;  %v8997_v36 = vsel %vm8962_vm8, %v8763_v63, 0.0  ;;  %9046 = vst [vmem:[%s15857_s20 + $0x70] sm:$0xff] %v8994_v15  ;;  %v15991_v58 = vsel %vm15610_vm14, %v15673_v3, %v15729_v9  ;;  %v16004_v3 = vpop.permute.xlu2 %8928  ;;  %v8673_v9 = vld [vmem:[%s9969_s30 + $0xf8] sm:$0xff]  ;;  %v16017_v15 = vpop.permute.xlu0 %8931 }
 0x4fb   : > { %v8720_v57 = vmul.f32 16.0, %v8668_v21  ;;  %v8768_v5 = vadd.f32 %v8716_v32, %v15938_v48  ;;  %v8998_v35 = vsel %vm8963_vm12, %v8764_v51, 0.0  ;;  %9047 = vst [vmem:[%s15857_s20 + $0x78] sm:$0xff] %v8995_v52  ;;  %v8721_v40 = vmul.f32 16.0, %v8669_v62  ;;  %v8675_v21 = vld [vmem:[%s9969_s30 + $0x108] sm:$0xff] }
 0x4fc   : > { %v8769_v59 = vadd.f32 %v8717_v44, %v15957_v6  ;;  %vm8965_vm5 = vcmp.eq.s32.totalorder %v15828_v19, 1  ;;  %v8999_v23 = vsel %vm8963_vm12, %v8765_v55, 0.0  ;;  %9048 = vst [vmem:[%s15857_s20 + $0x80] sm:$0xff] %v8996_v41  ;;  %v8722_v63 = vmul.f32 16.0, %v8670_v26 }
 0x4fd   : > { %v8770_v13 = vadd.f32 %v8718_v1, %v15974_v29  ;;  %v9000_v60 = vsel %vm8964_vm13, %v8766_v37, 0.0  ;;  %9049 = vst [vmem:[%s15857_s20 + $0x88] sm:$0xff] %v8997_v36  ;;  %v8723_v32 = vmul.f32 16.0, %v8671_v30  ;;  %v8771_v12 = vadd.f32 %v8719_v11, %v15991_v58  ;;  %v16030_v37 = vpop.permute.xlu1 %8934  ;;  %v8679_v30 = vld [vmem:[%s9969_s30 + $0x128] sm:$0xff] }
 0x4fe   : > { %vm8966_vm14 = vcmp.eq.s32.totalorder %v15840_v27, 1  ;;  %v9001_v51 = vsel %vm8964_vm13, %v8767_v42, 0.0  ;;  %9050 = vst [vmem:[%s15857_s20 + $0x90] sm:$0xff] %v8998_v35  ;;  %v8724_v44 = vmul.f32 16.0, %v8672_v16  ;;  %v8772_v55 = vadd.f32 %v8720_v57, %v15711_v22  ;;  %v8677_v22 = vld [vmem:[%s9969_s30 + $0x118] sm:$0xff]  ;;  %v8680_v35 = vld [vmem:[%s9969_s30 + $0x130] sm:$0xff] }
 0x4ff   : > { %v9002_v52 = vsel %vm8965_vm5, %v8768_v5, 0.0  ;;  %9051 = vst [vmem:[%s15857_s20 + $0x98] sm:$0xff] %v8999_v23  ;;  %v8725_v62 = vmul.f32 16.0, %v8673_v9  ;;  %v8773_v8 = vadd.f32 %v8721_v40, %v15717_v17  ;;  %vm8967_vm9 = vcmp.eq.s32.totalorder %v15860_v47, 1  ;;  %v8678_v17 = vld [vmem:[%s9969_s30 + $0x120] sm:$0xff]  ;;  %v8681_v40 = vld [vmem:[%s9969_s30 + $0x138] sm:$0xff] }
 0x500   : > { %v9003_v1 = vsel %vm8965_vm5, %v8769_v59, 0.0  ;;  %9052 = vst [vmem:[%s15857_s20 + $0xa0] sm:$0xff] %v9000_v60  ;;  %v8726_v41 = vmul.f32 16.0, %v8674_v38  ;;  %v8774_v26 = vadd.f32 %v8722_v63, %v15723_v14  ;;  %v9004_v11 = vsel %vm8966_vm14, %v8770_v13, 0.0  ;;  %v8682_v9 = vld [vmem:[%s9969_s30 + $0x140] sm:$0xff]  ;;  %v8683_v60 = vld [vmem:[%s9969_s30 + $0x148] sm:$0xff] }
 0x501   : > { %9053 = vst [vmem:[%s15857_s20 + $0xa8] sm:$0xff] %v9001_v51  ;;  %v8727_v42 = vmul.f32 16.0, %v8675_v21  ;;  %v8775_v19 = vadd.f32 %v8723_v32, %v15735_v18  ;;  %vm8968_vm1 = vcmp.eq.s32.totalorder %v15913_v28, 1  ;;  %v9005_v36 = vsel %vm8966_vm14, %v8771_v12, 0.0 }
 0x502   : > { %9054 = vst [vmem:[%s15857_s20 + $0xb0] sm:$0xff] %v9002_v52  ;;  %v8728_v14 = vmul.f32 16.0, %v8676_v46  ;;  %v8776_v57 = vadd.f32 %v8724_v44, %v15741_v24  ;;  %v9006_v5 = vsel %vm8967_vm9, %v8772_v55, 0.0  ;;  %v8729_v16 = vmul.f32 16.0, %v8677_v22  ;;  %v16065_v13 = vpop.permute.xlu2 %8937  ;;  %v16078_v21 = vpop.permute.xlu0 %8940  ;;  %v8685_v44 = vld [vmem:[%s9969_s30 + $0x158] sm:$0xff] }
 0x503   : > { %9055 = vst [vmem:[%s15857_s20 + $0xb8] sm:$0xff] %v9003_v1  ;;  %v8777_v18 = vadd.f32 %v8725_v62, %v15747_v43  ;;  %vm8969_vm11 = vcmp.eq.s32.totalorder %v15932_v0, 1  ;;  %v9007_v27 = vsel %vm8967_vm9, %v8773_v8, 0.0  ;;  %v8730_v59 = vmul.f32 16.0, %v8678_v17  ;;  %v8687_v1 = vld [vmem:[%s9969_s30 + $0x168] sm:$0xff]  ;;  %v8689_v17 = vld [vmem:[%s9969_s30 + $0x178] sm:$0xff] }
 0x504   : > { %9056 = vst [vmem:[%s15857_s20 + $0xc0] sm:$0xff] %v9004_v11  ;;  %v8778_v24 = vadd.f32 %v8726_v41, %v15756_v45  ;;  %v9008_v23 = vsel %vm8968_vm1, %v8774_v26, 0.0  ;;  %v8731_v63 = vmul.f32 16.0, %v8679_v30  ;;  %v8779_v43 = vadd.f32 %v8727_v42, %v15762_v53  ;;  %v8684_v53 = vld [vmem:[%s9969_s30 + $0x150] sm:$0xff] }
 0x505   : > { %9057 = vst [vmem:[%s15857_s20 + $0xc8] sm:$0xff] %v9005_v36  ;;  %vm8970_vm2 = vcmp.eq.s32.totalorder %v15951_v61, 1  ;;  %v9009_v47 = vsel %vm8968_vm1, %v8775_v19, 0.0  ;;  %v8732_v45 = vmul.f32 16.0, %v8680_v35  ;;  %v8780_v38 = vadd.f32 %v8728_v14, %v15769_v10  ;;  %v8944_v8 = vpop.permute.xlu1 %8943  ;;  %v8688_v26 = vld [vmem:[%s9969_s30 + $0x170] sm:$0xff]  ;;  %v8690_v36 = vld [vmem:[%s9969_s30 + $0x180] sm:$0xff] }
 0x506   : > { %9058 = vst [vmem:[%s15857_s20 + $0xd0] sm:$0xff] %v9006_v5  ;;  %v9010_v32 = vsel %vm8969_vm11, %v8776_v57, 0.0  ;;  %v8733_v12 = vmul.f32 16.0, %v8681_v40  ;;  %v8781_v28 = vadd.f32 %v8729_v16, %v15775_v54  ;;  %vm8971_vm3 = vcmp.eq.s32.totalorder %v16004_v3, 1  ;;  %v8686_v54 = vld [vmem:[%s9969_s30 + $0x160] sm:$0xff]  ;;  %v8691_v14 = vld [vmem:[%s9969_s30 + $0x188] sm:$0xff] }
 0x507   : > { %9059 = vst [vmem:[%s15857_s20 + $0xd8] sm:$0xff] %v9007_v27  ;;  %v9011_v51 = vsel %vm8969_vm11, %v8777_v18, 0.0  ;;  %v8734_v10 = vmul.f32 16.0, %v8682_v9  ;;  %v8782_v55 = vadd.f32 %v8730_v59, %v15782_v56  ;;  %v9012_v52 = vsel %vm8970_vm2, %v8778_v24, 0.0  ;;  %v8692_v35 = vld [vmem:[%s9969_s30 + $0x190] sm:$0xff]  ;;  %v8693_v27 = vld [vmem:[%s9969_s30 + $0x198] sm:$0xff] }
 0x508   : > { %9060 = vst [vmem:[%s15857_s20 + $0xe0] sm:$0xff] %v9008_v23  ;;  %v8735_v46 = vmul.f32 16.0, %v8683_v60  ;;  %v8783_v0 = vadd.f32 %v8731_v63, %v15788_v20  ;;  %vm8972_vm4 = vcmp.eq.s32.totalorder %v16017_v15, 1  ;;  %v9013_v62 = vsel %vm8970_vm2, %v8779_v43, 0.0 }
 0x509   : > { %9061 = vst [vmem:[%s15857_s20 + $0xe8] sm:$0xff] %v9009_v47  ;;  %v8736_v56 = vmul.f32 16.0, %v8684_v53  ;;  %v8784_v22 = vadd.f32 %v8732_v45, %v15794_v7  ;;  %v9014_v41 = vsel %vm8971_vm3, %v8780_v38, 0.0  ;;  %v8737_v20 = vmul.f32 16.0, %v8685_v44 }
 0x50a   : > { %9062 = vst [vmem:[%s15857_s20 + $0xf0] sm:$0xff] %v9010_v32  ;;  %v8785_v11 = vadd.f32 %v8733_v12, %v15801_v2  ;;  %vm8973_vm0 = vcmp.eq.s32.totalorder %v16030_v37, 1  ;;  %v9015_v61 = vsel %vm8971_vm3, %v8781_v28, 0.0  ;;  %v8738_v7 = vmul.f32 16.0, %v8686_v54  ;;  %v8947_v18 = vpop.permute.xlu2 %8946  ;;  %v8950_v23 = vpop.permute.xlu0 %8949 }
 0x50b   : > { %9063 = vst [vmem:[%s15857_s20 + $0xf8] sm:$0xff] %v9011_v51  ;;  %v8786_v42 = vadd.f32 %v8734_v10, %v15807_v4  ;;  %v9016_v19 = vsel %vm8972_vm4, %v8782_v55, 0.0  ;;  %v8739_v30 = vmul.f32 16.0, %v8687_v1  ;;  %v8787_v2 = vadd.f32 %v8735_v46, %v15812_v31 }
 0x50c   : > { %9064 = vst [vmem:[%s15857_s20 + $0x100] sm:$0xff] %v9012_v52  ;;  %vm8974_vm7 = vcmp.eq.s32.totalorder %v16065_v13, 1  ;;  %v9017_v3 = vsel %vm8972_vm4, %v8783_v0, 0.0  ;;  %v8740_v57 = vmul.f32 16.0, %v8688_v26  ;;  %v8788_v4 = vadd.f32 %v8736_v56, %v15818_v50 }
 0x50d   : > { %9065 = vst [vmem:[%s15857_s20 + $0x108] sm:$0xff] %v9013_v62  ;;  %v9018_v5 = vsel %vm8973_vm0, %v8784_v22, 0.0  ;;  %v8741_v16 = vmul.f32 16.0, %v8689_v17  ;;  %v8789_v31 = vadd.f32 %v8737_v20, %v15833_v49  ;;  %vm8975_vm15 = vcmp.eq.s32.totalorder %v16078_v21, 1  ;;  %v8953_v13 = vpop.permute.xlu1 %8952 }
 0x50e   : > { %9066 = vst [vmem:[%s15857_s20 + $0x110] sm:$0xff] %v9014_v41  ;;  %v9019_v15 = vsel %vm8973_vm0, %v8785_v11, 0.0  ;;  %v8742_v40 = vmul.f32 16.0, %v8690_v36  ;;  %v8790_v50 = vadd.f32 %v8738_v7, %v15866_v34  ;;  %v9020_v59 = vsel %vm8974_vm7, %v8786_v42, 0.0 }
 0x50f   : > { %9067 = vst [vmem:[%s15857_s20 + $0x118] sm:$0xff] %v9015_v61  ;;  %v8743_v24 = vmul.f32 16.0, %v8691_v14  ;;  %v8791_v49 = vadd.f32 %v8739_v30, %v15883_v33  ;;  %vm8976_vm10 = vcmp.eq.s32.totalorder %v8944_v8, 1  ;;  %v9021_v37 = vsel %vm8974_vm7, %v8787_v2, 0.0 }
 0x510   : > { %9068 = vst [vmem:[%s15857_s20 + $0x120] sm:$0xff] %v9016_v19  ;;  %v8744_v9 = vmul.f32 16.0, %v8692_v35  ;;  %v8792_v63 = vadd.f32 %v8740_v57, %v15900_v25  ;;  %v9022_v34 = vsel %vm8975_vm15, %v8788_v4, 0.0  ;;  %v8745_v43 = vmul.f32 16.0, %v8693_v27 }
 0x511   : > { %9069 = vst [vmem:[%s15857_s20 + $0x128] sm:$0xff] %v9017_v3  ;;  %v8793_v47 = vadd.f32 %v8741_v16, %v15919_v39  ;;  %vm8977_vm6 = vcmp.eq.s32.totalorder %v8947_v18, 1  ;;  %v9023_v33 = vsel %vm8975_vm15, %v8789_v31, 0.0  ;;  %v8794_v60 = vadd.f32 %v8742_v40, %v15938_v48 }
 0x512   : > { %9070 = vst [vmem:[%s15857_s20 + $0x130] sm:$0xff] %v9018_v5  ;;  %v9024_v25 = vsel %vm8976_vm10, %v8790_v50, 0.0  ;;  %v8795_v45 = vadd.f32 %v8743_v24, %v15957_v6  ;;  %vm8978_vm8 = vcmp.eq.s32.totalorder %v8950_v23, 1  ;;  %v9025_v39 = vsel %vm8976_vm10, %v8791_v49, 0.0 }
 0x513   : > { %9071 = vst [vmem:[%s15857_s20 + $0x138] sm:$0xff] %v9019_v15  ;;  %v8796_v38 = vadd.f32 %v8744_v9, %v15974_v29  ;;  %v9026_v32 = vsel %vm8977_vm6, %v8792_v63, 0.0  ;;  %v8797_v48 = vadd.f32 %v8745_v43, %v15991_v58  ;;  %vm8979_vm12 = vcmp.eq.s32.totalorder %v8953_v13, 1 }
 0x514   : > { %9072 = vst [vmem:[%s15857_s20 + $0x140] sm:$0xff] %v9020_v59  ;;  %v9027_v6 = vsel %vm8977_vm6, %v8793_v47, 0.0  ;;  %v9028_v53 = vsel %vm8978_vm8, %v8794_v60, 0.0  ;;  %v9029_v12 = vsel %vm8978_vm8, %v8795_v45, 0.0 }
 0x515   : > { %9073 = vst [vmem:[%s15857_s20 + $0x148] sm:$0xff] %v9021_v37  ;;  %v9030_v28 = vsel %vm8979_vm12, %v8796_v38, 0.0  ;;  %v9031_v51 = vsel %vm8979_vm12, %v8797_v48, 0.0 }
 0x516   : > { %9074 = vst [vmem:[%s15857_s20 + $0x150] sm:$0xff] %v9022_v34 }
 0x517   : > { %9075 = vst [vmem:[%s15857_s20 + $0x158] sm:$0xff] %v9023_v33 }
 0x518   : > { %9076 = vst [vmem:[%s15857_s20 + $0x160] sm:$0xff] %v9024_v25 }
 0x519   : > { %9077 = vst [vmem:[%s15857_s20 + $0x168] sm:$0xff] %v9025_v39 }
 0x51a   : > { %9078 = vst [vmem:[%s15857_s20 + $0x170] sm:$0xff] %v9026_v32 }
 0x51b   : > { %9079 = vst [vmem:[%s15857_s20 + $0x178] sm:$0xff] %v9027_v6  ;;  %9091 = sbr.rel (!%p9800_p9) target bundleno = 1331 (0x533), region = 92 }
 0x51c   : > { %9080 = vst [vmem:[%s15857_s20 + $0x180] sm:$0xff] %v9028_v53 }
 0x51d   : > { %9081 = vst [vmem:[%s15857_s20 + $0x188] sm:$0xff] %v9029_v12 }
 0x51e   : > { %9082 = vst [vmem:[%s15857_s20 + $0x190] sm:$0xff] %v9030_v28 }
 0x51f   : > { %9083 = vst [vmem:[%s15857_s20 + $0x198] sm:$0xff] %v9031_v51 }
 0x520   : > { %s9092_s21 = smul.u32 13, %s9773_s16 }
 0x522   : > { %s9093_s6 = ssub.s32 25, %s9092_s21 }
 0x523   : > { %p9094_p6 = scmp.lt.s32.totalorder %s9093_s6, 13 }
 0x525   : > { %s17136_s6 = smov (!%p9094_p6, %s9093_s6), 13 }
 0x526   : > { %s9468_s11 = sshll.u32 %s17136_s6, 5 }
 0x527   : > { %s9098_s5 = ssub.s32 416, %s9468_s11 }
 0x528   : > { %s9099_s7 = sshll.u32 %s9098_s5, 4 }
 0x529   : > { %9100 = vsyncadd %s9085_s28, %s9099_s7  ;;  %p16169_p1 = scmp.ne.s32.totalorder %s9468_s11, 0  ;;  %s9474_s26 = smul.u32 208, %s9773_s16 }
 0x52a   : > { %s9117_s29 = sshll.u32 %s15857_s20, 4  ;;  %s9472_s4 = sshll.u32 %s17136_s6, 9  ;;  %s9118_s29 = int_to_ptr.vmem [resolvable:$true] %s9117_s29 }
 0x52b   : > { %s9104_s30 = scalar_lea.hbm %s16205_s3, %s9474_s26  ;;  %s9726_s9 = smov 3328  }
 0x52c   : > { %s9119_s17 = sshll.u32 %s9104_s30, 4  ;;  %9126 = sst [smem:[#allocation10]] %s9726_s9  ;;  %s9120_s17 = int_to_ptr.hbm [resolvable:$true] %s9119_s17 }
 0x52d   : > { %9130 = sst [smem:[#allocation10 + $0x2]] %s17136_s6  ;;  %s9727_s23 = smov 6400  }
 0x52e   : > { %9128 = sst [smem:[#allocation10 + $0x1]] %s9727_s23  ;;  %s9728_s19 = smov 256  }
 0x52f   : > { %9132 = sst [smem:[#allocation10 + $0x3]] %s9728_s19  ;;  %s9729_s16 = smov 16  }
 0x530   : > { %9134 = sst [smem:[#allocation10 + $0x4]] %s9728_s19  ;;  %s9730_s10 = smov [#allocation9]  }
 0x531   : > { %9136 = sst [smem:[#allocation10 + $0x5]] %s9729_s16  ;;  %s9731_s20 = smov 0  }
 0x532   : > { %9138 = dma.general (%p16169_p1), %s9118_s29, %s9472_s4, %s9120_s17, %s9085_s28, %s9730_s10, [#allocation10], %s9731_s20, 0  }
 0x533 PF: > { %s9147_s21 = sand.u32 1, %s9668_s12   ;;  %p9482_p9 = pnand %p9274_p11, %p9804_p10 }
 0x534   : > { %s9148_s6 = scalar_lea.sflag [#allocation4], %s9147_s21 }
 0x535   : > { %p9483_p2 = pneg %p9482_p9 }
 0x537   : > { %9663 = dma.done.wait (%p9483_p2), %s9148_s6, 6656  }
 0x538   : > { %9665 = vsyncadd (%p9483_p2), %s9148_s6, 4294960640  ;;  %s17122_s11 = sld [smem:[#allocation13_spill]]  ;;  %p16_p3 = scmp.ge.s32.totalorder %s9777_s18, 4  }
 0x539   : > { %s17123_s12 = smov %s9672_s13  ;;  %s17124_s13 = smov %s9676_s14 }
 0x53a   : > { %s17126_s15 = smov %s9777_s18  ;;  %18 = sbr.rel (!%p16_p3) target bundleno = 5 (0x5), region = 177 }
 0x53e   : > { %s17125_s14 = smov %s17122_s11 }
 0x53f   :  { %9154 = vsyncpa [#allocation3], 1 }
 0x540   :  { %9156 = vsyncpa [#allocation3 + $0x1], 1 }
 0x541   :  { %9157 = vsyncpa [#allocation4], 1 }
 0x542   :  { %9159 = vsyncpa [#allocation4 + $0x1], 1 }

// kernel: tpu_custom_call.1
= control target key start
LH: loop header
LB: loop body
LE: loop exit
PB: predicated region body
PF: predicated region fallthrough
CT: control target
= control target key end

     0   :  { %8 = vsyncpa [#allocation3], 0  ;;  %s2059_s0 = inlined_call_operand.hbm [shape: f32[2,200,256], index: 0, kind: input, shape index: {}]   ;;  %s2060_s1 = inlined_call_operand.vmem [shape: f32[200,256], index: 1, kind: input, shape index: {}]   ;;  %s2061_s2 = inlined_call_operand.vmem [shape: f32[2,200,1], index: 2, kind: input, shape index: {}]   ;;  %s2062_s3 = inlined_call_operand.hbm [shape: f32[2,200,256], index: 3, kind: output, shape index: {}]  }
   0x1   :  { %10 = vsyncpa [#allocation3 + $0x1], 0 }
   0x2   :  { %11 = vsyncpa [#allocation4], 0 }
   0x3   :  { %13 = vsyncpa [#allocation4 + $0x1], 0  ;;  %s1512_s12 = smov 0   ;;  %s1514_s13 = smov 0  }
   0x4   :  { %s1516_s14 = smov 0   ;;  %s1518_s15 = smov 0  }
   0x5 LB: > { %s1533_s16 = sadd.s32 4294967295, %s1446_s15   ;;  %s1197_s17 = sadd.s32 4294967294, %s1446_s15   ;;  %s1446_s15 = sphi %s1518_s15, %s2079_s15   ;;  %s1442_s14 = sphi %s1516_s14, %s2078_s14   ;;  %s1438_s13 = sphi %s1514_s13, %s2077_s13   ;;  %s1434_s12 = sphi %s1512_s12, %s2076_s12  }
   0x6   : > { %s1537_s18 = sadd.s32 1, %s1446_s15   ;;  %s26_s19 = sadd.s32 1, %s1442_s14 }
   0x7   : > { %s23_s20 = ssub.s32 %s1446_s15, %s1537_s18  ;;  %p33_p0 = scmp.ne.s32.totalorder %s1442_s14, %s1438_s13 }
   0x8   : > { %p24_p1 = scmp.eq.s32.totalorder %s23_s20, 0  ;;  %p34_p2 = scmp.eq.s32.totalorder %s1446_s15, 0 }
   0x9   : > { %p39_p3 = scmp.ne.s32.totalorder %s1438_s13, %s1434_s12  ;;  %p40_p4 = scmp.eq.s32.totalorder %s1533_s16, 0 }
   0xa   : > { %s1549_s21 = scalar_select %p24_p1, %s1442_s14, %s26_s19  }
   0xb   : > { %p1551_p5 = por %p34_p2, %p33_p0  ;;  %p1555_p6 = por %p40_p4, %p39_p3 }
   0xc   : > { %2063 = sst [smem:[#allocation13_spill]] %s1549_s21  ;;  %p115_p7 = scmp.eq.s32.totalorder %s1533_s16, 1 }
   0xd   : > { %p121_p8 = scmp.eq.s32.totalorder %s1197_s17, 1  ;;  %p1199_p11 = scmp.ge.s32.totalorder %s1446_s15, 2 }
   0xe   : > { %p1560_p9 = por %p115_p7, %p33_p0 }
   0xf   : > { %p1564_p10 = por %p121_p8, %p39_p3  ;;  %137 = sbr.rel (%p1199_p11) target bundleno = 124 (0x7c), region = 16 }
  0x14   : > { %140 = sbr.rel (!%p1551_p5) target bundleno = 45 (0x2d), region = 20 }
  0x19   : > { %s141_s26 = sand.u32 1, %s1442_s14   ;;  %s146_s27 = smul.u32 13, %s1446_s15 }
  0x1a   : > { %s1247_s28 = smul.u32 416, %s141_s26  ;;  %s1578_s6 = scalar_lea.sflag [#allocation3], %s141_s26 }
  0x1b   : > { %s147_s29 = ssub.s32 25, %s146_s27 }
  0x1c   : > { %p148_p12 = scmp.lt.s32.totalorder %s147_s29, 13  ;;  %s145_s7 = scalar_lea.vmem [#allocation2], %s1247_s28 }
  0x1e   : > { %s2081_s29 = smov (!%p148_p12, %s147_s29), 13 }
  0x1f   : > { %s1233_s30 = sshll.u32 %s2081_s29, 5 }
  0x20   : > { %s152_s4 = ssub.s32 416, %s1233_s30 }
  0x21   : > { %s153_s5 = sshll.u32 %s152_s4, 4 }
  0x22   : > { %154 = vsyncadd %s1578_s6, %s153_s5  ;;  %p1581_p13 = scmp.ne.s32.totalorder %s1233_s30, 0  ;;  %s1245_s9 = smul.u32 208, %s1446_s15 }
  0x23   : > { %s165_s10 = sld [smem:[#allocation0]]   ;;  %s175_s11 = sshll.u32 %s145_s7, 4  ;;  %s176_s11 = int_to_ptr.vmem [resolvable:$true] %s175_s11 }
  0x24   : > { %s158_s20 = scalar_lea.hbm %s2059_s0, %s1245_s9  ;;  %s1237_s27 = sshll.u32 %s2081_s29, 9 }
  0x25   : > { %s173_s26 = sshll.u32 %s158_s20, 4  ;;  %s1480_s28 = smov 6400   ;;  %s174_s26 = int_to_ptr.hbm [resolvable:$true] %s173_s26 }
  0x26   : > { %182 = sst [smem:[#allocation8]] %s1480_s28  ;;  %s1481_s4 = smov 3328  }
  0x27   : > { %184 = sst [smem:[#allocation8 + $0x1]] %s1481_s4  ;;  %s1482_s21 = smov 256  }
  0x28   : > { %186 = sst [smem:[#allocation8 + $0x2]] %s2081_s29  ;;  %s1483_s7 = smov 16  }
  0x29   : > { %s1207_s30 = sshll.u32 %s165_s10, 26  ;;  %188 = sst [smem:[#allocation8 + $0x3]] %s1482_s21 }
  0x2a   : > { %s1208_s5 = sadd.s32 134217728, %s1207_s30  ;;  %190 = sst [smem:[#allocation8 + $0x4]] %s1482_s21 }
  0x2b   : > { %192 = sst [smem:[#allocation8 + $0x5]] %s1483_s7  ;;  %s1484_s17 = smov [#allocation7]  }
  0x2c   : > { %194 = dma.general (%p1581_p13), %s174_s26, %s1237_s27, %s176_s11, %s1578_s6, %s1484_s17, [#allocation8], %s1208_s5, 0  }
  0x2d PF: > { %217 = sbr.rel (!%p1551_p5) target bundleno = 124 (0x7c), region = 28  ;;  %s219_s9 = sand.u32 (%p1551_p5), 1, %s1442_s14  }
  0x2e   : > { %s222_s19 = smul.u32 (%p1551_p5), 13, %s1446_s15 }
  0x2f   : > { %s1248_s10 = smul.u32 (%p1551_p5), 208, %s219_s9 }
  0x30   : > { %s223_s29 = ssub.s32 (%p1551_p5), 25, %s222_s19  ;;  %s1238_s20 = smul.u32 (%p1551_p5), 104, %s1446_s15 }
  0x31   : > { %p224_p0 = scmp.lt.s32.totalorder (%p1551_p5), %s223_s29, 13  ;;  %s1607_s22 = scalar_lea.vmem (%p1551_p5), [#allocation5], %s1248_s10  }
  0x32   : > { %s1602_s4 = scalar_lea.vmem %s2061_s2, %s1238_s20  }
  0x33   : > { %s2083_s29 = smov (!%p224_p0, %s223_s29), 13 }
  0x34   : > { %s1210_s6 = sshll.u32 %s2083_s29, 4 }
  0x35   : > { %p1213_p1 = scmp.eq.s32.totalorder %s1210_s6, 0 }
  0x36   : > { %1367 = sdivrem.u32 (!%p1213_p1), %s2083_s29, 13 }
  0x37   : > { %232 = sbr.rel (%p1213_p1) target bundleno = 124 (0x7c), region = 32 }
  0x3f   : > { %s1610_s8 = spop.drf %1367 }
  0x40   : > { %s1369_s11 = spop.drf %1367  ;;  %p1214_p2 = scmp.le.s32.totalorder %s1610_s8, 0 }
  0x41   : > { %s2069_s26 = smov (!%p1214_p2), %s1607_s22  ;;  %s2070_s27 = smov (!%p1214_p2), %s1602_s4 }
  0x42   : > { %1138 = sbr.rel (%p1214_p2) target bundleno = 98 (0x62), region = 152  ;;  %s1619_s30 = smov (!%p1214_p2), 0  }
  0x43   : > { %s1621_s5 = smov (!%p1214_p2), 0  }
  0x47 LB: >> { %v349_v0 = vld [vmem:[%s1454_s27] sm:$0xff]  ;;  %v351_v1 = vld [vmem:[%s1454_s27 + $0x8] sm:$0xff]  ;;  %v353_v2 = vld [vmem:[%s1454_s27 + $0x10] sm:$0xff]  ;;  %s401_s7 = sadd.s32 1, %s1458_s30  ;;  %s343_s5 = sadd.s32 1, %s1462_s5   ;;  %s1462_s5 = sphi %s1621_s5, %s343_s5   ;;  %s1458_s30 = sphi %s1619_s30, %s2073_s30   ;;  %s1454_s27 = sphi %s2070_s27, %s2072_s27   ;;  %s1450_s26 = sphi %s2069_s26, %s2071_s26  }
  0x48   : >> { %350 = vst [vmem:[%s1450_s26] sm:$0xff] %v349_v0  ;;  %v355_v3 = vld [vmem:[%s1454_s27 + $0x18] sm:$0xff]  ;;  %p402_p3 = scmp.ge.s32.totalorder %s401_s7, %s1610_s8  ;;  %v357_v4 = vld [vmem:[%s1454_s27 + $0x20] sm:$0xff]  ;;  %v359_v5 = vld [vmem:[%s1454_s27 + $0x28] sm:$0xff]  ;;  %p342_p4 = scmp.ge.s32.totalorder %s343_s5, %s1610_s8 }
  0x49   : >> { %352 = vst [vmem:[%s1450_s26 + $0x8] sm:$0xff] %v351_v1  ;;  %v361_v6 = vld [vmem:[%s1454_s27 + $0x30] sm:$0xff]  ;;  %v363_v7 = vld [vmem:[%s1454_s27 + $0x38] sm:$0xff]  ;;  %v365_v8 = vld [vmem:[%s1454_s27 + $0x40] sm:$0xff] }
  0x4a   : >> { %354 = vst [vmem:[%s1450_s26 + $0x10] sm:$0xff] %v353_v2  ;;  %s2085_s7 = smov (%p402_p3, %s401_s7), 0  ;;  %v367_v9 = vld [vmem:[%s1454_s27 + $0x48] sm:$0xff]  ;;  %v369_v10 = vld [vmem:[%s1454_s27 + $0x50] sm:$0xff]  ;;  %v371_v11 = vld [vmem:[%s1454_s27 + $0x58] sm:$0xff] }
  0x4b   : >> { %356 = vst [vmem:[%s1450_s26 + $0x18] sm:$0xff] %v355_v3  ;;  %s404_s17 = smul.u32 104, %s2085_s7  ;;  %v373_v12 = vld [vmem:[%s1454_s27 + $0x60] sm:$0xff]  ;;  %v375_v13 = vld [vmem:[%s1454_s27 + $0xc8] sm:$0xff]  ;;  %v377_v14 = vld [vmem:[%s1454_s27 + $0xd0] sm:$0xff]  ;;  %s2073_s30 = smov %s2085_s7 }
  0x4c   : >> { %358 = vst [vmem:[%s1450_s26 + $0x20] sm:$0xff] %v357_v4  ;;  %v379_v15 = vld [vmem:[%s1454_s27 + $0xd8] sm:$0xff]  ;;  %v381_v16 = vld [vmem:[%s1454_s27 + $0xe0] sm:$0xff]  ;;  %v383_v17 = vld [vmem:[%s1454_s27 + $0xe8] sm:$0xff] }
  0x4d   : >> { %360 = vst [vmem:[%s1450_s26 + $0x28] sm:$0xff] %v359_v5  ;;  %s1655_s9 = scalar_lea.vmem %s1602_s4, %s404_s17   ;;  %s1658_s19 = scalar_lea.vmem %s1607_s22, %s404_s17 [#allocation5]   ;;  %v385_v18 = vld [vmem:[%s1454_s27 + $0xf0] sm:$0xff]  ;;  %v387_v19 = vld [vmem:[%s1454_s27 + $0xf8] sm:$0xff]  ;;  %v389_v20 = vld [vmem:[%s1454_s27 + $0x100] sm:$0xff] }
  0x4e   : >> { %362 = vst [vmem:[%s1450_s26 + $0x30] sm:$0xff] %v361_v6  ;;  %v391_v21 = vld [vmem:[%s1454_s27 + $0x108] sm:$0xff]  ;;  %v393_v22 = vld [vmem:[%s1454_s27 + $0x110] sm:$0xff]  ;;  %v395_v23 = vld [vmem:[%s1454_s27 + $0x118] sm:$0xff] }
  0x4f   : >> { %364 = vst [vmem:[%s1450_s26 + $0x38] sm:$0xff] %v363_v7  ;;  %v397_v24 = vld [vmem:[%s1454_s27 + $0x120] sm:$0xff]  ;;  %v399_v25 = vld [vmem:[%s1454_s27 + $0x128] sm:$0xff]  ;;  %s2072_s27 = smov %s1655_s9 }
  0x50   : >> { %366 = vst [vmem:[%s1450_s26 + $0x40] sm:$0xff] %v365_v8 }
  0x51   : >> { %368 = vst [vmem:[%s1450_s26 + $0x48] sm:$0xff] %v367_v9 }
  0x52   : >> { %370 = vst [vmem:[%s1450_s26 + $0x50] sm:$0xff] %v369_v10 }
  0x53   : >> { %372 = vst [vmem:[%s1450_s26 + $0x58] sm:$0xff] %v371_v11 }
  0x54   : >> { %374 = vst [vmem:[%s1450_s26 + $0x60] sm:$0xff] %v373_v12 }
  0x55   : >> { %376 = vst [vmem:[%s1450_s26 + $0x68] sm:$0xff] %v375_v13 }
  0x56   : >> { %378 = vst [vmem:[%s1450_s26 + $0x70] sm:$0xff] %v377_v14 }
  0x57   : >> { %380 = vst [vmem:[%s1450_s26 + $0x78] sm:$0xff] %v379_v15 }
  0x58   : >> { %382 = vst [vmem:[%s1450_s26 + $0x80] sm:$0xff] %v381_v16 }
  0x59   : >> { %384 = vst [vmem:[%s1450_s26 + $0x88] sm:$0xff] %v383_v17 }
  0x5a   : >> { %386 = vst [vmem:[%s1450_s26 + $0x90] sm:$0xff] %v385_v18 }
  0x5b   : >> { %388 = vst [vmem:[%s1450_s26 + $0x98] sm:$0xff] %v387_v19 }
  0x5c   : >> { %390 = vst [vmem:[%s1450_s26 + $0xa0] sm:$0xff] %v389_v20 }
  0x5d   : >> { %392 = vst [vmem:[%s1450_s26 + $0xa8] sm:$0xff] %v391_v21  ;;  %345 = sbr.rel (!%p342_p4) target bundleno = 71 (0x47), region = 158 }
  0x5e   : >> { %394 = vst [vmem:[%s1450_s26 + $0xb0] sm:$0xff] %v393_v22 }
  0x5f   : >> { %396 = vst [vmem:[%s1450_s26 + $0xb8] sm:$0xff] %v395_v23 }
  0x60   : >> { %398 = vst [vmem:[%s1450_s26 + $0xc0] sm:$0xff] %v397_v24 }
  0x61   : >> { %400 = vst [vmem:[%s1450_s26 + $0xc8] sm:$0xff] %v399_v25  ;;  %s2071_s26 = smov %s1658_s19 }
  0x62 PF: > { %1370 = sdivrem.u32 %s2083_s29, 13 }
  0x63   : > { %s1215_s10 = smul.u32 104, %s1610_s8 }
  0x65   : > { %s1711_s20 = scalar_lea.vmem %s1602_s4, %s1215_s10   ;;  %s1714_s28 = scalar_lea.vmem %s1607_s22, %s1215_s10 [#allocation5]  }
  0x6b   : > { %s1371_s21 = spop.drf %1370 }
  0x6c   : > { %s1372_s6 = spop.drf %1370 }
  0x6d   : > { %p1217_p5 = scmp.le.s32.totalorder %s1372_s6, 0 }
  0x6e   : > { %s1464_s11 = smov (!%p1217_p5), %s1714_s28   ;;  %s1468_s5 = smov (!%p1217_p5), %s1711_s20  }
  0x6f   : > { %1152 = sbr.rel (%p1217_p5) target bundleno = 124 (0x7c), region = 163  ;;  %s1472_s7 = smov (!%p1217_p5), 0  }
  0x70   : > { %s1476_s26 = smov (!%p1217_p5), 0  }
  0x74 LB: >> { %v424_v26 = vld [vmem:[%s1470_s5] sm:$0xff]  ;;  %v426_v27 = vld [vmem:[%s1470_s5 + $0xc8] sm:$0xff]  ;;  %s428_s29 = sadd.s32 1, %s1474_s7  ;;  %s418_s26 = sadd.s32 1, %s1478_s26   ;;  %s1478_s26 = sphi %s1476_s26, %s418_s26   ;;  %s1474_s7 = sphi %s1472_s7, %s1473_s7   ;;  %s1470_s5 = sphi %s1468_s5, %s433_s5   ;;  %s1466_s11 = sphi %s1464_s11, %s434_s11  }
  0x75   : >> { %425 = vst [vmem:[%s1466_s11] sm:$0xff] %v424_v26  ;;  %p429_p7 = scmp.ge.s32.totalorder %s428_s29, %s1372_s6  ;;  %p417_p8 = scmp.ge.s32.totalorder %s418_s26, %s1372_s6 }
  0x76   : >> { %427 = vst [vmem:[%s1466_s11 + $0x68] sm:$0xff] %v426_v27 }
  0x77   : >> { %s2087_s29 = smov (%p429_p7, %s428_s29), 0  ;;  %420 = sbr.rel (!%p417_p8) target bundleno = 116 (0x74), region = 169 }
  0x78   : >> { %s1218_s4 = sshll.u32 %s2087_s29, 3  ;;  %s1473_s7 = smov %s2087_s29  }
  0x79   : >> { %s433_s5 = scalar_lea.vmem %s1711_s20, %s1218_s4   ;;  %s434_s11 = scalar_lea.vmem %s1714_s28, %s1218_s4 [#allocation5]  }
  0x7c PF: > { %p1220_p12 = scmp.ge.s32.totalorder %s1446_s15, 1  ;;  %p439_p13 = scmp.lt.s32.totalorder %s1446_s15, 3 }
  0x7e   : > { %p440_p0 = pnand %p1220_p12, %p439_p13 }
  0x7f   : > { %s1723_s22 = sand.u32 (!%p440_p0), 1, %s1438_s13  }
  0x80   : > { %443 = sbr.rel (%p440_p0) target bundleno = 342 (0x156), region = 80  ;;  %s446_s27 = scalar_lea.sflag (!%p440_p0), [#allocation3], %s1723_s22 }
  0x81   : > { %s1249_s8 = smul.u32 (!%p440_p0), 416, %s1723_s22 }
  0x83   : > { %s1729_s30 = scalar_lea.vmem (!%p440_p0), [#allocation2], %s1249_s8 }
  0x85   : > { %1425 = dma.done.wait (%p1555_p6), %s446_s27, 6656  }
  0x86   : > { %1427 = vsyncadd (%p1555_p6), %s446_s27, 4294960640  ;;  %s1250_s17 = smul.u32 208, %s1723_s22  ;;  %v1485_v28 = vmov 0   ;;  %v537_v17 = vld [vmem:[%s1729_s30 + $0x40] sm:$0xff]  ;;  %v538_v18 = vld [vmem:[%s1729_s30 + $0x48] sm:$0xff]  ;;  %s1817_s6 = scalar_lea.vmem [#allocation6], %s1249_s8 }
  0x87   : > { %1375 = vset.pattern.permute.xlu2 %v1485_v28  ;;  %1374 = vset.pattern.permute.xlu1 %v1485_v28  ;;  %s1794_s23 = smul.u32 13, %s1533_s16  ;;  %v589_v19 = vmul.f32 16.0, %v537_v17  ;;  %v590_v20 = vmul.f32 16.0, %v538_v18  ;;  %v539_v25 = vld [vmem:[%s1729_s30 + $0x50] sm:$0xff]  ;;  %v540_v26 = vld [vmem:[%s1729_s30 + $0x58] sm:$0xff]  ;;  %s998_s11 = scalar_lea.sflag [#allocation4], %s1723_s22 }
  0x88   : > { %1373 = vset.pattern.permute.xlu0 %v1485_v28  ;;  %s1739_s9 = scalar_lea.vmem [#allocation5], %s1250_s17 }
  0x89   : > { %v715_v29 = vld [vmem:[%s1739_s9 + $0x20] sm:$0xff]  ;;  %v713_v30 = vld [vmem:[%s1739_s9 + $0x10] sm:$0xff]  ;;  %v716_v35 = vld [vmem:[%s1739_s9 + $0x28] sm:$0xff]  ;;  %p507_p6 = scmp.lt.s32.totalorder %s1794_s23, 24 }
  0x8a   : > { %v711_v31 = vld [vmem:[%s1739_s9] sm:$0xff]  ;;  %vm741_vm0 = vcmp.ne.f32.partialorder %v715_v29, 0.0  ;;  %vm739_vm1 = vcmp.ne.f32.partialorder %v713_v30, 0.0  ;;  %v714_v36 = vld [vmem:[%s1739_s9 + $0x18] sm:$0xff]  ;;  %v712_v37 = vld [vmem:[%s1739_s9 + $0x8] sm:$0xff]  ;;  %vm742_vm3 = vcmp.ne.f32.partialorder %v716_v35, 0.0 }
  0x8b   : > { %vm737_vm2 = vcmp.ne.f32.partialorder %v711_v31, 0.0  ;;  %v767_v32 = vsel %vm741_vm0, 1, %v1485_v28  ;;  %v765_v33 = vsel %vm739_vm1, 1, %v1485_v28  ;;  %vm740_vm4 = vcmp.ne.f32.partialorder %v714_v36, 0.0  ;;  %v719_v41 = vld [vmem:[%s1739_s9 + $0x40] sm:$0xff]  ;;  %v718_v42 = vld [vmem:[%s1739_s9 + $0x38] sm:$0xff] }
  0x8c   : > { %v763_v34 = vsel %vm737_vm2, 1, %v1485_v28  ;;  %802 = vperm.xlu2 %1375, %v767_v32   ;;  %796 = vperm.xlu1 %1374, %v765_v33   ;;  %vm738_vm5 = vcmp.ne.f32.partialorder %v712_v37, 0.0  ;;  %v768_v38 = vsel %vm742_vm3, 1, %v1485_v28  ;;  %v766_v39 = vsel %vm740_vm4, 1, %v1485_v28  ;;  %v717_v43 = vld [vmem:[%s1739_s9 + $0x30] sm:$0xff]  ;;  %v722_v47 = vld [vmem:[%s1739_s9 + $0x58] sm:$0xff] }
  0x8d   : > { %790 = vperm.xlu0 %1373, %v763_v34   ;;  %v764_v40 = vsel %vm738_vm5, 1, %v1485_v28  ;;  %vm745_vm6 = vcmp.ne.f32.partialorder %v719_v41, 0.0  ;;  %vm744_vm7 = vcmp.ne.f32.partialorder %v718_v42, 0.0  ;;  %vm743_vm8 = vcmp.ne.f32.partialorder %v717_v43, 0.0  ;;  %v721_v48 = vld [vmem:[%s1739_s9 + $0x50] sm:$0xff]  ;;  %v720_v49 = vld [vmem:[%s1739_s9 + $0x48] sm:$0xff] }
  0x8e   : > { %v771_v44 = vsel %vm745_vm6, 1, %v1485_v28  ;;  %v770_v45 = vsel %vm744_vm7, 1, %v1485_v28  ;;  %v769_v46 = vsel %vm743_vm8, 1, %v1485_v28  ;;  %vm748_vm9 = vcmp.ne.f32.partialorder %v722_v47, 0.0  ;;  %v725_v53 = vld [vmem:[%s1739_s9 + $0x70] sm:$0xff]  ;;  %v724_v54 = vld [vmem:[%s1739_s9 + $0x68] sm:$0xff] }
  0x8f   : > { %vm747_vm10 = vcmp.ne.f32.partialorder %v721_v48, 0.0  ;;  %vm746_vm11 = vcmp.ne.f32.partialorder %v720_v49, 0.0  ;;  %v774_v50 = vsel %vm748_vm9, 1, %v1485_v28  ;;  %v723_v55 = vld [vmem:[%s1739_s9 + $0x60] sm:$0xff]  ;;  %v736_v56 = vld [vmem:[%s1739_s9 + $0xc8] sm:$0xff]  ;;  %vm751_vm12 = vcmp.ne.f32.partialorder %v725_v53, 0.0 }
  0x90   : > { %v773_v51 = vsel %vm747_vm10, 1, %v1485_v28  ;;  %v772_v52 = vsel %vm746_vm11, 1, %v1485_v28  ;;  %vm750_vm13 = vcmp.ne.f32.partialorder %v724_v54, 0.0  ;;  %vm762_vm14 = vcmp.ne.f32.partialorder %v736_v56, 0.0  ;;  %v735_v61 = vld [vmem:[%s1739_s9 + $0xc0] sm:$0xff]  ;;  %v728_v62 = vld [vmem:[%s1739_s9 + $0x88] sm:$0xff] }
  0x91   : > { %vm749_vm15 = vcmp.ne.f32.partialorder %v723_v55, 0.0  ;;  %v788_v57 = vsel %vm762_vm14, 1, %v1485_v28  ;;  %v777_v58 = vsel %vm751_vm12, 1, %v1485_v28  ;;  %v776_v59 = vsel %vm750_vm13, 1, %v1485_v28  ;;  %v727_v63 = vld [vmem:[%s1739_s9 + $0x80] sm:$0xff]  ;;  %v726_v0 = vld [vmem:[%s1739_s9 + $0x78] sm:$0xff] }
  0x92   : > { %v775_v60 = vsel %vm749_vm15, 1, %v1485_v28  ;;  %vm761_vm0 = vcmp.ne.f32.partialorder %v735_v61, 0.0  ;;  %vm754_vm1 = vcmp.ne.f32.partialorder %v728_v62, 0.0  ;;  %vm753_vm2 = vcmp.ne.f32.partialorder %v727_v63, 0.0  ;;  %v731_v5 = vld [vmem:[%s1739_s9 + $0xa0] sm:$0xff]  ;;  %v730_v6 = vld [vmem:[%s1739_s9 + $0x98] sm:$0xff] }
  0x93   : > { %v787_v1 = vsel %vm761_vm0, 1, %v1485_v28  ;;  %vm752_vm3 = vcmp.ne.f32.partialorder %v726_v0, 0.0  ;;  %v780_v2 = vsel %vm754_vm1, 1, %v1485_v28  ;;  %v779_v3 = vsel %vm753_vm2, 1, %v1485_v28  ;;  %v729_v7 = vld [vmem:[%s1739_s9 + $0x90] sm:$0xff]  ;;  %v734_v11 = vld [vmem:[%s1739_s9 + $0xb8] sm:$0xff] }
  0x94   : > { %805 = vperm.xlu2 %1375, %v768_v38   ;;  %799 = vperm.xlu1 %1374, %v766_v39   ;;  %v778_v4 = vsel %vm752_vm3, 1, %v1485_v28  ;;  %vm757_vm4 = vcmp.ne.f32.partialorder %v731_v5, 0.0  ;;  %vm756_vm5 = vcmp.ne.f32.partialorder %v730_v6, 0.0  ;;  %vm755_vm6 = vcmp.ne.f32.partialorder %v729_v7, 0.0  ;;  %v733_v12 = vld [vmem:[%s1739_s9 + $0xb0] sm:$0xff]  ;;  %v732_v13 = vld [vmem:[%s1739_s9 + $0xa8] sm:$0xff] }
  0x95   : > { %793 = vperm.xlu0 %1373, %v764_v40   ;;  %v783_v8 = vsel %vm757_vm4, 1, %v1485_v28  ;;  %v782_v9 = vsel %vm756_vm5, 1, %v1485_v28  ;;  %v781_v10 = vsel %vm755_vm6, 1, %v1485_v28  ;;  %vm760_vm7 = vcmp.ne.f32.partialorder %v734_v11, 0.0  ;;  %s508_s19 = scalar_select %p507_p6, %s1794_s23, 24  ;;  %v545_v36 = vld [vmem:[%s1729_s30 + $0x80] sm:$0xff] }
  0x96   : > { %vm759_vm8 = vcmp.ne.f32.partialorder %v733_v12, 0.0  ;;  %vm758_vm9 = vcmp.ne.f32.partialorder %v732_v13, 0.0  ;;  %v786_v14 = vsel %vm760_vm7, 1, %v1485_v28  ;;  %v591_v30 = vmul.f32 16.0, %v539_v25  ;;  %v546_v37 = vld [vmem:[%s1729_s30 + $0x88] sm:$0xff]  ;;  %v533_v47 = vld [vmem:[%s1729_s30 + $0x20] sm:$0xff] }
  0x97   : > { %v785_v15 = vsel %vm759_vm8, 1, %v1485_v28  ;;  %v784_v16 = vsel %vm758_vm9, 1, %v1485_v28  ;;  %s1239_s10 = sshll.u32 %s508_s19, 4  ;;  %v592_v31 = vmul.f32 16.0, %v540_v26  ;;  %v597_v41 = vmul.f32 16.0, %v545_v36  ;;  %v551_v48 = vld [vmem:[%s1729_s30 + $0xb0] sm:$0xff] }
  0x98   : > { %s1803_s21 = scalar_lea.vmem %s2060_s1, %s1239_s10  ;;  %v598_v42 = vmul.f32 16.0, %v546_v37  ;;  %v552_v49 = vld [vmem:[%s1729_s30 + $0xb8] sm:$0xff]  ;;  %v529_v53 = vld [vmem:[%s1729_s30] sm:$0xff]  ;;  %v530_v54 = vld [vmem:[%s1729_s30 + $0x8] sm:$0xff] }
  0x99   : > { %v1806_v21 = vld [vmem:[%s1803_s21 + $0x40] sm:$0xff]  ;;  %v1809_v22 = vld [vmem:[%s1803_s21 + $0x48] sm:$0xff]  ;;  %v1821_v32 = vld [vmem:[%s1803_s21 + $0x50] sm:$0xff]  ;;  %v581_v0 = vmul.f32 16.0, %v529_v53 }
  0x9a   : > { %v667_v23 = vadd.f32 %v1806_v21, %v589_v19  ;;  %v668_v24 = vadd.f32 %v1809_v22, %v590_v20  ;;  %v1824_v33 = vld [vmem:[%s1803_s21 + $0x58] sm:$0xff]  ;;  %v669_v34 = vadd.f32 %v1821_v32, %v591_v30  ;;  %v1833_v43 = vld [vmem:[%s1803_s21 + $0x80] sm:$0xff]  ;;  %v1859_v63 = vld [vmem:[%s1803_s21 + $0x28] sm:$0xff] }
  0x9b   : > { %v670_v35 = vadd.f32 %v1824_v33, %v592_v31  ;;  %v1855_v62 = vld [vmem:[%s1803_s21 + $0x20] sm:$0xff]  ;;  %v531_v19 = vld [vmem:[%s1729_s30 + $0x10] sm:$0xff]  ;;  %v532_v20 = vld [vmem:[%s1729_s30 + $0x18] sm:$0xff] }
  0x9c   : > { %814 = vperm.xlu2 %1375, %v771_v44   ;;  %811 = vperm.xlu1 %1374, %v770_v45   ;;  %v1836_v44 = vld [vmem:[%s1803_s21 + $0x88] sm:$0xff]  ;;  %v675_v45 = vadd.f32 %v1833_v43, %v597_v41  ;;  %v557_v7 = vld [vmem:[%s1729_s30 + $0xe0] sm:$0xff]  ;;  %v635_v26 = vld [vmem:[%s1803_s21 + $0x10] sm:$0xff]  ;;  %v583_v36 = vmul.f32 16.0, %v531_v19  ;;  %v584_v37 = vmul.f32 16.0, %v532_v20 }
  0x9d   : > { %808 = vperm.xlu0 %1373, %v769_v46   ;;  %v676_v46 = vadd.f32 %v1836_v44, %v598_v42  ;;  %v609_v17 = vmul.f32 16.0, %v557_v7  ;;  %v1883_v31 = vld [vmem:[%s1803_s21 + $0x30] sm:$0xff]  ;;  %v549_v20 = vld [vmem:[%s1729_s30 + $0xa0] sm:$0xff] }
  0x9e   : > { %v563_v42 = vld [vmem:[%s1729_s30 + $0x110] sm:$0xff] }
  0xa4   : > { %823 = vperm.xlu2 %1375, %v774_v50   ;;  %820 = vperm.xlu1 %1374, %v773_v51   ;;  %v534_v51 = vld [vmem:[%s1729_s30 + $0x28] sm:$0xff] }
  0xa5   : > { %817 = vperm.xlu0 %1373, %v772_v52   ;;  %v585_v52 = vmul.f32 16.0, %v533_v47  ;;  %v586_v61 = vmul.f32 16.0, %v534_v51  ;;  %v543_v47 = vld [vmem:[%s1729_s30 + $0x70] sm:$0xff] }
  0xa7   : > { %v663_v6 = vadd.f32 %v1855_v62, %v585_v52  ;;  %v544_v52 = vld [vmem:[%s1729_s30 + $0x78] sm:$0xff] }
  0xac   : > { %832 = vperm.xlu2 %1375, %v777_v58   ;;  %829 = vperm.xlu1 %1374, %v776_v59   ;;  %v604_v58 = vmul.f32 16.0, %v552_v49  ;;  %v1849_v59 = vld [vmem:[%s1803_s21 + $0xb0] sm:$0xff] }
  0xad   : > { %826 = vperm.xlu0 %1373, %v775_v60   ;;  %v1852_v60 = vld [vmem:[%s1803_s21 + $0xb8] sm:$0xff] }
  0xae   : > { %v682_v5 = vadd.f32 %v1852_v60, %v604_v58 }
  0xb4   : > { %841 = vperm.xlu2 %1375, %v780_v2   ;;  %838 = vperm.xlu1 %1374, %v779_v3   ;;  %v1862_v2 = vld [vmem:[%s1803_s21] sm:$0xff]  ;;  %v1865_v3 = vld [vmem:[%s1803_s21 + $0x8] sm:$0xff] }
  0xb5   : > { %835 = vperm.xlu0 %1373, %v778_v4   ;;  %v659_v13 = vadd.f32 %v1862_v2, %v581_v0 }
  0xbc   : > { %850 = vperm.xlu2 %1375, %v783_v8   ;;  %847 = vperm.xlu1 %1374, %v782_v9   ;;  %v558_v8 = vld [vmem:[%s1729_s30 + $0xe8] sm:$0xff]  ;;  %v664_v9 = vadd.f32 %v1859_v63, %v586_v61 }
  0xbd   : > { %844 = vperm.xlu0 %1373, %v781_v10   ;;  %v535_v10 = vld [vmem:[%s1729_s30 + $0x30] sm:$0xff]  ;;  %v610_v18 = vmul.f32 16.0, %v558_v8  ;;  %v648_v8 = vld [vmem:[%s1803_s21 + $0x78] sm:$0xff] }
  0xc4   : > { %859 = vperm.xlu2 %1375, %v786_v14   ;;  %856 = vperm.xlu1 %1374, %v785_v15   ;;  %v536_v15 = vld [vmem:[%s1729_s30 + $0x38] sm:$0xff] }
  0xc5   : > { %853 = vperm.xlu0 %1373, %v784_v16   ;;  %v588_v30 = vmul.f32 16.0, %v536_v15 }
  0xcc   : > { %865 = vperm.xlu1 %1374, %v788_v57   ;;  %v603_v57 = vmul.f32 16.0, %v551_v48 }
  0xcd   : > { %862 = vperm.xlu0 %1373, %v787_v1   ;;  %v582_v1 = vmul.f32 16.0, %v530_v54  ;;  %v615_v54 = vmul.f32 16.0, %v563_v42 }
  0xce   : > { %v681_v4 = vadd.f32 %v1849_v59, %v603_v57  ;;  %v542_v57 = vld [vmem:[%s1729_s30 + $0x68] sm:$0xff] }
  0xcf   : > { %v660_v14 = vadd.f32 %v1865_v3, %v582_v1  ;;  %v595_v1 = vmul.f32 16.0, %v543_v47 }
  0xe6   : > { %v803_v27 = vpop.permute.xlu2 %802 }
  0xe7   : > { %vm871_vm10 = vcmp.eq.s32.totalorder %v803_v27, 1  ;;  %v587_v27 = vmul.f32 16.0, %v535_v10  ;;  %v594_v10 = vmul.f32 16.0, %v542_v57  ;;  %v555_v57 = vld [vmem:[%s1729_s30 + $0xd0] sm:$0xff] }
  0xe8   : > { %v901_v28 = vsel %vm871_vm10, %v667_v23, 0.0  ;;  %v902_v29 = vsel %vm871_vm10, %v668_v24, 0.0 }
  0xe9   : > { %953 = vst [vmem:[%s1817_s6 + $0x40] sm:$0xff] %v901_v28  ;;  %v665_v41 = vadd.f32 %v1883_v31, %v587_v27  ;;  %v550_v27 = vld [vmem:[%s1729_s30 + $0xa8] sm:$0xff] }
  0xea   : > { %954 = vst [vmem:[%s1817_s6 + $0x48] sm:$0xff] %v902_v29  ;;  %v636_v29 = vld [vmem:[%s1803_s21 + $0x18] sm:$0xff] }
  0xeb   : > { %v662_v51 = vadd.f32 %v636_v29, %v584_v37 }
  0xee   : > { %v806_v38 = vpop.permute.xlu2 %805 }
  0xef   : > { %vm872_vm11 = vcmp.eq.s32.totalorder %v806_v38, 1 }
  0xf0   : > { %v903_v39 = vsel %vm872_vm11, %v669_v34, 0.0  ;;  %v904_v40 = vsel %vm872_vm11, %v670_v35, 0.0  ;;  %v1887_v35 = vld [vmem:[%s1803_s21 + $0x38] sm:$0xff] }
  0xf1   : > { %955 = vst [vmem:[%s1817_s6 + $0x50] sm:$0xff] %v903_v39  ;;  %v687_v39 = vadd.f32 %v635_v26, %v609_v17  ;;  %v569_v17 = vld [vmem:[%s1729_s30 + $0x140] sm:$0xff] }
  0xf2   : > { %956 = vst [vmem:[%s1817_s6 + $0x58] sm:$0xff] %v904_v40  ;;  %v688_v40 = vadd.f32 %v636_v29, %v610_v18  ;;  %v570_v18 = vld [vmem:[%s1729_s30 + $0x148] sm:$0xff]  ;;  %v547_v29 = vld [vmem:[%s1729_s30 + $0x90] sm:$0xff] }
  0xf6   : > { %v815_v50 = vpop.permute.xlu2 %814 }
  0xf7   : > { %vm875_vm12 = vcmp.eq.s32.totalorder %v815_v50, 1  ;;  %v661_v50 = vadd.f32 %v635_v26, %v583_v36 }
  0xf8   : > { %v909_v55 = vsel %vm875_vm12, %v675_v45, 0.0  ;;  %v910_v56 = vsel %vm875_vm12, %v676_v46, 0.0  ;;  %v564_v45 = vld [vmem:[%s1729_s30 + $0x118] sm:$0xff]  ;;  %v666_v46 = vadd.f32 %v1887_v35, %v588_v30 }
  0xf9   : > { %961 = vst [vmem:[%s1817_s6 + $0x80] sm:$0xff] %v909_v55  ;;  %v616_v55 = vmul.f32 16.0, %v564_v45  ;;  %v548_v30 = vld [vmem:[%s1729_s30 + $0x98] sm:$0xff]  ;;  %v654_v45 = vld [vmem:[%s1803_s21 + $0xa8] sm:$0xff] }
  0xfa   : > { %962 = vst [vmem:[%s1817_s6 + $0x88] sm:$0xff] %v910_v56  ;;  %v541_v56 = vld [vmem:[%s1729_s30 + $0x60] sm:$0xff]  ;;  %v600_v47 = vmul.f32 16.0, %v548_v30 }
  0xfb   : > { %v694_v15 = vadd.f32 %v1809_v22, %v616_v55  ;;  %v621_v22 = vmul.f32 16.0, %v569_v17  ;;  %v576_v55 = vld [vmem:[%s1729_s30 + $0x178] sm:$0xff] }
  0xfe   : > { %v824_v11 = vpop.permute.xlu2 %823  ;;  %v797_v12 = vpop.permute.xlu1 %796 }
  0xff   : > { %vm878_vm13 = vcmp.eq.s32.totalorder %v824_v11, 1  ;;  %vm869_vm14 = vcmp.eq.s32.totalorder %v797_v12, 1  ;;  %v791_v16 = vpop.permute.xlu0 %790  ;;  %v1907_v12 = vld [vmem:[%s1803_s21 + $0x60] sm:$0xff] }
 0x100   : > { %v915_v23 = vsel %vm878_vm13, %v681_v4, 0.0  ;;  %v916_v24 = vsel %vm878_vm13, %v682_v5, 0.0  ;;  %v897_v25 = vsel %vm869_vm14, %v663_v6, 0.0  ;;  %v898_v28 = vsel %vm869_vm14, %v664_v9, 0.0  ;;  %v647_v6 = vld [vmem:[%s1803_s21 + $0x70] sm:$0xff] }
 0x101   : > { %967 = vst [vmem:[%s1817_s6 + $0xb0] sm:$0xff] %v915_v23  ;;  %vm867_vm15 = vcmp.eq.s32.totalorder %v791_v16, 1  ;;  %v596_v5 = vmul.f32 16.0, %v544_v52  ;;  %v593_v9 = vmul.f32 16.0, %v541_v56  ;;  %v673_v16 = vadd.f32 %v647_v6, %v595_v1 }
 0x102   : > { %968 = vst [vmem:[%s1817_s6 + $0xb8] sm:$0xff] %v916_v24  ;;  %v893_v34 = vsel %vm867_vm15, %v659_v13, 0.0  ;;  %v894_v38 = vsel %vm867_vm15, %v660_v14, 0.0  ;;  %v1910_v13 = vld [vmem:[%s1803_s21 + $0x68] sm:$0xff]  ;;  %v693_v14 = vadd.f32 %v1806_v21, %v615_v54  ;;  %v575_v54 = vld [vmem:[%s1729_s30 + $0x170] sm:$0xff] }
 0x103   : > { %949 = vst [vmem:[%s1817_s6 + $0x20] sm:$0xff] %v897_v25  ;;  %v674_v19 = vadd.f32 %v648_v8, %v596_v5  ;;  %v671_v25 = vadd.f32 %v1907_v12, %v593_v9  ;;  %v672_v26 = vadd.f32 %v1910_v13, %v594_v10 }
 0x104   : > { %950 = vst [vmem:[%s1817_s6 + $0x28] sm:$0xff] %v898_v28  ;;  %v622_v28 = vmul.f32 16.0, %v570_v18 }
 0x105   : > { %945 = vst [vmem:[%s1817_s6] sm:$0xff] %v893_v34 }
 0x106   : > { %946 = vst [vmem:[%s1817_s6 + $0x8] sm:$0xff] %v894_v38  ;;  %v833_v48 = vpop.permute.xlu2 %832  ;;  %v800_v49 = vpop.permute.xlu1 %799  ;;  %v601_v38 = vmul.f32 16.0, %v549_v20  ;;  %v700_v52 = vadd.f32 %v648_v8, %v622_v28  ;;  %v553_v8 = vld [vmem:[%s1729_s30 + $0xc0] sm:$0xff] }
 0x107   : > { %vm881_vm0 = vcmp.eq.s32.totalorder %v833_v48, 1  ;;  %vm870_vm1 = vcmp.eq.s32.totalorder %v800_v49, 1  ;;  %v794_v53 = vpop.permute.xlu0 %793  ;;  %v1931_v49 = vld [vmem:[%s1803_s21 + $0x90] sm:$0xff] }
 0x108   : > { %v921_v58 = vsel %vm881_vm0, %v687_v39, 0.0  ;;  %v922_v61 = vsel %vm881_vm0, %v688_v40, 0.0  ;;  %v899_v0 = vsel %vm870_vm1, %v665_v41, 0.0  ;;  %v900_v4 = vsel %vm870_vm1, %v666_v46, 0.0  ;;  %v653_v41 = vld [vmem:[%s1803_s21 + $0xa0] sm:$0xff] }
 0x109   : > { %973 = vst [vmem:[%s1817_s6 + $0xe0] sm:$0xff] %v921_v58  ;;  %vm868_vm2 = vcmp.eq.s32.totalorder %v794_v53, 1  ;;  %v602_v40 = vmul.f32 16.0, %v550_v27  ;;  %v599_v46 = vmul.f32 16.0, %v547_v29  ;;  %v679_v53 = vadd.f32 %v653_v41, %v601_v38  ;;  %v562_v29 = vld [vmem:[%s1729_s30 + $0x108] sm:$0xff]  ;;  %v560_v38 = vld [vmem:[%s1729_s30 + $0xf8] sm:$0xff] }
 0x10a   : > { %974 = vst [vmem:[%s1817_s6 + $0xe8] sm:$0xff] %v922_v61  ;;  %v895_v7 = vsel %vm868_vm2, %v661_v50, 0.0  ;;  %v896_v11 = vsel %vm868_vm2, %v662_v51, 0.0  ;;  %v1934_v50 = vld [vmem:[%s1803_s21 + $0x98] sm:$0xff]  ;;  %v699_v51 = vadd.f32 %v647_v6, %v621_v22  ;;  %v627_v6 = vmul.f32 16.0, %v575_v54  ;;  %v561_v22 = vld [vmem:[%s1729_s30 + $0x100] sm:$0xff] }
 0x10b   : > { %951 = vst [vmem:[%s1817_s6 + $0x30] sm:$0xff] %v899_v0  ;;  %v680_v56 = vadd.f32 %v654_v45, %v602_v40  ;;  %v677_v0 = vadd.f32 %v1931_v49, %v599_v46  ;;  %v678_v1 = vadd.f32 %v1934_v50, %v600_v47  ;;  %v613_v40 = vmul.f32 16.0, %v561_v22 }
 0x10c   : > { %952 = vst [vmem:[%s1817_s6 + $0x38] sm:$0xff] %v900_v4  ;;  %v556_v4 = vld [vmem:[%s1729_s30 + $0xd8] sm:$0xff] }
 0x10d   : > { %947 = vst [vmem:[%s1817_s6 + $0x10] sm:$0xff] %v895_v7  ;;  %v628_v7 = vmul.f32 16.0, %v576_v55  ;;  %v608_v17 = vmul.f32 16.0, %v556_v4  ;;  %v567_v55 = vld [vmem:[%s1729_s30 + $0x130] sm:$0xff] }
 0x10e   : > { %948 = vst [vmem:[%s1817_s6 + $0x18] sm:$0xff] %v896_v11  ;;  %v842_v23 = vpop.permute.xlu2 %841  ;;  %v812_v24 = vpop.permute.xlu1 %811 }
 0x10f   : > { %vm884_vm3 = vcmp.eq.s32.totalorder %v842_v23, 1  ;;  %vm874_vm4 = vcmp.eq.s32.totalorder %v812_v24, 1  ;;  %v809_v21 = vpop.permute.xlu0 %808  ;;  %v1951_v24 = vld [vmem:[%s1803_s21 + $0xc0] sm:$0xff]  ;;  %v686_v28 = vadd.f32 %v1865_v3, %v608_v17 }
 0x110   : > { %v927_v34 = vsel %vm884_vm3, %v693_v14, 0.0  ;;  %v928_v36 = vsel %vm884_vm3, %v694_v15, 0.0  ;;  %v907_v37 = vsel %vm874_vm4, %v673_v16, 0.0  ;;  %v908_v39 = vsel %vm874_vm4, %v674_v19, 0.0  ;;  %v554_v15 = vld [vmem:[%s1729_s30 + $0xc8] sm:$0xff] }
 0x111   : > { %979 = vst [vmem:[%s1817_s6 + $0x110] sm:$0xff] %v927_v34  ;;  %vm873_vm5 = vcmp.eq.s32.totalorder %v809_v21, 1  ;;  %v607_v14 = vmul.f32 16.0, %v555_v57  ;;  %v605_v19 = vmul.f32 16.0, %v553_v8  ;;  %v606_v23 = vmul.f32 16.0, %v554_v15  ;;  %v1956_v21 = vld [vmem:[%s1803_s21 + $0xc8] sm:$0xff] }
 0x112   : > { %980 = vst [vmem:[%s1817_s6 + $0x118] sm:$0xff] %v928_v36  ;;  %v905_v42 = vsel %vm873_vm5, %v671_v25, 0.0  ;;  %v906_v48 = vsel %vm873_vm5, %v672_v26, 0.0  ;;  %v705_v25 = vadd.f32 %v653_v41, %v627_v6  ;;  %v706_v26 = vadd.f32 %v654_v45, %v628_v7 }
 0x113   : > { %959 = vst [vmem:[%s1817_s6 + $0x70] sm:$0xff] %v907_v37  ;;  %v685_v27 = vadd.f32 %v1862_v2, %v607_v14  ;;  %v683_v36 = vadd.f32 %v1951_v24, %v605_v19  ;;  %v559_v37 = vld [vmem:[%s1729_s30 + $0xf0] sm:$0xff]  ;;  %v614_v45 = vmul.f32 16.0, %v562_v29  ;;  %v572_v19 = vld [vmem:[%s1729_s30 + $0x158] sm:$0xff] }
 0x114   : > { %960 = vst [vmem:[%s1817_s6 + $0x78] sm:$0xff] %v908_v39  ;;  %v684_v39 = vadd.f32 %v1956_v21, %v606_v23  ;;  %v611_v47 = vmul.f32 16.0, %v559_v37  ;;  %v579_v29 = vld [vmem:[%s1729_s30 + $0x190] sm:$0xff] }
 0x115   : > { %957 = vst [vmem:[%s1817_s6 + $0x60] sm:$0xff] %v905_v42  ;;  %v692_v54 = vadd.f32 %v1887_v35, %v614_v45 }
 0x116   : > { %958 = vst [vmem:[%s1817_s6 + $0x68] sm:$0xff] %v906_v48  ;;  %v851_v58 = vpop.permute.xlu2 %850  ;;  %v821_v61 = vpop.permute.xlu1 %820  ;;  %v612_v48 = vmul.f32 16.0, %v560_v38  ;;  %v577_v38 = vld [vmem:[%s1729_s30 + $0x180] sm:$0xff] }
 0x117   : > { %vm887_vm6 = vcmp.eq.s32.totalorder %v851_v58, 1  ;;  %vm877_vm7 = vcmp.eq.s32.totalorder %v821_v61, 1  ;;  %v818_v5 = vpop.permute.xlu0 %817  ;;  %v568_v58 = vld [vmem:[%s1729_s30 + $0x138] sm:$0xff] }
 0x118   : > { %v933_v9 = vsel %vm887_vm6, %v699_v51, 0.0  ;;  %v934_v10 = vsel %vm887_vm6, %v700_v52, 0.0  ;;  %v913_v11 = vsel %vm877_vm7, %v679_v53, 0.0  ;;  %v914_v16 = vsel %vm877_vm7, %v680_v56, 0.0 }
 0x119   : > { %985 = vst [vmem:[%s1817_s6 + $0x140] sm:$0xff] %v933_v9  ;;  %vm876_vm8 = vcmp.eq.s32.totalorder %v818_v5, 1  ;;  %v691_v53 = vadd.f32 %v1883_v31, %v613_v40  ;;  %v689_v56 = vadd.f32 %v1855_v62, %v611_v47  ;;  %v690_v57 = vadd.f32 %v1859_v63, %v612_v48 }
 0x11a   : > { %986 = vst [vmem:[%s1817_s6 + $0x148] sm:$0xff] %v934_v10  ;;  %v911_v18 = vsel %vm876_vm8, %v677_v0, 0.0  ;;  %v912_v20 = vsel %vm876_vm8, %v678_v1, 0.0  ;;  %v565_v0 = vld [vmem:[%s1729_s30 + $0x120] sm:$0xff]  ;;  %v566_v1 = vld [vmem:[%s1729_s30 + $0x128] sm:$0xff]  ;;  %v619_v31 = vmul.f32 16.0, %v567_v55 }
 0x11b   : > { %965 = vst [vmem:[%s1817_s6 + $0xa0] sm:$0xff] %v913_v11  ;;  %v620_v6 = vmul.f32 16.0, %v568_v58  ;;  %v617_v7 = vmul.f32 16.0, %v565_v0  ;;  %v618_v8 = vmul.f32 16.0, %v566_v1  ;;  %v573_v11 = vld [vmem:[%s1729_s30 + $0x160] sm:$0xff]  ;;  %v631_v40 = vmul.f32 16.0, %v579_v29 }
 0x11c   : > { %966 = vst [vmem:[%s1817_s6 + $0xa8] sm:$0xff] %v914_v16  ;;  %v697_v9 = vadd.f32 %v1907_v12, %v619_v31  ;;  %v574_v16 = vld [vmem:[%s1729_s30 + $0x168] sm:$0xff]  ;;  %v625_v23 = vmul.f32 16.0, %v573_v11 }
 0x11d   : > { %963 = vst [vmem:[%s1817_s6 + $0x90] sm:$0xff] %v911_v18  ;;  %v698_v10 = vadd.f32 %v1910_v13, %v620_v6  ;;  %v695_v14 = vadd.f32 %v1821_v32, %v617_v7  ;;  %v696_v15 = vadd.f32 %v1824_v33, %v618_v8  ;;  %v571_v18 = vld [vmem:[%s1729_s30 + $0x150] sm:$0xff]  ;;  %v626_v13 = vmul.f32 16.0, %v574_v16 }
 0x11e   : > { %964 = vst [vmem:[%s1817_s6 + $0x98] sm:$0xff] %v912_v20  ;;  %v860_v30 = vpop.permute.xlu2 %859  ;;  %v830_v34 = vpop.permute.xlu1 %829  ;;  %v703_v22 = vadd.f32 %v1931_v49, %v625_v23  ;;  %v709_v45 = vadd.f32 %v1951_v24, %v631_v40 }
 0x11f   : > { %vm890_vm9 = vcmp.eq.s32.totalorder %v860_v30, 1  ;;  %vm880_vm10 = vcmp.eq.s32.totalorder %v830_v34, 1  ;;  %v827_v2 = vpop.permute.xlu0 %826 }
 0x120   : > { %v939_v41 = vsel %vm890_vm9, %v705_v25, 0.0  ;;  %v940_v3 = vsel %vm890_vm9, %v706_v26, 0.0  ;;  %v919_v42 = vsel %vm880_vm10, %v685_v27, 0.0  ;;  %v920_v46 = vsel %vm880_vm10, %v686_v28, 0.0 }
 0x121   : > { %991 = vst [vmem:[%s1817_s6 + $0x170] sm:$0xff] %v939_v41  ;;  %vm879_vm11 = vcmp.eq.s32.totalorder %v827_v2, 1  ;;  %v623_v26 = vmul.f32 16.0, %v571_v18  ;;  %v624_v27 = vmul.f32 16.0, %v572_v19  ;;  %v704_v28 = vadd.f32 %v1934_v50, %v626_v13  ;;  %v578_v2 = vld [vmem:[%s1729_s30 + $0x188] sm:$0xff] }
 0x122   : > { %992 = vst [vmem:[%s1817_s6 + $0x178] sm:$0xff] %v940_v3  ;;  %v917_v51 = vsel %vm879_vm11, %v683_v36, 0.0  ;;  %v918_v52 = vsel %vm879_vm11, %v684_v39, 0.0  ;;  %v580_v36 = vld [vmem:[%s1729_s30 + $0x198] sm:$0xff] }
 0x123   : > { %971 = vst [vmem:[%s1817_s6 + $0xd0] sm:$0xff] %v919_v42  ;;  %v701_v30 = vadd.f32 %v1833_v43, %v623_v26  ;;  %v702_v34 = vadd.f32 %v1836_v44, %v624_v27  ;;  %v632_v3 = vmul.f32 16.0, %v580_v36  ;;  %v629_v43 = vmul.f32 16.0, %v577_v38 }
 0x124   : > { %972 = vst [vmem:[%s1817_s6 + $0xd8] sm:$0xff] %v920_v46  ;;  %v630_v44 = vmul.f32 16.0, %v578_v2 }
 0x125   : > { %969 = vst [vmem:[%s1817_s6 + $0xc0] sm:$0xff] %v917_v51  ;;  %v710_v46 = vadd.f32 %v1956_v21, %v632_v3  ;;  %v707_v47 = vadd.f32 %v1849_v59, %v629_v43 }
 0x126   : > { %970 = vst [vmem:[%s1817_s6 + $0xc8] sm:$0xff] %v918_v52  ;;  %v839_v61 = vpop.permute.xlu1 %838  ;;  %v708_v48 = vadd.f32 %v1852_v60, %v630_v44 }
 0x127   : > { %vm883_vm12 = vcmp.eq.s32.totalorder %v839_v61, 1  ;;  %v836_v4 = vpop.permute.xlu0 %835 }
 0x128   : > { %v925_v35 = vsel %vm883_vm12, %v691_v53, 0.0  ;;  %v926_v5 = vsel %vm883_vm12, %v692_v54, 0.0  ;;  %vm882_vm13 = vcmp.eq.s32.totalorder %v836_v4, 1 }
 0x129   : > { %977 = vst [vmem:[%s1817_s6 + $0x100] sm:$0xff] %v925_v35  ;;  %v923_v62 = vsel %vm882_vm13, %v689_v56, 0.0  ;;  %v924_v63 = vsel %vm882_vm13, %v690_v57, 0.0 }
 0x12a   : > { %978 = vst [vmem:[%s1817_s6 + $0x108] sm:$0xff] %v926_v5 }
 0x12b   : > { %975 = vst [vmem:[%s1817_s6 + $0xf0] sm:$0xff] %v923_v62 }
 0x12c   : > { %976 = vst [vmem:[%s1817_s6 + $0xf8] sm:$0xff] %v924_v63 }
 0x12e   : > { %v848_v17 = vpop.permute.xlu1 %847 }
 0x12f   : > { %vm886_vm14 = vcmp.eq.s32.totalorder %v848_v17, 1  ;;  %v845_v20 = vpop.permute.xlu0 %844 }
 0x130   : > { %v931_v12 = vsel %vm886_vm14, %v697_v9, 0.0  ;;  %v932_v25 = vsel %vm886_vm14, %v698_v10, 0.0  ;;  %vm885_vm15 = vcmp.eq.s32.totalorder %v845_v20, 1 }
 0x131   : > { %983 = vst [vmem:[%s1817_s6 + $0x130] sm:$0xff] %v931_v12  ;;  %v929_v32 = vsel %vm885_vm15, %v695_v14, 0.0  ;;  %v930_v33 = vsel %vm885_vm15, %v696_v15, 0.0 }
 0x132   : > { %984 = vst [vmem:[%s1817_s6 + $0x138] sm:$0xff] %v932_v25 }
 0x133   : > { %981 = vst [vmem:[%s1817_s6 + $0x120] sm:$0xff] %v929_v32 }
 0x134   : > { %982 = vst [vmem:[%s1817_s6 + $0x128] sm:$0xff] %v930_v33 }
 0x136   : > { %v857_v37 = vpop.permute.xlu1 %856 }
 0x137   : > { %vm889_vm0 = vcmp.eq.s32.totalorder %v857_v37, 1  ;;  %v854_v39 = vpop.permute.xlu0 %853 }
 0x138   : > { %v937_v41 = vsel %vm889_vm0, %v703_v22, 0.0  ;;  %v938_v49 = vsel %vm889_vm0, %v704_v28, 0.0  ;;  %vm888_vm1 = vcmp.eq.s32.totalorder %v854_v39, 1 }
 0x139   : > { %989 = vst [vmem:[%s1817_s6 + $0x160] sm:$0xff] %v937_v41  ;;  %v935_v50 = vsel %vm888_vm1, %v701_v30, 0.0  ;;  %v936_v42 = vsel %vm888_vm1, %v702_v34, 0.0 }
 0x13a   : > { %990 = vst [vmem:[%s1817_s6 + $0x168] sm:$0xff] %v938_v49 }
 0x13b   : > { %987 = vst [vmem:[%s1817_s6 + $0x150] sm:$0xff] %v935_v50 }
 0x13c   : > { %988 = vst [vmem:[%s1817_s6 + $0x158] sm:$0xff] %v936_v42 }
 0x13e   : > { %v866_v51 = vpop.permute.xlu1 %865 }
 0x13f   : > { %vm892_vm2 = vcmp.eq.s32.totalorder %v866_v51, 1  ;;  %v863_v52 = vpop.permute.xlu0 %862 }
 0x140   : > { %v943_v53 = vsel %vm892_vm2, %v709_v45, 0.0  ;;  %v944_v54 = vsel %vm892_vm2, %v710_v46, 0.0  ;;  %vm891_vm3 = vcmp.eq.s32.totalorder %v863_v52, 1  ;;  %1004 = sbr.rel (!%p1560_p9) target bundleno = 342 (0x156), region = 92 }
 0x141   : > { %995 = vst [vmem:[%s1817_s6 + $0x190] sm:$0xff] %v943_v53  ;;  %v941_v55 = vsel %vm891_vm3, %v707_v47, 0.0  ;;  %v942_v56 = vsel %vm891_vm3, %v708_v48, 0.0 }
 0x142   : > { %996 = vst [vmem:[%s1817_s6 + $0x198] sm:$0xff] %v944_v54 }
 0x143   : > { %993 = vst [vmem:[%s1817_s6 + $0x180] sm:$0xff] %v941_v55 }
 0x144   : > { %994 = vst [vmem:[%s1817_s6 + $0x188] sm:$0xff] %v942_v56 }
 0x145   : > { %s1006_s5 = ssub.s32 25, %s1794_s23 }
 0x146   : > { %p1007_p1 = scmp.lt.s32.totalorder %s1006_s5, 13 }
 0x148   : > { %s2089_s5 = smov (!%p1007_p1, %s1006_s5), 13 }
 0x149   : > { %s1240_s7 = sshll.u32 %s2089_s5, 5 }
 0x14a   : > { %s1011_s26 = ssub.s32 416, %s1240_s7 }
 0x14b   : > { %s1012_s29 = sshll.u32 %s1011_s26, 4 }
 0x14c   : > { %1013 = vsyncadd %s998_s11, %s1012_s29  ;;  %p2026_p2 = scmp.ne.s32.totalorder %s1240_s7, 0  ;;  %s1246_s24 = smul.u32 208, %s1533_s16 }
 0x14d   : > { %s1030_s8 = sshll.u32 %s1817_s6, 4  ;;  %s1244_s27 = sshll.u32 %s2089_s5, 9  ;;  %s1031_s8 = int_to_ptr.vmem [resolvable:$true] %s1030_s8 }
 0x14e   : > { %s1017_s9 = scalar_lea.hbm %s2062_s3, %s1246_s24  ;;  %s1486_s19 = smov 3328  }
 0x14f   : > { %s1032_s23 = sshll.u32 %s1017_s9, 4  ;;  %1039 = sst [smem:[#allocation10]] %s1486_s19  ;;  %s1033_s23 = int_to_ptr.hbm [resolvable:$true] %s1032_s23 }
 0x150   : > { %1043 = sst [smem:[#allocation10 + $0x2]] %s2089_s5  ;;  %s1487_s10 = smov 6400  }
 0x151   : > { %1041 = sst [smem:[#allocation10 + $0x1]] %s1487_s10  ;;  %s1488_s20 = smov 256  }
 0x152   : > { %1045 = sst [smem:[#allocation10 + $0x3]] %s1488_s20  ;;  %s1489_s16 = smov 16  }
 0x153   : > { %1047 = sst [smem:[#allocation10 + $0x4]] %s1488_s20  ;;  %s1490_s28 = smov [#allocation9]  }
 0x154   : > { %1049 = sst [smem:[#allocation10 + $0x5]] %s1489_s16  ;;  %s1491_s21 = smov 0  }
 0x155   : > { %1051 = dma.general (%p2026_p2), %s1031_s8, %s1244_s27, %s1033_s23, %s998_s11, %s1490_s28, [#allocation10], %s1491_s21, 0  }
 0x156 PF: > { %s1060_s6 = sand.u32 1, %s1434_s12   ;;  %p1254_p9 = pnand %p1199_p11, %p1564_p10 }
 0x157   : > { %s1061_s5 = scalar_lea.sflag [#allocation4], %s1060_s6 }
 0x158   : > { %p1255_p3 = pneg %p1254_p9 }
 0x15a   : > { %1429 = dma.done.wait (%p1255_p3), %s1061_s5, 6656  }
 0x15b   : > { %1431 = vsyncadd (%p1255_p3), %s1061_s5, 4294960640  ;;  %s2075_s7 = sld [smem:[#allocation13_spill]]  ;;  %p16_p4 = scmp.ge.s32.totalorder %s1537_s18, 4  }
 0x15c   : > { %s2076_s12 = smov %s1438_s13  ;;  %s2077_s13 = smov %s1442_s14 }
 0x15d   : > { %s2079_s15 = smov %s1537_s18  ;;  %18 = sbr.rel (!%p16_p4) target bundleno = 5 (0x5), region = 180 }
 0x161   : > { %s2078_s14 = smov %s2075_s7 }
 0x162   :  { %1067 = vsyncpa [#allocation3], 1 }
 0x163   :  { %1069 = vsyncpa [#allocation3 + $0x1], 1 }
 0x164   :  { %1070 = vsyncpa [#allocation4], 1 }
 0x165   :  { %1072 = vsyncpa [#allocation4 + $0x1], 1 }

</bundles_post_ra>
